<compile_context>
chip_gen: v5e
topology: v5e:2x2
jax: 0.10.0
libtpu: 0.0.40
codegen_flags: <defaults>
</compile_context>

<pallas_src>
import functools
import math

import numpy as np
import jax
import jax.numpy as jnp
from jax.experimental import pallas as pl
from jax.experimental.pallas import tpu as pltpu

# ----------------------------- configuration --------------------------------
B = 2               # batch
T = 8               # args.window_size          (vitals sequence length)
NUM_NODES = 4       # len(args.vitalsign_labtest)
D = 32              # args.transformer_dim
H = 4               # args.transformer_num_head
DH = D // H
NUM_LAYERS = 12
FUSION_START = 6    # args.mbt_fusion_startIdx
BOTTLENECK_N = 4
L_TXT = 8           # text sequence length
VOCAB = 42          # character tokenization / mimic_icu
DFF = D * 4
CLS_NODES = 64
PE_MAXLEN = 600
N_MODALITY = 2
USE_PE = (True, True)
LN_EPS = 1e-5
NEG_INF = -1e9


def _round_up(n, m):
    return ((n + m - 1) // m) * m


def _ln(x, g, b, eps=LN_EPS):
    mu = jnp.mean(x, axis=-1, keepdims=True)
    var = jnp.mean(jnp.square(x - mu), axis=-1, keepdims=True)
    return (x - mu) * jax.lax.rsqrt(var + eps) * g + b


# ------------------------------- kernel --------------------------------------
def mbt_kernel(xin_ref, base_ref, mask_ref, z_ref,
               fcw1_ref, fcw2_ref, fcvec_ref,
               wqkv_ref, bqkv_ref, wo_ref, bo_ref, ln1_ref,
               w1_ref, b1_ref, w2_ref, b2_ref, ln2_ref,
               lnc_ref, hw1_ref, hb1_ref, hw2_ref, hb2_ref,
               out_ref, x_scr,
               *, n_mod, bb, sp, dd, n_head, dh, t_len,
               fusion_start, bn_start, bn_n, n_layers):
    """Entire MBT_V1 forward in one kernel invocation (no grid).

    x_scr : VMEM scratch (n_modality, bb*sp, D); activations never leave VMEM.
    All weights are full-array VMEM-resident; per-layer slices are taken with a
    dynamic index inside the layer fori_loop.
    """
    # ---- init_fc: Linear -> LN -> ReLU -> Linear -> LN -> ReLU (fused) ------
    hfc = jnp.dot(xin_ref[...], fcw1_ref[...],
                  preferred_element_type=jnp.float32) + fcvec_ref[0:1, :]
    hfc = jnp.maximum(_ln(hfc, fcvec_ref[1:2, :], fcvec_ref[2:3, :]), 0.0)
    hfc = jnp.dot(hfc, fcw2_ref[...],
                  preferred_element_type=jnp.float32) + fcvec_ref[3:4, :]
    vslt = jnp.maximum(_ln(hfc, fcvec_ref[4:5, :], fcvec_ref[5:6, :]), 0.0)  # (bb*T, D)

    # ---- place the vitals embedding into the pre-built activation slab ------
    # base already holds CLS(+PE), PE for the vitals rows, and text emb(+PE);
    # build a value-level delta so all ref stores stay sublane-aligned.
    pieces = []
    for b in range(bb):
        pieces.append(jnp.zeros((1, dd), jnp.float32))                # CLS row
        pieces.append(vslt[b * t_len:(b + 1) * t_len, :])             # vitals rows
        pieces.append(jnp.zeros((sp - 1 - t_len, dd), jnp.float32))   # pad + bottleneck
    x_scr[0] = base_ref[0] + jnp.concatenate(pieces, axis=0)
    for m in range(1, n_mod):
        x_scr[m] = base_ref[m]

    # ---- loop-invariant helpers (hoisted out of the layer loop) -------------
    lane = jax.lax.broadcasted_iota(jnp.int32, (1, dd), 1)
    head_masks = [((lane >= hh * dh) & (lane < (hh + 1) * dh)).astype(jnp.float32)
                  for hh in range(n_head)]
    cols = jax.lax.broadcasted_iota(jnp.int32, (1, sp), 1)
    bn_neg = jnp.where((cols >= bn_start) & (cols < bn_start + bn_n), NEG_INF, 0.0)
    zero_row = jnp.zeros_like(bn_neg)

    def layer_body(l, carry):
        # (Re)initialize the shared bottleneck tokens right before fusion start.
        # NOTE: pre-fusion layers still run attention/FFN on the (inert) bottleneck
        # and padding rows; they are masked as keys and never read downstream.
        for m in range(n_mod):
            for b in range(bb):
                r = b * sp + bn_start
                cur = x_scr[m, r:r + bn_n, :]
                x_scr[m, r:r + bn_n, :] = jnp.where(l == fusion_start, z_ref[b], cur)

        # bottleneck columns are invalid keys before fusion start
        extra = jnp.where(l < fusion_start, bn_neg, zero_row)          # (1, sp)

        for m in range(n_mod):
            wqkv = wqkv_ref[m, l]          # (D, 3D)  (scale folded into Q slab)
            bqkv = bqkv_ref[m, l]          # (1, 3D)
            wo = wo_ref[m, l]
            bo = bo_ref[m, l]
            ln1 = ln1_ref[m, l]            # (2, D)  rows: gamma, beta
            w1 = w1_ref[m, l]
            b1 = b1_ref[m, l]
            w2 = w2_ref[m, l]
            b2 = b2_ref[m, l]
            ln2 = ln2_ref[m, l]

            x_all = x_scr[m]                                            # (bb*sp, D)
            qkv = jnp.dot(x_all, wqkv,
                          preferred_element_type=jnp.float32) + bqkv    # (bb*sp, 3D)

            ctx_list = []
            for b in range(bb):
                r = b * sp
                q = qkv[r:r + sp, 0:dd]
                k = qkv[r:r + sp, dd:2 * dd]
                v = qkv[r:r + sp, 2 * dd:3 * dd]
                mask_mb = mask_ref[m, b] + extra                        # (1, sp)
                # all heads batched along sublanes -> one score matmul, one softmax
                q_stack = jnp.concatenate([q * hm for hm in head_masks], axis=0)
                s = jax.lax.dot_general(q_stack, k, (((1,), (1,)), ((), ())),
                                        preferred_element_type=jnp.float32)  # (H*sp, sp)
                s = s + mask_mb
                s = s - jnp.max(s, axis=-1, keepdims=True)
                p = jnp.exp(s)
                p = p / jnp.sum(p, axis=-1, keepdims=True)              # exact divide
                c = jnp.dot(p, v, preferred_element_type=jnp.float32)   # (H*sp, D)
                ctx = c[0:sp, :] * head_masks[0]
                for hh in range(1, n_head):
                    ctx = ctx + c[hh * sp:(hh + 1) * sp, :] * head_masks[hh]
                ctx_list.append(ctx)
            ctx_all = jnp.concatenate(ctx_list, axis=0)                 # (bb*sp, D)

            attn = jnp.dot(ctx_all, wo, preferred_element_type=jnp.float32) + bo
            h1 = _ln(x_all + attn, ln1[0:1, :], ln1[1:2, :])
            ff = jnp.maximum(
                jnp.dot(h1, w1, preferred_element_type=jnp.float32) + b1, 0.0)
            ff = jnp.dot(ff, w2, preferred_element_type=jnp.float32) + b2
            x_scr[m] = _ln(h1 + ff, ln2[0:1, :], ln2[1:2, :])

        # share (average) bottleneck tokens across modalities after fused layers
        fused = l >= fusion_start
        for b in range(bb):
            r = b * sp + bn_start
            z_sum = x_scr[0, r:r + bn_n, :]
            for m in range(1, n_mod):
                z_sum = z_sum + x_scr[m, r:r + bn_n, :]
            z_avg = z_sum * (1.0 / n_mod)
            for m in range(n_mod):
                cur = x_scr[m, r:r + bn_n, :]
                x_scr[m, r:r + bn_n, :] = jnp.where(fused, z_avg, cur)
        return carry

    jax.lax.fori_loop(0, n_layers, layer_body, 0)

    # ---- classifier epilogue: LN + 12 fused heads (BN folded), one store ----
    cls_rows = []
    for b in range(bb):
        parts = [x_scr[m, b * sp:b * sp + 1, :] for m in range(n_mod)]
        cls_rows.append(jnp.concatenate(parts, axis=1))                 # (1, n_mod*D)
    cls_cat = jnp.concatenate(cls_rows, axis=0)                         # (bb, n_mod*D)
    xc = _ln(cls_cat, lnc_ref[0:1, :], lnc_ref[1:2, :])
    hid = jnp.maximum(
        jnp.dot(xc, hw1_ref[...], preferred_element_type=jnp.float32)
        + hb1_ref[...], 0.0)
    out_ref[...] = (jnp.dot(hid, hw2_ref[...], preferred_element_type=jnp.float32)
                    + hb2_ref[...])


# ----------------------------- pallas wrapper ---------------------------------
def _vmem_spec():
    return pl.BlockSpec(memory_space=pltpu.MemorySpace.VMEM)


def pallas_mbt_forward(xin, base, mask, z, params, *, bb, sp, bn_start, t_len):
    enc = params['enc']
    args = (xin, base, mask, z,
            params['fc_w1'], params['fc_w2'], params['fc_vec'],
            enc['wqkv'], enc['bqkv'], enc['wo'], enc['bo'], enc['ln1'],
            enc['w1'], enc['b1'], enc['w2'], enc['b2'], enc['ln2'],
            params['lnc'], params['head_w1'], params['head_b1'],
            params['head_w2'], params['head_b2'])
    kernel = functools.partial(
        mbt_kernel, n_mod=N_MODALITY, bb=bb, sp=sp, dd=D, n_head=H, dh=DH,
        t_len=t_len, fusion_start=FUSION_START, bn_start=bn_start,
        bn_n=BOTTLENECK_N, n_layers=NUM_LAYERS)
    return pl.pallas_call(
        kernel,
        out_shape=jax.ShapeDtypeStruct((bb, 12), jnp.float32),
        in_specs=[_vmem_spec()] * len(args),
        out_specs=_vmem_spec(),
        scratch_shapes=[pltpu.VMEM((N_MODALITY, bb * sp, D), jnp.float32)],
    )(*args)


# ------------------------------ parameters ------------------------------------
def make_params(key):
    keys = iter(jax.random.split(key, 32))

    def w(shape, scale=0.02):
        return (scale * jax.random.normal(next(keys), shape)).astype(jnp.float32)

    def zeros(shape):
        return jnp.zeros(shape, jnp.float32)

    def ones(shape):
        return jnp.ones(shape, jnp.float32)

    params = {}
    # init_fc: Linear -> LN -> ReLU -> Linear -> LN -> ReLU (vectors packed)
    params['fc_w1'] = w((NUM_NODES + 2, D))
    params['fc_w2'] = w((D, D))
    params['fc_vec'] = jnp.concatenate(
        [zeros((1, D)), ones((1, D)), zeros((1, D)),     # b1, ln1_g, ln1_b
         zeros((1, D)), ones((1, D)), zeros((1, D))],    # b2, ln2_g, ln2_b
        axis=0)
    # text embedding
    params['txt_emb'] = w((VOCAB, D), scale=1.0)

    enc = {}
    enc['cls'] = [w((1, 1, D)) for _ in range(N_MODALITY)]
    enc['bottleneck'] = w((1, BOTTLENECK_N, D))
    pos = np.arange(PE_MAXLEN)[:, None].astype(np.float32)
    div = np.exp(np.arange(0, D, 2).astype(np.float32) * (-math.log(10000.0) / D))
    pe = np.zeros((PE_MAXLEN, D), np.float32)
    pe[:, 0::2] = np.sin(pos * div)
    pe[:, 1::2] = np.cos(pos * div)
    enc['pe'] = jnp.asarray(pe)

    M, L = N_MODALITY, NUM_LAYERS
    scale = 1.0 / math.sqrt(DH)
    # merged Q|K|V with the 1/sqrt(dh) scale folded into the Q slab
    wq, wk, wv = w((M, L, D, D)), w((M, L, D, D)), w((M, L, D, D))
    bq, bk, bv = zeros((M, L, 1, D)), zeros((M, L, 1, D)), zeros((M, L, 1, D))
    enc['wqkv'] = jnp.concatenate([wq * scale, wk, wv], axis=-1)   # (M, L, D, 3D)
    enc['bqkv'] = jnp.concatenate([bq * scale, bk, bv], axis=-1)   # (M, L, 1, 3D)
    enc['wo'] = w((M, L, D, D));   enc['bo'] = zeros((M, L, 1, D))
    enc['ln1'] = jnp.concatenate([ones((M, L, 1, D)), zeros((M, L, 1, D))], axis=2)
    enc['w1'] = w((M, L, D, DFF)); enc['b1'] = zeros((M, L, 1, DFF))
    enc['w2'] = w((M, L, DFF, D)); enc['b2'] = zeros((M, L, 1, D))
    enc['ln2'] = jnp.concatenate([ones((M, L, 1, D)), zeros((M, L, 1, D))], axis=2)
    params['enc'] = enc

    # final LayerNorm after CLS concat (row 0: gamma, row 1: beta)
    params['lnc'] = jnp.concatenate([ones((1, 2 * D)), zeros((1, 2 * D))], axis=0)

    # 12 multitask heads fused: stacked W1 (BatchNorm1d eval w/ default stats
    # folded in) and block-diagonal W2 -> one matmul for all 12 logits.
    bn_scale = 1.0 / math.sqrt(1.0 + 1e-5)
    params['head_w1'] = w((2 * D, 12 * CLS_NODES)) * bn_scale
    params['head_b1'] = zeros((1, 12 * CLS_NODES))
    w2_all = w((12, CLS_NODES))
    params['head_w2'] = (jnp.eye(12, dtype=jnp.float32)[:, None, :]
                         * w2_all[:, :, None]).reshape(12 * CLS_NODES, 12)
    params['head_b2'] = zeros((1, 12))
    return params


# -------------------------------- forward -------------------------------------
def forward(params, x, h, m, d, x_m, age, gen, input_lengths, txts, txt_lengths):
    # h, m, d, x_m are unused by MBT_V1.forward (kept for signature parity).
    del h, m, d, x_m
    bb, tt, _ = x.shape
    l_txt = txts.shape[1]
    enc = params['enc']

    # -- glue (plain JAX, fused by XLA): vitals concat, text emb gather, PE,
    #    CLS placement/padding, length masks.  Everything heavy is in the kernel.
    age_r = jnp.broadcast_to(age[:, None, None].astype(jnp.float32), (bb, tt, 1))
    gen_r = jnp.broadcast_to(gen[:, None, None].astype(jnp.float32), (bb, tt, 1))
    xin = jnp.concatenate([x.astype(jnp.float32), age_r, gen_r],
                          axis=2).reshape(bb * tt, NUM_NODES + 2)
    txt_emb = jnp.take(params['txt_emb'], txts.astype(jnp.int32), axis=0)

    s_reals = [tt + 1, l_txt + 1]
    bn_start = _round_up(max(s_reals), 8)              # sublane-aligned bottleneck slot
    sp = _round_up(bn_start + BOTTLENECK_N, 8)         # pad sequence to sublane multiple

    pe = enc['pe']
    base = jnp.zeros((N_MODALITY, bb, sp, D), jnp.float32)
    cls0 = jnp.broadcast_to(enc['cls'][0], (bb, 1, D))
    rows0 = jnp.concatenate([cls0, jnp.zeros((bb, tt, D), jnp.float32)], axis=1)
    if USE_PE[0]:
        rows0 = rows0 + pe[None, :tt + 1, :]
    base = base.at[0, :, :tt + 1, :].set(rows0)
    cls1 = jnp.broadcast_to(enc['cls'][1], (bb, 1, D))
    rows1 = jnp.concatenate([cls1, txt_emb.astype(jnp.float32)], axis=1)
    if USE_PE[1]:
        rows1 = rows1 + pe[None, :l_txt + 1, :]
    base = base.at[1, :, :l_txt + 1, :].set(rows1)
    base = base.reshape(N_MODALITY, bb * sp, D)

    lengths = [input_lengths, txt_lengths + 2]
    cols = jnp.arange(sp)[None, :]
    masks = []
    for i in range(N_MODALITY):
        valid = jnp.minimum(lengths[i].astype(jnp.int32) + 1, s_reals[i])   # +1 for CLS
        key_ok = (cols < valid[:, None]) | ((cols >= bn_start)
                                            & (cols < bn_start + BOTTLENECK_N))
        masks.append(jnp.where(key_ok, 0.0, NEG_INF).astype(jnp.float32)[:, None, :])
    mask = jnp.stack(masks, axis=0)                     # (M, B, 1, SP)

    z = jnp.broadcast_to(enc['bottleneck'],
                         (bb, BOTTLENECK_N, D)).astype(jnp.float32)

    logits = pallas_mbt_forward(xin, base, mask, z, params,
                                bb=bb, sp=sp, bn_start=bn_start, t_len=tt)  # (B, 12)
    return jnp.transpose(logits)[:, :, None]            # (12, B, 1)


# --------------------------------- main ---------------------------------------
if __name__ == "__main__":
    root = jax.random.PRNGKey(0)
    pkey, dkey = jax.random.split(root)
    params = make_params(pkey)

    ks = jax.random.split(dkey, 8)
    x = jax.random.normal(ks[0], (B, T, NUM_NODES), jnp.float32)
    h0 = jnp.zeros((B, D), jnp.float32)               # unused
    m0 = jnp.zeros((B, T, NUM_NODES), jnp.float32)    # unused
    d0 = jnp.zeros((B, T, NUM_NODES), jnp.float32)    # unused
    xm0 = jnp.zeros((B, T, NUM_NODES), jnp.float32)   # unused
    age = jax.random.normal(ks[1], (B,), jnp.float32)
    gen = jax.random.bernoulli(ks[2], 0.5, (B,)).astype(jnp.float32)
    input_lengths = jnp.array([T, T - 3], jnp.int32)
    txts = jax.random.randint(ks[3], (B, L_TXT), 0, VOCAB, jnp.int32)
    txt_lengths = jnp.array([L_TXT - 2, L_TXT - 4], jnp.int32)

    fwd = jax.jit(forward)
    out = fwd(params, x, h0, m0, d0, xm0, age, gen,
              input_lengths, txts, txt_lengths)
    out = jax.block_until_ready(out)
    assert out.shape == (12, B, 1), out.shape
    assert bool(jnp.all(jnp.isfinite(out)))
    print("KERNEL_OK")
</pallas_src>

<mosaic_0001>
module attributes {stable_mosaic.version = 11 : i64} {
  func.func @mbt_kernel(%arg0: memref<16x6xf32, #tpu.memory_space<vmem>>, %arg1: memref<2x48x32xf32, #tpu.memory_space<vmem>>, %arg2: memref<2x2x1x24xf32, #tpu.memory_space<vmem>>, %arg3: memref<2x4x32xf32, #tpu.memory_space<vmem>>, %arg4: memref<6x32xf32, #tpu.memory_space<vmem>>, %arg5: memref<32x32xf32, #tpu.memory_space<vmem>>, %arg6: memref<6x32xf32, #tpu.memory_space<vmem>>, %arg7: memref<2x12x32x96xf32, #tpu.memory_space<vmem>>, %arg8: memref<2x12x1x96xf32, #tpu.memory_space<vmem>>, %arg9: memref<2x12x32x32xf32, #tpu.memory_space<vmem>>, %arg10: memref<2x12x1x32xf32, #tpu.memory_space<vmem>>, %arg11: memref<2x12x2x32xf32, #tpu.memory_space<vmem>>, %arg12: memref<2x12x32x128xf32, #tpu.memory_space<vmem>>, %arg13: memref<2x12x1x128xf32, #tpu.memory_space<vmem>>, %arg14: memref<2x12x128x32xf32, #tpu.memory_space<vmem>>, %arg15: memref<2x12x1x32xf32, #tpu.memory_space<vmem>>, %arg16: memref<2x12x2x32xf32, #tpu.memory_space<vmem>>, %arg17: memref<2x64xf32, #tpu.memory_space<vmem>>, %arg18: memref<64x768xf32, #tpu.memory_space<vmem>>, %arg19: memref<1x768xf32, #tpu.memory_space<vmem>>, %arg20: memref<768x12xf32, #tpu.memory_space<vmem>>, %arg21: memref<1x12xf32, #tpu.memory_space<vmem>>, %arg22: memref<2x12xf32, #tpu.memory_space<vmem>>, %arg23: memref<2x48x32xf32, #tpu.memory_space<vmem>>) attributes {dimension_semantics = [], scalar_prefetch = 0 : i64, scratch_operands = 1 : i64, tpu.core_type = #tpu.core_type<tc>} {
    %c0 = arith.constant 0 : index
    %c0_0 = arith.constant 0 : index
    %0 = vector.load %arg0[%c0, %c0_0] : memref<16x6xf32, #tpu.memory_space<vmem>>, vector<16x6xf32>
    %c0_1 = arith.constant 0 : index
    %c0_2 = arith.constant 0 : index
    %1 = vector.load %arg4[%c0_1, %c0_2] : memref<6x32xf32, #tpu.memory_space<vmem>>, vector<6x32xf32>
    %cst = arith.constant dense<0.000000e+00> : vector<16x32xf32>
    %2 = tpu.matmul %0, %1, %cst {dimension_numbers = #tpu.dot_dimension_numbers<[1], [0], [0], [1], [0, 0, 1, 1], [], []>} : vector<16x6xf32>, vector<6x32xf32>, vector<16x32xf32> -> vector<16x32xf32>
    %c0_3 = arith.constant 0 : index
    %c0_4 = arith.constant 0 : index
    %3 = vector.load %arg6[%c0_3, %c0_4] : memref<6x32xf32, #tpu.memory_space<vmem>>, vector<1x32xf32>
    %4 = vector.broadcast %3 : vector<1x32xf32> to vector<16x32xf32>
    %5 = arith.addf %2, %4 : vector<16x32xf32>
    %c1 = arith.constant 1 : index
    %c0_5 = arith.constant 0 : index
    %6 = vector.load %arg6[%c1, %c0_5] : memref<6x32xf32, #tpu.memory_space<vmem>>, vector<1x32xf32>
    %c2 = arith.constant 2 : index
    %c0_6 = arith.constant 0 : index
    %7 = vector.load %arg6[%c2, %c0_6] : memref<6x32xf32, #tpu.memory_space<vmem>>, vector<1x32xf32>
    %cst_7 = arith.constant dense<0.000000e+00> : vector<16xf32>
    %8 = vector.multi_reduction <add>, %5, %cst_7 [1] : vector<16x32xf32> to vector<16xf32>
    %9 = vector.shape_cast %8 : vector<16xf32> to vector<16x1xf32>
    %cst_8 = arith.constant 3.200000e+01 : f32
    %10 = vector.broadcast %cst_8 : f32 to vector<16x1xf32>
    %11 = arith.divf %9, %10 : vector<16x1xf32>
    %12 = vector.broadcast %11 : vector<16x1xf32> to vector<16x32xf32>
    %13 = arith.subf %5, %12 : vector<16x32xf32>
    %14 = arith.mulf %13, %13 : vector<16x32xf32>
    %cst_9 = arith.constant dense<0.000000e+00> : vector<16xf32>
    %15 = vector.multi_reduction <add>, %14, %cst_9 [1] : vector<16x32xf32> to vector<16xf32>
    %16 = vector.shape_cast %15 : vector<16xf32> to vector<16x1xf32>
    %cst_10 = arith.constant 3.200000e+01 : f32
    %17 = vector.broadcast %cst_10 : f32 to vector<16x1xf32>
    %18 = arith.divf %16, %17 : vector<16x1xf32>
    %19 = vector.broadcast %11 : vector<16x1xf32> to vector<16x32xf32>
    %20 = arith.subf %5, %19 : vector<16x32xf32>
    %cst_11 = arith.constant 9.99999974E-6 : f32
    %21 = vector.broadcast %cst_11 : f32 to vector<16x1xf32>
    %22 = arith.addf %18, %21 : vector<16x1xf32>
    %23 = math.rsqrt %22 : vector<16x1xf32>
    %24 = vector.broadcast %23 : vector<16x1xf32> to vector<16x32xf32>
    %25 = arith.mulf %20, %24 : vector<16x32xf32>
    %26 = vector.broadcast %6 : vector<1x32xf32> to vector<16x32xf32>
    %27 = arith.mulf %25, %26 : vector<16x32xf32>
    %28 = vector.broadcast %7 : vector<1x32xf32> to vector<16x32xf32>
    %29 = arith.addf %27, %28 : vector<16x32xf32>
    %cst_12 = arith.constant 0.000000e+00 : f32
    %30 = vector.broadcast %cst_12 : f32 to vector<16x32xf32>
    %31 = arith.maximumf %29, %30 : vector<16x32xf32>
    %c0_13 = arith.constant 0 : index
    %c0_14 = arith.constant 0 : index
    %32 = vector.load %arg5[%c0_13, %c0_14] : memref<32x32xf32, #tpu.memory_space<vmem>>, vector<32x32xf32>
    %cst_15 = arith.constant dense<0.000000e+00> : vector<16x32xf32>
    %33 = tpu.matmul %31, %32, %cst_15 {dimension_numbers = #tpu.dot_dimension_numbers<[1], [0], [0], [1], [0, 0, 1, 1], [], []>} : vector<16x32xf32>, vector<32x32xf32>, vector<16x32xf32> -> vector<16x32xf32>
    %c3 = arith.constant 3 : index
    %c0_16 = arith.constant 0 : index
    %34 = vector.load %arg6[%c3, %c0_16] : memref<6x32xf32, #tpu.memory_space<vmem>>, vector<1x32xf32>
    %35 = vector.broadcast %34 : vector<1x32xf32> to vector<16x32xf32>
    %36 = arith.addf %33, %35 : vector<16x32xf32>
    %c4 = arith.constant 4 : index
    %c0_17 = arith.constant 0 : index
    %37 = vector.load %arg6[%c4, %c0_17] : memref<6x32xf32, #tpu.memory_space<vmem>>, vector<1x32xf32>
    %c5 = arith.constant 5 : index
    %c0_18 = arith.constant 0 : index
    %38 = vector.load %arg6[%c5, %c0_18] : memref<6x32xf32, #tpu.memory_space<vmem>>, vector<1x32xf32>
    %cst_19 = arith.constant dense<0.000000e+00> : vector<16xf32>
    %39 = vector.multi_reduction <add>, %36, %cst_19 [1] : vector<16x32xf32> to vector<16xf32>
    %40 = vector.shape_cast %39 : vector<16xf32> to vector<16x1xf32>
    %cst_20 = arith.constant 3.200000e+01 : f32
    %41 = vector.broadcast %cst_20 : f32 to vector<16x1xf32>
    %42 = arith.divf %40, %41 : vector<16x1xf32>
    %43 = vector.broadcast %42 : vector<16x1xf32> to vector<16x32xf32>
    %44 = arith.subf %36, %43 : vector<16x32xf32>
    %45 = arith.mulf %44, %44 : vector<16x32xf32>
    %cst_21 = arith.constant dense<0.000000e+00> : vector<16xf32>
    %46 = vector.multi_reduction <add>, %45, %cst_21 [1] : vector<16x32xf32> to vector<16xf32>
    %47 = vector.shape_cast %46 : vector<16xf32> to vector<16x1xf32>
    %cst_22 = arith.constant 3.200000e+01 : f32
    %48 = vector.broadcast %cst_22 : f32 to vector<16x1xf32>
    %49 = arith.divf %47, %48 : vector<16x1xf32>
    %50 = vector.broadcast %42 : vector<16x1xf32> to vector<16x32xf32>
    %51 = arith.subf %36, %50 : vector<16x32xf32>
    %cst_23 = arith.constant 9.99999974E-6 : f32
    %52 = vector.broadcast %cst_23 : f32 to vector<16x1xf32>
    %53 = arith.addf %49, %52 : vector<16x1xf32>
    %54 = math.rsqrt %53 : vector<16x1xf32>
    %55 = vector.broadcast %54 : vector<16x1xf32> to vector<16x32xf32>
    %56 = arith.mulf %51, %55 : vector<16x32xf32>
    %57 = vector.broadcast %37 : vector<1x32xf32> to vector<16x32xf32>
    %58 = arith.mulf %56, %57 : vector<16x32xf32>
    %59 = vector.broadcast %38 : vector<1x32xf32> to vector<16x32xf32>
    %60 = arith.addf %58, %59 : vector<16x32xf32>
    %cst_24 = arith.constant 0.000000e+00 : f32
    %61 = vector.broadcast %cst_24 : f32 to vector<16x32xf32>
    %62 = arith.maximumf %60, %61 : vector<16x32xf32>
    %cst_25 = arith.constant 0.000000e+00 : f32
    %63 = vector.broadcast %cst_25 : f32 to vector<1x32xf32>
    %64 = vector.extract_strided_slice %62 {offsets = [0, 0], sizes = [8, 32], strides = [1, 1]} : vector<16x32xf32> to vector<8x32xf32>
    %cst_26 = arith.constant 0.000000e+00 : f32
    %65 = vector.broadcast %cst_26 : f32 to vector<15x32xf32>
    %cst_27 = arith.constant 0.000000e+00 : f32
    %66 = vector.broadcast %cst_27 : f32 to vector<1x32xf32>
    %67 = vector.extract_strided_slice %62 {offsets = [8, 0], sizes = [8, 32], strides = [1, 1]} : vector<16x32xf32> to vector<8x32xf32>
    %cst_28 = arith.constant 0.000000e+00 : f32
    %68 = vector.broadcast %cst_28 : f32 to vector<15x32xf32>
    %c0_29 = arith.constant 0 : index
    %c0_30 = arith.constant 0 : index
    %c0_31 = arith.constant 0 : index
    %69 = vector.load %arg1[%c0_29, %c0_30, %c0_31] : memref<2x48x32xf32, #tpu.memory_space<vmem>>, vector<1x48x32xf32>
    %70 = vector.shape_cast %69 : vector<1x48x32xf32> to vector<48x32xf32>
    %71 = tpu.concatenate %63, %64, %65, %66, %67, %68 in 0 : vector<1x32xf32>, vector<8x32xf32>, vector<15x32xf32>, vector<1x32xf32>, vector<8x32xf32>, vector<15x32xf32> -> vector<48x32xf32>
    %72 = arith.addf %70, %71 : vector<48x32xf32>
    %c0_32 = arith.constant 0 : index
    %c0_33 = arith.constant 0 : index
    %c0_34 = arith.constant 0 : index
    %73 = vector.load %arg23[%c0_32, %c0_33, %c0_34] : memref<2x48x32xf32, #tpu.memory_space<vmem>>, vector<1x48x32xf32>
    %74 = vector.shape_cast %73 : vector<1x48x32xf32> to vector<48x32xf32>
    %75 = vector.shape_cast %72 : vector<48x32xf32> to vector<1x48x32xf32>
    tpu.vector_store %arg23[%c0_32, %c0_33, %c0_34], %75 {strides = array<i32>} : memref<2x48x32xf32, #tpu.memory_space<vmem>>, vector<1x48x32xf32>,
    %c1_35 = arith.constant 1 : index
    %c0_36 = arith.constant 0 : index
    %c0_37 = arith.constant 0 : index
    %76 = vector.load %arg1[%c1_35, %c0_36, %c0_37] : memref<2x48x32xf32, #tpu.memory_space<vmem>>, vector<1x48x32xf32>
    %77 = vector.shape_cast %76 : vector<1x48x32xf32> to vector<48x32xf32>
    %c1_38 = arith.constant 1 : index
    %c0_39 = arith.constant 0 : index
    %c0_40 = arith.constant 0 : index
    %78 = vector.load %arg23[%c1_38, %c0_39, %c0_40] : memref<2x48x32xf32, #tpu.memory_space<vmem>>, vector<1x48x32xf32>
    %79 = vector.shape_cast %78 : vector<1x48x32xf32> to vector<48x32xf32>
    %80 = vector.shape_cast %77 : vector<48x32xf32> to vector<1x48x32xf32>
    tpu.vector_store %arg23[%c1_38, %c0_39, %c0_40], %80 {strides = array<i32>} : memref<2x48x32xf32, #tpu.memory_space<vmem>>, vector<1x48x32xf32>,
    %81 = tpu.iota {dimensions = array<i32: 1>} : vector<1x32xi32>
    %c0_i32 = arith.constant 0 : i32
    %82 = vector.broadcast %c0_i32 : i32 to vector<1x32xi32>
    %83 = arith.cmpi sge, %81, %82 : vector<1x32xi32>
    %c8_i32 = arith.constant 8 : i32
    %84 = vector.broadcast %c8_i32 : i32 to vector<1x32xi32>
    %85 = arith.cmpi slt, %81, %84 : vector<1x32xi32>
    %86 = arith.andi %83, %85 : vector<1x32xi1>
    %87 = arith.extui %86 : vector<1x32xi1> to vector<1x32xi32>
    %88 = arith.sitofp %87 : vector<1x32xi32> to vector<1x32xf32>
    %c8_i32_41 = arith.constant 8 : i32
    %89 = vector.broadcast %c8_i32_41 : i32 to vector<1x32xi32>
    %90 = arith.cmpi sge, %81, %89 : vector<1x32xi32>
    %c16_i32 = arith.constant 16 : i32
    %91 = vector.broadcast %c16_i32 : i32 to vector<1x32xi32>
    %92 = arith.cmpi slt, %81, %91 : vector<1x32xi32>
    %93 = arith.andi %90, %92 : vector<1x32xi1>
    %94 = arith.extui %93 : vector<1x32xi1> to vector<1x32xi32>
    %95 = arith.sitofp %94 : vector<1x32xi32> to vector<1x32xf32>
    %c16_i32_42 = arith.constant 16 : i32
    %96 = vector.broadcast %c16_i32_42 : i32 to vector<1x32xi32>
    %97 = arith.cmpi sge, %81, %96 : vector<1x32xi32>
    %c24_i32 = arith.constant 24 : i32
    %98 = vector.broadcast %c24_i32 : i32 to vector<1x32xi32>
    %99 = arith.cmpi slt, %81, %98 : vector<1x32xi32>
    %100 = arith.andi %97, %99 : vector<1x32xi1>
    %101 = arith.extui %100 : vector<1x32xi1> to vector<1x32xi32>
    %102 = arith.sitofp %101 : vector<1x32xi32> to vector<1x32xf32>
    %c24_i32_43 = arith.constant 24 : i32
    %103 = vector.broadcast %c24_i32_43 : i32 to vector<1x32xi32>
    %104 = arith.cmpi sge, %81, %103 : vector<1x32xi32>
    %c32_i32 = arith.constant 32 : i32
    %105 = vector.broadcast %c32_i32 : i32 to vector<1x32xi32>
    %106 = arith.cmpi slt, %81, %105 : vector<1x32xi32>
    %107 = arith.andi %104, %106 : vector<1x32xi1>
    %108 = arith.extui %107 : vector<1x32xi1> to vector<1x32xi32>
    %109 = arith.sitofp %108 : vector<1x32xi32> to vector<1x32xf32>
    %110 = tpu.iota {dimensions = array<i32: 1>} : vector<1x24xi32>
    %c16_i32_44 = arith.constant 16 : i32
    %111 = vector.broadcast %c16_i32_44 : i32 to vector<1x24xi32>
    %112 = arith.cmpi sge, %110, %111 : vector<1x24xi32>
    %c20_i32 = arith.constant 20 : i32
    %113 = vector.broadcast %c20_i32 : i32 to vector<1x24xi32>
    %114 = arith.cmpi slt, %110, %113 : vector<1x24xi32>
    %115 = arith.andi %112, %114 : vector<1x24xi1>
    %cst_45 = arith.constant -1.000000e+09 : f32
    %cst_46 = arith.constant 0.000000e+00 : f32
    %116 = vector.broadcast %cst_45 : f32 to vector<1x24xf32>
    %117 = vector.broadcast %cst_46 : f32 to vector<1x24xf32>
    %118 = arith.select %115, %116, %117 : vector<1x24xi1>, vector<1x24xf32>
    %cst_47 = arith.constant 0.000000e+00 : f32
    %119 = vector.broadcast %cst_47 : f32 to vector<1x24xf32>
    %c0_i32_48 = arith.constant 0 : i32
    %c12_i32 = arith.constant 12 : i32
    %120 = arith.addi %c0_i32_48, %c12_i32 : i32
    %c1_i32 = arith.constant 1 : i32
    scf.for %arg24 = %c0_i32_48 to %120 step %c1_i32  : i32 {
      %c0_83 = arith.constant 0 : index
      %c16 = arith.constant 16 : index
      %c0_84 = arith.constant 0 : index
      %169 = vector.load %arg23[%c0_83, %c16, %c0_84] : memref<2x48x32xf32, #tpu.memory_space<vmem>>, vector<1x4x32xf32>
      %170 = vector.shape_cast %169 : vector<1x4x32xf32> to vector<4x32xf32>
      %c6_i32 = arith.constant 6 : i32
      %171 = arith.cmpi eq, %arg24, %c6_i32 : i32
      %c0_85 = arith.constant 0 : index
      %c0_86 = arith.constant 0 : index
      %c0_87 = arith.constant 0 : index
      %172 = vector.load %arg3[%c0_85, %c0_86, %c0_87] : memref<2x4x32xf32, #tpu.memory_space<vmem>>, vector<1x4x32xf32>
      %173 = vector.shape_cast %172 : vector<1x4x32xf32> to vector<4x32xf32>
      %174 = arith.select %171, %173, %170 : vector<4x32xf32>
      %c0_88 = arith.constant 0 : index
      %c16_89 = arith.constant 16 : index
      %c0_90 = arith.constant 0 : index
      %175 = vector.load %arg23[%c0_88, %c16_89, %c0_90] : memref<2x48x32xf32, #tpu.memory_space<vmem>>, vector<1x4x32xf32>
      %176 = vector.shape_cast %175 : vector<1x4x32xf32> to vector<4x32xf32>
      %177 = vector.shape_cast %174 : vector<4x32xf32> to vector<1x4x32xf32>
      tpu.vector_store %arg23[%c0_88, %c16_89, %c0_90], %177 {strides = array<i32>} : memref<2x48x32xf32, #tpu.memory_space<vmem>>, vector<1x4x32xf32>,
      %c0_91 = arith.constant 0 : index
      %c40 = arith.constant 40 : index
      %c0_92 = arith.constant 0 : index
      %178 = vector.load %arg23[%c0_91, %c40, %c0_92] : memref<2x48x32xf32, #tpu.memory_space<vmem>>, vector<1x4x32xf32>
      %179 = vector.shape_cast %178 : vector<1x4x32xf32> to vector<4x32xf32>
      %c6_i32_93 = arith.constant 6 : i32
      %180 = arith.cmpi eq, %arg24, %c6_i32_93 : i32
      %c1_94 = arith.constant 1 : index
      %c0_95 = arith.constant 0 : index
      %c0_96 = arith.constant 0 : index
      %181 = vector.load %arg3[%c1_94, %c0_95, %c0_96] : memref<2x4x32xf32, #tpu.memory_space<vmem>>, vector<1x4x32xf32>
      %182 = vector.shape_cast %181 : vector<1x4x32xf32> to vector<4x32xf32>
      %183 = arith.select %180, %182, %179 : vector<4x32xf32>
      %c0_97 = arith.constant 0 : index
      %c40_98 = arith.constant 40 : index
      %c0_99 = arith.constant 0 : index
      %184 = vector.load %arg23[%c0_97, %c40_98, %c0_99] : memref<2x48x32xf32, #tpu.memory_space<vmem>>, vector<1x4x32xf32>
      %185 = vector.shape_cast %184 : vector<1x4x32xf32> to vector<4x32xf32>
      %186 = vector.shape_cast %183 : vector<4x32xf32> to vector<1x4x32xf32>
      tpu.vector_store %arg23[%c0_97, %c40_98, %c0_99], %186 {strides = array<i32>} : memref<2x48x32xf32, #tpu.memory_space<vmem>>, vector<1x4x32xf32>,
      %c1_100 = arith.constant 1 : index
      %c16_101 = arith.constant 16 : index
      %c0_102 = arith.constant 0 : index
      %187 = vector.load %arg23[%c1_100, %c16_101, %c0_102] : memref<2x48x32xf32, #tpu.memory_space<vmem>>, vector<1x4x32xf32>
      %188 = vector.shape_cast %187 : vector<1x4x32xf32> to vector<4x32xf32>
      %c6_i32_103 = arith.constant 6 : i32
      %189 = arith.cmpi eq, %arg24, %c6_i32_103 : i32
      %c0_104 = arith.constant 0 : index
      %c0_105 = arith.constant 0 : index
      %c0_106 = arith.constant 0 : index
      %190 = vector.load %arg3[%c0_104, %c0_105, %c0_106] : memref<2x4x32xf32, #tpu.memory_space<vmem>>, vector<1x4x32xf32>
      %191 = vector.shape_cast %190 : vector<1x4x32xf32> to vector<4x32xf32>
      %192 = arith.select %189, %191, %188 : vector<4x32xf32>
      %c1_107 = arith.constant 1 : index
      %c16_108 = arith.constant 16 : index
      %c0_109 = arith.constant 0 : index
      %193 = vector.load %arg23[%c1_107, %c16_108, %c0_109] : memref<2x48x32xf32, #tpu.memory_space<vmem>>, vector<1x4x32xf32>
      %194 = vector.shape_cast %193 : vector<1x4x32xf32> to vector<4x32xf32>
      %195 = vector.shape_cast %192 : vector<4x32xf32> to vector<1x4x32xf32>
      tpu.vector_store %arg23[%c1_107, %c16_108, %c0_109], %195 {strides = array<i32>} : memref<2x48x32xf32, #tpu.memory_space<vmem>>, vector<1x4x32xf32>,
      %c1_110 = arith.constant 1 : index
      %c40_111 = arith.constant 40 : index
      %c0_112 = arith.constant 0 : index
      %196 = vector.load %arg23[%c1_110, %c40_111, %c0_112] : memref<2x48x32xf32, #tpu.memory_space<vmem>>, vector<1x4x32xf32>
      %197 = vector.shape_cast %196 : vector<1x4x32xf32> to vector<4x32xf32>
      %c6_i32_113 = arith.constant 6 : i32
      %198 = arith.cmpi eq, %arg24, %c6_i32_113 : i32
      %c1_114 = arith.constant 1 : index
      %c0_115 = arith.constant 0 : index
      %c0_116 = arith.constant 0 : index
      %199 = vector.load %arg3[%c1_114, %c0_115, %c0_116] : memref<2x4x32xf32, #tpu.memory_space<vmem>>, vector<1x4x32xf32>
      %200 = vector.shape_cast %199 : vector<1x4x32xf32> to vector<4x32xf32>
      %201 = arith.select %198, %200, %197 : vector<4x32xf32>
      %c1_117 = arith.constant 1 : index
      %c40_118 = arith.constant 40 : index
      %c0_119 = arith.constant 0 : index
      %202 = vector.load %arg23[%c1_117, %c40_118, %c0_119] : memref<2x48x32xf32, #tpu.memory_space<vmem>>, vector<1x4x32xf32>
      %203 = vector.shape_cast %202 : vector<1x4x32xf32> to vector<4x32xf32>
      %204 = vector.shape_cast %201 : vector<4x32xf32> to vector<1x4x32xf32>
      tpu.vector_store %arg23[%c1_117, %c40_118, %c0_119], %204 {strides = array<i32>} : memref<2x48x32xf32, #tpu.memory_space<vmem>>, vector<1x4x32xf32>,
      %c6_i32_120 = arith.constant 6 : i32
      %205 = arith.cmpi slt, %arg24, %c6_i32_120 : i32
      %206 = arith.select %205, %118, %119 : vector<1x24xf32>
      %c0_121 = arith.constant 0 : index
      %207 = arith.index_cast %arg24 : i32 to index
      %c0_122 = arith.constant 0 : index
      %c0_123 = arith.constant 0 : index
      %208 = vector.load %arg7[%c0_121, %207, %c0_122, %c0_123] : memref<2x12x32x96xf32, #tpu.memory_space<vmem>>, vector<1x1x32x96xf32>
      %209 = vector.shape_cast %208 : vector<1x1x32x96xf32> to vector<32x96xf32>
      %c0_124 = arith.constant 0 : index
      %210 = arith.index_cast %arg24 : i32 to index
      %c0_125 = arith.constant 0 : index
      %c0_126 = arith.constant 0 : index
      %211 = vector.load %arg8[%c0_124, %210, %c0_125, %c0_126] : memref<2x12x1x96xf32, #tpu.memory_space<vmem>>, vector<1x1x1x96xf32>
      %212 = vector.shape_cast %211 : vector<1x1x1x96xf32> to vector<1x96xf32>
      %c0_127 = arith.constant 0 : index
      %213 = arith.index_cast %arg24 : i32 to index
      %c0_128 = arith.constant 0 : index
      %c0_129 = arith.constant 0 : index
      %214 = vector.load %arg9[%c0_127, %213, %c0_128, %c0_129] : memref<2x12x32x32xf32, #tpu.memory_space<vmem>>, vector<1x1x32x32xf32>
      %215 = vector.shape_cast %214 : vector<1x1x32x32xf32> to vector<32x32xf32>
      %c0_130 = arith.constant 0 : index
      %216 = arith.index_cast %arg24 : i32 to index
      %c0_131 = arith.constant 0 : index
      %c0_132 = arith.constant 0 : index
      %217 = vector.load %arg10[%c0_130, %216, %c0_131, %c0_132] : memref<2x12x1x32xf32, #tpu.memory_space<vmem>>, vector<1x1x1x32xf32>
      %218 = vector.shape_cast %217 : vector<1x1x1x32xf32> to vector<1x32xf32>
      %c0_133 = arith.constant 0 : index
      %219 = arith.index_cast %arg24 : i32 to index
      %c0_134 = arith.constant 0 : index
      %c0_135 = arith.constant 0 : index
      %220 = vector.load %arg11[%c0_133, %219, %c0_134, %c0_135] : memref<2x12x2x32xf32, #tpu.memory_space<vmem>>, vector<1x1x2x32xf32>
      %221 = vector.shape_cast %220 : vector<1x1x2x32xf32> to vector<2x32xf32>
      %c0_136 = arith.constant 0 : index
      %222 = arith.index_cast %arg24 : i32 to index
      %c0_137 = arith.constant 0 : index
      %c0_138 = arith.constant 0 : index
      %223 = vector.load %arg12[%c0_136, %222, %c0_137, %c0_138] : memref<2x12x32x128xf32, #tpu.memory_space<vmem>>, vector<1x1x32x128xf32>
      %224 = vector.shape_cast %223 : vector<1x1x32x128xf32> to vector<32x128xf32>
      %c0_139 = arith.constant 0 : index
      %225 = arith.index_cast %arg24 : i32 to index
      %c0_140 = arith.constant 0 : index
      %c0_141 = arith.constant 0 : index
      %226 = vector.load %arg13[%c0_139, %225, %c0_140, %c0_141] : memref<2x12x1x128xf32, #tpu.memory_space<vmem>>, vector<1x1x1x128xf32>
      %227 = vector.shape_cast %226 : vector<1x1x1x128xf32> to vector<1x128xf32>
      %c0_142 = arith.constant 0 : index
      %228 = arith.index_cast %arg24 : i32 to index
      %c0_143 = arith.constant 0 : index
      %c0_144 = arith.constant 0 : index
      %229 = vector.load %arg14[%c0_142, %228, %c0_143, %c0_144] : memref<2x12x128x32xf32, #tpu.memory_space<vmem>>, vector<1x1x128x32xf32>
      %230 = vector.shape_cast %229 : vector<1x1x128x32xf32> to vector<128x32xf32>
      %c0_145 = arith.constant 0 : index
      %231 = arith.index_cast %arg24 : i32 to index
      %c0_146 = arith.constant 0 : index
      %c0_147 = arith.constant 0 : index
      %232 = vector.load %arg15[%c0_145, %231, %c0_146, %c0_147] : memref<2x12x1x32xf32, #tpu.memory_space<vmem>>, vector<1x1x1x32xf32>
      %233 = vector.shape_cast %232 : vector<1x1x1x32xf32> to vector<1x32xf32>
      %c0_148 = arith.constant 0 : index
      %234 = arith.index_cast %arg24 : i32 to index
      %c0_149 = arith.constant 0 : index
      %c0_150 = arith.constant 0 : index
      %235 = vector.load %arg16[%c0_148, %234, %c0_149, %c0_150] : memref<2x12x2x32xf32, #tpu.memory_space<vmem>>, vector<1x1x2x32xf32>
      %236 = vector.shape_cast %235 : vector<1x1x2x32xf32> to vector<2x32xf32>
      %c0_151 = arith.constant 0 : index
      %c0_152 = arith.constant 0 : index
      %c0_153 = arith.constant 0 : index
      %237 = vector.load %arg23[%c0_151, %c0_152, %c0_153] : memref<2x48x32xf32, #tpu.memory_space<vmem>>, vector<1x48x32xf32>
      %238 = vector.shape_cast %237 : vector<1x48x32xf32> to vector<48x32xf32>
      %cst_154 = arith.constant dense<0.000000e+00> : vector<48x96xf32>
      %239 = tpu.matmul %238, %209, %cst_154 {dimension_numbers = #tpu.dot_dimension_numbers<[1], [0], [0], [1], [0, 0, 1, 1], [], []>} : vector<48x32xf32>, vector<32x96xf32>, vector<48x96xf32> -> vector<48x96xf32>
      %240 = vector.broadcast %212 : vector<1x96xf32> to vector<48x96xf32>
      %241 = arith.addf %239, %240 : vector<48x96xf32>
      %242 = vector.extract_strided_slice %241 {offsets = [0, 0], sizes = [24, 32], strides = [1, 1]} : vector<48x96xf32> to vector<24x32xf32>
      %243 = vector.extract_strided_slice %241 {offsets = [0, 32], sizes = [24, 32], strides = [1, 1]} : vector<48x96xf32> to vector<24x32xf32>
      %244 = vector.extract_strided_slice %241 {offsets = [0, 64], sizes = [24, 32], strides = [1, 1]} : vector<48x96xf32> to vector<24x32xf32>
      %c0_155 = arith.constant 0 : index
      %c0_156 = arith.constant 0 : index
      %c0_157 = arith.constant 0 : index
      %c0_158 = arith.constant 0 : index
      %245 = vector.load %arg2[%c0_155, %c0_156, %c0_157, %c0_158] : memref<2x2x1x24xf32, #tpu.memory_space<vmem>>, vector<1x1x1x24xf32>
      %246 = vector.shape_cast %245 : vector<1x1x1x24xf32> to vector<1x24xf32>
      %247 = arith.addf %246, %206 : vector<1x24xf32>
      %248 = vector.broadcast %88 : vector<1x32xf32> to vector<24x32xf32>
      %249 = arith.mulf %242, %248 : vector<24x32xf32>
      %250 = vector.broadcast %95 : vector<1x32xf32> to vector<24x32xf32>
      %251 = arith.mulf %242, %250 : vector<24x32xf32>
      %252 = vector.broadcast %102 : vector<1x32xf32> to vector<24x32xf32>
      %253 = arith.mulf %242, %252 : vector<24x32xf32>
      %254 = vector.broadcast %109 : vector<1x32xf32> to vector<24x32xf32>
      %255 = arith.mulf %242, %254 : vector<24x32xf32>
      %256 = tpu.concatenate %249, %251, %253, %255 in 0 : vector<24x32xf32>, vector<24x32xf32>, vector<24x32xf32>, vector<24x32xf32> -> vector<96x32xf32>
      %cst_159 = arith.constant dense<0.000000e+00> : vector<96x24xf32>
      %257 = tpu.matmul %256, %243, %cst_159 {dimension_numbers = #tpu.dot_dimension_numbers<[1], [1], [0], [0], [0, 0, 1, 0], [], []>} : vector<96x32xf32>, vector<24x32xf32>, vector<96x24xf32> -> vector<96x24xf32>
      %258 = vector.broadcast %247 : vector<1x24xf32> to vector<96x24xf32>
      %259 = arith.addf %257, %258 : vector<96x24xf32>
      %cst_160 = arith.constant dense<0xFF800000> : vector<96xf32>
      %260 = vector.multi_reduction <maximumf>, %259, %cst_160 [1] : vector<96x24xf32> to vector<96xf32>
      %261 = vector.shape_cast %260 : vector<96xf32> to vector<96x1xf32>
      %262 = vector.broadcast %261 : vector<96x1xf32> to vector<96x24xf32>
      %263 = arith.subf %259, %262 : vector<96x24xf32>
      %264 = math.exp %263 : vector<96x24xf32>
      %cst_161 = arith.constant dense<0.000000e+00> : vector<96xf32>
      %265 = vector.multi_reduction <add>, %264, %cst_161 [1] : vector<96x24xf32> to vector<96xf32>
      %266 = vector.shape_cast %265 : vector<96xf32> to vector<96x1xf32>
      %267 = vector.broadcast %266 : vector<96x1xf32> to vector<96x24xf32>
      %268 = arith.divf %264, %267 : vector<96x24xf32>
      %cst_162 = arith.constant dense<0.000000e+00> : vector<96x32xf32>
      %269 = tpu.matmul %268, %244, %cst_162 {dimension_numbers = #tpu.dot_dimension_numbers<[1], [0], [0], [1], [0, 0, 1, 1], [], []>} : vector<96x24xf32>, vector<24x32xf32>, vector<96x32xf32> -> vector<96x32xf32>
      %270 = vector.extract_strided_slice %269 {offsets = [0, 0], sizes = [24, 32], strides = [1, 1]} : vector<96x32xf32> to vector<24x32xf32>
      %271 = vector.broadcast %88 : vector<1x32xf32> to vector<24x32xf32>
      %272 = arith.mulf %270, %271 : vector<24x32xf32>
      %273 = vector.extract_strided_slice %269 {offsets = [24, 0], sizes = [24, 32], strides = [1, 1]} : vector<96x32xf32> to vector<24x32xf32>
      %274 = vector.broadcast %95 : vector<1x32xf32> to vector<24x32xf32>
      %275 = arith.mulf %273, %274 : vector<24x32xf32>
      %276 = arith.addf %272, %275 : vector<24x32xf32>
      %277 = vector.extract_strided_slice %269 {offsets = [48, 0], sizes = [24, 32], strides = [1, 1]} : vector<96x32xf32> to vector<24x32xf32>
      %278 = vector.broadcast %102 : vector<1x32xf32> to vector<24x32xf32>
      %279 = arith.mulf %277, %278 : vector<24x32xf32>
      %280 = arith.addf %276, %279 : vector<24x32xf32>
      %281 = vector.extract_strided_slice %269 {offsets = [72, 0], sizes = [24, 32], strides = [1, 1]} : vector<96x32xf32> to vector<24x32xf32>
      %282 = vector.broadcast %109 : vector<1x32xf32> to vector<24x32xf32>
      %283 = arith.mulf %281, %282 : vector<24x32xf32>
      %284 = arith.addf %280, %283 : vector<24x32xf32>
      %285 = vector.extract_strided_slice %241 {offsets = [24, 0], sizes = [24, 32], strides = [1, 1]} : vector<48x96xf32> to vector<24x32xf32>
      %286 = vector.extract_strided_slice %241 {offsets = [24, 32], sizes = [24, 32], strides = [1, 1]} : vector<48x96xf32> to vector<24x32xf32>
      %287 = vector.extract_strided_slice %241 {offsets = [24, 64], sizes = [24, 32], strides = [1, 1]} : vector<48x96xf32> to vector<24x32xf32>
      %c0_163 = arith.constant 0 : index
      %c1_164 = arith.constant 1 : index
      %c0_165 = arith.constant 0 : index
      %c0_166 = arith.constant 0 : index
      %288 = vector.load %arg2[%c0_163, %c1_164, %c0_165, %c0_166] : memref<2x2x1x24xf32, #tpu.memory_space<vmem>>, vector<1x1x1x24xf32>
      %289 = vector.shape_cast %288 : vector<1x1x1x24xf32> to vector<1x24xf32>
      %290 = arith.addf %289, %206 : vector<1x24xf32>
      %291 = vector.broadcast %88 : vector<1x32xf32> to vector<24x32xf32>
      %292 = arith.mulf %285, %291 : vector<24x32xf32>
      %293 = vector.broadcast %95 : vector<1x32xf32> to vector<24x32xf32>
      %294 = arith.mulf %285, %293 : vector<24x32xf32>
      %295 = vector.broadcast %102 : vector<1x32xf32> to vector<24x32xf32>
      %296 = arith.mulf %285, %295 : vector<24x32xf32>
      %297 = vector.broadcast %109 : vector<1x32xf32> to vector<24x32xf32>
      %298 = arith.mulf %285, %297 : vector<24x32xf32>
      %299 = tpu.concatenate %292, %294, %296, %298 in 0 : vector<24x32xf32>, vector<24x32xf32>, vector<24x32xf32>, vector<24x32xf32> -> vector<96x32xf32>
      %cst_167 = arith.constant dense<0.000000e+00> : vector<96x24xf32>
      %300 = tpu.matmul %299, %286, %cst_167 {dimension_numbers = #tpu.dot_dimension_numbers<[1], [1], [0], [0], [0, 0, 1, 0], [], []>} : vector<96x32xf32>, vector<24x32xf32>, vector<96x24xf32> -> vector<96x24xf32>
      %301 = vector.broadcast %290 : vector<1x24xf32> to vector<96x24xf32>
      %302 = arith.addf %300, %301 : vector<96x24xf32>
      %cst_168 = arith.constant dense<0xFF800000> : vector<96xf32>
      %303 = vector.multi_reduction <maximumf>, %302, %cst_168 [1] : vector<96x24xf32> to vector<96xf32>
      %304 = vector.shape_cast %303 : vector<96xf32> to vector<96x1xf32>
      %305 = vector.broadcast %304 : vector<96x1xf32> to vector<96x24xf32>
      %306 = arith.subf %302, %305 : vector<96x24xf32>
      %307 = math.exp %306 : vector<96x24xf32>
      %cst_169 = arith.constant dense<0.000000e+00> : vector<96xf32>
      %308 = vector.multi_reduction <add>, %307, %cst_169 [1] : vector<96x24xf32> to vector<96xf32>
      %309 = vector.shape_cast %308 : vector<96xf32> to vector<96x1xf32>
      %310 = vector.broadcast %309 : vector<96x1xf32> to vector<96x24xf32>
      %311 = arith.divf %307, %310 : vector<96x24xf32>
      %cst_170 = arith.constant dense<0.000000e+00> : vector<96x32xf32>
      %312 = tpu.matmul %311, %287, %cst_170 {dimension_numbers = #tpu.dot_dimension_numbers<[1], [0], [0], [1], [0, 0, 1, 1], [], []>} : vector<96x24xf32>, vector<24x32xf32>, vector<96x32xf32> -> vector<96x32xf32>
      %313 = vector.extract_strided_slice %312 {offsets = [0, 0], sizes = [24, 32], strides = [1, 1]} : vector<96x32xf32> to vector<24x32xf32>
      %314 = vector.broadcast %88 : vector<1x32xf32> to vector<24x32xf32>
      %315 = arith.mulf %313, %314 : vector<24x32xf32>
      %316 = vector.extract_strided_slice %312 {offsets = [24, 0], sizes = [24, 32], strides = [1, 1]} : vector<96x32xf32> to vector<24x32xf32>
      %317 = vector.broadcast %95 : vector<1x32xf32> to vector<24x32xf32>
      %318 = arith.mulf %316, %317 : vector<24x32xf32>
      %319 = arith.addf %315, %318 : vector<24x32xf32>
      %320 = vector.extract_strided_slice %312 {offsets = [48, 0], sizes = [24, 32], strides = [1, 1]} : vector<96x32xf32> to vector<24x32xf32>
      %321 = vector.broadcast %102 : vector<1x32xf32> to vector<24x32xf32>
      %322 = arith.mulf %320, %321 : vector<24x32xf32>
      %323 = arith.addf %319, %322 : vector<24x32xf32>
      %324 = vector.extract_strided_slice %312 {offsets = [72, 0], sizes = [24, 32], strides = [1, 1]} : vector<96x32xf32> to vector<24x32xf32>
      %325 = vector.broadcast %109 : vector<1x32xf32> to vector<24x32xf32>
      %326 = arith.mulf %324, %325 : vector<24x32xf32>
      %327 = arith.addf %323, %326 : vector<24x32xf32>
      %328 = tpu.concatenate %284, %327 in 0 : vector<24x32xf32>, vector<24x32xf32> -> vector<48x32xf32>
      %cst_171 = arith.constant dense<0.000000e+00> : vector<48x32xf32>
      %329 = tpu.matmul %328, %215, %cst_171 {dimension_numbers = #tpu.dot_dimension_numbers<[1], [0], [0], [1], [0, 0, 1, 1], [], []>} : vector<48x32xf32>, vector<32x32xf32>, vector<48x32xf32> -> vector<48x32xf32>
      %330 = vector.broadcast %218 : vector<1x32xf32> to vector<48x32xf32>
      %331 = arith.addf %329, %330 : vector<48x32xf32>
      %332 = arith.addf %238, %331 : vector<48x32xf32>
      %333 = vector.extract_strided_slice %221 {offsets = [0, 0], sizes = [1, 32], strides = [1, 1]} : vector<2x32xf32> to vector<1x32xf32>
      %334 = vector.extract_strided_slice %221 {offsets = [1, 0], sizes = [1, 32], strides = [1, 1]} : vector<2x32xf32> to vector<1x32xf32>
      %cst_172 = arith.constant dense<0.000000e+00> : vector<48xf32>
      %335 = vector.multi_reduction <add>, %332, %cst_172 [1] : vector<48x32xf32> to vector<48xf32>
      %336 = vector.shape_cast %335 : vector<48xf32> to vector<48x1xf32>
      %cst_173 = arith.constant 3.200000e+01 : f32
      %337 = vector.broadcast %cst_173 : f32 to vector<48x1xf32>
      %338 = arith.divf %336, %337 : vector<48x1xf32>
      %339 = vector.broadcast %338 : vector<48x1xf32> to vector<48x32xf32>
      %340 = arith.subf %332, %339 : vector<48x32xf32>
      %341 = arith.mulf %340, %340 : vector<48x32xf32>
      %cst_174 = arith.constant dense<0.000000e+00> : vector<48xf32>
      %342 = vector.multi_reduction <add>, %341, %cst_174 [1] : vector<48x32xf32> to vector<48xf32>
      %343 = vector.shape_cast %342 : vector<48xf32> to vector<48x1xf32>
      %cst_175 = arith.constant 3.200000e+01 : f32
      %344 = vector.broadcast %cst_175 : f32 to vector<48x1xf32>
      %345 = arith.divf %343, %344 : vector<48x1xf32>
      %346 = vector.broadcast %338 : vector<48x1xf32> to vector<48x32xf32>
      %347 = arith.subf %332, %346 : vector<48x32xf32>
      %cst_176 = arith.constant 9.99999974E-6 : f32
      %348 = vector.broadcast %cst_176 : f32 to vector<48x1xf32>
      %349 = arith.addf %345, %348 : vector<48x1xf32>
      %350 = math.rsqrt %349 : vector<48x1xf32>
      %351 = vector.broadcast %350 : vector<48x1xf32> to vector<48x32xf32>
      %352 = arith.mulf %347, %351 : vector<48x32xf32>
      %353 = vector.broadcast %333 : vector<1x32xf32> to vector<48x32xf32>
      %354 = arith.mulf %352, %353 : vector<48x32xf32>
      %355 = vector.broadcast %334 : vector<1x32xf32> to vector<48x32xf32>
      %356 = arith.addf %354, %355 : vector<48x32xf32>
      %cst_177 = arith.constant dense<0.000000e+00> : vector<48x128xf32>
      %357 = tpu.matmul %356, %224, %cst_177 {dimension_numbers = #tpu.dot_dimension_numbers<[1], [0], [0], [1], [0, 0, 1, 1], [], []>} : vector<48x32xf32>, vector<32x128xf32>, vector<48x128xf32> -> vector<48x128xf32>
      %358 = vector.broadcast %227 : vector<1x128xf32> to vector<48x128xf32>
      %359 = arith.addf %357, %358 : vector<48x128xf32>
      %cst_178 = arith.constant 0.000000e+00 : f32
      %360 = vector.broadcast %cst_178 : f32 to vector<48x128xf32>
      %361 = arith.maximumf %359, %360 : vector<48x128xf32>
      %cst_179 = arith.constant dense<0.000000e+00> : vector<48x32xf32>
      %362 = tpu.matmul %361, %230, %cst_179 {dimension_numbers = #tpu.dot_dimension_numbers<[1], [0], [0], [1], [0, 0, 1, 1], [], []>} : vector<48x128xf32>, vector<128x32xf32>, vector<48x32xf32> -> vector<48x32xf32>
      %363 = vector.broadcast %233 : vector<1x32xf32> to vector<48x32xf32>
      %364 = arith.addf %362, %363 : vector<48x32xf32>
      %365 = arith.addf %356, %364 : vector<48x32xf32>
      %366 = vector.extract_strided_slice %236 {offsets = [0, 0], sizes = [1, 32], strides = [1, 1]} : vector<2x32xf32> to vector<1x32xf32>
      %367 = vector.extract_strided_slice %236 {offsets = [1, 0], sizes = [1, 32], strides = [1, 1]} : vector<2x32xf32> to vector<1x32xf32>
      %cst_180 = arith.constant dense<0.000000e+00> : vector<48xf32>
      %368 = vector.multi_reduction <add>, %365, %cst_180 [1] : vector<48x32xf32> to vector<48xf32>
      %369 = vector.shape_cast %368 : vector<48xf32> to vector<48x1xf32>
      %cst_181 = arith.constant 3.200000e+01 : f32
      %370 = vector.broadcast %cst_181 : f32 to vector<48x1xf32>
      %371 = arith.divf %369, %370 : vector<48x1xf32>
      %372 = vector.broadcast %371 : vector<48x1xf32> to vector<48x32xf32>
      %373 = arith.subf %365, %372 : vector<48x32xf32>
      %374 = arith.mulf %373, %373 : vector<48x32xf32>
      %cst_182 = arith.constant dense<0.000000e+00> : vector<48xf32>
      %375 = vector.multi_reduction <add>, %374, %cst_182 [1] : vector<48x32xf32> to vector<48xf32>
      %376 = vector.shape_cast %375 : vector<48xf32> to vector<48x1xf32>
      %cst_183 = arith.constant 3.200000e+01 : f32
      %377 = vector.broadcast %cst_183 : f32 to vector<48x1xf32>
      %378 = arith.divf %376, %377 : vector<48x1xf32>
      %379 = vector.broadcast %371 : vector<48x1xf32> to vector<48x32xf32>
      %380 = arith.subf %365, %379 : vector<48x32xf32>
      %cst_184 = arith.constant 9.99999974E-6 : f32
      %381 = vector.broadcast %cst_184 : f32 to vector<48x1xf32>
      %382 = arith.addf %378, %381 : vector<48x1xf32>
      %383 = math.rsqrt %382 : vector<48x1xf32>
      %384 = vector.broadcast %383 : vector<48x1xf32> to vector<48x32xf32>
      %385 = arith.mulf %380, %384 : vector<48x32xf32>
      %386 = vector.broadcast %366 : vector<1x32xf32> to vector<48x32xf32>
      %387 = arith.mulf %385, %386 : vector<48x32xf32>
      %388 = vector.broadcast %367 : vector<1x32xf32> to vector<48x32xf32>
      %389 = arith.addf %387, %388 : vector<48x32xf32>
      %c0_185 = arith.constant 0 : index
      %c0_186 = arith.constant 0 : index
      %c0_187 = arith.constant 0 : index
      %390 = vector.load %arg23[%c0_185, %c0_186, %c0_187] : memref<2x48x32xf32, #tpu.memory_space<vmem>>, vector<1x48x32xf32>
      %391 = vector.shape_cast %390 : vector<1x48x32xf32> to vector<48x32xf32>
      %392 = vector.shape_cast %389 : vector<48x32xf32> to vector<1x48x32xf32>
      tpu.vector_store %arg23[%c0_185, %c0_186, %c0_187], %392 {strides = array<i32>} : memref<2x48x32xf32, #tpu.memory_space<vmem>>, vector<1x48x32xf32>,
      %c1_188 = arith.constant 1 : index
      %393 = arith.index_cast %arg24 : i32 to index
      %c0_189 = arith.constant 0 : index
      %c0_190 = arith.constant 0 : index
      %394 = vector.load %arg7[%c1_188, %393, %c0_189, %c0_190] : memref<2x12x32x96xf32, #tpu.memory_space<vmem>>, vector<1x1x32x96xf32>
      %395 = vector.shape_cast %394 : vector<1x1x32x96xf32> to vector<32x96xf32>
      %c1_191 = arith.constant 1 : index
      %396 = arith.index_cast %arg24 : i32 to index
      %c0_192 = arith.constant 0 : index
      %c0_193 = arith.constant 0 : index
      %397 = vector.load %arg8[%c1_191, %396, %c0_192, %c0_193] : memref<2x12x1x96xf32, #tpu.memory_space<vmem>>, vector<1x1x1x96xf32>
      %398 = vector.shape_cast %397 : vector<1x1x1x96xf32> to vector<1x96xf32>
      %c1_194 = arith.constant 1 : index
      %399 = arith.index_cast %arg24 : i32 to index
      %c0_195 = arith.constant 0 : index
      %c0_196 = arith.constant 0 : index
      %400 = vector.load %arg9[%c1_194, %399, %c0_195, %c0_196] : memref<2x12x32x32xf32, #tpu.memory_space<vmem>>, vector<1x1x32x32xf32>
      %401 = vector.shape_cast %400 : vector<1x1x32x32xf32> to vector<32x32xf32>
      %c1_197 = arith.constant 1 : index
      %402 = arith.index_cast %arg24 : i32 to index
      %c0_198 = arith.constant 0 : index
      %c0_199 = arith.constant 0 : index
      %403 = vector.load %arg10[%c1_197, %402, %c0_198, %c0_199] : memref<2x12x1x32xf32, #tpu.memory_space<vmem>>, vector<1x1x1x32xf32>
      %404 = vector.shape_cast %403 : vector<1x1x1x32xf32> to vector<1x32xf32>
      %c1_200 = arith.constant 1 : index
      %405 = arith.index_cast %arg24 : i32 to index
      %c0_201 = arith.constant 0 : index
      %c0_202 = arith.constant 0 : index
      %406 = vector.load %arg11[%c1_200, %405, %c0_201, %c0_202] : memref<2x12x2x32xf32, #tpu.memory_space<vmem>>, vector<1x1x2x32xf32>
      %407 = vector.shape_cast %406 : vector<1x1x2x32xf32> to vector<2x32xf32>
      %c1_203 = arith.constant 1 : index
      %408 = arith.index_cast %arg24 : i32 to index
      %c0_204 = arith.constant 0 : index
      %c0_205 = arith.constant 0 : index
      %409 = vector.load %arg12[%c1_203, %408, %c0_204, %c0_205] : memref<2x12x32x128xf32, #tpu.memory_space<vmem>>, vector<1x1x32x128xf32>
      %410 = vector.shape_cast %409 : vector<1x1x32x128xf32> to vector<32x128xf32>
      %c1_206 = arith.constant 1 : index
      %411 = arith.index_cast %arg24 : i32 to index
      %c0_207 = arith.constant 0 : index
      %c0_208 = arith.constant 0 : index
      %412 = vector.load %arg13[%c1_206, %411, %c0_207, %c0_208] : memref<2x12x1x128xf32, #tpu.memory_space<vmem>>, vector<1x1x1x128xf32>
      %413 = vector.shape_cast %412 : vector<1x1x1x128xf32> to vector<1x128xf32>
      %c1_209 = arith.constant 1 : index
      %414 = arith.index_cast %arg24 : i32 to index
      %c0_210 = arith.constant 0 : index
      %c0_211 = arith.constant 0 : index
      %415 = vector.load %arg14[%c1_209, %414, %c0_210, %c0_211] : memref<2x12x128x32xf32, #tpu.memory_space<vmem>>, vector<1x1x128x32xf32>
      %416 = vector.shape_cast %415 : vector<1x1x128x32xf32> to vector<128x32xf32>
      %c1_212 = arith.constant 1 : index
      %417 = arith.index_cast %arg24 : i32 to index
      %c0_213 = arith.constant 0 : index
      %c0_214 = arith.constant 0 : index
      %418 = vector.load %arg15[%c1_212, %417, %c0_213, %c0_214] : memref<2x12x1x32xf32, #tpu.memory_space<vmem>>, vector<1x1x1x32xf32>
      %419 = vector.shape_cast %418 : vector<1x1x1x32xf32> to vector<1x32xf32>
      %c1_215 = arith.constant 1 : index
      %420 = arith.index_cast %arg24 : i32 to index
      %c0_216 = arith.constant 0 : index
      %c0_217 = arith.constant 0 : index
      %421 = vector.load %arg16[%c1_215, %420, %c0_216, %c0_217] : memref<2x12x2x32xf32, #tpu.memory_space<vmem>>, vector<1x1x2x32xf32>
      %422 = vector.shape_cast %421 : vector<1x1x2x32xf32> to vector<2x32xf32>
      %c1_218 = arith.constant 1 : index
      %c0_219 = arith.constant 0 : index
      %c0_220 = arith.constant 0 : index
      %423 = vector.load %arg23[%c1_218, %c0_219, %c0_220] : memref<2x48x32xf32, #tpu.memory_space<vmem>>, vector<1x48x32xf32>
      %424 = vector.shape_cast %423 : vector<1x48x32xf32> to vector<48x32xf32>
      %cst_221 = arith.constant dense<0.000000e+00> : vector<48x96xf32>
      %425 = tpu.matmul %424, %395, %cst_221 {dimension_numbers = #tpu.dot_dimension_numbers<[1], [0], [0], [1], [0, 0, 1, 1], [], []>} : vector<48x32xf32>, vector<32x96xf32>, vector<48x96xf32> -> vector<48x96xf32>
      %426 = vector.broadcast %398 : vector<1x96xf32> to vector<48x96xf32>
      %427 = arith.addf %425, %426 : vector<48x96xf32>
      %428 = vector.extract_strided_slice %427 {offsets = [0, 0], sizes = [24, 32], strides = [1, 1]} : vector<48x96xf32> to vector<24x32xf32>
      %429 = vector.extract_strided_slice %427 {offsets = [0, 32], sizes = [24, 32], strides = [1, 1]} : vector<48x96xf32> to vector<24x32xf32>
      %430 = vector.extract_strided_slice %427 {offsets = [0, 64], sizes = [24, 32], strides = [1, 1]} : vector<48x96xf32> to vector<24x32xf32>
      %c1_222 = arith.constant 1 : index
      %c0_223 = arith.constant 0 : index
      %c0_224 = arith.constant 0 : index
      %c0_225 = arith.constant 0 : index
      %431 = vector.load %arg2[%c1_222, %c0_223, %c0_224, %c0_225] : memref<2x2x1x24xf32, #tpu.memory_space<vmem>>, vector<1x1x1x24xf32>
      %432 = vector.shape_cast %431 : vector<1x1x1x24xf32> to vector<1x24xf32>
      %433 = arith.addf %432, %206 : vector<1x24xf32>
      %434 = vector.broadcast %88 : vector<1x32xf32> to vector<24x32xf32>
      %435 = arith.mulf %428, %434 : vector<24x32xf32>
      %436 = vector.broadcast %95 : vector<1x32xf32> to vector<24x32xf32>
      %437 = arith.mulf %428, %436 : vector<24x32xf32>
      %438 = vector.broadcast %102 : vector<1x32xf32> to vector<24x32xf32>
      %439 = arith.mulf %428, %438 : vector<24x32xf32>
      %440 = vector.broadcast %109 : vector<1x32xf32> to vector<24x32xf32>
      %441 = arith.mulf %428, %440 : vector<24x32xf32>
      %442 = tpu.concatenate %435, %437, %439, %441 in 0 : vector<24x32xf32>, vector<24x32xf32>, vector<24x32xf32>, vector<24x32xf32> -> vector<96x32xf32>
      %cst_226 = arith.constant dense<0.000000e+00> : vector<96x24xf32>
      %443 = tpu.matmul %442, %429, %cst_226 {dimension_numbers = #tpu.dot_dimension_numbers<[1], [1], [0], [0], [0, 0, 1, 0], [], []>} : vector<96x32xf32>, vector<24x32xf32>, vector<96x24xf32> -> vector<96x24xf32>
      %444 = vector.broadcast %433 : vector<1x24xf32> to vector<96x24xf32>
      %445 = arith.addf %443, %444 : vector<96x24xf32>
      %cst_227 = arith.constant dense<0xFF800000> : vector<96xf32>
      %446 = vector.multi_reduction <maximumf>, %445, %cst_227 [1] : vector<96x24xf32> to vector<96xf32>
      %447 = vector.shape_cast %446 : vector<96xf32> to vector<96x1xf32>
      %448 = vector.broadcast %447 : vector<96x1xf32> to vector<96x24xf32>
      %449 = arith.subf %445, %448 : vector<96x24xf32>
      %450 = math.exp %449 : vector<96x24xf32>
      %cst_228 = arith.constant dense<0.000000e+00> : vector<96xf32>
      %451 = vector.multi_reduction <add>, %450, %cst_228 [1] : vector<96x24xf32> to vector<96xf32>
      %452 = vector.shape_cast %451 : vector<96xf32> to vector<96x1xf32>
      %453 = vector.broadcast %452 : vector<96x1xf32> to vector<96x24xf32>
      %454 = arith.divf %450, %453 : vector<96x24xf32>
      %cst_229 = arith.constant dense<0.000000e+00> : vector<96x32xf32>
      %455 = tpu.matmul %454, %430, %cst_229 {dimension_numbers = #tpu.dot_dimension_numbers<[1], [0], [0], [1], [0, 0, 1, 1], [], []>} : vector<96x24xf32>, vector<24x32xf32>, vector<96x32xf32> -> vector<96x32xf32>
      %456 = vector.extract_strided_slice %455 {offsets = [0, 0], sizes = [24, 32], strides = [1, 1]} : vector<96x32xf32> to vector<24x32xf32>
      %457 = vector.broadcast %88 : vector<1x32xf32> to vector<24x32xf32>
      %458 = arith.mulf %456, %457 : vector<24x32xf32>
      %459 = vector.extract_strided_slice %455 {offsets = [24, 0], sizes = [24, 32], strides = [1, 1]} : vector<96x32xf32> to vector<24x32xf32>
      %460 = vector.broadcast %95 : vector<1x32xf32> to vector<24x32xf32>
      %461 = arith.mulf %459, %460 : vector<24x32xf32>
      %462 = arith.addf %458, %461 : vector<24x32xf32>
      %463 = vector.extract_strided_slice %455 {offsets = [48, 0], sizes = [24, 32], strides = [1, 1]} : vector<96x32xf32> to vector<24x32xf32>
      %464 = vector.broadcast %102 : vector<1x32xf32> to vector<24x32xf32>
      %465 = arith.mulf %463, %464 : vector<24x32xf32>
      %466 = arith.addf %462, %465 : vector<24x32xf32>
      %467 = vector.extract_strided_slice %455 {offsets = [72, 0], sizes = [24, 32], strides = [1, 1]} : vector<96x32xf32> to vector<24x32xf32>
      %468 = vector.broadcast %109 : vector<1x32xf32> to vector<24x32xf32>
      %469 = arith.mulf %467, %468 : vector<24x32xf32>
      %470 = arith.addf %466, %469 : vector<24x32xf32>
      %471 = vector.extract_strided_slice %427 {offsets = [24, 0], sizes = [24, 32], strides = [1, 1]} : vector<48x96xf32> to vector<24x32xf32>
      %472 = vector.extract_strided_slice %427 {offsets = [24, 32], sizes = [24, 32], strides = [1, 1]} : vector<48x96xf32> to vector<24x32xf32>
      %473 = vector.extract_strided_slice %427 {offsets = [24, 64], sizes = [24, 32], strides = [1, 1]} : vector<48x96xf32> to vector<24x32xf32>
      %c1_230 = arith.constant 1 : index
      %c1_231 = arith.constant 1 : index
      %c0_232 = arith.constant 0 : index
      %c0_233 = arith.constant 0 : index
      %474 = vector.load %arg2[%c1_230, %c1_231, %c0_232, %c0_233] : memref<2x2x1x24xf32, #tpu.memory_space<vmem>>, vector<1x1x1x24xf32>
      %475 = vector.shape_cast %474 : vector<1x1x1x24xf32> to vector<1x24xf32>
      %476 = arith.addf %475, %206 : vector<1x24xf32>
      %477 = vector.broadcast %88 : vector<1x32xf32> to vector<24x32xf32>
      %478 = arith.mulf %471, %477 : vector<24x32xf32>
      %479 = vector.broadcast %95 : vector<1x32xf32> to vector<24x32xf32>
      %480 = arith.mulf %471, %479 : vector<24x32xf32>
      %481 = vector.broadcast %102 : vector<1x32xf32> to vector<24x32xf32>
      %482 = arith.mulf %471, %481 : vector<24x32xf32>
      %483 = vector.broadcast %109 : vector<1x32xf32> to vector<24x32xf32>
      %484 = arith.mulf %471, %483 : vector<24x32xf32>
      %485 = tpu.concatenate %478, %480, %482, %484 in 0 : vector<24x32xf32>, vector<24x32xf32>, vector<24x32xf32>, vector<24x32xf32> -> vector<96x32xf32>
      %cst_234 = arith.constant dense<0.000000e+00> : vector<96x24xf32>
      %486 = tpu.matmul %485, %472, %cst_234 {dimension_numbers = #tpu.dot_dimension_numbers<[1], [1], [0], [0], [0, 0, 1, 0], [], []>} : vector<96x32xf32>, vector<24x32xf32>, vector<96x24xf32> -> vector<96x24xf32>
      %487 = vector.broadcast %476 : vector<1x24xf32> to vector<96x24xf32>
      %488 = arith.addf %486, %487 : vector<96x24xf32>
      %cst_235 = arith.constant dense<0xFF800000> : vector<96xf32>
      %489 = vector.multi_reduction <maximumf>, %488, %cst_235 [1] : vector<96x24xf32> to vector<96xf32>
      %490 = vector.shape_cast %489 : vector<96xf32> to vector<96x1xf32>
      %491 = vector.broadcast %490 : vector<96x1xf32> to vector<96x24xf32>
      %492 = arith.subf %488, %491 : vector<96x24xf32>
      %493 = math.exp %492 : vector<96x24xf32>
      %cst_236 = arith.constant dense<0.000000e+00> : vector<96xf32>
      %494 = vector.multi_reduction <add>, %493, %cst_236 [1] : vector<96x24xf32> to vector<96xf32>
      %495 = vector.shape_cast %494 : vector<96xf32> to vector<96x1xf32>
      %496 = vector.broadcast %495 : vector<96x1xf32> to vector<96x24xf32>
      %497 = arith.divf %493, %496 : vector<96x24xf32>
      %cst_237 = arith.constant dense<0.000000e+00> : vector<96x32xf32>
      %498 = tpu.matmul %497, %473, %cst_237 {dimension_numbers = #tpu.dot_dimension_numbers<[1], [0], [0], [1], [0, 0, 1, 1], [], []>} : vector<96x24xf32>, vector<24x32xf32>, vector<96x32xf32> -> vector<96x32xf32>
      %499 = vector.extract_strided_slice %498 {offsets = [0, 0], sizes = [24, 32], strides = [1, 1]} : vector<96x32xf32> to vector<24x32xf32>
      %500 = vector.broadcast %88 : vector<1x32xf32> to vector<24x32xf32>
      %501 = arith.mulf %499, %500 : vector<24x32xf32>
      %502 = vector.extract_strided_slice %498 {offsets = [24, 0], sizes = [24, 32], strides = [1, 1]} : vector<96x32xf32> to vector<24x32xf32>
      %503 = vector.broadcast %95 : vector<1x32xf32> to vector<24x32xf32>
      %504 = arith.mulf %502, %503 : vector<24x32xf32>
      %505 = arith.addf %501, %504 : vector<24x32xf32>
      %506 = vector.extract_strided_slice %498 {offsets = [48, 0], sizes = [24, 32], strides = [1, 1]} : vector<96x32xf32> to vector<24x32xf32>
      %507 = vector.broadcast %102 : vector<1x32xf32> to vector<24x32xf32>
      %508 = arith.mulf %506, %507 : vector<24x32xf32>
      %509 = arith.addf %505, %508 : vector<24x32xf32>
      %510 = vector.extract_strided_slice %498 {offsets = [72, 0], sizes = [24, 32], strides = [1, 1]} : vector<96x32xf32> to vector<24x32xf32>
      %511 = vector.broadcast %109 : vector<1x32xf32> to vector<24x32xf32>
      %512 = arith.mulf %510, %511 : vector<24x32xf32>
      %513 = arith.addf %509, %512 : vector<24x32xf32>
      %514 = tpu.concatenate %470, %513 in 0 : vector<24x32xf32>, vector<24x32xf32> -> vector<48x32xf32>
      %cst_238 = arith.constant dense<0.000000e+00> : vector<48x32xf32>
      %515 = tpu.matmul %514, %401, %cst_238 {dimension_numbers = #tpu.dot_dimension_numbers<[1], [0], [0], [1], [0, 0, 1, 1], [], []>} : vector<48x32xf32>, vector<32x32xf32>, vector<48x32xf32> -> vector<48x32xf32>
      %516 = vector.broadcast %404 : vector<1x32xf32> to vector<48x32xf32>
      %517 = arith.addf %515, %516 : vector<48x32xf32>
      %518 = arith.addf %424, %517 : vector<48x32xf32>
      %519 = vector.extract_strided_slice %407 {offsets = [0, 0], sizes = [1, 32], strides = [1, 1]} : vector<2x32xf32> to vector<1x32xf32>
      %520 = vector.extract_strided_slice %407 {offsets = [1, 0], sizes = [1, 32], strides = [1, 1]} : vector<2x32xf32> to vector<1x32xf32>
      %cst_239 = arith.constant dense<0.000000e+00> : vector<48xf32>
      %521 = vector.multi_reduction <add>, %518, %cst_239 [1] : vector<48x32xf32> to vector<48xf32>
      %522 = vector.shape_cast %521 : vector<48xf32> to vector<48x1xf32>
      %cst_240 = arith.constant 3.200000e+01 : f32
      %523 = vector.broadcast %cst_240 : f32 to vector<48x1xf32>
      %524 = arith.divf %522, %523 : vector<48x1xf32>
      %525 = vector.broadcast %524 : vector<48x1xf32> to vector<48x32xf32>
      %526 = arith.subf %518, %525 : vector<48x32xf32>
      %527 = arith.mulf %526, %526 : vector<48x32xf32>
      %cst_241 = arith.constant dense<0.000000e+00> : vector<48xf32>
      %528 = vector.multi_reduction <add>, %527, %cst_241 [1] : vector<48x32xf32> to vector<48xf32>
      %529 = vector.shape_cast %528 : vector<48xf32> to vector<48x1xf32>
      %cst_242 = arith.constant 3.200000e+01 : f32
      %530 = vector.broadcast %cst_242 : f32 to vector<48x1xf32>
      %531 = arith.divf %529, %530 : vector<48x1xf32>
      %532 = vector.broadcast %524 : vector<48x1xf32> to vector<48x32xf32>
      %533 = arith.subf %518, %532 : vector<48x32xf32>
      %cst_243 = arith.constant 9.99999974E-6 : f32
      %534 = vector.broadcast %cst_243 : f32 to vector<48x1xf32>
      %535 = arith.addf %531, %534 : vector<48x1xf32>
      %536 = math.rsqrt %535 : vector<48x1xf32>
      %537 = vector.broadcast %536 : vector<48x1xf32> to vector<48x32xf32>
      %538 = arith.mulf %533, %537 : vector<48x32xf32>
      %539 = vector.broadcast %519 : vector<1x32xf32> to vector<48x32xf32>
      %540 = arith.mulf %538, %539 : vector<48x32xf32>
      %541 = vector.broadcast %520 : vector<1x32xf32> to vector<48x32xf32>
      %542 = arith.addf %540, %541 : vector<48x32xf32>
      %cst_244 = arith.constant dense<0.000000e+00> : vector<48x128xf32>
      %543 = tpu.matmul %542, %410, %cst_244 {dimension_numbers = #tpu.dot_dimension_numbers<[1], [0], [0], [1], [0, 0, 1, 1], [], []>} : vector<48x32xf32>, vector<32x128xf32>, vector<48x128xf32> -> vector<48x128xf32>
      %544 = vector.broadcast %413 : vector<1x128xf32> to vector<48x128xf32>
      %545 = arith.addf %543, %544 : vector<48x128xf32>
      %cst_245 = arith.constant 0.000000e+00 : f32
      %546 = vector.broadcast %cst_245 : f32 to vector<48x128xf32>
      %547 = arith.maximumf %545, %546 : vector<48x128xf32>
      %cst_246 = arith.constant dense<0.000000e+00> : vector<48x32xf32>
      %548 = tpu.matmul %547, %416, %cst_246 {dimension_numbers = #tpu.dot_dimension_numbers<[1], [0], [0], [1], [0, 0, 1, 1], [], []>} : vector<48x128xf32>, vector<128x32xf32>, vector<48x32xf32> -> vector<48x32xf32>
      %549 = vector.broadcast %419 : vector<1x32xf32> to vector<48x32xf32>
      %550 = arith.addf %548, %549 : vector<48x32xf32>
      %551 = arith.addf %542, %550 : vector<48x32xf32>
      %552 = vector.extract_strided_slice %422 {offsets = [0, 0], sizes = [1, 32], strides = [1, 1]} : vector<2x32xf32> to vector<1x32xf32>
      %553 = vector.extract_strided_slice %422 {offsets = [1, 0], sizes = [1, 32], strides = [1, 1]} : vector<2x32xf32> to vector<1x32xf32>
      %cst_247 = arith.constant dense<0.000000e+00> : vector<48xf32>
      %554 = vector.multi_reduction <add>, %551, %cst_247 [1] : vector<48x32xf32> to vector<48xf32>
      %555 = vector.shape_cast %554 : vector<48xf32> to vector<48x1xf32>
      %cst_248 = arith.constant 3.200000e+01 : f32
      %556 = vector.broadcast %cst_248 : f32 to vector<48x1xf32>
      %557 = arith.divf %555, %556 : vector<48x1xf32>
      %558 = vector.broadcast %557 : vector<48x1xf32> to vector<48x32xf32>
      %559 = arith.subf %551, %558 : vector<48x32xf32>
      %560 = arith.mulf %559, %559 : vector<48x32xf32>
      %cst_249 = arith.constant dense<0.000000e+00> : vector<48xf32>
      %561 = vector.multi_reduction <add>, %560, %cst_249 [1] : vector<48x32xf32> to vector<48xf32>
      %562 = vector.shape_cast %561 : vector<48xf32> to vector<48x1xf32>
      %cst_250 = arith.constant 3.200000e+01 : f32
      %563 = vector.broadcast %cst_250 : f32 to vector<48x1xf32>
      %564 = arith.divf %562, %563 : vector<48x1xf32>
      %565 = vector.broadcast %557 : vector<48x1xf32> to vector<48x32xf32>
      %566 = arith.subf %551, %565 : vector<48x32xf32>
      %cst_251 = arith.constant 9.99999974E-6 : f32
      %567 = vector.broadcast %cst_251 : f32 to vector<48x1xf32>
      %568 = arith.addf %564, %567 : vector<48x1xf32>
      %569 = math.rsqrt %568 : vector<48x1xf32>
      %570 = vector.broadcast %569 : vector<48x1xf32> to vector<48x32xf32>
      %571 = arith.mulf %566, %570 : vector<48x32xf32>
      %572 = vector.broadcast %552 : vector<1x32xf32> to vector<48x32xf32>
      %573 = arith.mulf %571, %572 : vector<48x32xf32>
      %574 = vector.broadcast %553 : vector<1x32xf32> to vector<48x32xf32>
      %575 = arith.addf %573, %574 : vector<48x32xf32>
      %c1_252 = arith.constant 1 : index
      %c0_253 = arith.constant 0 : index
      %c0_254 = arith.constant 0 : index
      %576 = vector.load %arg23[%c1_252, %c0_253, %c0_254] : memref<2x48x32xf32, #tpu.memory_space<vmem>>, vector<1x48x32xf32>
      %577 = vector.shape_cast %576 : vector<1x48x32xf32> to vector<48x32xf32>
      %578 = vector.shape_cast %575 : vector<48x32xf32> to vector<1x48x32xf32>
      tpu.vector_store %arg23[%c1_252, %c0_253, %c0_254], %578 {strides = array<i32>} : memref<2x48x32xf32, #tpu.memory_space<vmem>>, vector<1x48x32xf32>,
      %c6_i32_255 = arith.constant 6 : i32
      %579 = arith.cmpi sge, %arg24, %c6_i32_255 : i32
      %c0_256 = arith.constant 0 : index
      %c16_257 = arith.constant 16 : index
      %c0_258 = arith.constant 0 : index
      %580 = vector.load %arg23[%c0_256, %c16_257, %c0_258] : memref<2x48x32xf32, #tpu.memory_space<vmem>>, vector<1x4x32xf32>
      %581 = vector.shape_cast %580 : vector<1x4x32xf32> to vector<4x32xf32>
      %c1_259 = arith.constant 1 : index
      %c16_260 = arith.constant 16 : index
      %c0_261 = arith.constant 0 : index
      %582 = vector.load %arg23[%c1_259, %c16_260, %c0_261] : memref<2x48x32xf32, #tpu.memory_space<vmem>>, vector<1x4x32xf32>
      %583 = vector.shape_cast %582 : vector<1x4x32xf32> to vector<4x32xf32>
      %584 = arith.addf %581, %583 : vector<4x32xf32>
      %cst_262 = arith.constant 5.000000e-01 : f32
      %585 = vector.broadcast %cst_262 : f32 to vector<4x32xf32>
      %586 = arith.mulf %584, %585 : vector<4x32xf32>
      %c0_263 = arith.constant 0 : index
      %c16_264 = arith.constant 16 : index
      %c0_265 = arith.constant 0 : index
      %587 = vector.load %arg23[%c0_263, %c16_264, %c0_265] : memref<2x48x32xf32, #tpu.memory_space<vmem>>, vector<1x4x32xf32>
      %588 = vector.shape_cast %587 : vector<1x4x32xf32> to vector<4x32xf32>
      %589 = arith.select %579, %586, %588 : vector<4x32xf32>
      %c0_266 = arith.constant 0 : index
      %c16_267 = arith.constant 16 : index
      %c0_268 = arith.constant 0 : index
      %590 = vector.load %arg23[%c0_266, %c16_267, %c0_268] : memref<2x48x32xf32, #tpu.memory_space<vmem>>, vector<1x4x32xf32>
      %591 = vector.shape_cast %590 : vector<1x4x32xf32> to vector<4x32xf32>
      %592 = vector.shape_cast %589 : vector<4x32xf32> to vector<1x4x32xf32>
      tpu.vector_store %arg23[%c0_266, %c16_267, %c0_268], %592 {strides = array<i32>} : memref<2x48x32xf32, #tpu.memory_space<vmem>>, vector<1x4x32xf32>,
      %c1_269 = arith.constant 1 : index
      %c16_270 = arith.constant 16 : index
      %c0_271 = arith.constant 0 : index
      %593 = vector.load %arg23[%c1_269, %c16_270, %c0_271] : memref<2x48x32xf32, #tpu.memory_space<vmem>>, vector<1x4x32xf32>
      %594 = vector.shape_cast %593 : vector<1x4x32xf32> to vector<4x32xf32>
      %595 = arith.select %579, %586, %594 : vector<4x32xf32>
      %c1_272 = arith.constant 1 : index
      %c16_273 = arith.constant 16 : index
      %c0_274 = arith.constant 0 : index
      %596 = vector.load %arg23[%c1_272, %c16_273, %c0_274] : memref<2x48x32xf32, #tpu.memory_space<vmem>>, vector<1x4x32xf32>
      %597 = vector.shape_cast %596 : vector<1x4x32xf32> to vector<4x32xf32>
      %598 = vector.shape_cast %595 : vector<4x32xf32> to vector<1x4x32xf32>
      tpu.vector_store %arg23[%c1_272, %c16_273, %c0_274], %598 {strides = array<i32>} : memref<2x48x32xf32, #tpu.memory_space<vmem>>, vector<1x4x32xf32>,
      %c0_275 = arith.constant 0 : index
      %c40_276 = arith.constant 40 : index
      %c0_277 = arith.constant 0 : index
      %599 = vector.load %arg23[%c0_275, %c40_276, %c0_277] : memref<2x48x32xf32, #tpu.memory_space<vmem>>, vector<1x4x32xf32>
      %600 = vector.shape_cast %599 : vector<1x4x32xf32> to vector<4x32xf32>
      %c1_278 = arith.constant 1 : index
      %c40_279 = arith.constant 40 : index
      %c0_280 = arith.constant 0 : index
      %601 = vector.load %arg23[%c1_278, %c40_279, %c0_280] : memref<2x48x32xf32, #tpu.memory_space<vmem>>, vector<1x4x32xf32>
      %602 = vector.shape_cast %601 : vector<1x4x32xf32> to vector<4x32xf32>
      %603 = arith.addf %600, %602 : vector<4x32xf32>
      %cst_281 = arith.constant 5.000000e-01 : f32
      %604 = vector.broadcast %cst_281 : f32 to vector<4x32xf32>
      %605 = arith.mulf %603, %604 : vector<4x32xf32>
      %c0_282 = arith.constant 0 : index
      %c40_283 = arith.constant 40 : index
      %c0_284 = arith.constant 0 : index
      %606 = vector.load %arg23[%c0_282, %c40_283, %c0_284] : memref<2x48x32xf32, #tpu.memory_space<vmem>>, vector<1x4x32xf32>
      %607 = vector.shape_cast %606 : vector<1x4x32xf32> to vector<4x32xf32>
      %608 = arith.select %579, %605, %607 : vector<4x32xf32>
      %c0_285 = arith.constant 0 : index
      %c40_286 = arith.constant 40 : index
      %c0_287 = arith.constant 0 : index
      %609 = vector.load %arg23[%c0_285, %c40_286, %c0_287] : memref<2x48x32xf32, #tpu.memory_space<vmem>>, vector<1x4x32xf32>
      %610 = vector.shape_cast %609 : vector<1x4x32xf32> to vector<4x32xf32>
      %611 = vector.shape_cast %608 : vector<4x32xf32> to vector<1x4x32xf32>
      tpu.vector_store %arg23[%c0_285, %c40_286, %c0_287], %611 {strides = array<i32>} : memref<2x48x32xf32, #tpu.memory_space<vmem>>, vector<1x4x32xf32>,
      %c1_288 = arith.constant 1 : index
      %c40_289 = arith.constant 40 : index
      %c0_290 = arith.constant 0 : index
      %612 = vector.load %arg23[%c1_288, %c40_289, %c0_290] : memref<2x48x32xf32, #tpu.memory_space<vmem>>, vector<1x4x32xf32>
      %613 = vector.shape_cast %612 : vector<1x4x32xf32> to vector<4x32xf32>
      %614 = arith.select %579, %605, %613 : vector<4x32xf32>
      %c1_291 = arith.constant 1 : index
      %c40_292 = arith.constant 40 : index
      %c0_293 = arith.constant 0 : index
      %615 = vector.load %arg23[%c1_291, %c40_292, %c0_293] : memref<2x48x32xf32, #tpu.memory_space<vmem>>, vector<1x4x32xf32>
      %616 = vector.shape_cast %615 : vector<1x4x32xf32> to vector<4x32xf32>
      %617 = vector.shape_cast %614 : vector<4x32xf32> to vector<1x4x32xf32>
      tpu.vector_store %arg23[%c1_291, %c40_292, %c0_293], %617 {strides = array<i32>} : memref<2x48x32xf32, #tpu.memory_space<vmem>>, vector<1x4x32xf32>,
    }
    %c12_i32_49 = arith.constant 12 : i32
    %c0_50 = arith.constant 0 : index
    %c0_51 = arith.constant 0 : index
    %c0_52 = arith.constant 0 : index
    %121 = vector.load %arg23[%c0_50, %c0_51, %c0_52] : memref<2x48x32xf32, #tpu.memory_space<vmem>>, vector<1x1x32xf32>
    %122 = vector.shape_cast %121 : vector<1x1x32xf32> to vector<1x32xf32>
    %c1_53 = arith.constant 1 : index
    %c0_54 = arith.constant 0 : index
    %c0_55 = arith.constant 0 : index
    %123 = vector.load %arg23[%c1_53, %c0_54, %c0_55] : memref<2x48x32xf32, #tpu.memory_space<vmem>>, vector<1x1x32xf32>
    %124 = vector.shape_cast %123 : vector<1x1x32xf32> to vector<1x32xf32>
    %125 = tpu.concatenate %122, %124 in 1 : vector<1x32xf32>, vector<1x32xf32> -> vector<1x64xf32>
    %c0_56 = arith.constant 0 : index
    %c24 = arith.constant 24 : index
    %c0_57 = arith.constant 0 : index
    %126 = vector.load %arg23[%c0_56, %c24, %c0_57] : memref<2x48x32xf32, #tpu.memory_space<vmem>>, vector<1x1x32xf32>
    %127 = vector.shape_cast %126 : vector<1x1x32xf32> to vector<1x32xf32>
    %c1_58 = arith.constant 1 : index
    %c24_59 = arith.constant 24 : index
    %c0_60 = arith.constant 0 : index
    %128 = vector.load %arg23[%c1_58, %c24_59, %c0_60] : memref<2x48x32xf32, #tpu.memory_space<vmem>>, vector<1x1x32xf32>
    %129 = vector.shape_cast %128 : vector<1x1x32xf32> to vector<1x32xf32>
    %130 = tpu.concatenate %127, %129 in 1 : vector<1x32xf32>, vector<1x32xf32> -> vector<1x64xf32>
    %131 = tpu.concatenate %125, %130 in 0 : vector<1x64xf32>, vector<1x64xf32> -> vector<2x64xf32>
    %c0_61 = arith.constant 0 : index
    %c0_62 = arith.constant 0 : index
    %132 = vector.load %arg17[%c0_61, %c0_62] : memref<2x64xf32, #tpu.memory_space<vmem>>, vector<1x64xf32>
    %c1_63 = arith.constant 1 : index
    %c0_64 = arith.constant 0 : index
    %133 = vector.load %arg17[%c1_63, %c0_64] : memref<2x64xf32, #tpu.memory_space<vmem>>, vector<1x64xf32>
    %cst_65 = arith.constant dense<0.000000e+00> : vector<2xf32>
    %134 = vector.multi_reduction <add>, %131, %cst_65 [1] : vector<2x64xf32> to vector<2xf32>
    %135 = vector.shape_cast %134 : vector<2xf32> to vector<2x1xf32>
    %cst_66 = arith.constant 6.400000e+01 : f32
    %136 = vector.broadcast %cst_66 : f32 to vector<2x1xf32>
    %137 = arith.divf %135, %136 : vector<2x1xf32>
    %138 = vector.broadcast %137 : vector<2x1xf32> to vector<2x64xf32>
    %139 = arith.subf %131, %138 : vector<2x64xf32>
    %140 = arith.mulf %139, %139 : vector<2x64xf32>
    %cst_67 = arith.constant dense<0.000000e+00> : vector<2xf32>
    %141 = vector.multi_reduction <add>, %140, %cst_67 [1] : vector<2x64xf32> to vector<2xf32>
    %142 = vector.shape_cast %141 : vector<2xf32> to vector<2x1xf32>
    %cst_68 = arith.constant 6.400000e+01 : f32
    %143 = vector.broadcast %cst_68 : f32 to vector<2x1xf32>
    %144 = arith.divf %142, %143 : vector<2x1xf32>
    %145 = vector.broadcast %137 : vector<2x1xf32> to vector<2x64xf32>
    %146 = arith.subf %131, %145 : vector<2x64xf32>
    %cst_69 = arith.constant 9.99999974E-6 : f32
    %147 = vector.broadcast %cst_69 : f32 to vector<2x1xf32>
    %148 = arith.addf %144, %147 : vector<2x1xf32>
    %149 = math.rsqrt %148 : vector<2x1xf32>
    %150 = vector.broadcast %149 : vector<2x1xf32> to vector<2x64xf32>
    %151 = arith.mulf %146, %150 : vector<2x64xf32>
    %152 = vector.broadcast %132 : vector<1x64xf32> to vector<2x64xf32>
    %153 = arith.mulf %151, %152 : vector<2x64xf32>
    %154 = vector.broadcast %133 : vector<1x64xf32> to vector<2x64xf32>
    %155 = arith.addf %153, %154 : vector<2x64xf32>
    %c0_70 = arith.constant 0 : index
    %c0_71 = arith.constant 0 : index
    %156 = vector.load %arg18[%c0_70, %c0_71] : memref<64x768xf32, #tpu.memory_space<vmem>>, vector<64x768xf32>
    %cst_72 = arith.constant dense<0.000000e+00> : vector<2x768xf32>
    %157 = tpu.matmul %155, %156, %cst_72 {dimension_numbers = #tpu.dot_dimension_numbers<[1], [0], [0], [1], [0, 0, 1, 1], [], []>} : vector<2x64xf32>, vector<64x768xf32>, vector<2x768xf32> -> vector<2x768xf32>
    %c0_73 = arith.constant 0 : index
    %c0_74 = arith.constant 0 : index
    %158 = vector.load %arg19[%c0_73, %c0_74] : memref<1x768xf32, #tpu.memory_space<vmem>>, vector<1x768xf32>
    %159 = vector.broadcast %158 : vector<1x768xf32> to vector<2x768xf32>
    %160 = arith.addf %157, %159 : vector<2x768xf32>
    %cst_75 = arith.constant 0.000000e+00 : f32
    %161 = vector.broadcast %cst_75 : f32 to vector<2x768xf32>
    %162 = arith.maximumf %160, %161 : vector<2x768xf32>
    %c0_76 = arith.constant 0 : index
    %c0_77 = arith.constant 0 : index
    %163 = vector.load %arg20[%c0_76, %c0_77] : memref<768x12xf32, #tpu.memory_space<vmem>>, vector<768x12xf32>
    %cst_78 = arith.constant dense<0.000000e+00> : vector<2x12xf32>
    %164 = tpu.matmul %162, %163, %cst_78 {dimension_numbers = #tpu.dot_dimension_numbers<[1], [0], [0], [1], [0, 0, 1, 1], [], []>} : vector<2x768xf32>, vector<768x12xf32>, vector<2x12xf32> -> vector<2x12xf32>
    %c0_79 = arith.constant 0 : index
    %c0_80 = arith.constant 0 : index
    %165 = vector.load %arg21[%c0_79, %c0_80] : memref<1x12xf32, #tpu.memory_space<vmem>>, vector<1x12xf32>
    %166 = vector.broadcast %165 : vector<1x12xf32> to vector<2x12xf32>
    %167 = arith.addf %164, %166 : vector<2x12xf32>
    %c0_81 = arith.constant 0 : index
    %c0_82 = arith.constant 0 : index
    %168 = vector.load %arg22[%c0_81, %c0_82] : memref<2x12xf32, #tpu.memory_space<vmem>>, vector<2x12xf32>
    tpu.vector_store %arg22[%c0_81, %c0_82], %167 {strides = array<i32>} : memref<2x12xf32, #tpu.memory_space<vmem>>, vector<2x12xf32>,
    return
  }
}

</mosaic_0001>

<bundles_post_ra>
// kernel: forward.1
= control target key start
LH: loop header
LB: loop body
LE: loop exit
PB: predicated region body
PF: predicated region fallthrough
CT: control target
= control target key end

     0   :  { %s7429_s0 = inlined_call_operand.vmem [shape: f32[16,6], index: 0, kind: input, shape index: {}]   ;;  %s7430_s1 = inlined_call_operand.vmem [shape: f32[2,48,32], index: 1, kind: input, shape index: {}]   ;;  %s7431_s2 = inlined_call_operand.vmem [shape: f32[2,2,1,24], index: 2, kind: input, shape index: {}]   ;;  %s7432_s3 = inlined_call_operand.vmem [shape: f32[2,4,32], index: 3, kind: input, shape index: {}]   ;;  %s7433_s4 = inlined_call_operand.vmem [shape: f32[6,32], index: 4, kind: input, shape index: {}]   ;;  %s7434_s5 = inlined_call_operand.vmem [shape: f32[32,32], index: 5, kind: input, shape index: {}]   ;;  %s7435_s6 = inlined_call_operand.vmem [shape: f32[6,32], index: 6, kind: input, shape index: {}]   ;;  %s7436_s7 = inlined_call_operand.vmem [shape: f32[2,12,32,96], index: 7, kind: input, shape index: {}]   ;;  %s7437_s8 = inlined_call_operand.vmem [shape: f32[2,12,1,96], index: 8, kind: input, shape index: {}]   ;;  %s7438_s9 = inlined_call_operand.vmem [shape: f32[2,12,32,32], index: 9, kind: input, shape index: {}]   ;;  %s7439_s10 = inlined_call_operand.vmem [shape: f32[2,12,1,32], index: 10, kind: input, shape index: {}]   ;;  %s7440_s11 = inlined_call_operand.vmem [shape: f32[2,12,2,32], index: 11, kind: input, shape index: {}]   ;;  %s7441_s12 = inlined_call_operand.vmem [shape: f32[2,12,32,128], index: 12, kind: input, shape index: {}]   ;;  %s7442_s13 = inlined_call_operand.vmem [shape: f32[2,12,1,128], index: 13, kind: input, shape index: {}]   ;;  %s7443_s14 = inlined_call_operand.vmem [shape: f32[2,12,128,32], index: 14, kind: input, shape index: {}]   ;;  %s7444_s15 = inlined_call_operand.vmem [shape: f32[2,12,1,32], index: 15, kind: input, shape index: {}]   ;;  %s7445_s16 = inlined_call_operand.vmem [shape: f32[2,12,2,32], index: 16, kind: input, shape index: {}]   ;;  %s7446_s17 = inlined_call_operand.vmem [shape: f32[2,64], index: 17, kind: input, shape index: {}]   ;;  %s7447_s18 = inlined_call_operand.vmem [shape: f32[64,768], index: 18, kind: input, shape index: {}]   ;;  %s7448_s19 = inlined_call_operand.vmem [shape: f32[1,768], index: 19, kind: input, shape index: {}]   ;;  %s7449_s20 = inlined_call_operand.vmem [shape: f32[768,12], index: 20, kind: input, shape index: {}]   ;;  %s7450_s21 = inlined_call_operand.vmem [shape: f32[1,12], index: 21, kind: input, shape index: {}]   ;;  %s7451_s22 = inlined_call_operand.hbm [shape: f32[2,12], index: 22, kind: output, shape index: {}]  }
   0x1   :  { %7460 = sst [smem:[#allocation10_spill]] %s7429_s0 }
   0x2   :  { %7461 = sst [smem:[#allocation11_spill]] %s7430_s1 }
   0x3   :  { %7462 = sst [smem:[#allocation12_spill]] %s7431_s2 }
   0x4   :  { %7463 = sst [smem:[#allocation13_spill]] %s7432_s3 }
   0x5   :  { %7464 = sst [smem:[#allocation14_spill]] %s7433_s4 }
   0x6   :  { %7465 = sst [smem:[#allocation15_spill]] %s7434_s5 }
   0x7   :  { %7466 = sst [smem:[#allocation16_spill]] %s7435_s6 }
   0x8   :  { %s7467_s29 = sld [smem:[#allocation14_spill]]  ;;  %vm84_vm0 = vcmask 1045504   ;;  %vm77_vm1 = vcmask 48128  }
   0x9   :  { %s7468_s0 = sld [smem:[#allocation10_spill]] }
   0xe   :  { %v74_v0 = vld [vmem:[%s7467_s29] sm:$0x3f] }
   0xf   :  { %v73_v1 = vld [vmem:[%s7468_s0 + $0x8] sm:$0xff]  ;;  %v72_v2 = vld [vmem:[%s7468_s0] sm:$0xff]  ;;  %4396 = vmatpush.msk.msra.mxu3 %vm84_vm0, %v74_v0 }
  0x10   :  { %27 = vsyncpa [#allocation4], 0  ;;  %4183 = vmatpush.msk.msra.mxu0 %vm84_vm0, %v74_v0  ;;  %4185 = vmatmul.msk.f32.vlgmr.msra.gmra.mxu3 %vm77_vm1, %v73_v1  ;;  %vm113_vm2 = vcmask 261120   ;;  %s7469_s6 = sld [smem:[#allocation11_spill]]  ;;  %v4763_v18 = vmov 32.0   ;;  %s5008_s27 = smov 0  }
  0x11   :  { %4184 = vmatmul.msk.f32.vlgmr.msra.gmra.mxu0 %vm77_vm1, %v72_v2  ;;  %s7470_s2 = sld [smem:[#allocation16_spill]]  ;;  %4422 = vrcp.f32 %v4763_v18 }
  0x12   :  { %s7471_s28 = sld [smem:[#allocation15_spill]] }
  0x16   :  { %v264_v3 = vld [vmem:[%s7469_s6 + $0x10] sm:$0xff]  ;;  %v267_v4 = vld [vmem:[%s7469_s6 + $0x28] sm:$0xff]  ;;  %v4189_v6 = vld [vmem:[%s7469_s6 + $0x38] sm:$0xff] }
  0x17   :  { %v4188_v5 = vld [vmem:[%s7469_s6 + $0x30] sm:$0xff]  ;;  %287 = vst.msk [vmem:[#allocation2 + $0x10] sm:$0xff] %vm113_vm2, %v264_v3  ;;  %v4190_v7 = vld [vmem:[%s7469_s6 + $0x40] sm:$0xff]  ;;  %v4191_v8 = vld [vmem:[%s7469_s6 + $0x48] sm:$0xff]  ;;  %v4423_v19 = vpop.eup %4422 }
  0x18   :  { %290 = vst.msk [vmem:[#allocation2 + $0x28] sm:$0xff] %vm113_vm2, %v267_v4  ;;  %v4192_v9 = vld [vmem:[%s7469_s6 + $0x50] sm:$0xff]  ;;  %v4193_v10 = vld [vmem:[%s7469_s6 + $0x58] sm:$0xff]  ;;  %v4416_v11 = vld [vmem:[%s7470_s2] ss:$0 sm:$0xff]  ;;  %v121_v20 = vmul.f32 32.0, %v4423_v19  ;;  %vm125_vm3 = vweird.f32 %v4423_v19 }
  0x19   :  { %299 = vst.msk [vmem:[#allocation2 + $0x30] sm:$0xff] %vm113_vm2, %v4188_v5  ;;  %v176_v35 = vld [vmem:[%s7471_s28 + $0x18] sm:$0xff]  ;;  %v175_v36 = vld [vmem:[%s7471_s28 + $0x10] sm:$0xff]  ;;  %v174_v37 = vld [vmem:[%s7471_s28 + $0x8] sm:$0xff] }
  0x1a   :  { %300 = vst.msk [vmem:[#allocation2 + $0x38] sm:$0xff] %vm113_vm2, %v4189_v6  ;;  %v122_v21 = vsub.f32 1.0, %v121_v20  ;;  %4397 = vmatpush.msra.mxu2 %v176_v35  ;;  %197 = vmatpush.msra.mxu1 %v176_v35  ;;  %v173_v38 = vld [vmem:[%s7471_s28] sm:$0xff] }
  0x1b   :  { %301 = vst.msk [vmem:[#allocation2 + $0x40] sm:$0xff] %vm113_vm2, %v4190_v7  ;;  %v4417_v53 = vld [vmem:[%s7470_s2 + $0x1] ss:$0 sm:$0xff]  ;;  %v4418_v57 = vld [vmem:[%s7470_s2 + $0x2] ss:$0 sm:$0xff] }
  0x1c   :  { %302 = vst.msk [vmem:[#allocation2 + $0x48] sm:$0xff] %vm113_vm2, %v4191_v8  ;;  %v123_v22 = vmul.f32 %v4423_v19, %v122_v21  ;;  %4398 = vmatpush.msra.mxu2 %v175_v36  ;;  %198 = vmatpush.msra.mxu1 %v175_v36  ;;  %v4419_v5 = vld [vmem:[%s7470_s2 + $0x3] ss:$0 sm:$0xff] }
  0x1d   :  { %303 = vst.msk [vmem:[#allocation2 + $0x50] sm:$0xff] %vm113_vm2, %v4192_v9 }
  0x1e   :  { %304 = vst.msk [vmem:[#allocation2 + $0x58] sm:$0xff] %vm113_vm2, %v4193_v10  ;;  %v124_v23 = vadd.f32 %v4423_v19, %v123_v22  ;;  %4399 = vmatpush.msra.mxu2 %v174_v37  ;;  %199 = vmatpush.msra.mxu1 %v174_v37 }
  0x20   :  { %v4931_v24 = vsel %vm125_vm3, %v4423_v19, %v124_v23  ;;  %4400 = vmatpush.msra.mxu2 %v173_v38  ;;  %200 = vmatpush.msra.mxu1 %v173_v38 }
  0x8e   :  { %v105_v14 = vpop.f32.mrf.mxu0 }
  0x8f   :  { %v106_v16 = vadd.f32 %v4416_v11, %v105_v14 }
  0x91   :  { %v114_v17 = vsel %vm113_vm2, %v106_v16, 0.0 }
  0x93   :  { %v108_v12 = vpop.f32.mrf.mxu3 }
  0x94   :  { %v109_v13 = vadd.f32 %v4416_v11, %v108_v12 }
  0x96   :  { %v117_v15 = vsel %vm113_vm2, %v109_v13, 0.0 }
  0x97   :  { %118 = vadd.xlane.f32.xlu0 %v117_v15 }
  0x9f   :  { %115 = vadd.xlane.f32.xlu0 %v114_v17 }
 0x10a   :  { %v119_v25 = vpop.xlane.xlu0 %118 }
 0x10b   :  { %v128_v26 = vmul.f32 %v4931_v24, %v119_v25 }
 0x10d   :  { %v130_v27 = vsub.f32 %v109_v13, %v128_v26  ;;  %v305_v26 = vlaneseq }
 0x10f   :  { %v132_v28 = vmul.f32 %v130_v27, %v130_v27 }
 0x111   :  { %v136_v29 = vsel %vm113_vm2, %v132_v28, 0.0 }
 0x112   :  { %137 = vadd.xlane.f32.xlu1 %v136_v29  ;;  %v116_v30 = vpop.xlane.xlu0 %115  ;;  %v306_v29 = vand.u32 127, %v305_v26 }
 0x113   :  { %v127_v31 = vmul.f32 %v4931_v24, %v116_v30 }
 0x114   :  { %vm312_vm10 = vcmp.ge.s32.totalorder %v306_v29, 8  ;;  %vm313_vm11 = vcmp.lt.s32.totalorder %v306_v29, 16  ;;  %vm308_vm12 = vcmp.lt.s32.totalorder %v306_v29, 8  ;;  %vm317_vm14 = vcmp.ge.s32.totalorder %v306_v29, 16 }
 0x115   :  { %v129_v32 = vsub.f32 %v106_v16, %v127_v31  ;;  %vm314_vm13 = vmand %vm312_vm10, %vm313_vm11  ;;  %vm318_vm15 = vcmp.lt.s32.totalorder %v306_v29, 24  ;;  %vm322_vm0 = vcmp.ge.s32.totalorder %v306_v29, 24  ;;  %vm323_vm1 = vcmp.lt.s32.totalorder %v306_v29, 32 }
 0x116   :  { %vm319_vm3 = vmand %vm317_vm14, %vm318_vm15 }
 0x117   :  { %v131_v33 = vmul.f32 %v129_v32, %v129_v32 }
 0x119   :  { %v133_v34 = vsel %vm113_vm2, %v131_v33, 0.0  ;;  %v4764_v33 = vmov 0.0  }
 0x11a   :  { %134 = vadd.xlane.f32.xlu1 %v133_v34  ;;  %v4970_v34 = vsel %vm308_vm12, 1.0, %v4764_v33  ;;  %v4972_v35 = vsel %vm314_vm13, 1.0, %v4764_v33  ;;  %v4975_v38 = vsel %vm319_vm3, 1.0, %v4764_v33  ;;  %vm274_vm13 = vcmask 1040384  }
 0x185   :  { %v138_v39 = vpop.xlane.xlu1 %137 }
 0x186   :  { %v140_v40 = vmul.f32 %v138_v39, %v4931_v24 }
 0x188   :  { %v142_v41 = vadd.f32 1e-05, %v140_v40 }
 0x18a   :  { %4424 = vrsqrt.f32 %v142_v41  ;;  %vm159_vm5 = vweird.f32 %v142_v41 }
 0x18d   :  { %v135_v42 = vpop.xlane.xlu1 %134 }
 0x18e   :  { %v139_v43 = vmul.f32 %v135_v42, %v4931_v24 }
 0x190   :  { %v4425_v44 = vpop.eup %4424  ;;  %v141_v45 = vadd.f32 1e-05, %v139_v43 }
 0x191   :  { %v154_v46 = vmul.f32 %v4425_v44, %v142_v41  ;;  %vm160_vm4 = vweird.f32 %v4425_v44 }
 0x192   :  { %4426 = vrsqrt.f32 %v141_v45  ;;  %vm161_vm6 = vmor %vm159_vm5, %vm160_vm4  ;;  %vm149_vm8 = vweird.f32 %v141_v45  ;;  %vm327_vm4 = vcmp.lt.s32.totalorder %v306_v29, 20 }
 0x193   :  { %v155_v47 = vmul.f32 %v4425_v44, %v154_v46  ;;  %vm324_vm5 = vmand %vm322_vm0, %vm323_vm1 }
 0x194   :  { %v4977_v39 = vsel %vm324_vm5, 1.0, %v4764_v33 }
 0x195   :  { %v156_v48 = vmul.f32 0.5, %v155_v47 }
 0x197   :  { %v157_v49 = vsub.f32 1.5, %v156_v48  ;;  %v4421_v48 = vld [vmem:[%s7470_s2 + $0x5] ss:$0 sm:$0xff] }
 0x198   :  { %v4427_v50 = vpop.eup %4426 }
 0x199   :  { %v158_v51 = vmul.f32 %v4425_v44, %v157_v49  ;;  %v144_v52 = vmul.f32 %v4427_v50, %v141_v45  ;;  %vm150_vm7 = vweird.f32 %v4427_v50  ;;  %v4420_v45 = vld [vmem:[%s7470_s2 + $0x4] ss:$0 sm:$0xff] }
 0x19a   :  { %vm151_vm9 = vmor %vm149_vm8, %vm150_vm7 }
 0x19b   :  { %v162_v54 = vsel %vm161_vm6, %v4425_v44, %v158_v51  ;;  %v145_v55 = vmul.f32 %v4427_v50, %v144_v52  ;;  %vm328_vm6 = vmand %vm317_vm14, %vm327_vm4 }
 0x19c   :  { %v164_v56 = vmul.f32 %v162_v54, %v130_v27  ;;  %v4980_v41 = vsel %vm328_vm6, -1e+09, %v4764_v33 }
 0x19d   :  { %v146_v58 = vmul.f32 0.5, %v145_v55  ;;  %7472 = vst [vmem:[#allocation6_spill] sm:$0xff] %v4980_v41 }
 0x19e   :  { %v167_v59 = vmul.f32 %v4417_v53, %v164_v56 }
 0x19f   :  { %v147_v60 = vsub.f32 1.5, %v146_v58  ;;  %v263_v58 = vld [vmem:[%s7469_s6 + $0x8] sm:$0xff] }
 0x1a0   :  { %v170_v61 = vadd.f32 %v4418_v57, %v167_v59 }
 0x1a1   :  { %v148_v62 = vmul.f32 %v4427_v50, %v147_v60 }
 0x1a2   :  { %v172_v63 = vmax.f32 %v170_v61, 0.0 }
 0x1a3   :  { %v152_v0 = vsel %vm151_vm9, %v4427_v50, %v148_v62 }
 0x1a4   :  { %4187 = vmatmul.msk.f32.vlgmr.msra.gmra.mxu2 %vm113_vm2, %v172_v63  ;;  %v163_v1 = vmul.f32 %v152_v0, %v129_v32 }
 0x1a6   :  { %v166_v2 = vmul.f32 %v4417_v53, %v163_v1 }
 0x1a8   :  { %v169_v3 = vadd.f32 %v4418_v57, %v166_v2  ;;  %v262_v57 = vld [vmem:[%s7469_s6] sm:$0xff] }
 0x1aa   :  { %v171_v4 = vmax.f32 %v169_v3, 0.0 }
 0x1ac   :  { %4186 = vmatmul.msk.f32.vlgmr.msra.gmra.mxu1 %vm113_vm2, %v171_v4  ;;  %v265_v4 = vld [vmem:[%s7469_s6 + $0x18] sm:$0xff] }
 0x227   :  { %v205_v9 = vpop.f32.mrf.mxu2 }
 0x228   :  { %v206_v10 = vadd.f32 %v4419_v5, %v205_v9 }
 0x229   :  { %v202_v6 = vpop.f32.mrf.mxu1 }
 0x22a   :  { %v203_v7 = vadd.f32 %v4419_v5, %v202_v6  ;;  %v213_v11 = vsel %vm113_vm2, %v206_v10, 0.0  ;;  %v266_v5 = vld [vmem:[%s7469_s6 + $0x20] sm:$0xff] }
 0x22c   :  { %v210_v8 = vsel %vm113_vm2, %v203_v7, 0.0 }
 0x22d   :  { %211 = vadd.xlane.f32.xlu2 %v210_v8 }
 0x235   :  { %214 = vadd.xlane.f32.xlu2 %v213_v11 }
 0x2a0   :  { %v212_v12 = vpop.xlane.xlu2 %211 }
 0x2a1   :  { %v216_v13 = vmul.f32 %v212_v12, %v4931_v24 }
 0x2a3   :  { %v218_v14 = vsub.f32 %v203_v7, %v216_v13 }
 0x2a5   :  { %v220_v15 = vmul.f32 %v218_v14, %v218_v14 }
 0x2a7   :  { %v222_v16 = vsel %vm113_vm2, %v220_v15, 0.0 }
 0x2a8   :  { %223 = vadd.xlane.f32.xlu0 %v222_v16  ;;  %v215_v17 = vpop.xlane.xlu2 %214 }
 0x2a9   :  { %v217_v18 = vmul.f32 %v215_v17, %v4931_v24 }
 0x2ab   :  { %v219_v19 = vsub.f32 %v206_v10, %v217_v18 }
 0x2ad   :  { %v221_v20 = vmul.f32 %v219_v19, %v219_v19 }
 0x2af   :  { %v225_v21 = vsel %vm113_vm2, %v221_v20, 0.0 }
 0x2b0   :  { %226 = vadd.xlane.f32.xlu1 %v225_v21 }
 0x31b   :  { %v224_v22 = vpop.xlane.xlu0 %223 }
 0x31c   :  { %v228_v23 = vmul.f32 %v224_v22, %v4931_v24 }
 0x31e   :  { %v230_v25 = vadd.f32 1e-05, %v228_v23 }
 0x320   :  { %4428 = vrsqrt.f32 %v230_v25  ;;  %vm238_vm8 = vweird.f32 %v230_v25 }
 0x323   :  { %v227_v27 = vpop.xlane.xlu1 %226 }
 0x324   :  { %v229_v28 = vmul.f32 %v227_v27, %v4931_v24 }
 0x326   :  { %v4429_v30 = vpop.eup %4428  ;;  %v231_v31 = vadd.f32 1e-05, %v229_v28 }
 0x327   :  { %v233_v32 = vmul.f32 %v4429_v30, %v230_v25  ;;  %vm239_vm7 = vweird.f32 %v4429_v30 }
 0x328   :  { %4430 = vrsqrt.f32 %v231_v31  ;;  %vm240_vm9 = vmor %vm238_vm8, %vm239_vm7  ;;  %vm248_vm11 = vweird.f32 %v231_v31 }
 0x329   :  { %v234_v36 = vmul.f32 %v4429_v30, %v233_v32 }
 0x32b   :  { %v235_v37 = vmul.f32 0.5, %v234_v36 }
 0x32d   :  { %v236_v40 = vsub.f32 1.5, %v235_v37 }
 0x32e   :  { %v4431_v42 = vpop.eup %4430 }
 0x32f   :  { %v237_v43 = vmul.f32 %v4429_v30, %v236_v40  ;;  %v243_v44 = vmul.f32 %v4431_v42, %v231_v31  ;;  %vm249_vm10 = vweird.f32 %v4431_v42 }
 0x330   :  { %vm250_vm12 = vmor %vm248_vm11, %vm249_vm10 }
 0x331   :  { %v241_v46 = vsel %vm240_vm9, %v4429_v30, %v237_v43  ;;  %v244_v47 = vmul.f32 %v4431_v42, %v243_v44 }
 0x332   :  { %v252_v49 = vmul.f32 %v241_v46, %v218_v14 }
 0x333   :  { %v245_v50 = vmul.f32 0.5, %v244_v47 }
 0x334   :  { %v255_v51 = vmul.f32 %v4420_v45, %v252_v49 }
 0x335   :  { %v246_v52 = vsub.f32 1.5, %v245_v50 }
 0x336   :  { %v258_v53 = vadd.f32 %v4421_v48, %v255_v51 }
 0x337   :  { %v247_v54 = vmul.f32 %v4431_v42, %v246_v52 }
 0x338   :  { %v260_v55 = vmax.f32 %v258_v53, 0.0 }
 0x339   :  { %v251_v56 = vsel %vm250_vm12, %v4431_v42, %v247_v54 }
 0x33a   :  { %v269_v59 = vrot.slane %v260_v55, 7  ;;  %v253_v60 = vmul.f32 %v251_v56, %v219_v19 }
 0x33c   :  { %v275_v61 = vsel %vm274_vm13, 0.0, %v269_v59  ;;  %v276_v62 = vsel %vm274_vm13, %v269_v59, 0.0  ;;  %v256_v63 = vmul.f32 %v4420_v45, %v253_v60 }
 0x33d   :  { %v279_v0 = vadd.f32 %v275_v61, %v262_v57  ;;  %v280_v1 = vadd.f32 %v276_v62, %v263_v58 }
 0x33e   :  { %v259_v2 = vadd.f32 %v4421_v48, %v256_v63 }
 0x33f   :  { %285 = vst.msk [vmem:[#allocation2] sm:$0xff] %vm113_vm2, %v279_v0 }
 0x340   :  { %286 = vst.msk [vmem:[#allocation2 + $0x8] sm:$0xff] %vm113_vm2, %v280_v1  ;;  %v261_v3 = vmax.f32 %v259_v2, 0.0 }
 0x342   :  { %v272_v6 = vrot.slane %v261_v3, 7 }
 0x344   :  { %v277_v7 = vsel %vm274_vm13, 0.0, %v272_v6  ;;  %v278_v8 = vsel %vm274_vm13, %v272_v6, 0.0 }
 0x345   :  { %v282_v9 = vadd.f32 %v277_v7, %v265_v4  ;;  %v283_v10 = vadd.f32 %v278_v8, %v266_v5 }
 0x347   :  { %288 = vst.msk [vmem:[#allocation2 + $0x18] sm:$0xff] %vm113_vm2, %v282_v9 }
 0x348   :  { %289 = vst.msk [vmem:[#allocation2 + $0x20] sm:$0xff] %vm113_vm2, %v283_v10 }
 0x349 LB: > { %s5014_s6 = sshll.u32 %s4761_s27, 5  ;;  %p337_p0 = scmp.eq.s32.totalorder %s4761_s27, 6  ;;  %v336_v14 = vld [vmem:[#allocation2 + $0x10] sm:$0xf]  ;;  %v410_v17 = vld [vmem:[#allocation2] sm:$0xff]  ;;  %vm343_vm14 = vcmask 257024   ;;  %s4761_s27 = sphi %s5008_s27, %s335_s27  }
 0x34a   : > { %s5020_s29 = scalar_lea.vmem %s7436_s7, %s5014_s6  ;;  %s5030_s0 = scalar_lea.vmem %s7437_s8, %s4761_s27  ;;  %v345_v20 = vld [vmem:[#allocation2 + $0x28] sm:$0xf]  ;;  %vm593_vm1 = vcmask 195584  }
 0x34b   : > { %v368_v11 = vld [vmem:[%s5020_s29 + $0x18] sm:$0xff]  ;;  %v367_v12 = vld [vmem:[%s5020_s29 + $0x10] sm:$0xff]  ;;  %v366_v13 = vld [vmem:[%s5020_s29 + $0x8] sm:$0xff]  ;;  %s339_s23 = scalar_select %p337_p0, 1, 0 }
 0x34c   : > { %449 = vmatpush.msra.mxu0 %v368_v11  ;;  %v365_v15 = vld [vmem:[%s5020_s29] sm:$0xff]  ;;  %s7473_s2 = sld [smem:[#allocation13_spill]]  ;;  %v411_v25 = vld [vmem:[#allocation2 + $0x8] sm:$0xff]  ;;  %s4765_s26 = smov 96  }
 0x34d   : > { %v340_v18 = vstv %s339_s23  ;;  %v4462_v30 = vld [vmem:[%s5030_s0] ss:$0 sm:$0xff]  ;;  %p358_p1 = scmp.lt.s32.totalorder %s4761_s27, 6  ;;  %v7476_v41 = vld [vmem:[#allocation6_spill] sm:$0xff]  ;;  %s7477_s4 = sld [smem:[#allocation12_spill]] }
 0x34e   : > { %450 = vmatpush.msra.mxu0 %v367_v12  ;;  %vm5036_vm15 = vcmp.eq.s32.totalorder %v340_v18, 1  ;;  %v413_v27 = vld [vmem:[#allocation2 + $0x18] sm:$0xff]  ;;  %s4766_s5 = smov 64   ;;  %s5676_s23 = scalar_lea.vmem %s7439_s10, %s4761_s27 }
 0x34f   : > { %v414_v28 = vld [vmem:[#allocation2 + $0x20] sm:$0xff]  ;;  %s359_s3 = scalar_select %p358_p1, 1, 0 }
 0x350   : > { %451 = vmatpush.msra.mxu0 %v366_v13  ;;  %s5797_s30 = scalar_lea.vmem %s7441_s12, %s5014_s6  ;;  %s5838_s28 = scalar_lea.vmem %s7442_s13, %s4761_s27 }
 0x351   : > { %s5928_s1 = scalar_lea.vmem %s7444_s15, %s4761_s27  ;;  %p3630_p2 = scmp.ge.s32.totalorder %s4761_s27, 6 }
 0x352   : > { %v338_v16 = vld [vmem:[%s7473_s2] sm:$0xf]  ;;  %v4198_v21 = vld [vmem:[%s7473_s2 + $0x4] sm:$0xf]  ;;  %452 = vmatpush.msra.mxu0 %v365_v15 }
 0x353   : > { %v342_v22 = vsel %vm5036_vm15, %v338_v16, %v336_v14  ;;  %v348_v23 = vsel %vm5036_vm15, %v4198_v21, %v345_v20  ;;  %4203 = vmatmul.msk.f32.vlgmr.msra.gmra.mxu0 %vm113_vm2, %v410_v17  ;;  %v360_v17 = vstv %s359_s3  ;;  %v472_v20 = vld [vmem:[%s7477_s4] sm:$0x1]  ;;  %s5658_s3 = scalar_lea.vmem %s7438_s9, %s5014_s6  ;;  %s4201_s6 = sshll.u32 %s4761_s27, 1 }
 0x354   : > { %344 = vst.msk [vmem:[#allocation2 + $0x10] sm:$0xf] %vm343_vm14, %v342_v22  ;;  %vm361_vm0 = vcmp.eq.s32.totalorder %v360_v17, 1 }
 0x355   : > { %349 = vst.msk [vmem:[#allocation2 + $0x28] sm:$0xf] %vm343_vm14, %v348_v23  ;;  %v5166_v18 = vsel %vm361_vm0, %v7476_v41, 0.0 }
 0x356   : > { %v473_v21 = vadd.f32 %v472_v20, %v5166_v18 }
 0x358   : > { %v5172_v22 = vperm.slane %v473_v21, 0 }
 0x35b   : > { %4204 = vmatmul.msk.f32.gmra.mxu0 %vm113_vm2, %v411_v25  ;;  %v412_v26 = vld [vmem:[#allocation2 + $0x10] sm:$0xff] }
 0x35c   : > { %v415_v29 = vld [vmem:[#allocation2 + $0x28] sm:$0xff] }
 0x363   : > { %4205 = vmatmul.msk.f32.gmra.mxu0 %vm113_vm2, %v412_v26 }
 0x36b   : > { %4206 = vmatmul.msk.f32.gmra.mxu0 %vm113_vm2, %v413_v27 }
 0x373   : > { %4207 = vmatmul.msk.f32.gmra.mxu0 %vm113_vm2, %v414_v28 }
 0x37b   : > { %4208 = vmatmul.msk.f32.gmra.mxu0 %vm113_vm2, %v415_v29 }
 0x3d0   : > { %v454_v31 = vpop.f32.mrf.mxu0 }
 0x3d1   : > { %v5056_v32 = vadd.f32 %v4462_v30, %v454_v31 }
 0x3d3   : > { %492 = vrot.lane.b32.xlu1 %v5056_v32, %s4765_s26  ;;  %v474_v54 = vmul.f32 %v4970_v34, %v5056_v32  ;;  %v477_v61 = vmul.f32 %v4972_v35, %v5056_v32  ;;  %v480_v3 = vmul.f32 %v4975_v38, %v5056_v32  ;;  %v483_v9 = vmul.f32 %v4977_v39, %v5056_v32 }
 0x3d8   : > { %v457_v33 = vpop.f32.mrf.mxu0 }
 0x3d9   : > { %v5062_v40 = vadd.f32 %v4462_v30, %v457_v33 }
 0x3db   : > { %v475_v56 = vmul.f32 %v4970_v34, %v5062_v40  ;;  %v478_v63 = vmul.f32 %v4972_v35, %v5062_v40  ;;  %v481_v5 = vmul.f32 %v4975_v38, %v5062_v40  ;;  %v484_v11 = vmul.f32 %v4977_v39, %v5062_v40 }
 0x3e0   : > { %v460_v36 = vpop.f32.mrf.mxu0 }
 0x3e1   : > { %v5060_v37 = vadd.f32 %v4462_v30, %v460_v36 }
 0x3e3   : > { %496 = vrot.lane.b32.xlu0 %v5060_v37, %s4765_s26  ;;  %v4432_v42 = vpack.i.bf16 %v5062_v40, %v5060_v37  ;;  %v476_v59 = vmul.f32 %v4970_v34, %v5060_v37  ;;  %v479_v1 = vmul.f32 %v4972_v35, %v5060_v37  ;;  %v482_v7 = vmul.f32 %v4975_v38, %v5060_v37 }
 0x3e4   : > { %v485_v13 = vmul.f32 %v4977_v39, %v5060_v37 }
 0x3e8   : > { %v463_v43 = vpop.f32.mrf.mxu0 }
 0x3e9   : > { %v5074_v46 = vadd.f32 %v4462_v30, %v463_v43 }
 0x3eb   : > { %494 = vrot.lane.b32.xlu0 %v5062_v40, %s4765_s26  ;;  %v1004_v60 = vmul.f32 %v4970_v34, %v5074_v46  ;;  %v1007_v2 = vmul.f32 %v4972_v35, %v5074_v46  ;;  %v1010_v8 = vmul.f32 %v4975_v38, %v5074_v46  ;;  %v1013_v14 = vmul.f32 %v4977_v39, %v5074_v46 }
 0x3f0   : > { %v466_v44 = vpop.f32.mrf.mxu0 }
 0x3f1   : > { %v5070_v45 = vadd.f32 %v4462_v30, %v466_v44 }
 0x3f3   : > { %1024 = vrot.lane.b32.xlu2 %v5070_v45, %s4765_s26  ;;  %v4442_v50 = vpack.i.bf16 %v5074_v46, %v5070_v45  ;;  %v1005_v62 = vmul.f32 %v4970_v34, %v5070_v45  ;;  %v1008_v4 = vmul.f32 %v4972_v35, %v5070_v45  ;;  %v1011_v10 = vmul.f32 %v4975_v38, %v5070_v45 }
 0x3f4   : > { %v1014_v15 = vmul.f32 %v4977_v39, %v5070_v45 }
 0x3f8   : > { %v469_v47 = vpop.f32.mrf.mxu0 }
 0x3f9   : > { %v5076_v48 = vadd.f32 %v4462_v30, %v469_v47  ;;  %v4236_v30 = vld [vmem:[%s7477_s4 + $0x1] sm:$0x1] }
 0x3fa   : > { %v1003_v36 = vadd.f32 %v4236_v30, %v5166_v18 }
 0x3fb   : > { %1026 = vrot.lane.b32.xlu1 %v5076_v48, %s4765_s26  ;;  %1022 = vrot.lane.b32.xlu2 %v5074_v46, %s4765_s26  ;;  %v4437_v49 = vpack.i.bf16 %v5076_v48, %v5056_v32  ;;  %v1006_v0 = vmul.f32 %v4970_v34, %v5076_v48  ;;  %v1009_v6 = vmul.f32 %v4972_v35, %v5076_v48 }
 0x3fc   : > { %v1012_v12 = vmul.f32 %v4975_v38, %v5076_v48  ;;  %v1015_v16 = vmul.f32 %v4977_v39, %v5076_v48  ;;  %v5193_v44 = vperm.slane %v1003_v36, 0 }
 0x445   : > { %v493_v53 = vpop.permute.xlu1 %492 }
 0x44d   : > { %v1025_v55 = vpop.permute.xlu2 %1024 }
 0x455   : > { %v497_v51 = vpop.permute.xlu0 %496  ;;  %v1023_v58 = vpop.permute.xlu2 %1022 }
 0x456   : > { %4209 = vmatpush.xpose.msk.msra.mxu1 %vm113_vm2, %v497_v51 }
 0x45d   : > { %v495_v52 = vpop.permute.xlu0 %494 }
 0x45e   : > { %4210 = vmatpush.xpose.msk.msra.mxu1 %vm113_vm2, %v495_v52 }
 0x462   : > { %4211 = vmatpush.xpose.msk.msra.mxu1 %vm113_vm2, %v493_v53 }
 0x465   : > { %4212 = vmatmul.msk.f32.vlgmr.msra.gmra.mxu1 %vm113_vm2, %v474_v54 }
 0x46d   : > { %v1027_v57 = vpop.permute.xlu1 %1026  ;;  %4213 = vmatmul.msk.f32.gmra.mxu1 %vm113_vm2, %v475_v56 }
 0x46e   : > { %4237 = vmatpush.xpose.msk.msra.mxu3 %vm113_vm2, %v1027_v57 }
 0x472   : > { %4238 = vmatpush.xpose.msk.msra.mxu3 %vm113_vm2, %v1025_v55 }
 0x475   : > { %4214 = vmatmul.msk.f32.gmra.mxu1 %vm113_vm2, %v476_v59 }
 0x476   : > { %4239 = vmatpush.xpose.msk.msra.mxu3 %vm113_vm2, %v1023_v58 }
 0x479   : > { %4240 = vmatmul.msk.f32.vlgmr.msra.gmra.mxu3 %vm113_vm2, %v1004_v60 }
 0x47d   : > { %4215 = vmatmul.msk.f32.gmra.mxu1 %vm113_vm2, %v477_v61 }
 0x481   : > { %4241 = vmatmul.msk.f32.gmra.mxu3 %vm113_vm2, %v1005_v62 }
 0x485   : > { %4216 = vmatmul.msk.f32.gmra.mxu1 %vm113_vm2, %v478_v63 }
 0x489   : > { %4242 = vmatmul.msk.f32.gmra.mxu3 %vm113_vm2, %v1006_v0 }
 0x48d   : > { %4217 = vmatmul.msk.f32.gmra.mxu1 %vm113_vm2, %v479_v1 }
 0x491   : > { %4243 = vmatmul.msk.f32.gmra.mxu3 %vm113_vm2, %v1007_v2 }
 0x495   : > { %4218 = vmatmul.msk.f32.gmra.mxu1 %vm113_vm2, %v480_v3 }
 0x499   : > { %4244 = vmatmul.msk.f32.gmra.mxu3 %vm113_vm2, %v1008_v4 }
 0x49d   : > { %4219 = vmatmul.msk.f32.gmra.mxu1 %vm113_vm2, %v481_v5 }
 0x4a1   : > { %4245 = vmatmul.msk.f32.gmra.mxu3 %vm113_vm2, %v1009_v6 }
 0x4a5   : > { %4220 = vmatmul.msk.f32.gmra.mxu1 %vm113_vm2, %v482_v7 }
 0x4a9   : > { %4246 = vmatmul.msk.f32.gmra.mxu3 %vm113_vm2, %v1010_v8 }
 0x4ad   : > { %4221 = vmatmul.msk.f32.gmra.mxu1 %vm113_vm2, %v483_v9 }
 0x4b1   : > { %4247 = vmatmul.msk.f32.gmra.mxu3 %vm113_vm2, %v1011_v10 }
 0x4b5   : > { %4222 = vmatmul.msk.f32.gmra.mxu1 %vm113_vm2, %v484_v11 }
 0x4b9   : > { %4248 = vmatmul.msk.f32.gmra.mxu3 %vm113_vm2, %v1012_v12 }
 0x4bd   : > { %4223 = vmatmul.msk.f32.gmra.mxu1 %vm113_vm2, %v485_v13 }
 0x4c1   : > { %4249 = vmatmul.msk.f32.gmra.mxu3 %vm113_vm2, %v1013_v14 }
 0x4c9   : > { %4250 = vmatmul.msk.f32.gmra.mxu3 %vm113_vm2, %v1014_v15 }
 0x4d1   : > { %4251 = vmatmul.msk.f32.gmra.mxu3 %vm113_vm2, %v1015_v16 }
 0x4e2   : > { %v557_v23 = vpop.f32.mrf.mxu1 }
 0x4e3   : > { %v5175_v25 = vadd.f32 %v557_v23, %v5172_v22 }
 0x4e5   : > { %v594_v26 = vsel %vm593_vm1, %v5175_v25, -inf }
 0x4e6   : > { %595 = vmax.xlane.f32.xlu0 %v594_v26 }
 0x4ea   : > { %v560_v27 = vpop.f32.mrf.mxu1 }
 0x4eb   : > { %v5180_v28 = vadd.f32 %v560_v27, %v5172_v22 }
 0x4ed   : > { %v597_v29 = vsel %vm593_vm1, %v5180_v28, -inf }
 0x4ee   : > { %598 = vmax.xlane.f32.xlu1 %v597_v29 }
 0x4f2   : > { %v563_v31 = vpop.f32.mrf.mxu1 }
 0x4f3   : > { %v5188_v33 = vadd.f32 %v563_v31, %v5172_v22 }
 0x4f5   : > { %v600_v43 = vsel %vm593_vm1, %v5188_v33, -inf }
 0x4f6   : > { %601 = vmax.xlane.f32.xlu2 %v600_v43 }
 0x4fa   : > { %v566_v47 = vpop.f32.mrf.mxu1 }
 0x4fb   : > { %v5196_v51 = vadd.f32 %v566_v47, %v5172_v22 }
 0x4fc   : > { %v1087_v52 = vpop.f32.mrf.mxu3 }
 0x4fd   : > { %v5199_v53 = vadd.f32 %v1087_v52, %v5193_v44  ;;  %v603_v54 = vsel %vm593_vm1, %v5196_v51, -inf }
 0x4fe   : > { %604 = vmax.xlane.f32.xlu2 %v603_v54 }
 0x4ff   : > { %v1123_v55 = vsel %vm593_vm1, %v5199_v53, -inf }
 0x500   : > { %1124 = vmax.xlane.f32.xlu0 %v1123_v55 }
 0x502   : > { %v569_v56 = vpop.f32.mrf.mxu1 }
 0x503   : > { %v5206_v57 = vadd.f32 %v569_v56, %v5172_v22 }
 0x504   : > { %v1090_v58 = vpop.f32.mrf.mxu3 }
 0x505   : > { %v5209_v59 = vadd.f32 %v1090_v58, %v5193_v44  ;;  %v606_v60 = vsel %vm593_vm1, %v5206_v57, -inf }
 0x506   : > { %607 = vmax.xlane.f32.xlu1 %v606_v60 }
 0x507   : > { %v1126_v61 = vsel %vm593_vm1, %v5209_v59, -inf }
 0x508   : > { %1127 = vmax.xlane.f32.xlu2 %v1126_v61 }
 0x50a   : > { %v572_v62 = vpop.f32.mrf.mxu1 }
 0x50b   : > { %v5216_v63 = vadd.f32 %v572_v62, %v5172_v22 }
 0x50c   : > { %v1093_v0 = vpop.f32.mrf.mxu3 }
 0x50d   : > { %v609_v1 = vsel %vm593_vm1, %v5216_v63, -inf  ;;  %v5262_v21 = vadd.f32 %v1093_v0, %v5193_v44 }
 0x50e   : > { %610 = vmax.xlane.f32.xlu0 %v609_v1 }
 0x50f   : > { %v1129_v26 = vsel %vm593_vm1, %v5262_v21, -inf }
 0x512   : > { %v575_v2 = vpop.f32.mrf.mxu1 }
 0x513   : > { %v5221_v3 = vadd.f32 %v575_v2, %v5172_v22 }
 0x514   : > { %v1096_v4 = vpop.f32.mrf.mxu3 }
 0x515   : > { %v612_v5 = vsel %vm593_vm1, %v5221_v3, -inf  ;;  %v5272_v29 = vadd.f32 %v1096_v4, %v5193_v44 }
 0x516   : > { %613 = vmax.xlane.f32.xlu2 %v612_v5 }
 0x517   : > { %v1132_v43 = vsel %vm593_vm1, %v5272_v29, -inf }
 0x51a   : > { %v578_v6 = vpop.f32.mrf.mxu1 }
 0x51b   : > { %v5226_v7 = vadd.f32 %v578_v6, %v5172_v22 }
 0x51c   : > { %v1099_v8 = vpop.f32.mrf.mxu3 }
 0x51d   : > { %v615_v9 = vsel %vm593_vm1, %v5226_v7, -inf  ;;  %v5282_v52 = vadd.f32 %v1099_v8, %v5193_v44 }
 0x51e   : > { %616 = vmax.xlane.f32.xlu2 %v615_v9 }
 0x51f   : > { %4438 = vrot.lane.b32.xlu1 %v4437_v49, %s4766_s5  ;;  %v1135_v56 = vsel %vm593_vm1, %v5282_v52, -inf }
 0x522   : > { %v581_v10 = vpop.f32.mrf.mxu1  ;;  %4433 = vrot.lane.b32.xlu0 %v4432_v42, %s4766_s5 }
 0x523   : > { %v5239_v11 = vadd.f32 %v581_v10, %v5172_v22 }
 0x524   : > { %v1102_v13 = vpop.f32.mrf.mxu3 }
 0x525   : > { %v618_v12 = vsel %vm593_vm1, %v5239_v11, -inf  ;;  %v5244_v14 = vadd.f32 %v1102_v13, %v5193_v44 }
 0x526   : > { %619 = vmax.xlane.f32.xlu2 %v618_v12 }
 0x527   : > { %v1138_v32 = vsel %vm593_vm1, %v5244_v14, -inf }
 0x52a   : > { %v584_v48 = vpop.f32.mrf.mxu1 }
 0x52b   : > { %v5249_v49 = vadd.f32 %v584_v48, %v5172_v22 }
 0x52c   : > { %v1105_v40 = vpop.f32.mrf.mxu3 }
 0x52d   : > { %v621_v37 = vsel %vm593_vm1, %v5249_v49, -inf  ;;  %v5254_v42 = vadd.f32 %v1105_v40, %v5193_v44 }
 0x52e   : > { %1139 = vmax.xlane.f32.xlu2 %v1138_v32 }
 0x52f   : > { %v1141_v15 = vsel %vm593_vm1, %v5254_v42, -inf }
 0x532   : > { %v587_v16 = vpop.f32.mrf.mxu1 }
 0x533   : > { %v5259_v17 = vadd.f32 %v587_v16, %v5172_v22 }
 0x534   : > { %v1108_v20 = vpop.f32.mrf.mxu3 }
 0x535   : > { %v624_v23 = vsel %vm593_vm1, %v5259_v17, -inf  ;;  %v5269_v27 = vadd.f32 %v1108_v20, %v5193_v44 }
 0x536   : > { %622 = vmax.xlane.f32.xlu2 %v621_v37 }
 0x537   : > { %v1144_v31 = vsel %vm593_vm1, %v5269_v27, -inf }
 0x53a   : > { %v590_v36 = vpop.f32.mrf.mxu1 }
 0x53b   : > { %v5279_v47 = vadd.f32 %v590_v36, %v5172_v22 }
 0x53c   : > { %v1111_v30 = vpop.f32.mrf.mxu3 }
 0x53d   : > { %v627_v54 = vsel %vm593_vm1, %v5279_v47, -inf }
 0x53e   : > { %1142 = vmax.xlane.f32.xlu2 %v1141_v15 }
 0x544   : > { %v1114_v55 = vpop.f32.mrf.mxu3 }
 0x545   : > { %v5289_v58 = vadd.f32 %v1114_v55, %v5193_v44 }
 0x546   : > { %625 = vmax.xlane.f32.xlu2 %v624_v23 }
 0x547   : > { %v1150_v62 = vsel %vm593_vm1, %v5289_v58, -inf }
 0x549   : > { %1130 = vmax.xlane.f32.xlu1 %v1129_v26 }
 0x54e   : > { %1145 = vmax.xlane.f32.xlu2 %v1144_v31 }
 0x551   : > { %1133 = vmax.xlane.f32.xlu1 %v1132_v43 }
 0x556   : > { %628 = vmax.xlane.f32.xlu2 %v627_v54 }
 0x559   : > { %v596_v60 = vpop.xlane.xlu0 %595  ;;  %1136 = vmax.xlane.f32.xlu1 %v1135_v56 }
 0x55a   : > { %v630_v22 = vsub.f32 %v5175_v25, %v596_v60 }
 0x55c   : > { %v642_v61 = vmul.f32 1.442695, %v630_v22 }
 0x55e   : > { %4470 = vpow2.f32 %v642_v61  ;;  %1151 = vmax.xlane.f32.xlu2 %v1150_v62 }
 0x561   : > { %v599_v0 = vpop.xlane.xlu1 %598 }
 0x562   : > { %v631_v1 = vsub.f32 %v5180_v28, %v599_v0  ;;  %v5305_v28 = vadd.f32 %v1111_v30, %v5193_v44 }
 0x564   : > { %v5295_v2 = vpop.eup %4470  ;;  %v644_v4 = vmul.f32 1.442695, %v631_v1  ;;  %v1147_v40 = vsel %vm593_vm1, %v5305_v28, -inf }
 0x565   : > { %v666_v5 = vsel %vm593_vm1, %v5295_v2, 0.0 }
 0x566   : > { %4472 = vpow2.f32 %v644_v4  ;;  %667 = vadd.xlane.f32.xlu0 %v666_v5 }
 0x569   : > { %v602_v6 = vpop.xlane.xlu2 %601 }
 0x56a   : > { %v632_v25 = vsub.f32 %v5188_v33, %v602_v6 }
 0x56c   : > { %v5300_v8 = vpop.eup %4472  ;;  %v646_v9 = vmul.f32 1.442695, %v632_v25 }
 0x56d   : > { %v669_v10 = vsel %vm593_vm1, %v5300_v8, 0.0 }
 0x56e   : > { %4474 = vpow2.f32 %v646_v9  ;;  %670 = vadd.xlane.f32.xlu0 %v669_v10 }
 0x571   : > { %v605_v12 = vpop.xlane.xlu2 %604 }
 0x572   : > { %v633_v13 = vsub.f32 %v5196_v51, %v605_v12 }
 0x573   : > { %v1125_v32 = vpop.xlane.xlu0 %1124 }
 0x574   : > { %v5308_v48 = vpop.eup %4474  ;;  %v648_v37 = vmul.f32 1.442695, %v633_v13  ;;  %v1159_v33 = vsub.f32 %v5199_v53, %v1125_v32 }
 0x575   : > { %v672_v15 = vsel %vm593_vm1, %v5308_v48, 0.0 }
 0x576   : > { %4476 = vpow2.f32 %v648_v37  ;;  %v1171_v16 = vmul.f32 1.442695, %v1159_v33  ;;  %1148 = vmax.xlane.f32.xlu0 %v1147_v40  ;;  %673 = vadd.xlane.f32.xlu1 %v672_v15 }
 0x578   : > { %4478 = vpow2.f32 %v1171_v16 }
 0x579   : > { %v608_v20 = vpop.xlane.xlu1 %607 }
 0x57a   : > { %v634_v51 = vsub.f32 %v5206_v57, %v608_v20 }
 0x57b   : > { %v1128_v23 = vpop.xlane.xlu2 %1127 }
 0x57c   : > { %v5316_v26 = vpop.eup %4476  ;;  %v650_v30 = vmul.f32 1.442695, %v634_v51  ;;  %v1160_v53 = vsub.f32 %v5209_v59, %v1128_v23 }
 0x57d   : > { %v675_v31 = vsel %vm593_vm1, %v5316_v26, 0.0 }
 0x57e   : > { %v5321_v36 = vpop.eup %4478  ;;  %4480 = vpow2.f32 %v650_v30  ;;  %v1173_v43 = vmul.f32 1.442695, %v1160_v53  ;;  %676 = vadd.xlane.f32.xlu0 %v675_v31 }
 0x57f   : > { %v1195_v54 = vsel %vm593_vm1, %v5321_v36, 0.0 }
 0x580   : > { %4482 = vpow2.f32 %v1173_v43  ;;  %1196 = vadd.xlane.f32.xlu1 %v1195_v54 }
 0x581   : > { %v611_v57 = vpop.xlane.xlu0 %610 }
 0x582   : > { %v635_v55 = vsub.f32 %v5216_v63, %v611_v57 }
 0x584   : > { %v5326_v56 = vpop.eup %4480  ;;  %v652_v60 = vmul.f32 1.442695, %v635_v55 }
 0x585   : > { %v678_v59 = vsel %vm593_vm1, %v5326_v56, 0.0 }
 0x586   : > { %v5330_v22 = vpop.eup %4482  ;;  %4484 = vpow2.f32 %v652_v60  ;;  %679 = vadd.xlane.f32.xlu2 %v678_v59 }
 0x587   : > { %v1198_v61 = vsel %vm593_vm1, %v5330_v22, 0.0 }
 0x588   : > { %1199 = vadd.xlane.f32.xlu0 %v1198_v61  ;;  %v1117_v61 = vpop.f32.mrf.mxu3 }
 0x589   : > { %v614_v62 = vpop.xlane.xlu2 %613 }
 0x58a   : > { %v636_v0 = vsub.f32 %v5221_v3, %v614_v62 }
 0x58c   : > { %v5335_v1 = vpop.eup %4484  ;;  %v654_v63 = vmul.f32 1.442695, %v636_v0 }
 0x58d   : > { %v681_v4 = vsel %vm593_vm1, %v5335_v1, 0.0 }
 0x58e   : > { %4486 = vpow2.f32 %v654_v63  ;;  %682 = vadd.xlane.f32.xlu2 %v681_v4 }
 0x591   : > { %v4439_v5 = vpop.permute.xlu1 %4438  ;;  %v617_v32 = vpop.xlane.xlu2 %616 }
 0x592   : > { %v4441_v6 = vunpack.i.h.bf16 %v4439_v5  ;;  %v4440_v13 = vunpack.i.l.bf16 %v4439_v5  ;;  %v637_v30 = vsub.f32 %v5226_v7, %v617_v32  ;;  %v5370_v5 = vadd.f32 %v1117_v61, %v5193_v44 }
 0x594   : > { %v5339_v25 = vpop.eup %4486  ;;  %v4434_v9 = vpop.permute.xlu0 %4433  ;;  %1469 = vmatpush.msrb.mxu0 %v4441_v6  ;;  %v656_v46 = vmul.f32 1.442695, %v637_v30 }
 0x595   : > { %v684_v10 = vsel %vm593_vm1, %v5339_v25, 0.0  ;;  %v4435_v12 = vunpack.i.l.bf16 %v4434_v9  ;;  %v4436_v3 = vunpack.i.h.bf16 %v4434_v9 }
 0x596   : > { %685 = vadd.xlane.f32.xlu0 %v684_v10  ;;  %v1153_v10 = vsel %vm593_vm1, %v5370_v5, -inf }
 0x597   : > { %940 = vmatpush.msra.mxu2 %v4435_v12 }
 0x599   : > { %941 = vmatpush.msra.mxu2 %v4436_v3  ;;  %4443 = vrot.lane.b32.xlu1 %v4442_v50, %s4766_s5  ;;  %v620_v37 = vpop.xlane.xlu2 %619  ;;  %v1120_v3 = vpop.f32.mrf.mxu3 }
 0x59a   : > { %v638_v40 = vsub.f32 %v5239_v11, %v620_v37 }
 0x59b   : > { %942 = vmatpush.msra.mxu2 %v4440_v13 }
 0x59c   : > { %v658_v15 = vmul.f32 1.442695, %v638_v40 }
 0x59e   : > { %4488 = vpow2.f32 %v658_v15 }
 0x5a1   : > { %v1140_v33 = vpop.xlane.xlu2 %1139 }
 0x5a4   : > { %v5349_v23 = vpop.eup %4488 }
 0x5a5   : > { %v690_v45 = vsel %vm593_vm1, %v5349_v23, 0.0 }
 0x5a9   : > { %v623_v16 = vpop.xlane.xlu2 %622 }
 0x5b1   : > { %v1143_v50 = vpop.xlane.xlu2 %1142 }
 0x5b9   : > { %v626_v60 = vpop.xlane.xlu2 %625 }
 0x5bc   : > { %v1131_v20 = vpop.xlane.xlu1 %1130 }
 0x5bd   : > { %v1161_v51 = vsub.f32 %v5262_v21, %v1131_v20 }
 0x5bf   : > { %v1175_v53 = vmul.f32 1.442695, %v1161_v51 }
 0x5c1   : > { %4490 = vpow2.f32 %v1175_v53  ;;  %v1146_v9 = vpop.xlane.xlu2 %1145 }
 0x5c2   : > { %4492 = vpow2.f32 %v656_v46  ;;  %v1166_v40 = vsub.f32 %v5269_v27, %v1146_v9 }
 0x5c3   : > { %691 = vadd.xlane.f32.xlu1 %v690_v45 }
 0x5c4   : > { %v1134_v31 = vpop.xlane.xlu1 %1133  ;;  %v1185_v45 = vmul.f32 1.442695, %v1166_v40 }
 0x5c5   : > { %v1162_v11 = vsub.f32 %v5272_v29, %v1134_v31  ;;  %v1164_v29 = vsub.f32 %v5244_v14, %v1140_v33  ;;  %v1165_v14 = vsub.f32 %v5254_v42, %v1143_v50  ;;  %v640_v42 = vsub.f32 %v5259_v17, %v626_v60 }
 0x5c7   : > { %v5355_v43 = vpop.eup %4490  ;;  %v1177_v54 = vmul.f32 1.442695, %v1162_v11  ;;  %v1181_v4 = vmul.f32 1.442695, %v1164_v29  ;;  %v1183_v37 = vmul.f32 1.442695, %v1165_v14 }
 0x5c8   : > { %v1201_v21 = vsel %vm593_vm1, %v5355_v43, 0.0  ;;  %v5359_v57 = vpop.eup %4492 }
 0x5c9   : > { %4494 = vpow2.f32 %v1177_v54  ;;  %1202 = vadd.xlane.f32.xlu2 %v1201_v21  ;;  %v687_v63 = vsel %vm593_vm1, %v5359_v57, 0.0  ;;  %v629_v53 = vpop.xlane.xlu2 %628 }
 0x5ca   : > { %v641_v11 = vsub.f32 %v5279_v47, %v629_v53 }
 0x5cc   : > { %v1137_v7 = vpop.xlane.xlu1 %1136 }
 0x5cd   : > { %v1163_v55 = vsub.f32 %v5282_v52, %v1137_v7  ;;  %v639_v52 = vsub.f32 %v5249_v49, %v623_v16  ;;  %v5381_v49 = vadd.f32 %v1120_v3, %v5193_v44  ;;  %v662_v44 = vmul.f32 1.442695, %v640_v42 }
 0x5cf   : > { %v5362_v59 = vpop.eup %4494  ;;  %v1179_v62 = vmul.f32 1.442695, %v1163_v55  ;;  %v660_v32 = vmul.f32 1.442695, %v639_v52  ;;  %v1156_v16 = vsel %vm593_vm1, %v5381_v49, -inf }
 0x5d0   : > { %v1204_v0 = vsel %vm593_vm1, %v5362_v59, 0.0 }
 0x5d1   : > { %4496 = vpow2.f32 %v1179_v62  ;;  %1205 = vadd.xlane.f32.xlu0 %v1204_v0  ;;  %688 = vadd.xlane.f32.xlu2 %v687_v63  ;;  %v664_v63 = vmul.f32 1.442695, %v641_v11 }
 0x5d2   : > { %4498 = vpow2.f32 %v1181_v4 }
 0x5d7   : > { %v5373_v6 = vpop.eup %4496 }
 0x5d8   : > { %v1207_v12 = vsel %vm593_vm1, %v5373_v6, 0.0  ;;  %v5383_v33 = vpop.eup %4498 }
 0x5d9   : > { %v668_v13 = vpop.xlane.xlu0 %667  ;;  %1154 = vmax.xlane.f32.xlu0 %v1153_v10  ;;  %1208 = vadd.xlane.f32.xlu2 %v1207_v12  ;;  %v1210_v20 = vsel %vm593_vm1, %v5383_v33, 0.0  ;;  %v1152_v10 = vpop.xlane.xlu2 %1151 }
 0x5da   : > { %4500 = vrcp.f32 %v668_v13  ;;  %v713_v31 = vand.u32 2147483648, %v668_v13  ;;  %v711_v54 = vand.u32 2147483647, %v668_v13  ;;  %vm707_vm4 = vweird.f32 %v668_v13 }
 0x5db   : > { %4502 = vpow2.f32 %v660_v32 }
 0x5dc   : > { %4504 = vpow2.f32 %v1183_v37  ;;  %v714_v61 = vor.u32 1.1754944e-38, %v713_v31  ;;  %vm712_vm6 = vcmp.eq.f32.partialorder %v711_v54, 8.507059e+37 }
 0x5e0   : > { %v4501_v15 = vpop.eup %4500 }
 0x5e1   : > { %v703_v51 = vmul.f32 %v4501_v15, %v668_v13  ;;  %v671_v30 = vpop.xlane.xlu0 %670  ;;  %1157 = vmax.xlane.f32.xlu0 %v1156_v16  ;;  %1211 = vadd.xlane.f32.xlu2 %v1210_v20  ;;  %v5391_v17 = vpop.eup %4502  ;;  %vm708_vm3 = vweird.f32 %v4501_v15 }
 0x5e2   : > { %4506 = vrcp.f32 %v671_v30  ;;  %v5393_v50 = vpop.eup %4504  ;;  %v693_v55 = vsel %vm593_vm1, %v5391_v17, 0.0  ;;  %vm709_vm5 = vmor %vm707_vm4, %vm708_vm3  ;;  %v728_v12 = vand.u32 2147483648, %v671_v30  ;;  %v726_v42 = vand.u32 2147483647, %v671_v30 }
 0x5e3   : > { %v704_v46 = vsub.f32 1.0, %v703_v51  ;;  %4508 = vpow2.f32 %v662_v44  ;;  %v1213_v60 = vsel %vm593_vm1, %v5393_v50, 0.0  ;;  %vm722_vm8 = vweird.f32 %v671_v30 }
 0x5e4   : > { %4510 = vpow2.f32 %v1185_v45  ;;  %v729_v16 = vor.u32 1.1754944e-38, %v728_v12  ;;  %vm727_vm10 = vcmp.eq.f32.partialorder %v726_v42, 8.507059e+37 }
 0x5e5   : > { %v705_v27 = vmul.f32 %v4501_v15, %v704_v46 }
 0x5e7   : > { %v706_v21 = vadd.f32 %v4501_v15, %v705_v27 }
 0x5e8   : > { %v4507_v7 = vpop.eup %4506 }
 0x5e9   : > { %v718_v29 = vmul.f32 %v4507_v7, %v671_v30  ;;  %v1149_v62 = vpop.xlane.xlu0 %1148  ;;  %v5400_v0 = vpop.xlane.xlu1 %673  ;;  %694 = vadd.xlane.f32.xlu0 %v693_v55  ;;  %1214 = vadd.xlane.f32.xlu2 %v1213_v60  ;;  %v710_v47 = vsel %vm709_vm5, %v4501_v15, %v706_v21  ;;  %vm723_vm7 = vweird.f32 %v4507_v7 }
 0x5ea   : > { %v1167_v4 = vsub.f32 %v5305_v28, %v1149_v62  ;;  %4512 = vrcp.f32 %v5400_v0  ;;  %v715_v14 = vsel %vm712_vm6, %v714_v61, %v710_v47  ;;  %v5404_v9 = vpop.eup %4508  ;;  %v1168_v28 = vsub.f32 %v5289_v58, %v1152_v10  ;;  %vm724_vm9 = vmor %vm722_vm8, %vm723_vm7 }
 0x5eb   : > { %v719_v52 = vsub.f32 1.0, %v718_v29  ;;  %v716_v13 = vmul.f32 %v5295_v2, %v715_v14  ;;  %v5407_v32 = vpop.eup %4510  ;;  %4514 = vpow2.f32 %v664_v63  ;;  %v696_v20 = vsel %vm593_vm1, %v5404_v9, 0.0 }
 0x5ec   : > { %v1187_v3 = vmul.f32 1.442695, %v1167_v4  ;;  %v1216_v2 = vsel %vm593_vm1, %v5407_v32, 0.0  ;;  %v1189_v30 = vmul.f32 1.442695, %v1168_v28  ;;  %v743_v11 = vand.u32 2147483648, %v5400_v0 }
 0x5ed   : > { %v720_v37 = vmul.f32 %v4507_v7, %v719_v52  ;;  %4224 = vmatmul.msk.f32.vlgmr.msra.gmra.mxu2 %vm593_vm1, %v716_v13  ;;  %vm737_vm12 = vweird.f32 %v5400_v0 }
 0x5ee   : > { %4516 = vpow2.f32 %v1187_v3 }
 0x5ef   : > { %v721_v40 = vadd.f32 %v4507_v7, %v720_v37 }
 0x5f0   : > { %v4513_v15 = vpop.eup %4512 }
 0x5f1   : > { %v733_v51 = vmul.f32 %v4513_v15, %v5400_v0  ;;  %v677_v44 = vpop.xlane.xlu0 %676  ;;  %697 = vadd.xlane.f32.xlu0 %v696_v20  ;;  %1217 = vadd.xlane.f32.xlu2 %v1216_v2  ;;  %v725_v53 = vsel %vm724_vm9, %v4507_v7, %v721_v40  ;;  %v5419_v31 = vpop.eup %4514  ;;  %vm738_vm11 = vweird.f32 %v4513_v15  ;;  %v741_v7 = vand.u32 2147483647, %v5400_v0 }
 0x5f2   : > { %4518 = vrcp.f32 %v677_v44  ;;  %v730_v58 = vsel %vm727_vm10, %v729_v16, %v725_v53  ;;  %v699_v29 = vsel %vm593_vm1, %v5419_v31, 0.0  ;;  %vm739_vm0 = vmor %vm737_vm12, %vm738_vm11  ;;  %v758_v3 = vand.u32 2147483648, %v677_v44 }
 0x5f3   : > { %v734_v45 = vsub.f32 1.0, %v733_v51  ;;  %v5416_v46 = vpop.xlane.xlu1 %1196  ;;  %v731_v27 = vmul.f32 %v5300_v8, %v730_v58  ;;  %v744_v8 = vor.u32 1.1754944e-38, %v743_v11  ;;  %vm742_vm3 = vcmp.eq.f32.partialorder %v741_v7, 8.507059e+37 }
 0x5f4   : > { %4520 = vrcp.f32 %v5416_v46  ;;  %v5423_v54 = vpop.eup %4516  ;;  %v756_v28 = vand.u32 2147483647, %v677_v44  ;;  %vm752_vm5 = vweird.f32 %v677_v44  ;;  %v759_v16 = vor.u32 1.1754944e-38, %v758_v3 }
 0x5f5   : > { %v735_v21 = vmul.f32 %v4513_v15, %v734_v45  ;;  %4225 = vmatmul.msk.f32.gmra.mxu2 %vm593_vm1, %v731_v27  ;;  %4522 = vpow2.f32 %v1189_v30  ;;  %v1219_v61 = vsel %vm593_vm1, %v5423_v54, 0.0  ;;  %vm1236_vm10 = vweird.f32 %v5416_v46 }
 0x5f6   : > { %vm757_vm7 = vcmp.eq.f32.partialorder %v756_v28, 8.507059e+37 }
 0x5f7   : > { %v736_v55 = vadd.f32 %v4513_v15, %v735_v21 }
 0x5f8   : > { %v4519_v60 = vpop.eup %4518 }
 0x5f9   : > { %v748_v62 = vmul.f32 %v4519_v60, %v677_v44  ;;  %1220 = vadd.xlane.f32.xlu2 %v1219_v61  ;;  %700 = vadd.xlane.f32.xlu0 %v699_v29  ;;  %v680_v47 = vpop.xlane.xlu2 %679  ;;  %v740_v63 = vsel %vm739_vm0, %v4513_v15, %v736_v55  ;;  %vm753_vm4 = vweird.f32 %v4519_v60 }
 0x5fa   : > { %v5432_v4 = vpop.eup %4520  ;;  %4524 = vrcp.f32 %v680_v47  ;;  %v745_v0 = vsel %vm742_vm3, %v744_v8, %v740_v63  ;;  %vm754_vm6 = vmor %vm752_vm5, %vm753_vm4  ;;  %v773_v11 = vand.u32 2147483648, %v680_v47  ;;  %v771_v21 = vand.u32 2147483647, %v680_v47 }
 0x5fb   : > { %v749_v52 = vsub.f32 1.0, %v748_v62  ;;  %v1232_v14 = vmul.f32 %v5432_v4, %v5416_v46  ;;  %v5436_v10 = vpop.xlane.xlu0 %1199  ;;  %v746_v12 = vmul.f32 %v5308_v48, %v745_v0  ;;  %v5440_v13 = vpop.eup %4522  ;;  %vm1237_vm8 = vweird.f32 %v5432_v4 }
 0x5fc   : > { %4526 = vrcp.f32 %v5436_v10  ;;  %v1222_v20 = vsel %vm593_vm1, %v5440_v13, 0.0  ;;  %v1242_v8 = vand.u32 2147483648, %v5416_v46  ;;  %vm5459_vm11 = vmor %vm1236_vm10, %vm1237_vm8  ;;  %vm767_vm12 = vweird.f32 %v680_v47 }
 0x5fd   : > { %v750_v37 = vmul.f32 %v4519_v60, %v749_v52  ;;  %v1233_v42 = vsub.f32 1.0, %v1232_v14  ;;  %4226 = vmatmul.msk.f32.gmra.mxu2 %vm593_vm1, %v746_v12  ;;  %v774_v63 = vor.u32 1.1754944e-38, %v773_v11  ;;  %vm772_vm3 = vcmp.eq.f32.partialorder %v771_v21, 8.507059e+37 }
 0x5ff   : > { %v751_v40 = vadd.f32 %v4519_v60, %v750_v37  ;;  %v1234_v48 = vmul.f32 %v5432_v4, %v1233_v42  ;;  %v1243_v37 = vor.u32 1.1754944e-38, %v1242_v8 }
 0x600   : > { %v4525_v15 = vpop.eup %4524 }
 0x601   : > { %v763_v2 = vmul.f32 %v4525_v15, %v680_v47  ;;  %1223 = vadd.xlane.f32.xlu0 %v1222_v20  ;;  %v5446_v51 = vpop.xlane.xlu2 %682  ;;  %v755_v53 = vsel %vm754_vm6, %v4519_v60, %v751_v40  ;;  %v1235_v7 = vadd.f32 %v5432_v4, %v1234_v48  ;;  %vm768_vm9 = vweird.f32 %v4525_v15 }
 0x602   : > { %v5448_v58 = vpop.eup %4526  ;;  %4528 = vrcp.f32 %v5446_v51  ;;  %v760_v44 = vsel %vm757_vm7, %v759_v16, %v755_v53  ;;  %vm769_vm0 = vmor %vm767_vm12, %vm768_vm9  ;;  %v788_v40 = vand.u32 2147483648, %v5446_v51  ;;  %vm1251_vm7 = vweird.f32 %v5436_v10 }
 0x603   : > { %v764_v30 = vsub.f32 1.0, %v763_v2  ;;  %v1247_v45 = vmul.f32 %v5448_v58, %v5436_v10  ;;  %v761_v27 = vmul.f32 %v5316_v26, %v760_v44  ;;  %v1240_v26 = vand.u32 2147483647, %v5416_v46 }
 0x604   : > { %v1239_v3 = vsel %vm5459_vm11, %v5432_v4, %v1235_v7  ;;  %vm1252_vm5 = vweird.f32 %v5448_v58  ;;  %v1257_v2 = vand.u32 2147483648, %v5436_v10  ;;  %vm782_vm8 = vweird.f32 %v5446_v51 }
 0x605   : > { %v765_v55 = vmul.f32 %v4525_v15, %v764_v30  ;;  %v1248_v60 = vsub.f32 1.0, %v1247_v45  ;;  %4227 = vmatmul.msk.f32.gmra.mxu2 %vm593_vm1, %v761_v27  ;;  %vm1241_vm4 = vcmp.eq.f32.partialorder %v1240_v26, 8.507059e+37  ;;  %vm5479_vm9 = vmor %vm1251_vm7, %vm1252_vm5  ;;  %v1255_v45 = vand.u32 2147483647, %v5436_v10 }
 0x606   : > { %v1244_v20 = vsel %vm1241_vm4, %v1243_v37, %v1239_v3  ;;  %v789_v11 = vor.u32 1.1754944e-38, %v788_v40 }
 0x607   : > { %v766_v29 = vadd.f32 %v4525_v15, %v765_v55  ;;  %v1249_v0 = vmul.f32 %v5448_v58, %v1248_v60  ;;  %v1245_v53 = vmul.f32 %v5321_v36, %v1244_v20  ;;  %vm1256_vm12 = vcmp.eq.f32.partialorder %v1255_v45, 8.507059e+37 }
 0x608   : > { %v4529_v62 = vpop.eup %4528 }
 0x609   : > { %v778_v52 = vmul.f32 %v4529_v62, %v5446_v51  ;;  %v686_v14 = vpop.xlane.xlu0 %685  ;;  %v770_v12 = vsel %vm769_vm0, %v4525_v15, %v766_v29  ;;  %vm783_vm6 = vweird.f32 %v4529_v62  ;;  %v786_v15 = vand.u32 2147483647, %v5446_v51 }
 0x60a   : > { %4530 = vrcp.f32 %v686_v14  ;;  %v775_v42 = vsel %vm772_vm3, %v774_v63, %v770_v12  ;;  %v1250_v4 = vadd.f32 %v5448_v58, %v1249_v0  ;;  %vm784_vm10 = vmor %vm782_vm8, %vm783_vm6  ;;  %v1258_v51 = vor.u32 1.1754944e-38, %v1257_v2 }
 0x60b   : > { %v779_v46 = vsub.f32 1.0, %v778_v52  ;;  %v4444_v47 = vpop.permute.xlu1 %4443  ;;  %v776_v28 = vmul.f32 %v5326_v56, %v775_v42  ;;  %vm787_vm11 = vcmp.eq.f32.partialorder %v786_v15, 8.507059e+37  ;;  %v803_v10 = vand.u32 2147483648, %v686_v14 }
 0x60c   : > { %v4445_v16 = vunpack.i.l.bf16 %v4444_v47  ;;  %v4446_v56 = vunpack.i.h.bf16 %v4444_v47  ;;  %v1254_v36 = vsel %vm5479_vm9, %v5448_v58, %v1250_v4  ;;  %v801_v29 = vand.u32 2147483647, %v686_v14 }
 0x60d   : > { %v780_v48 = vmul.f32 %v4529_v62, %v779_v46  ;;  %4228 = vmatmul.msk.f32.gmra.mxu2 %vm593_vm1, %v776_v28  ;;  %v1259_v61 = vsel %vm1256_vm12, %v1258_v51, %v1254_v36  ;;  %vm797_vm3 = vweird.f32 %v686_v14  ;;  %v804_v0 = vor.u32 1.1754944e-38, %v803_v10 }
 0x60e   : > { %1470 = vmatpush.msrb.mxu0 %v4445_v16  ;;  %vm802_vm5 = vcmp.eq.f32.partialorder %v801_v29, 8.507059e+37 }
 0x60f   : > { %v781_v44 = vadd.f32 %v4529_v62, %v780_v48 }
 0x610   : > { %v4531_v27 = vpop.eup %4530  ;;  %1471 = vmatpush.msrb.mxu0 %v4446_v56 }
 0x611   : > { %v793_v21 = vmul.f32 %v4531_v27, %v686_v14  ;;  %4252 = vmatmul.msk.f32.vlgmr.msrb.gmra.mxu0 %vm593_vm1, %v1245_v53  ;;  %v785_v7 = vsel %vm784_vm10, %v4529_v62, %v781_v44  ;;  %vm798_vm0 = vweird.f32 %v4531_v27  ;;  %v1260_v62 = vmul.f32 %v5330_v22, %v1259_v61 }
 0x612   : > { %v790_v55 = vsel %vm787_vm11, %v789_v11, %v785_v7  ;;  %vm799_vm4 = vmor %vm797_vm3, %vm798_vm0 }
 0x613   : > { %v794_v60 = vsub.f32 1.0, %v793_v21  ;;  %v791_v8 = vmul.f32 %v5335_v1, %v790_v55 }
 0x615   : > { %v795_v26 = vmul.f32 %v4531_v27, %v794_v60  ;;  %4229 = vmatmul.msk.f32.gmra.mxu2 %vm593_vm1, %v791_v8 }
 0x617   : > { %v796_v63 = vadd.f32 %v4531_v27, %v795_v26 }
 0x619   : > { %4253 = vmatmul.msk.f32.gmra.mxu0 %vm593_vm1, %v1260_v62  ;;  %v800_v58 = vsel %vm799_vm4, %v4531_v27, %v796_v63 }
 0x61a   : > { %v805_v52 = vsel %vm802_vm5, %v804_v0, %v800_v58 }
 0x61b   : > { %v806_v1 = vmul.f32 %v5339_v25, %v805_v52 }
 0x61d   : > { %4230 = vmatmul.msk.f32.gmra.mxu2 %vm593_vm1, %v806_v1 }
 0x636   : > { %v5495_v12 = vpop.xlane.xlu1 %691 }
 0x637   : > { %vm827_vm10 = vweird.f32 %v5495_v12  ;;  %v833_v60 = vand.u32 2147483648, %v5495_v12  ;;  %v831_v52 = vand.u32 2147483647, %v5495_v12 }
 0x63c   : > { %v1203_v3 = vpop.xlane.xlu2 %1202 }
 0x63d   : > { %4532 = vrcp.f32 %v1203_v3  ;;  %v1272_v40 = vand.u32 2147483648, %v1203_v3  ;;  %v1270_v16 = vand.u32 2147483647, %v1203_v3  ;;  %vm1266_vm7 = vweird.f32 %v1203_v3 }
 0x63e   : > { %4534 = vrcp.f32 %v5495_v12 }
 0x63f   : > { %v1273_v2 = vor.u32 1.1754944e-38, %v1272_v40  ;;  %vm1271_vm9 = vcmp.eq.f32.partialorder %v1270_v16, 8.507059e+37 }
 0x643   : > { %v4533_v14 = vpop.eup %4532 }
 0x644   : > { %v5498_v22 = vpop.eup %4534  ;;  %v1262_v37 = vmul.f32 %v4533_v14, %v1203_v3  ;;  %v1206_v42 = vpop.xlane.xlu0 %1205  ;;  %vm1267_vm6 = vweird.f32 %v4533_v14 }
 0x645   : > { %v5500_v46 = vpop.xlane.xlu2 %688  ;;  %4536 = vrcp.f32 %v1206_v42  ;;  %v823_v25 = vmul.f32 %v5498_v22, %v5495_v12  ;;  %vm1268_vm8 = vmor %vm1266_vm7, %vm1267_vm6  ;;  %v1287_v10 = vand.u32 2147483648, %v1206_v42  ;;  %v1285_v26 = vand.u32 2147483647, %v1206_v42 }
 0x646   : > { %v1263_v47 = vsub.f32 1.0, %v1262_v37  ;;  %4538 = vrcp.f32 %v5500_v46  ;;  %vm1281_vm12 = vweird.f32 %v1206_v42  ;;  %v816_v29 = vand.u32 2147483647, %v5500_v46 }
 0x647   : > { %v824_v15 = vsub.f32 1.0, %v823_v25  ;;  %vm828_vm4 = vweird.f32 %v5498_v22  ;;  %v1288_v1 = vor.u32 1.1754944e-38, %v1287_v10  ;;  %vm812_vm5 = vweird.f32 %v5500_v46 }
 0x648   : > { %v1264_v28 = vmul.f32 %v4533_v14, %v1263_v47  ;;  %vm1286_vm7 = vcmp.eq.f32.partialorder %v1285_v26, 8.507059e+37 }
 0x649   : > { %v825_v7 = vmul.f32 %v5498_v22, %v824_v15 }
 0x64a   : > { %v1265_v20 = vadd.f32 %v4533_v14, %v1264_v28 }
 0x64b   : > { %v4537_v48 = vpop.eup %4536  ;;  %v826_v58 = vadd.f32 %v5498_v22, %v825_v7 }
 0x64c   : > { %v4539_v4 = vpop.eup %4538  ;;  %v1277_v56 = vmul.f32 %v4537_v48, %v1206_v42  ;;  %v1155_v53 = vpop.xlane.xlu0 %1154  ;;  %v1269_v30 = vsel %vm1268_vm8, %v4533_v14, %v1265_v20  ;;  %vm1282_vm11 = vweird.f32 %v4537_v48  ;;  %vm817_vm8 = vcmp.eq.f32.partialorder %v816_v29, 8.507059e+37 }
 0x64d   : > { %v5505_v44 = vpop.xlane.xlu2 %1208  ;;  %v808_v45 = vmul.f32 %v4539_v4, %v5500_v46  ;;  %v1169_v27 = vsub.f32 %v5370_v5, %v1155_v53  ;;  %v1274_v21 = vsel %vm1271_vm9, %v1273_v2, %v1269_v30  ;;  %v818_v5 = vand.u32 2147483648, %v5500_v46  ;;  %vm5517_vm3 = vmor %vm1281_vm12, %vm1282_vm11 }
 0x64e   : > { %4540 = vrcp.f32 %v5505_v44  ;;  %v1278_v11 = vsub.f32 1.0, %v1277_v56  ;;  %v1275_v55 = vmul.f32 %v5355_v43, %v1274_v21  ;;  %vm813_vm0 = vweird.f32 %v4539_v4  ;;  %vm5545_vm11 = vmor %vm827_vm10, %vm828_vm4 }
 0x64f   : > { %v809_v36 = vsub.f32 1.0, %v808_v45  ;;  %v1191_v51 = vmul.f32 1.442695, %v1169_v27  ;;  %v819_v47 = vor.u32 1.1754944e-38, %v818_v5  ;;  %vm814_vm6 = vmor %vm812_vm5, %vm813_vm0  ;;  %v1302_v20 = vand.u32 2147483648, %v5505_v44 }
 0x650   : > { %v1279_v8 = vmul.f32 %v4537_v48, %v1278_v11  ;;  %4254 = vmatmul.msk.f32.gmra.mxu0 %vm593_vm1, %v1275_v55  ;;  %vm1296_vm12 = vweird.f32 %v5505_v44  ;;  %v834_v27 = vor.u32 1.1754944e-38, %v833_v60  ;;  %vm832_vm10 = vcmp.eq.f32.partialorder %v831_v52, 8.507059e+37 }
 0x651   : > { %v810_v61 = vmul.f32 %v4539_v4, %v809_v36  ;;  %4542 = vpow2.f32 %v1191_v51  ;;  %v1303_v11 = vor.u32 1.1754944e-38, %v1302_v20 }
 0x652   : > { %v1280_v62 = vadd.f32 %v4537_v48, %v1279_v8 }
 0x653   : > { %v811_v63 = vadd.f32 %v4539_v4, %v810_v61 }
 0x654   : > { %v4541_v43 = vpop.eup %4540  ;;  %v1158_v14 = vpop.xlane.xlu0 %1157  ;;  %v1284_v42 = vsel %vm5517_vm3, %v4537_v48, %v1280_v62 }
 0x655   : > { %v1292_v3 = vmul.f32 %v4541_v43, %v5505_v44  ;;  %v5526_v37 = vpop.xlane.xlu2 %1211  ;;  %v1170_v25 = vsub.f32 %v5381_v49, %v1158_v14  ;;  %v815_v40 = vsel %vm814_vm6, %v4539_v4, %v811_v63  ;;  %v1289_v46 = vsel %vm1286_vm7, %v1288_v1, %v1284_v42 }
 0x656   : > { %4544 = vrcp.f32 %v5526_v37  ;;  %v820_v2 = vsel %vm817_vm8, %v819_v47, %v815_v40  ;;  %v1290_v48 = vmul.f32 %v5362_v59, %v1289_v46  ;;  %vm1297_vm9 = vweird.f32 %v4541_v43 }
 0x657   : > { %v1293_v28 = vsub.f32 1.0, %v1292_v3  ;;  %v5533_v16 = vpop.eup %4542  ;;  %v1193_v15 = vmul.f32 1.442695, %v1170_v25  ;;  %v821_v49 = vmul.f32 %v5359_v57, %v820_v2  ;;  %v1300_v59 = vand.u32 2147483647, %v5505_v44  ;;  %vm1298_vm0 = vmor %vm1296_vm12, %vm1297_vm9 }
 0x658   : > { %v1225_v53 = vsel %vm593_vm1, %v5533_v16, 0.0  ;;  %4255 = vmatmul.msk.f32.gmra.mxu0 %vm593_vm1, %v1290_v48  ;;  %v830_v57 = vsel %vm5545_vm11, %v5498_v22, %v826_v58  ;;  %v1317_v5 = vand.u32 2147483648, %v5526_v37  ;;  %vm1311_vm5 = vweird.f32 %v5526_v37 }
 0x659   : > { %v1294_v56 = vmul.f32 %v4541_v43, %v1293_v28  ;;  %4546 = vpow2.f32 %v1193_v15  ;;  %1226 = vadd.xlane.f32.xlu2 %v1225_v53  ;;  %4231 = vmatmul.msk.f32.gmra.mxu2 %vm593_vm1, %v821_v49  ;;  %v835_v44 = vsel %vm832_vm10, %v834_v27, %v830_v57  ;;  %vm1301_vm3 = vcmp.eq.f32.partialorder %v1300_v59, 8.507059e+37 }
 0x65a   : > { %v836_v10 = vmul.f32 %v5349_v23, %v835_v44  ;;  %v1315_v29 = vand.u32 2147483647, %v5526_v37  ;;  %v1318_v58 = vor.u32 1.1754944e-38, %v1317_v5 }
 0x65b   : > { %v1295_v30 = vadd.f32 %v4541_v43, %v1294_v56 }
 0x65c   : > { %v4545_v45 = vpop.eup %4544  ;;  %v5556_v21 = vpop.xlane.xlu0 %694  ;;  %vm1316_vm7 = vcmp.eq.f32.partialorder %v1315_v29, 8.507059e+37 }
 0x65d   : > { %v1307_v12 = vmul.f32 %v4545_v45, %v5526_v37  ;;  %v5558_v7 = vpop.xlane.xlu2 %1214  ;;  %v1299_v36 = vsel %vm1298_vm0, %v4541_v43, %v1295_v30  ;;  %4548 = vrcp.f32 %v5556_v21  ;;  %vm1312_vm4 = vweird.f32 %v4545_v45 }
 0x65e   : > { %4550 = vrcp.f32 %v5558_v7  ;;  %v1304_v22 = vsel %vm1301_vm3, %v1303_v11, %v1299_v36  ;;  %vm1313_vm6 = vmor %vm1311_vm5, %vm1312_vm4  ;;  %v848_v42 = vand.u32 2147483648, %v5556_v21  ;;  %v1332_v28 = vand.u32 2147483648, %v5558_v7 }
 0x65f   : > { %v1308_v51 = vsub.f32 1.0, %v1307_v12  ;;  %v5562_v55 = vpop.eup %4546  ;;  %v1305_v60 = vmul.f32 %v5373_v6, %v1304_v22  ;;  %v846_v40 = vand.u32 2147483647, %v5556_v21  ;;  %vm842_vm9 = vweird.f32 %v5556_v21 }
 0x660   : > { %v1228_v61 = vsel %vm593_vm1, %v5562_v55, 0.0  ;;  %v1330_v20 = vand.u32 2147483647, %v5558_v7  ;;  %v849_v56 = vor.u32 1.1754944e-38, %v848_v42  ;;  %vm1326_vm0 = vweird.f32 %v5558_v7 }
 0x661   : > { %v1309_v8 = vmul.f32 %v4545_v45, %v1308_v51  ;;  %4256 = vmatmul.msk.f32.gmra.mxu0 %vm593_vm1, %v1305_v60  ;;  %1229 = vadd.xlane.f32.xlu0 %v1228_v61  ;;  %v1333_v57 = vor.u32 1.1754944e-38, %v1332_v28  ;;  %vm847_vm10 = vcmp.eq.f32.partialorder %v846_v40, 8.507059e+37 }
 0x662   : > { %4232 = vmatmul.msk.f32.gmra.mxu2 %vm593_vm1, %v836_v10  ;;  %vm1331_vm4 = vcmp.eq.f32.partialorder %v1330_v20, 8.507059e+37 }
 0x663   : > { %v1310_v26 = vadd.f32 %v4545_v45, %v1309_v8  ;;  %v4549_v6 = vpop.eup %4548 }
 0x664   : > { %v4551_v62 = vpop.eup %4550  ;;  %v838_v23 = vmul.f32 %v4549_v6, %v5556_v21  ;;  %v5574_v43 = vpop.xlane.xlu0 %697  ;;  %vm843_vm8 = vweird.f32 %v4549_v6 }
 0x665   : > { %v5576_v63 = vpop.xlane.xlu2 %1217  ;;  %v1314_v0 = vsel %vm1313_vm6, %v4545_v45, %v1310_v26  ;;  %v1322_v52 = vmul.f32 %v4551_v62, %v5558_v7  ;;  %4552 = vrcp.f32 %v5574_v43  ;;  %vm5588_vm11 = vmor %vm842_vm9, %vm843_vm8  ;;  %vm1327_vm12 = vweird.f32 %v4551_v62 }
 0x666   : > { %v839_v1 = vsub.f32 1.0, %v838_v23  ;;  %4554 = vrcp.f32 %v5576_v63  ;;  %v1319_v14 = vsel %vm1316_vm7, %v1318_v58, %v1314_v0  ;;  %v863_v27 = vand.u32 2147483648, %v5574_v43  ;;  %vm1328_vm3 = vmor %vm1326_vm0, %vm1327_vm12 }
 0x667   : > { %v1323_v3 = vsub.f32 1.0, %v1322_v52  ;;  %v1320_v47 = vmul.f32 %v5383_v33, %v1319_v14  ;;  %v1347_v12 = vand.u32 2147483648, %v5576_v63  ;;  %v861_v8 = vand.u32 2147483647, %v5574_v43 }
 0x668   : > { %v840_v37 = vmul.f32 %v4549_v6, %v839_v1  ;;  %v1345_v10 = vand.u32 2147483647, %v5576_v63  ;;  %vm857_vm6 = vweird.f32 %v5574_v43  ;;  %vm1341_vm8 = vweird.f32 %v5576_v63 }
 0x669   : > { %v1324_v25 = vmul.f32 %v4551_v62, %v1323_v3  ;;  %4257 = vmatmul.msk.f32.gmra.mxu0 %vm593_vm1, %v1320_v47  ;;  %v864_v29 = vor.u32 1.1754944e-38, %v863_v27 }
 0x66a   : > { %v841_v46 = vadd.f32 %v4549_v6, %v840_v37  ;;  %vm1346_vm0 = vcmp.eq.f32.partialorder %v1345_v10, 8.507059e+37 }
 0x66b   : > { %v4553_v15 = vpop.eup %4552  ;;  %v1325_v48 = vadd.f32 %v4551_v62, %v1324_v25 }
 0x66c   : > { %v4555_v33 = vpop.eup %4554  ;;  %v853_v49 = vmul.f32 %v4553_v15, %v5574_v43  ;;  %v5594_v53 = vpop.xlane.xlu0 %700  ;;  %v845_v59 = vsel %vm5588_vm11, %v4549_v6, %v841_v46  ;;  %vm858_vm5 = vweird.f32 %v4553_v15  ;;  %v1348_v6 = vor.u32 1.1754944e-38, %v1347_v12 }
 0x66d   : > { %v5596_v4 = vpop.xlane.xlu2 %1220  ;;  %v1337_v30 = vmul.f32 %v4555_v33, %v5576_v63  ;;  %4556 = vrcp.f32 %v5594_v53  ;;  %v850_v21 = vsel %vm847_vm10, %v849_v56, %v845_v59  ;;  %v1329_v7 = vsel %vm1328_vm3, %v4551_v62, %v1325_v48  ;;  %vm5614_vm9 = vmor %vm857_vm6, %vm858_vm5 }
 0x66e   : > { %v854_v45 = vsub.f32 1.0, %v853_v49  ;;  %4558 = vrcp.f32 %v5596_v4  ;;  %v851_v44 = vmul.f32 %v5391_v17, %v850_v21  ;;  %v1334_v51 = vsel %vm1331_vm4, %v1333_v57, %v1329_v7  ;;  %v375_v17 = vld [vmem:[%s5658_s3 + $0x18] sm:$0xff] }
 0x66f   : > { %v1338_v11 = vsub.f32 1.0, %v1337_v30  ;;  %v1335_v60 = vmul.f32 %v5393_v50, %v1334_v51  ;;  %vm1342_vm7 = vweird.f32 %v4555_v33  ;;  %vm862_vm11 = vcmp.eq.f32.partialorder %v861_v8, 8.507059e+37  ;;  %1563 = vmatpush.msrb.mxu2 %v375_v17 }
 0x670   : > { %v855_v36 = vmul.f32 %v4553_v15, %v854_v45  ;;  %4233 = vmatmul.msk.f32.gmra.mxu2 %vm593_vm1, %v851_v44  ;;  %vm1343_vm12 = vmor %vm1341_vm8, %vm1342_vm7  ;;  %v878_v58 = vand.u32 2147483648, %v5594_v53  ;;  %v1362_v14 = vand.u32 2147483648, %v5596_v4  ;;  %v876_v28 = vand.u32 2147483647, %v5594_v53 }
 0x671   : > { %v1339_v22 = vmul.f32 %v4555_v33, %v1338_v11  ;;  %4258 = vmatmul.msk.f32.gmra.mxu0 %vm593_vm1, %v1335_v60  ;;  %v1360_v46 = vand.u32 2147483647, %v5596_v4  ;;  %vm872_vm4 = vweird.f32 %v5594_v53  ;;  %vm1356_vm5 = vweird.f32 %v5596_v4 }
 0x672   : > { %v856_v61 = vadd.f32 %v4553_v15, %v855_v36  ;;  %v879_v2 = vor.u32 1.1754944e-38, %v878_v58  ;;  %vm877_vm7 = vcmp.eq.f32.partialorder %v876_v28, 8.507059e+37 }
 0x673   : > { %v4557_v5 = vpop.eup %4556  ;;  %v1340_v50 = vadd.f32 %v4555_v33, %v1339_v22 }
 0x674   : > { %v4559_v26 = vpop.eup %4558  ;;  %v868_v62 = vmul.f32 %v4557_v5, %v5594_v53  ;;  %v1224_v23 = vpop.xlane.xlu0 %1223  ;;  %v860_v43 = vsel %vm5614_vm9, %v4553_v15, %v856_v61  ;;  %vm873_vm10 = vweird.f32 %v4557_v5  ;;  %vm1361_vm9 = vcmp.eq.f32.partialorder %v1360_v46, 8.507059e+37 }
 0x675   : > { %v1352_v0 = vmul.f32 %v4559_v26, %v5596_v4  ;;  %4560 = vrcp.f32 %v1224_v23  ;;  %v865_v52 = vsel %vm862_vm11, %v864_v29, %v860_v43  ;;  %v1344_v1 = vsel %vm1343_vm12, %v4555_v33, %v1340_v50  ;;  %vm874_vm6 = vmor %vm872_vm4, %vm873_vm10 }
 0x676   : > { %v869_v63 = vsub.f32 1.0, %v868_v62  ;;  %v866_v37 = vmul.f32 %v5404_v9, %v865_v52  ;;  %v1349_v42 = vsel %vm1346_vm0, %v1348_v6, %v1344_v1  ;;  %vm1357_vm3 = vweird.f32 %v4559_v26 }
 0x677   : > { %v1353_v3 = vsub.f32 1.0, %v1352_v0  ;;  %v1350_v25 = vmul.f32 %v5407_v32, %v1349_v42  ;;  %v1363_v32 = vor.u32 1.1754944e-38, %v1362_v14  ;;  %vm1358_vm8 = vmor %vm1356_vm5, %vm1357_vm3  ;;  %v1377_v30 = vand.u32 2147483648, %v1224_v23  ;;  %v372_v14 = vld [vmem:[%s5658_s3] sm:$0xff] }
 0x678   : > { %v870_v47 = vmul.f32 %v4557_v5, %v869_v63  ;;  %4234 = vmatmul.msk.f32.gmra.mxu2 %vm593_vm1, %v866_v37  ;;  %v1375_v27 = vand.u32 2147483647, %v1224_v23  ;;  %vm1371_vm12 = vweird.f32 %v1224_v23  ;;  %v373_v63 = vld [vmem:[%s5658_s3 + $0x8] sm:$0xff] }
 0x679   : > { %v1354_v40 = vmul.f32 %v4559_v26, %v1353_v3  ;;  %4259 = vmatmul.msk.f32.gmra.mxu0 %vm593_vm1, %v1350_v25  ;;  %v1378_v12 = vor.u32 1.1754944e-38, %v1377_v30 }
 0x67a   : > { %v871_v20 = vadd.f32 %v4557_v5, %v870_v47  ;;  %vm1376_vm10 = vcmp.eq.f32.partialorder %v1375_v27, 8.507059e+37 }
 0x67b   : > { %v4561_v15 = vpop.eup %4560  ;;  %v1355_v9 = vadd.f32 %v4559_v26, %v1354_v40 }
 0x67c   : > { %v1367_v48 = vmul.f32 %v4561_v15, %v1224_v23  ;;  %v875_v33 = vsel %vm874_vm6, %v4557_v5, %v871_v20  ;;  %vm1372_vm11 = vweird.f32 %v4561_v15  ;;  %v374_v23 = vld [vmem:[%s5658_s3 + $0x10] sm:$0xff] }
 0x67d   : > { %v880_v56 = vsel %vm877_vm7, %v879_v2, %v875_v33  ;;  %v1359_v49 = vsel %vm1358_vm8, %v4559_v26, %v1355_v9  ;;  %vm1373_vm0 = vmor %vm1371_vm12, %vm1372_vm11  ;;  %1564 = vmatpush.msrb.mxu2 %v374_v23 }
 0x67e   : > { %v1368_v53 = vsub.f32 1.0, %v1367_v48  ;;  %v881_v59 = vmul.f32 %v5419_v31, %v880_v56  ;;  %v1364_v57 = vsel %vm1361_vm9, %v1363_v32, %v1359_v49 }
 0x67f   : > { %v1365_v4 = vmul.f32 %v5423_v54, %v1364_v57  ;;  %v5640_v54 = vpop.f32.mrf.mxu2  ;;  %1565 = vmatpush.msrb.mxu2 %v373_v63 }
 0x680   : > { %v1369_v45 = vmul.f32 %v4561_v15, %v1368_v53  ;;  %4235 = vmatmul.msk.f32.gmra.mxu2 %vm593_vm1, %v881_v59  ;;  %v980_v57 = vmul.f32 %v4970_v34, %v5640_v54 }
 0x681   : > { %4260 = vmatmul.msk.f32.gmra.mxu0 %vm593_vm1, %v1365_v4  ;;  %1566 = vmatpush.msrb.mxu2 %v372_v14 }
 0x682   : > { %v1370_v11 = vadd.f32 %v4561_v15, %v1369_v45 }
 0x684   : > { %v1374_v21 = vsel %vm1373_vm0, %v4561_v15, %v1370_v11 }
 0x685   : > { %v1379_v7 = vsel %vm1376_vm10, %v1378_v12, %v1374_v21 }
 0x686   : > { %v1380_v31 = vmul.f32 %v5440_v13, %v1379_v7 }
 0x687   : > { %v5642_v36 = vpop.f32.mrf.mxu2 }
 0x688   : > { %v981_v7 = vmul.f32 %v4970_v34, %v5642_v36 }
 0x689   : > { %4261 = vmatmul.msk.f32.gmra.mxu0 %vm593_vm1, %v1380_v31 }
 0x68e   : > { %v5646_v51 = vpop.f32.mrf.mxu0 }
 0x68f   : > { %v5644_v44 = vpop.f32.mrf.mxu2 }
 0x696   : > { %v5648_v60 = vpop.f32.mrf.mxu0 }
 0x697   : > { %v953_v22 = vpop.f32.mrf.mxu2 }
 0x698   : > { %v983_v53 = vmul.f32 %v4972_v35, %v953_v22 }
 0x69a   : > { %v986_v4 = vadd.f32 %v983_v53, %v980_v57  ;;  %v4463_v53 = vld [vmem:[%s5676_s23] ss:$0 sm:$0xff] }
 0x69b   : > { %v350_v57 = vld [vmem:[#allocation2 + $0x40] sm:$0xf] }
 0x69f   : > { %v5650_v8 = vpop.f32.mrf.mxu2 }
 0x6a0   : > { %v984_v11 = vmul.f32 %v4972_v35, %v5650_v8  ;;  %v982_v8 = vmul.f32 %v4970_v34, %v5644_v44 }
 0x6a2   : > { %v987_v54 = vadd.f32 %v984_v11, %v981_v7 }
 0x6a7   : > { %v5660_v13 = vpop.f32.mrf.mxu2 }
 0x6a8   : > { %v985_v17 = vmul.f32 %v4972_v35, %v5660_v13  ;;  %v1509_v13 = vmul.f32 %v4970_v34, %v5646_v51 }
 0x6aa   : > { %v988_v36 = vadd.f32 %v985_v17, %v982_v8 }
 0x6af   : > { %v962_v1 = vpop.f32.mrf.mxu2 }
 0x6b0   : > { %v989_v30 = vmul.f32 %v4975_v38, %v962_v1 }
 0x6cc   : > { %v1227_v10 = vpop.xlane.xlu2 %1226 }
 0x6cd   : > { %4562 = vrcp.f32 %v1227_v10  ;;  %v5652_v61 = vpop.f32.mrf.mxu0  ;;  %v1392_v62 = vand.u32 2147483648, %v1227_v10  ;;  %v1390_v0 = vand.u32 2147483647, %v1227_v10  ;;  %vm1386_vm4 = vweird.f32 %v1227_v10 }
 0x6cf   : > { %v1393_v3 = vor.u32 1.1754944e-38, %v1392_v62  ;;  %vm1391_vm6 = vcmp.eq.f32.partialorder %v1390_v0, 8.507059e+37 }
 0x6d3   : > { %v4563_v5 = vpop.eup %4562 }
 0x6d4   : > { %v1382_v50 = vmul.f32 %v4563_v5, %v1227_v10  ;;  %v1230_v26 = vpop.xlane.xlu0 %1229  ;;  %vm1387_vm3 = vweird.f32 %v4563_v5 }
 0x6d5   : > { %4564 = vrcp.f32 %v1230_v26  ;;  %v5663_v6 = vpop.f32.mrf.mxu0  ;;  %vm1388_vm5 = vmor %vm1386_vm4, %vm1387_vm3  ;;  %v1407_v46 = vand.u32 2147483648, %v1230_v26  ;;  %v1405_v15 = vand.u32 2147483647, %v1230_v26  ;;  %vm1401_vm8 = vweird.f32 %v1230_v26 }
 0x6d6   : > { %v1383_v29 = vsub.f32 1.0, %v1382_v50  ;;  %v1512_v0 = vmul.f32 %v4972_v35, %v5663_v6  ;;  %v1510_v6 = vmul.f32 %v4970_v34, %v5648_v60 }
 0x6d7   : > { %v1408_v9 = vor.u32 1.1754944e-38, %v1407_v46  ;;  %vm1406_vm11 = vcmp.eq.f32.partialorder %v1405_v15, 8.507059e+37 }
 0x6d8   : > { %v1384_v43 = vmul.f32 %v4563_v5, %v1383_v29  ;;  %v1515_v44 = vadd.f32 %v1512_v0, %v1509_v13 }
 0x6da   : > { %v1385_v58 = vadd.f32 %v4563_v5, %v1384_v43 }
 0x6db   : > { %v4565_v52 = vpop.eup %4564 }
 0x6dc   : > { %v1397_v37 = vmul.f32 %v4565_v52, %v1230_v26  ;;  %v1389_v42 = vsel %vm1388_vm5, %v4563_v5, %v1385_v58  ;;  %vm1402_vm7 = vweird.f32 %v4565_v52  ;;  %v965_v32 = vpop.f32.mrf.mxu2 }
 0x6dd   : > { %v1394_v47 = vsel %vm1391_vm6, %v1393_v3, %v1389_v42  ;;  %vm1403_vm9 = vmor %vm1401_vm8, %vm1402_vm7  ;;  %v990_v31 = vmul.f32 %v4975_v38, %v965_v32 }
 0x6de   : > { %v1398_v25 = vsub.f32 1.0, %v1397_v37  ;;  %v1485_v28 = vpop.f32.mrf.mxu0  ;;  %v1395_v40 = vmul.f32 %v5533_v16, %v1394_v47 }
 0x6df   : > { %v993_v5 = vadd.f32 %v990_v31, %v987_v54  ;;  %v1513_v37 = vmul.f32 %v4972_v35, %v1485_v28  ;;  %v1511_v28 = vmul.f32 %v4970_v34, %v5652_v61  ;;  %v2044_v61 = vld [vmem:[#allocation2 + $0x30] sm:$0xff] }
 0x6e0   : > { %v1399_v20 = vmul.f32 %v4565_v52, %v1398_v25  ;;  %4262 = vmatmul.msk.f32.gmra.mxu0 %vm593_vm1, %v1395_v40 }
 0x6e1   : > { %v1516_v51 = vadd.f32 %v1513_v37, %v1510_v6 }
 0x6e2   : > { %v1400_v2 = vadd.f32 %v4565_v52, %v1399_v20 }
 0x6e4   : > { %v1404_v48 = vsel %vm1403_vm9, %v4565_v52, %v1400_v2 }
 0x6e5   : > { %v1409_v33 = vsel %vm1406_vm11, %v1408_v9, %v1404_v48  ;;  %v968_v16 = vpop.f32.mrf.mxu2 }
 0x6e6   : > { %v1410_v56 = vmul.f32 %v5562_v55, %v1409_v33  ;;  %v1488_v49 = vpop.f32.mrf.mxu0  ;;  %v992_v55 = vadd.f32 %v989_v30, %v986_v4  ;;  %v991_v29 = vmul.f32 %v4975_v38, %v968_v16  ;;  %v4280_v33 = vld [vmem:[%s5020_s29 + $0x198] sm:$0xff]  ;;  %v4277_v16 = vld [vmem:[%s5020_s29 + $0x180] sm:$0xff] }
 0x6e7   : > { %v1514_v46 = vmul.f32 %v4972_v35, %v1488_v49  ;;  %2083 = vmatpush.msra.mxu2 %v4280_v33  ;;  %v4278_v49 = vld [vmem:[%s5020_s29 + $0x188] sm:$0xff]  ;;  %v351_v30 = vld [vmem:[%s7473_s2] sm:$0xf] }
 0x6e8   : > { %4263 = vmatmul.msk.f32.gmra.mxu0 %vm593_vm1, %v1410_v56  ;;  %v994_v43 = vadd.f32 %v991_v29, %v988_v36  ;;  %v4279_v56 = vld [vmem:[%s5020_s29 + $0x190] sm:$0xff]  ;;  %v352_v4 = vsel %vm5036_vm15, %v351_v30, %v350_v57  ;;  %s5821_s29 = scalar_lea.vmem %s7440_s11, %s4201_s6 }
 0x6e9   : > { %v1517_v60 = vadd.f32 %v1514_v46, %v1511_v28  ;;  %2084 = vmatpush.msra.mxu2 %v4279_v56  ;;  %353 = vst.msk [vmem:[#allocation2 + $0x40] sm:$0xf] %vm343_vm14, %v352_v4  ;;  %v4712_v29 = vld [vmem:[#allocation2 + $0x10] sm:$0xff]  ;;  %v4464_v46 = vld [vmem:[%s5030_s0 + $0xc] ss:$0 sm:$0xff] }
 0x6eb   : > { %2085 = vmatpush.msra.mxu2 %v4278_v49 }
 0x6ed   : > { %2086 = vmatpush.msra.mxu2 %v4277_v16 }
 0x6ee   : > { %v1491_v59 = vpop.f32.mrf.mxu0 }
 0x6ef   : > { %v1518_v52 = vmul.f32 %v4975_v38, %v1491_v59  ;;  %v2045_v59 = vld [vmem:[#allocation2 + $0x38] sm:$0xff] }
 0x6f0   : > { %v2046_v54 = vld [vmem:[#allocation2 + $0x40] sm:$0xff] }
 0x6f1   : > { %v1521_v3 = vadd.f32 %v1518_v52, %v1515_v44 }
 0x6f3   : > { %v971_v45 = vpop.f32.mrf.mxu2 }
 0x6f4   : > { %v995_v27 = vmul.f32 %v4977_v39, %v971_v45  ;;  %v354_v45 = vld [vmem:[#allocation2 + $0x58] sm:$0xf] }
 0x6f6   : > { %v998_v12 = vadd.f32 %v995_v27, %v992_v55  ;;  %v1494_v21 = vpop.f32.mrf.mxu0  ;;  %v4199_v27 = vld [vmem:[%s7473_s2 + $0x4] sm:$0xf] }
 0x6f7   : > { %v1519_v42 = vmul.f32 %v4975_v38, %v1494_v21  ;;  %v4710_v21 = vld [vmem:[#allocation2] sm:$0xff] }
 0x6f8   : > { %4264 = vmatmul.msk.f32.vlgmr.msrb.gmra.mxu2 %vm113_vm2, %v998_v12  ;;  %v356_v12 = vsel %vm5036_vm15, %v4199_v27, %v354_v45 }
 0x6f9   : > { %v1522_v25 = vadd.f32 %v1519_v42, %v1516_v51  ;;  %357 = vst.msk [vmem:[#allocation2 + $0x58] sm:$0xf] %vm343_vm14, %v356_v12  ;;  %v4715_v51 = vld [vmem:[#allocation2 + $0x28] sm:$0xff] }
 0x6fb   : > { %v974_v22 = vpop.f32.mrf.mxu2 }
 0x6fc   : > { %v996_v10 = vmul.f32 %v4977_v39, %v974_v22 }
 0x6fe   : > { %v1497_v50 = vpop.f32.mrf.mxu0  ;;  %v999_v26 = vadd.f32 %v996_v10, %v993_v5  ;;  %v4711_v5 = vld [vmem:[#allocation2 + $0x8] sm:$0xff] }
 0x6ff   : > { %v1520_v15 = vmul.f32 %v4975_v38, %v1497_v50 }
 0x700   : > { %4265 = vmatmul.msk.f32.gmra.mxu2 %vm113_vm2, %v999_v26  ;;  %v2047_v26 = vld [vmem:[#allocation2 + $0x48] sm:$0xff]  ;;  %v2049_v52 = vld [vmem:[#allocation2 + $0x58] sm:$0xff] }
 0x701   : > { %v1523_v9 = vadd.f32 %v1520_v15, %v1517_v60 }
 0x703   : > { %v977_v62 = vpop.f32.mrf.mxu2 }
 0x704   : > { %v997_v23 = vmul.f32 %v4977_v39, %v977_v62 }
 0x706   : > { %v1000_v63 = vadd.f32 %v997_v23, %v994_v43  ;;  %v1500_v58 = vpop.f32.mrf.mxu0  ;;  %v2048_v23 = vld [vmem:[#allocation2 + $0x50] sm:$0xff] }
 0x707   : > { %v1524_v1 = vmul.f32 %v4977_v39, %v1500_v58 }
 0x708   : > { %4266 = vmatmul.msk.f32.gmra.mxu2 %vm113_vm2, %v1000_v63  ;;  %v4713_v63 = vld [vmem:[#allocation2 + $0x18] sm:$0xff] }
 0x709   : > { %v1527_v14 = vadd.f32 %v1524_v1, %v1521_v3  ;;  %v4714_v3 = vld [vmem:[#allocation2 + $0x20] sm:$0xff] }
 0x710   : > { %4267 = vmatmul.msk.f32.gmra.mxu2 %vm113_vm2, %v1527_v14 }
 0x75d   : > { %v1503_v47 = vpop.f32.mrf.mxu0 }
 0x75e   : > { %v1525_v40 = vmul.f32 %v4977_v39, %v1503_v47 }
 0x760   : > { %v1528_v20 = vadd.f32 %v1525_v40, %v1522_v25 }
 0x762   : > { %4268 = vmatmul.msk.f32.gmra.mxu2 %vm113_vm2, %v1528_v20 }
 0x765   : > { %v1506_v2 = vpop.f32.mrf.mxu0 }
 0x766   : > { %v1526_v32 = vmul.f32 %v4977_v39, %v1506_v2 }
 0x768   : > { %v1529_v48 = vadd.f32 %v1526_v32, %v1523_v9 }
 0x76a   : > { %4269 = vmatmul.msk.f32.gmra.mxu2 %vm113_vm2, %v1529_v48 }
 0x772   : > { %4316 = vmatmul.msk.f32.vlgmr.msra.gmra.mxu2 %vm113_vm2, %v2044_v61 }
 0x77a   : > { %4317 = vmatmul.msk.f32.gmra.mxu2 %vm113_vm2, %v2045_v59 }
 0x77b   : > { %v1568_v55 = vpop.f32.mrf.mxu2 }
 0x77c   : > { %v1569_v11 = vadd.f32 %v4463_v53, %v1568_v55 }
 0x77e   : > { %v1586_v7 = vadd.f32 %v4710_v21, %v1569_v11 }
 0x780   : > { %v1592_v31 = vsel %vm113_vm2, %v1586_v7, 0.0 }
 0x781   : > { %1593 = vadd.xlane.f32.xlu1 %v1592_v31 }
 0x782   : > { %4318 = vmatmul.msk.f32.gmra.mxu2 %vm113_vm2, %v2046_v54 }
 0x783   : > { %v1571_v22 = vpop.f32.mrf.mxu2 }
 0x784   : > { %v1572_v10 = vadd.f32 %v4463_v53, %v1571_v22 }
 0x786   : > { %v1587_v17 = vadd.f32 %v4711_v5, %v1572_v10 }
 0x788   : > { %v1595_v50 = vsel %vm113_vm2, %v1587_v17, 0.0 }
 0x789   : > { %1596 = vadd.xlane.f32.xlu2 %v1595_v50 }
 0x78a   : > { %4319 = vmatmul.msk.f32.gmra.mxu2 %vm113_vm2, %v2047_v26 }
 0x78b   : > { %v1574_v19 = vpop.f32.mrf.mxu2 }
 0x78c   : > { %v1575_v8 = vadd.f32 %v4463_v53, %v1574_v19 }
 0x78e   : > { %v1588_v36 = vadd.f32 %v4712_v29, %v1575_v8 }
 0x790   : > { %v1598_v62 = vsel %vm113_vm2, %v1588_v36, 0.0 }
 0x791   : > { %1599 = vadd.xlane.f32.xlu0 %v1598_v62 }
 0x792   : > { %4320 = vmatmul.msk.f32.gmra.mxu2 %vm113_vm2, %v2048_v23 }
 0x793   : > { %v1577_v43 = vpop.f32.mrf.mxu2 }
 0x794   : > { %v1578_v0 = vadd.f32 %v4463_v53, %v1577_v43 }
 0x796   : > { %v1589_v58 = vadd.f32 %v4713_v63, %v1578_v0  ;;  %v385_v0 = vld [vmem:[%s5797_s30 + $0x18] sm:$0xff] }
 0x797   : > { %1771 = vmatpush.msrb.mxu1 %v385_v0 }
 0x798   : > { %v1601_v13 = vsel %vm113_vm2, %v1589_v58, 0.0 }
 0x799   : > { %1602 = vadd.xlane.f32.xlu1 %v1601_v13 }
 0x79a   : > { %4321 = vmatmul.msk.f32.gmra.mxu2 %vm113_vm2, %v2049_v52  ;;  %v383_v52 = vld [vmem:[%s5797_s30 + $0x8] sm:$0xff] }
 0x7e5   : > { %v1580_v44 = vpop.f32.mrf.mxu2 }
 0x7e6   : > { %v1581_v1 = vadd.f32 %v4463_v53, %v1580_v44  ;;  %v382_v44 = vld [vmem:[%s5797_s30] sm:$0xff] }
 0x7e8   : > { %v1590_v14 = vadd.f32 %v4714_v3, %v1581_v1 }
 0x7ea   : > { %v1604_v37 = vsel %vm113_vm2, %v1590_v14, 0.0 }
 0x7eb   : > { %1605 = vadd.xlane.f32.xlu2 %v1604_v37 }
 0x7ed   : > { %v1583_v6 = vpop.f32.mrf.mxu2 }
 0x7ee   : > { %v1584_v42 = vadd.f32 %v4463_v53, %v1583_v6 }
 0x7f0   : > { %v1591_v47 = vadd.f32 %v4715_v51, %v1584_v42 }
 0x7f2   : > { %v1607_v25 = vsel %vm113_vm2, %v1591_v47, 0.0 }
 0x7f3   : > { %1608 = vadd.xlane.f32.xlu0 %v1607_v25 }
 0x7f4   : > { %v1594_v40 = vpop.xlane.xlu1 %1593 }
 0x7f5   : > { %v1610_v20 = vmul.f32 %v1594_v40, %v4931_v24  ;;  %v2088_v28 = vpop.f32.mrf.mxu2 }
 0x7f6   : > { %v5748_v15 = vadd.f32 %v4464_v46, %v2088_v28 }
 0x7f7   : > { %v5750_v60 = vsub.f32 %v1586_v7, %v1610_v20 }
 0x7f9   : > { %v1622_v2 = vmul.f32 %v5750_v60, %v5750_v60 }
 0x7fb   : > { %v1628_v9 = vsel %vm113_vm2, %v1622_v2, 0.0  ;;  %v380_v2 = vld [vmem:[%s5821_s29] sm:$0x3] }
 0x7fc   : > { %1629 = vadd.xlane.f32.xlu1 %v1628_v9  ;;  %v1597_v32 = vpop.xlane.xlu2 %1596 }
 0x7fd   : > { %v1611_v48 = vmul.f32 %v1597_v32, %v4931_v24  ;;  %v2091_v33 = vpop.f32.mrf.mxu2 }
 0x7fe   : > { %v5756_v56 = vadd.f32 %v4464_v46, %v2091_v33 }
 0x7ff   : > { %v5758_v49 = vsub.f32 %v1587_v17, %v1611_v48 }
 0x801   : > { %v1623_v16 = vmul.f32 %v5758_v49, %v5758_v49 }
 0x803   : > { %v1631_v61 = vsel %vm113_vm2, %v1623_v16, 0.0  ;;  %v5827_v16 = vperm.slane %v380_v2, 0 }
 0x804   : > { %v1600_v53 = vpop.xlane.xlu0 %1599  ;;  %1632 = vadd.xlane.f32.xlu2 %v1631_v61 }
 0x805   : > { %v1612_v59 = vmul.f32 %v1600_v53, %v4931_v24  ;;  %v2094_v57 = vpop.f32.mrf.mxu2 }
 0x806   : > { %v5779_v10 = vadd.f32 %v4464_v46, %v2094_v57  ;;  %v5832_v57 = vperm.slane %v380_v2, 1 }
 0x807   : > { %v5764_v30 = vsub.f32 %v1588_v36, %v1612_v59 }
 0x808   : > { %v4447_v62 = vpack.i.bf16 %v5756_v56, %v5779_v10 }
 0x809   : > { %v1624_v4 = vmul.f32 %v5764_v30, %v5764_v30 }
 0x80b   : > { %v1634_v45 = vsel %vm113_vm2, %v1624_v4, 0.0 }
 0x80c   : > { %v1603_v55 = vpop.xlane.xlu1 %1602  ;;  %1635 = vadd.xlane.f32.xlu0 %v1634_v45 }
 0x80d   : > { %v1613_v27 = vmul.f32 %v1603_v55, %v4931_v24  ;;  %v2097_v11 = vpop.f32.mrf.mxu2 }
 0x80e   : > { %v5772_v21 = vadd.f32 %v4464_v46, %v2097_v11 }
 0x80f   : > { %v5770_v12 = vsub.f32 %v1589_v58, %v1613_v27  ;;  %v384_v58 = vld [vmem:[%s5797_s30 + $0x10] sm:$0xff] }
 0x810   : > { %1772 = vmatpush.msrb.mxu1 %v384_v58 }
 0x811   : > { %v1625_v7 = vmul.f32 %v5770_v12, %v5770_v12 }
 0x812   : > { %1773 = vmatpush.msrb.mxu1 %v383_v52 }
 0x813   : > { %v1637_v31 = vsel %vm113_vm2, %v1625_v7, 0.0 }
 0x814   : > { %1638 = vadd.xlane.f32.xlu1 %v1637_v31  ;;  %1774 = vmatpush.msrb.mxu1 %v382_v44 }
 0x815   : > { %v2100_v54 = vpop.f32.mrf.mxu2 }
 0x816   : > { %v5777_v22 = vadd.f32 %v4464_v46, %v2100_v54 }
 0x81d   : > { %v2103_v5 = vpop.f32.mrf.mxu2 }
 0x81e   : > { %v5783_v17 = vadd.f32 %v4464_v46, %v2103_v5 }
 0x82d   : > { %2131 = vrot.lane.b32.xlu1 %v5779_v10, %s4765_s26 }
 0x835   : > { %2660 = vrot.lane.b32.xlu1 %v5783_v17, %s4765_s26 }
 0x85e   : > { %v1606_v50 = vpop.xlane.xlu2 %1605 }
 0x85f   : > { %v1614_v26 = vmul.f32 %v1606_v50, %v4931_v24 }
 0x861   : > { %v5788_v19 = vsub.f32 %v1590_v14, %v1614_v26 }
 0x863   : > { %v1626_v8 = vmul.f32 %v5788_v19, %v5788_v19 }
 0x865   : > { %v1640_v29 = vsel %vm113_vm2, %v1626_v8, 0.0 }
 0x866   : > { %v1609_v36 = vpop.xlane.xlu0 %1608  ;;  %1641 = vadd.xlane.f32.xlu2 %v1640_v29 }
 0x867   : > { %v1615_v23 = vmul.f32 %v1609_v36, %v4931_v24 }
 0x869   : > { %v5802_v43 = vsub.f32 %v1591_v47, %v1615_v23 }
 0x86b   : > { %v1627_v63 = vmul.f32 %v5802_v43, %v5802_v43 }
 0x86d   : > { %v1643_v13 = vsel %vm113_vm2, %v1627_v63, 0.0 }
 0x86e   : > { %1644 = vadd.xlane.f32.xlu0 %v1643_v13 }
 0x86f   : > { %v1630_v1 = vpop.xlane.xlu1 %1629 }
 0x870   : > { %v1646_v3 = vmul.f32 %v1630_v1, %v4931_v24 }
 0x872   : > { %v1652_v14 = vadd.f32 1e-05, %v1646_v3 }
 0x874   : > { %4566 = vrsqrt.f32 %v1652_v14  ;;  %vm1664_vm12 = vweird.f32 %v1652_v14 }
 0x877   : > { %v1633_v37 = vpop.xlane.xlu2 %1632 }
 0x878   : > { %v1647_v6 = vmul.f32 %v1633_v37, %v4931_v24 }
 0x87a   : > { %v4567_v42 = vpop.eup %4566  ;;  %v1653_v51 = vadd.f32 1e-05, %v1647_v6 }
 0x87b   : > { %v1659_v47 = vmul.f32 %v4567_v42, %v1652_v14  ;;  %vm1665_vm15 = vweird.f32 %v4567_v42 }
 0x87c   : > { %4568 = vrsqrt.f32 %v1653_v51  ;;  %vm1666_vm0 = vmor %vm1664_vm12, %vm1665_vm15  ;;  %vm1674_vm3 = vweird.f32 %v1653_v51 }
 0x87d   : > { %v1660_v25 = vmul.f32 %v4567_v42, %v1659_v47 }
 0x87e   : > { %2129 = vrot.lane.b32.xlu2 %v5756_v56, %s4765_s26 }
 0x87f   : > { %v1661_v40 = vmul.f32 0.5, %v1660_v25  ;;  %v1636_v46 = vpop.xlane.xlu0 %1635 }
 0x880   : > { %v1648_v20 = vmul.f32 %v1636_v46, %v4931_v24 }
 0x881   : > { %v1662_v28 = vsub.f32 1.5, %v1661_v40 }
 0x882   : > { %2127 = vrot.lane.b32.xlu0 %v5748_v15, %s4765_s26  ;;  %v4569_v9 = vpop.eup %4568  ;;  %v1654_v32 = vadd.f32 1e-05, %v1648_v20 }
 0x883   : > { %v1663_v48 = vmul.f32 %v4567_v42, %v1662_v28  ;;  %v1669_v33 = vmul.f32 %v4569_v9, %v1653_v51  ;;  %vm1675_vm10 = vweird.f32 %v4569_v9 }
 0x884   : > { %4570 = vrsqrt.f32 %v1654_v32  ;;  %vm1676_vm4 = vmor %vm1674_vm3, %vm1675_vm10  ;;  %vm1684_vm6 = vweird.f32 %v1654_v32 }
 0x885   : > { %v1667_v61 = vsel %vm1666_vm0, %v4567_v42, %v1663_v48  ;;  %v1670_v53 = vmul.f32 %v4569_v9, %v1669_v33 }
 0x886   : > { %2658 = vrot.lane.b32.xlu2 %v5777_v22, %s4765_s26  ;;  %v1718_v59 = vmul.f32 %v1667_v61, %v5750_v60 }
 0x887   : > { %v1671_v4 = vmul.f32 0.5, %v1670_v53  ;;  %v1639_v45 = vpop.xlane.xlu1 %1638 }
 0x888   : > { %v1649_v55 = vmul.f32 %v1639_v45, %v4931_v24  ;;  %v1725_v27 = vmul.f32 %v5827_v16, %v1718_v59 }
 0x889   : > { %v1672_v11 = vsub.f32 1.5, %v1671_v4 }
 0x88a   : > { %2656 = vrot.lane.b32.xlu0 %v5772_v21, %s4765_s26  ;;  %v4571_v7 = vpop.eup %4570  ;;  %v1655_v60 = vadd.f32 1e-05, %v1649_v55  ;;  %v5845_v31 = vadd.f32 %v5832_v57, %v1725_v27  ;;  %s4202_s26 = sshll.u32 %s4761_s27, 7  ;;  %s335_s27 = sadd.s32 1, %s4761_s27  }
 0x88b   : > { %v1673_v54 = vmul.f32 %v4569_v9, %v1672_v11  ;;  %v1679_v5 = vmul.f32 %v4571_v7, %v1654_v32  ;;  %vm1685_vm5 = vweird.f32 %v4571_v7  ;;  %s5875_s25 = scalar_lea.vmem %s7443_s14, %s4202_s26  ;;  %p332_p3 = scmp.ge.s32.totalorder %s335_s27, 12  }
 0x88c   : > { %4572 = vrsqrt.f32 %v1655_v60  ;;  %4270 = vmatmul.msk.f32.vlgmr.msrb.gmra.mxu1 %vm113_vm2, %v5845_v31  ;;  %vm1686_vm7 = vmor %vm1684_vm6, %vm1685_vm5  ;;  %vm1694_vm9 = vweird.f32 %v1655_v60  ;;  %v404_v40 = vld [vmem:[%s5875_s25 + $0x70] sm:$0xff]  ;;  %v403_v46 = vld [vmem:[%s5875_s25 + $0x68] sm:$0xff]  ;;  %s4769_s12 = smov (%p332_p3), [#allocation3]  }
 0x88d   : > { %v1680_v50 = vmul.f32 %v4571_v7, %v1679_v5  ;;  %v1677_v26 = vsel %vm1676_vm4, %v4569_v9, %v1673_v54  ;;  %v402_v20 = vld [vmem:[%s5875_s25 + $0x60] sm:$0xff]  ;;  %v401_v2 = vld [vmem:[%s5875_s25 + $0x58] sm:$0xff]  ;;  %v400_v32 = vld [vmem:[%s5875_s25 + $0x50] sm:$0xff]  ;;  %s4125_s13 = sshll.u32 (%p332_p3), %s4769_s12, 4  ;;  %s4126_s13 = int_to_ptr.vmem [resolvable:$true] %s4125_s13 }
 0x88e   : > { %v1719_v8 = vmul.f32 %v1677_v26, %v5758_v49  ;;  %v399_v33 = vld [vmem:[%s5875_s25 + $0x48] sm:$0xff]  ;;  %v398_v61 = vld [vmem:[%s5875_s25 + $0x40] sm:$0xff]  ;;  %v397_v4 = vld [vmem:[%s5875_s25 + $0x38] sm:$0xff] }
 0x88f   : > { %v1681_v29 = vmul.f32 0.5, %v1680_v50  ;;  %v396_v55 = vld [vmem:[%s5875_s25 + $0x30] sm:$0xff]  ;;  %v394_v5 = vld [vmem:[%s5875_s25 + $0x20] sm:$0xff]  ;;  %v393_v26 = vld [vmem:[%s5875_s25 + $0x18] sm:$0xff] }
 0x890   : > { %v1726_v36 = vmul.f32 %v5827_v16, %v1719_v8 }
 0x891   : > { %v1682_v23 = vsub.f32 1.5, %v1681_v29 }
 0x892   : > { %v4573_v0 = vpop.eup %4572  ;;  %v5852_v63 = vadd.f32 %v5832_v57, %v1726_v36 }
 0x893   : > { %v1683_v58 = vmul.f32 %v4571_v7, %v1682_v23  ;;  %v1689_v13 = vmul.f32 %v4573_v0, %v1655_v60  ;;  %vm1695_vm8 = vweird.f32 %v4573_v0  ;;  %v395_v60 = vld [vmem:[%s5875_s25 + $0x28] sm:$0xff] }
 0x894   : > { %4271 = vmatmul.msk.f32.gmra.mxu1 %vm113_vm2, %v5852_v63  ;;  %vm1696_vm11 = vmor %vm1694_vm9, %vm1695_vm8 }
 0x895   : > { %v1690_v52 = vmul.f32 %v4573_v0, %v1689_v13  ;;  %v1687_v44 = vsel %vm1686_vm7, %v4571_v7, %v1683_v58  ;;  %v391_v58 = vld [vmem:[%s5875_s25 + $0x8] sm:$0xff] }
 0x896   : > { %v1720_v49 = vmul.f32 %v1687_v44, %v5764_v30  ;;  %v390_v44 = vld [vmem:[%s5875_s25] sm:$0xff] }
 0x897   : > { %v1691_v1 = vmul.f32 0.5, %v1690_v52 }
 0x898   : > { %v1727_v3 = vmul.f32 %v5827_v16, %v1720_v49 }
 0x899   : > { %v1692_v14 = vsub.f32 1.5, %v1691_v1 }
 0x89a   : > { %v5859_v37 = vadd.f32 %v5832_v57, %v1727_v3 }
 0x89b   : > { %v1693_v6 = vmul.f32 %v4573_v0, %v1692_v14 }
 0x89c   : > { %4272 = vmatmul.msk.f32.gmra.mxu1 %vm113_vm2, %v5859_v37 }
 0x89d   : > { %v1697_v42 = vsel %vm1696_vm11, %v4573_v0, %v1693_v6  ;;  %v392_v0 = vld [vmem:[%s5875_s25 + $0x10] sm:$0xff] }
 0x89e   : > { %v1721_v51 = vmul.f32 %v1697_v42, %v5770_v12  ;;  %v405_v12 = vld [vmem:[%s5875_s25 + $0x78] sm:$0xff] }
 0x89f   : > { %v2132_v47 = vpop.permute.xlu1 %2131  ;;  %1803 = vmatpush.msrb.mxu3 %v405_v12 }
 0x8a0   : > { %v1728_v30 = vmul.f32 %v5827_v16, %v1721_v51  ;;  %4323 = vmatpush.xpose.msk.msra.mxu0 %vm113_vm2, %v2132_v47 }
 0x8a1   : > { %1804 = vmatpush.msrb.mxu3 %v404_v40 }
 0x8a2   : > { %v5867_v25 = vadd.f32 %v5832_v57, %v1728_v30 }
 0x8a3   : > { %1805 = vmatpush.msrb.mxu3 %v403_v46  ;;  %v2110_v46 = vmul.f32 %v4970_v34, %v5756_v56 }
 0x8a4   : > { %7490 = vst [vmem:[#allocation7_spill] sm:$0xff] %v5867_v25  ;;  %4273 = vmatmul.msk.f32.gmra.mxu1 %vm113_vm2, %v5867_v25 }
 0x8a5   : > { %1806 = vmatpush.msrb.mxu3 %v402_v20  ;;  %v2111_v20 = vmul.f32 %v4970_v34, %v5779_v10 }
 0x8a7   : > { %1807 = vmatpush.msrb.mxu3 %v401_v2 }
 0x8a9   : > { %1808 = vmatpush.msrb.mxu3 %v400_v32 }
 0x8ab   : > { %1809 = vmatpush.msrb.mxu3 %v399_v33  ;;  %v2113_v33 = vmul.f32 %v4972_v35, %v5756_v56 }
 0x8ad   : > { %1810 = vmatpush.msrb.mxu3 %v398_v61 }
 0x8af   : > { %1811 = vmatpush.msrb.mxu3 %v397_v4  ;;  %v2114_v4 = vmul.f32 %v4972_v35, %v5779_v10 }
 0x8b1   : > { %1812 = vmatpush.msrb.mxu3 %v396_v55 }
 0x8b3   : > { %1813 = vmatpush.msrb.mxu3 %v395_v60  ;;  %v2116_v60 = vmul.f32 %v4975_v38, %v5756_v56 }
 0x8b5   : > { %1814 = vmatpush.msrb.mxu3 %v394_v5 }
 0x8b7   : > { %1815 = vmatpush.msrb.mxu3 %v393_v26  ;;  %v2118_v26 = vmul.f32 %v4977_v39, %v5748_v15 }
 0x8b9   : > { %1816 = vmatpush.msrb.mxu3 %v392_v0 }
 0x8bb   : > { %1817 = vmatpush.msrb.mxu3 %v391_v58 }
 0x8bd   : > { %1818 = vmatpush.msrb.mxu3 %v390_v44 }
 0x8d9   : > { %v1642_v28 = vpop.xlane.xlu2 %1641 }
 0x8da   : > { %v1650_v9 = vmul.f32 %v1642_v28, %v4931_v24  ;;  %v4465_v28 = vld [vmem:[%s5838_s28] ss:$0 sm:$0xff] }
 0x8dc   : > { %v1656_v48 = vadd.f32 1e-05, %v1650_v9 }
 0x8de   : > { %4574 = vrsqrt.f32 %v1656_v48  ;;  %vm1704_vm12 = vweird.f32 %v1656_v48 }
 0x8e1   : > { %v1645_v53 = vpop.xlane.xlu0 %1644  ;;  %v2130_v59 = vpop.permute.xlu2 %2129 }
 0x8e2   : > { %v1651_v45 = vmul.f32 %v1645_v53, %v4931_v24  ;;  %4324 = vmatpush.xpose.msk.msra.mxu0 %vm113_vm2, %v2130_v59 }
 0x8e4   : > { %v4575_v27 = vpop.eup %4574  ;;  %v1657_v11 = vadd.f32 1e-05, %v1651_v45 }
 0x8e5   : > { %v1699_v7 = vmul.f32 %v4575_v27, %v1656_v48  ;;  %vm1705_vm15 = vweird.f32 %v4575_v27 }
 0x8e6   : > { %4576 = vrsqrt.f32 %v1657_v11  ;;  %vm1706_vm0 = vmor %vm1704_vm12, %vm1705_vm15  ;;  %vm1714_vm3 = vweird.f32 %v1657_v11 }
 0x8e7   : > { %v1700_v54 = vmul.f32 %v4575_v27, %v1699_v7  ;;  %v2661_v7 = vpop.permute.xlu1 %2660 }
 0x8e8   : > { %4351 = vmatpush.xpose.msk.msra.mxu3 %vm113_vm2, %v2661_v7 }
 0x8e9   : > { %v1701_v50 = vmul.f32 0.5, %v1700_v54  ;;  %v2659_v54 = vpop.permute.xlu2 %2658 }
 0x8eb   : > { %v1702_v8 = vsub.f32 1.5, %v1701_v50  ;;  %v2117_v50 = vmul.f32 %v4975_v38, %v5779_v10 }
 0x8ec   : > { %v4577_v29 = vpop.eup %4576  ;;  %4352 = vmatpush.xpose.msk.msra.mxu3 %vm113_vm2, %v2659_v54 }
 0x8ed   : > { %v1703_v36 = vmul.f32 %v4575_v27, %v1702_v8  ;;  %v1709_v23 = vmul.f32 %v4577_v29, %v1657_v11  ;;  %vm1715_vm10 = vweird.f32 %v4577_v29  ;;  %v2115_v11 = vmul.f32 %v4975_v38, %v5748_v15 }
 0x8ee   : > { %vm1716_vm4 = vmor %vm1714_vm3, %vm1715_vm10  ;;  %v2119_v8 = vmul.f32 %v4977_v39, %v5756_v56 }
 0x8ef   : > { %v1710_v13 = vmul.f32 %v4577_v29, %v1709_v23  ;;  %v1707_v52 = vsel %vm1706_vm0, %v4575_v27, %v1703_v36  ;;  %v4322_v36 = vld [vmem:[%s7477_s4 + $0x2] sm:$0x1] }
 0x8f0   : > { %v1722_v49 = vmul.f32 %v1707_v52, %v5788_v19  ;;  %v2109_v19 = vmul.f32 %v4970_v34, %v5748_v15  ;;  %v2108_v23 = vadd.f32 %v4322_v36, %v5166_v18  ;;  %v2646_v36 = vmul.f32 %v4975_v38, %v5783_v17 }
 0x8f1   : > { %v1711_v1 = vmul.f32 0.5, %v1710_v13 }
 0x8f2   : > { %v1729_v3 = vmul.f32 %v5827_v16, %v1722_v49  ;;  %v5961_v0 = vperm.slane %v2108_v23, 0  ;;  %v2647_v23 = vmul.f32 %v4977_v39, %v5772_v21 }
 0x8f3   : > { %v1712_v14 = vsub.f32 1.5, %v1711_v1 }
 0x8f4   : > { %v2128_v6 = vpop.permute.xlu0 %2127  ;;  %v5899_v42 = vadd.f32 %v5832_v57, %v1729_v3 }
 0x8f5   : > { %v1713_v51 = vmul.f32 %v4577_v29, %v1712_v14  ;;  %4325 = vmatpush.xpose.msk.msra.mxu0 %vm113_vm2, %v2128_v6 }
 0x8f6   : > { %7491 = vst [vmem:[#allocation8_spill] sm:$0xff] %v5899_v42  ;;  %4274 = vmatmul.msk.f32.gmra.mxu1 %vm113_vm2, %v5899_v42 }
 0x8f7   : > { %v1717_v47 = vsel %vm1716_vm4, %v4577_v29, %v1713_v51  ;;  %v2120_v29 = vmul.f32 %v4977_v39, %v5779_v10 }
 0x8f8   : > { %4326 = vmatmul.msk.f32.vlgmr.msra.gmra.mxu0 %vm113_vm2, %v2109_v19  ;;  %v1723_v30 = vmul.f32 %v1717_v47, %v5802_v43 }
 0x8fa   : > { %v1730_v12 = vmul.f32 %v5827_v16, %v1723_v30 }
 0x8fc   : > { %v5910_v40 = vadd.f32 %v5832_v57, %v1730_v12  ;;  %v2112_v57 = vmul.f32 %v4972_v35, %v5748_v15  ;;  %v2657_v5 = vpop.permute.xlu0 %2656 }
 0x8fd   : > { %4353 = vmatpush.xpose.msk.msra.mxu3 %vm113_vm2, %v2657_v5 }
 0x8fe   : > { %4275 = vmatmul.msk.f32.gmra.mxu1 %vm113_vm2, %v5910_v40 }
 0x900   : > { %4327 = vmatmul.msk.f32.gmra.mxu0 %vm113_vm2, %v2110_v46  ;;  %v2638_v46 = vmul.f32 %v4970_v34, %v5772_v21 }
 0x908   : > { %4328 = vmatmul.msk.f32.gmra.mxu0 %vm113_vm2, %v2111_v20 }
 0x909   : > { %v1776_v43 = vpop.f32.mrf.mxu1 }
 0x90a   : > { %v1777_v2 = vadd.f32 %v4465_v28, %v1776_v43 }
 0x90c   : > { %v1794_v16 = vmax.f32 %v1777_v2, 0.0  ;;  %v2639_v2 = vmul.f32 %v4970_v34, %v5777_v22 }
 0x90e   : > { %1819 = vmatmul.f32.vlgmr.msrb.gmra.mxu3 %v1794_v16 }
 0x910   : > { %4329 = vmatmul.msk.f32.gmra.mxu0 %vm113_vm2, %v2112_v57 }
 0x911   : > { %v1779_v9 = vpop.f32.mrf.mxu1 }
 0x912   : > { %v1780_v32 = vadd.f32 %v4465_v28, %v1779_v9 }
 0x914   : > { %v1795_v48 = vmax.f32 %v1780_v32, 0.0  ;;  %v2640_v32 = vmul.f32 %v4970_v34, %v5783_v17 }
 0x916   : > { %1822 = vmatmul.f32.gmra.mxu3 %v1795_v48 }
 0x918   : > { %4330 = vmatmul.msk.f32.gmra.mxu0 %vm113_vm2, %v2113_v33 }
 0x919   : > { %v1782_v61 = vpop.f32.mrf.mxu1 }
 0x91a   : > { %v1783_v53 = vadd.f32 %v4465_v28, %v1782_v61 }
 0x91c   : > { %v1796_v59 = vmax.f32 %v1783_v53, 0.0  ;;  %v2641_v53 = vmul.f32 %v4972_v35, %v5772_v21 }
 0x91e   : > { %1825 = vmatmul.f32.gmra.mxu3 %v1796_v59 }
 0x920   : > { %4331 = vmatmul.msk.f32.gmra.mxu0 %vm113_vm2, %v2114_v4 }
 0x921   : > { %v1785_v45 = vpop.f32.mrf.mxu1 }
 0x922   : > { %v1786_v55 = vadd.f32 %v4465_v28, %v1785_v45 }
 0x924   : > { %v1797_v27 = vmax.f32 %v1786_v55, 0.0  ;;  %v2642_v55 = vmul.f32 %v4972_v35, %v5777_v22 }
 0x926   : > { %1828 = vmatmul.f32.gmra.mxu3 %v1797_v27 }
 0x928   : > { %4332 = vmatmul.msk.f32.gmra.mxu0 %vm113_vm2, %v2115_v11 }
 0x930   : > { %4333 = vmatmul.msk.f32.gmra.mxu0 %vm113_vm2, %v2116_v60  ;;  %v2643_v60 = vmul.f32 %v4972_v35, %v5783_v17 }
 0x938   : > { %4334 = vmatmul.msk.f32.gmra.mxu0 %vm113_vm2, %v2117_v50 }
 0x940   : > { %4335 = vmatmul.msk.f32.gmra.mxu0 %vm113_vm2, %v2118_v26  ;;  %v2644_v26 = vmul.f32 %v4975_v38, %v5772_v21 }
 0x948   : > { %4336 = vmatmul.msk.f32.gmra.mxu0 %vm113_vm2, %v2119_v8 }
 0x950   : > { %4337 = vmatmul.msk.f32.gmra.mxu0 %vm113_vm2, %v2120_v29  ;;  %v2645_v29 = vmul.f32 %v4975_v38, %v5777_v22 }
 0x973   : > { %v1788_v58 = vpop.f32.mrf.mxu1 }
 0x974   : > { %v1789_v13 = vadd.f32 %v4465_v28, %v1788_v58 }
 0x975   : > { %v2192_v52 = vpop.f32.mrf.mxu0 }
 0x976   : > { %v1798_v44 = vmax.f32 %v1789_v13, 0.0  ;;  %v5964_v49 = vadd.f32 %v2192_v52, %v5961_v0  ;;  %v2648_v13 = vmul.f32 %v4977_v39, %v5777_v22  ;;  %v2649_v52 = vmul.f32 %v4977_v39, %v5783_v17 }
 0x978   : > { %1831 = vmatmul.f32.gmra.mxu3 %v1798_v44  ;;  %v2228_v1 = vsel %vm593_vm1, %v5964_v49, -inf }
 0x979   : > { %2229 = vmax.xlane.f32.xlu1 %v2228_v1 }
 0x97b   : > { %v1791_v3 = vpop.f32.mrf.mxu1 }
 0x97c   : > { %v1792_v14 = vadd.f32 %v4465_v28, %v1791_v3 }
 0x97d   : > { %v2195_v6 = vpop.f32.mrf.mxu0 }
 0x97e   : > { %v1799_v51 = vmax.f32 %v1792_v14, 0.0  ;;  %v5969_v19 = vadd.f32 %v2195_v6, %v5961_v0 }
 0x980   : > { %1834 = vmatmul.f32.gmra.mxu3 %v1799_v51  ;;  %v2231_v47 = vsel %vm593_vm1, %v5969_v19, -inf }
 0x981   : > { %2232 = vmax.xlane.f32.xlu2 %v2231_v47 }
 0x985   : > { %v2198_v30 = vpop.f32.mrf.mxu0 }
 0x986   : > { %v5974_v12 = vadd.f32 %v2198_v30, %v5961_v0 }
 0x988   : > { %4354 = vmatmul.msk.f32.vlgmr.msra.gmra.mxu3 %vm113_vm2, %v2638_v46  ;;  %v2234_v20 = vsel %vm593_vm1, %v5974_v12, -inf }
 0x989   : > { %2235 = vmax.xlane.f32.xlu0 %v2234_v20 }
 0x98d   : > { %v2201_v28 = vpop.f32.mrf.mxu0 }
 0x98e   : > { %v5982_v43 = vadd.f32 %v2201_v28, %v5961_v0 }
 0x990   : > { %4355 = vmatmul.msk.f32.gmra.mxu3 %vm113_vm2, %v2639_v2  ;;  %v2237_v16 = vsel %vm593_vm1, %v5982_v43, -inf }
 0x991   : > { %2238 = vmax.xlane.f32.xlu1 %v2237_v16  ;;  %v6038_v58 = vpop.f32.mrf.mxu3 }
 0x995   : > { %v2204_v57 = vpop.f32.mrf.mxu0 }
 0x996   : > { %v5990_v9 = vadd.f32 %v2204_v57, %v5961_v0 }
 0x998   : > { %4356 = vmatmul.msk.f32.gmra.mxu3 %vm113_vm2, %v2640_v32  ;;  %v2240_v48 = vsel %vm593_vm1, %v5990_v9, -inf }
 0x999   : > { %2241 = vmax.xlane.f32.xlu2 %v2240_v48  ;;  %v6045_v44 = vpop.f32.mrf.mxu3 }
 0x99d   : > { %v2207_v33 = vpop.f32.mrf.mxu0 }
 0x99e   : > { %v5998_v61 = vadd.f32 %v2207_v33, %v5961_v0 }
 0x9a0   : > { %4357 = vmatmul.msk.f32.gmra.mxu3 %vm113_vm2, %v2641_v53  ;;  %v2243_v59 = vsel %vm593_vm1, %v5998_v61, -inf }
 0x9a1   : > { %2244 = vmax.xlane.f32.xlu0 %v2243_v59  ;;  %v6048_v1 = vpop.f32.mrf.mxu3 }
 0x9a5   : > { %v2210_v4 = vpop.f32.mrf.mxu0 }
 0x9a6   : > { %v6006_v45 = vadd.f32 %v2210_v4, %v5961_v0 }
 0x9a8   : > { %4358 = vmatmul.msk.f32.gmra.mxu3 %vm113_vm2, %v2642_v55  ;;  %v2246_v27 = vsel %vm593_vm1, %v6006_v45, -inf }
 0x9a9   : > { %2247 = vmax.xlane.f32.xlu1 %v2246_v27  ;;  %v6051_v51 = vpop.f32.mrf.mxu3 }
 0x9aa   : > { %7492 = vst [vmem:[#allocation9_spill] sm:$0xff] %v6051_v51 }
 0x9ad   : > { %v2213_v11 = vpop.f32.mrf.mxu0 }
 0x9ae   : > { %v6014_v7 = vadd.f32 %v2213_v11, %v5961_v0 }
 0x9b0   : > { %4359 = vmatmul.msk.f32.gmra.mxu3 %vm113_vm2, %v2643_v60  ;;  %v2249_v54 = vsel %vm593_vm1, %v6014_v7, -inf }
 0x9b1   : > { %2250 = vmax.xlane.f32.xlu1 %v2249_v54 }
 0x9b5   : > { %v2216_v5 = vpop.f32.mrf.mxu0 }
 0x9b6   : > { %v6022_v50 = vadd.f32 %v2216_v5, %v5961_v0 }
 0x9b8   : > { %4360 = vmatmul.msk.f32.gmra.mxu3 %vm113_vm2, %v2644_v26  ;;  %v2252_v8 = vsel %vm593_vm1, %v6022_v50, -inf }
 0x9b9   : > { %2253 = vmax.xlane.f32.xlu1 %v2252_v8 }
 0x9bd   : > { %v2219_v5 = vpop.f32.mrf.mxu0 }
 0x9be   : > { %v6085_v8 = vadd.f32 %v2219_v5, %v5961_v0 }
 0x9c0   : > { %4361 = vmatmul.msk.f32.gmra.mxu3 %vm113_vm2, %v2645_v29 }
 0x9c8   : > { %4362 = vmatmul.msk.f32.gmra.mxu3 %vm113_vm2, %v2646_v36 }
 0x9d0   : > { %4363 = vmatmul.msk.f32.gmra.mxu3 %vm113_vm2, %v2647_v23 }
 0x9d8   : > { %4364 = vmatmul.msk.f32.gmra.mxu3 %vm113_vm2, %v2648_v13 }
 0x9e0   : > { %4365 = vmatmul.msk.f32.gmra.mxu3 %vm113_vm2, %v2649_v52 }
 0x9ec   : > { %v2230_v3 = vpop.xlane.xlu1 %2229 }
 0x9ed   : > { %v2264_v14 = vsub.f32 %v5964_v49, %v2230_v3 }
 0x9ef   : > { %v2276_v6 = vmul.f32 1.442695, %v2264_v14 }
 0x9f1   : > { %4578 = vpow2.f32 %v2276_v6 }
 0x9f4   : > { %v2233_v47 = vpop.xlane.xlu2 %2232 }
 0x9f5   : > { %v2265_v30 = vsub.f32 %v5969_v19, %v2233_v47  ;;  %v4350_v19 = vld [vmem:[%s7477_s4 + $0x3] sm:$0x1] }
 0x9f6   : > { %v2637_v32 = vadd.f32 %v4350_v19, %v5166_v18  ;;  %v4452_v19 = vpack.i.bf16 %v5783_v17, %v5748_v15 }
 0x9f7   : > { %v6054_v46 = vpop.eup %4578  ;;  %v2278_v20 = vmul.f32 1.442695, %v2265_v30 }
 0x9f8   : > { %v2300_v28 = vsel %vm593_vm1, %v6054_v46, 0.0  ;;  %v6070_v48 = vperm.slane %v2637_v32, 0 }
 0x9f9   : > { %4580 = vpow2.f32 %v2278_v20  ;;  %2301 = vadd.xlane.f32.xlu2 %v2300_v28  ;;  %v4457_v28 = vpack.i.bf16 %v5772_v21, %v5777_v22 }
 0x9fb   : > { %v6058_v2 = vpop.f32.mrf.mxu3 }
 0x9fc   : > { %v2236_v4 = vpop.xlane.xlu0 %2235 }
 0x9fd   : > { %v2266_v60 = vsub.f32 %v5974_v12, %v2236_v4 }
 0x9ff   : > { %v6060_v16 = vpop.eup %4580  ;;  %v2280_v26 = vmul.f32 1.442695, %v2266_v60 }
 0xa00   : > { %v2303_v49 = vsel %vm593_vm1, %v6060_v16, 0.0 }
 0xa01   : > { %2304 = vadd.xlane.f32.xlu2 %v2303_v49  ;;  %4582 = vpow2.f32 %v2280_v26 }
 0xa03   : > { %v6067_v57 = vpop.f32.mrf.mxu3 }
 0xa07   : > { %v6094_v13 = vpop.eup %4582 }
 0xa08   : > { %v2306_v6 = vsel %vm593_vm1, %v6094_v13, 0.0 }
 0xa0b   : > { %v2721_v33 = vpop.f32.mrf.mxu3 }
 0xa0c   : > { %v6073_v53 = vadd.f32 %v2721_v33, %v6070_v48  ;;  %v2242_v55 = vpop.xlane.xlu2 %2241 }
 0xa0d   : > { %v2268_v18 = vsub.f32 %v5990_v9, %v2242_v55  ;;  %v2255_v9 = vsel %vm593_vm1, %v6085_v8, -inf }
 0xa0e   : > { %v2757_v59 = vsel %vm593_vm1, %v6073_v53, -inf }
 0xa0f   : > { %2758 = vmax.xlane.f32.xlu2 %v2757_v59  ;;  %v2284_v29 = vmul.f32 1.442695, %v2268_v18  ;;  %v2239_v59 = vpop.xlane.xlu1 %2238 }
 0xa10   : > { %v2267_v4 = vsub.f32 %v5982_v43, %v2239_v59 }
 0xa11   : > { %4584 = vpow2.f32 %v2284_v29 }
 0xa12   : > { %v2282_v55 = vmul.f32 1.442695, %v2267_v4 }
 0xa13   : > { %v2724_v27 = vpop.f32.mrf.mxu3 }
 0xa14   : > { %v6078_v11 = vadd.f32 %v2724_v27, %v6070_v48  ;;  %v2245_v22 = vpop.xlane.xlu0 %2244  ;;  %v2222_v27 = vpop.f32.mrf.mxu0  ;;  %4586 = vpow2.f32 %v2282_v55 }
 0xa15   : > { %v2269_v60 = vsub.f32 %v5998_v61, %v2245_v22  ;;  %v6125_v10 = vadd.f32 %v2222_v27, %v5961_v0 }
 0xa16   : > { %v2760_v54 = vsel %vm593_vm1, %v6078_v11, -inf }
 0xa17   : > { %2761 = vmax.xlane.f32.xlu0 %v2760_v54  ;;  %v6096_v3 = vpop.eup %4584  ;;  %v2286_v56 = vmul.f32 1.442695, %v2269_v60  ;;  %v2258_v29 = vsel %vm593_vm1, %v6125_v10, -inf }
 0xa18   : > { %v2312_v30 = vsel %vm593_vm1, %v6096_v3, 0.0 }
 0xa19   : > { %4588 = vpow2.f32 %v2286_v56 }
 0xa1a   : > { %v6122_v17 = vpop.eup %4586 }
 0xa1b   : > { %v2727_v36 = vpop.f32.mrf.mxu3  ;;  %v2309_v54 = vsel %vm593_vm1, %v6122_v17, 0.0 }
 0xa1c   : > { %v6088_v23 = vadd.f32 %v2727_v36, %v6070_v48  ;;  %v2225_v5 = vpop.f32.mrf.mxu0 }
 0xa1d   : > { %v6138_v36 = vadd.f32 %v2225_v5, %v5961_v0 }
 0xa1e   : > { %v2763_v12 = vsel %vm593_vm1, %v6088_v23, -inf }
 0xa1f   : > { %2764 = vmax.xlane.f32.xlu1 %v2763_v12  ;;  %2256 = vmax.xlane.f32.xlu0 %v2255_v9 }
 0xa23   : > { %v2730_v52 = vpop.f32.mrf.mxu3 }
 0xa24   : > { %v6099_v14 = vadd.f32 %v2730_v52, %v6070_v48  ;;  %v6142_v52 = vpop.eup %4588 }
 0xa25   : > { %v2315_v0 = vsel %vm593_vm1, %v6142_v52, 0.0 }
 0xa26   : > { %v2766_v47 = vsel %vm593_vm1, %v6099_v14, -inf }
 0xa27   : > { %2307 = vadd.xlane.f32.xlu1 %v2306_v6  ;;  %2767 = vmax.xlane.f32.xlu2 %v2766_v47 }
 0xa28   : > { %2313 = vadd.xlane.f32.xlu0 %v2312_v30 }
 0xa2b   : > { %v2733_v20 = vpop.f32.mrf.mxu3 }
 0xa2c   : > { %v6120_v15 = vadd.f32 %v2733_v20, %v6070_v48 }
 0xa2e   : > { %v2769_v43 = vsel %vm593_vm1, %v6120_v15, -inf }
 0xa33   : > { %v2736_v49 = vpop.f32.mrf.mxu3 }
 0xa34   : > { %v6133_v26 = vadd.f32 %v2736_v49, %v6070_v48 }
 0xa36   : > { %v2772_v9 = vsel %vm593_vm1, %v6133_v26, -inf }
 0xa3b   : > { %v2739_v32 = vpop.f32.mrf.mxu3 }
 0xa3c   : > { %4458 = vrot.lane.b32.xlu0 %v4457_v28, %s4766_s5  ;;  %v6149_v30 = vadd.f32 %v2739_v32, %v6070_v48 }
 0xa3e   : > { %v2775_v28 = vsel %vm593_vm1, %v6149_v30, -inf }
 0xa3f   : > { %4448 = vrot.lane.b32.xlu2 %v4447_v62, %s4766_s5  ;;  %v2248_v62 = vpop.xlane.xlu1 %2247 }
 0xa40   : > { %4453 = vrot.lane.b32.xlu1 %v4452_v19, %s4766_s5  ;;  %v2270_v61 = vsub.f32 %v6006_v45, %v2248_v62  ;;  %v2261_v45 = vsel %vm593_vm1, %v6138_v36, -inf }
 0xa42   : > { %v2288_v12 = vmul.f32 1.442695, %v2270_v61 }
 0xa43   : > { %v2742_v33 = vpop.f32.mrf.mxu3 }
 0xa44   : > { %4590 = vpow2.f32 %v2288_v12  ;;  %v6163_v32 = vadd.f32 %v2742_v33, %v6070_v48 }
 0xa46   : > { %v2778_v60 = vsel %vm593_vm1, %v6163_v32, -inf }
 0xa47   : > { %v6179_v56 = vpop.xlane.xlu1 %2250 }
 0xa4a   : > { %v6158_v49 = vpop.eup %4590 }
 0xa4b   : > { %v2745_v21 = vpop.f32.mrf.mxu3  ;;  %v2318_v59 = vsel %vm593_vm1, %v6158_v49, 0.0 }
 0xa4c   : > { %v6182_v62 = vadd.f32 %v2745_v21, %v6070_v48 }
 0xa4e   : > { %v2781_v61 = vsel %vm593_vm1, %v6182_v62, -inf }
 0xa53   : > { %v2748_v18 = vpop.f32.mrf.mxu3 }
 0xa54   : > { %v6154_v20 = vadd.f32 %v2748_v18, %v6070_v48 }
 0xa56   : > { %v2784_v19 = vsel %vm593_vm1, %v6154_v20, -inf }
 0xa5b   : > { %v2751_v6 = vpop.f32.mrf.mxu3 }
 0xa5c   : > { %v6170_v22 = vadd.f32 %v2751_v6, %v6070_v48 }
 0xa5e   : > { %v2787_v33 = vsel %vm593_vm1, %v6170_v22, -inf }
 0xa63   : > { %v2754_v4 = vpop.f32.mrf.mxu3 }
 0xa64   : > { %v6173_v27 = vadd.f32 %v2754_v4, %v6070_v48 }
 0xa66   : > { %2770 = vmax.xlane.f32.xlu0 %v2769_v43  ;;  %v2790_v43 = vsel %vm593_vm1, %v6173_v27, -inf }
 0xa68   : > { %2310 = vadd.xlane.f32.xlu2 %v2309_v54 }
 0xa6a   : > { %2259 = vmax.xlane.f32.xlu1 %v2258_v29  ;;  %v6189_v29 = vpop.xlane.xlu1 %2253 }
 0xa6c   : > { %v6146_v47 = vpop.xlane.xlu2 %2301 }
 0xa6d   : > { %vm2341_vm6 = vweird.f32 %v6146_v47 }
 0xa6e   : > { %2773 = vmax.xlane.f32.xlu0 %v2772_v9 }
 0xa70   : > { %2262 = vmax.xlane.f32.xlu2 %v2261_v45 }
 0xa72   : > { %2316 = vadd.xlane.f32.xlu1 %v2315_v0 }
 0xa74   : > { %v6167_v55 = vpop.xlane.xlu2 %2304 }
 0xa75   : > { %v2362_v25 = vand.u32 2147483648, %v6167_v55  ;;  %vm2356_vm11 = vweird.f32 %v6167_v55 }
 0xa76   : > { %2776 = vmax.xlane.f32.xlu0 %v2775_v28 }
 0xa78   : > { %2785 = vmax.xlane.f32.xlu2 %v2784_v19 }
 0xa7a   : > { %2319 = vadd.xlane.f32.xlu1 %v2318_v59 }
 0xa7e   : > { %2779 = vmax.xlane.f32.xlu0 %v2778_v60 }
 0xa80   : > { %2788 = vmax.xlane.f32.xlu2 %v2787_v33 }
 0xa82   : > { %2791 = vmax.xlane.f32.xlu1 %v2790_v43  ;;  %v2759_v18 = vpop.xlane.xlu2 %2758 }
 0xa83   : > { %v2793_v54 = vsub.f32 %v6073_v53, %v2759_v18 }
 0xa85   : > { %v2805_v5 = vmul.f32 1.442695, %v2793_v54 }
 0xa86   : > { %2782 = vmax.xlane.f32.xlu0 %v2781_v61 }
 0xa87   : > { %4592 = vpow2.f32 %v2805_v5 }
 0xa8a   : > { %v2762_v12 = vpop.xlane.xlu0 %2761 }
 0xa8b   : > { %v2794_v9 = vsub.f32 %v6078_v11, %v2762_v12 }
 0xa8d   : > { %v6192_v48 = vpop.eup %4592  ;;  %v2807_v21 = vmul.f32 1.442695, %v2794_v9 }
 0xa8e   : > { %v2829_v45 = vsel %vm593_vm1, %v6192_v48, 0.0 }
 0xa8f   : > { %4594 = vpow2.f32 %v2807_v21  ;;  %2830 = vadd.xlane.f32.xlu0 %v2829_v45 }
 0xa90   : > { %4596 = vrcp.f32 %v6146_v47 }
 0xa92   : > { %v2765_v53 = vpop.xlane.xlu1 %2764  ;;  %v6209_v18 = vpop.xlane.xlu0 %2256 }
 0xa93   : > { %v2795_v6 = vsub.f32 %v6088_v23, %v2765_v53 }
 0xa95   : > { %v6197_v0 = vpop.eup %4594  ;;  %v2809_v28 = vmul.f32 1.442695, %v2795_v6 }
 0xa96   : > { %v2832_v19 = vsel %vm593_vm1, %v6197_v0, 0.0  ;;  %v4597_v59 = vpop.eup %4596 }
 0xa97   : > { %4598 = vpow2.f32 %v2809_v28  ;;  %2833 = vadd.xlane.f32.xlu0 %v2832_v19  ;;  %v2337_v23 = vmul.f32 %v4597_v59, %v6146_v47  ;;  %vm2342_vm5 = vweird.f32 %v4597_v59 }
 0xa98   : > { %4600 = vrcp.f32 %v6167_v55  ;;  %vm2343_vm7 = vmor %vm2341_vm6, %vm2342_vm5 }
 0xa99   : > { %v2338_v54 = vsub.f32 1.0, %v2337_v23  ;;  %v2345_v23 = vand.u32 2147483647, %v6146_v47 }
 0xa9a   : > { %v2768_v11 = vpop.xlane.xlu2 %2767  ;;  %v2308_v5 = vpop.xlane.xlu1 %2307 }
 0xa9b   : > { %v2796_v4 = vsub.f32 %v6099_v14, %v2768_v11  ;;  %v2339_v45 = vmul.f32 %v4597_v59, %v2338_v54  ;;  %v6216_v11 = vpop.xlane.xlu0 %2313  ;;  %vm2346_vm8 = vcmp.eq.f32.partialorder %v2345_v23, 8.507059e+37  ;;  %v2363_v23 = vor.u32 1.1754944e-38, %v2362_v25 }
 0xa9c   : > { %vm2371_vm10 = vweird.f32 %v2308_v5 }
 0xa9d   : > { %v6203_v60 = vpop.eup %4598  ;;  %v2811_v33 = vmul.f32 1.442695, %v2796_v4  ;;  %v2340_v28 = vadd.f32 %v4597_v59, %v2339_v45 }
 0xa9e   : > { %v2835_v43 = vsel %vm593_vm1, %v6203_v60, 0.0  ;;  %v4601_v12 = vpop.eup %4600 }
 0xa9f   : > { %4602 = vpow2.f32 %v2811_v33  ;;  %2836 = vadd.xlane.f32.xlu0 %v2835_v43  ;;  %v2352_v53 = vmul.f32 %v4601_v12, %v6167_v55  ;;  %v2347_v33 = vand.u32 2147483648, %v6146_v47  ;;  %v2344_v43 = vsel %vm2343_vm7, %v4597_v59, %v2340_v28 }
 0xaa0   : > { %4604 = vrcp.f32 %v2308_v5  ;;  %vm2357_vm9 = vweird.f32 %v4601_v12  ;;  %v2360_v59 = vand.u32 2147483647, %v6167_v55  ;;  %v2375_v55 = vand.u32 2147483647, %v2308_v5 }
 0xaa1   : > { %v2353_v19 = vsub.f32 1.0, %v2352_v53  ;;  %vm2358_vm15 = vmor %vm2356_vm11, %vm2357_vm9  ;;  %4606 = vrcp.f32 %v6216_v11  ;;  %vm2401_vm11 = vweird.f32 %v6216_v11 }
 0xaa2   : > { %v4449_v61 = vpop.permute.xlu2 %4448  ;;  %vm2361_vm12 = vcmp.eq.f32.partialorder %v2360_v59, 8.507059e+37  ;;  %vm2376_vm4 = vcmp.eq.f32.partialorder %v2375_v55, 8.507059e+37  ;;  %v2273_v55 = vsub.f32 %v6085_v8, %v6209_v18 }
 0xaa3   : > { %v4450_v9 = vunpack.i.l.bf16 %v4449_v61  ;;  %v4451_v21 = vunpack.i.h.bf16 %v4449_v61  ;;  %v2354_v54 = vmul.f32 %v4601_v12, %v2353_v19 }
 0xaa5   : > { %v6211_v14 = vpop.eup %4602  ;;  %2574 = vmatpush.msra.mxu1 %v4450_v9  ;;  %v2348_v9 = vor.u32 1.1754944e-38, %v2347_v33  ;;  %v2355_v53 = vadd.f32 %v4601_v12, %v2354_v54 }
 0xaa6   : > { %v2838_v6 = vsel %vm593_vm1, %v6211_v14, 0.0  ;;  %v4605_v4 = vpop.eup %4604 }
 0xaa7   : > { %2839 = vadd.xlane.f32.xlu0 %v2838_v6  ;;  %2575 = vmatpush.msra.mxu1 %v4451_v21  ;;  %v2367_v61 = vmul.f32 %v4605_v4, %v2308_v5  ;;  %v2349_v6 = vsel %vm2346_vm8, %v2348_v9, %v2344_v43  ;;  %v2359_v33 = vsel %vm2358_vm15, %v4601_v12, %v2355_v53  ;;  %vm2372_vm0 = vweird.f32 %v4605_v4 }
 0xaa8   : > { %v2350_v47 = vmul.f32 %v6054_v46, %v2349_v6  ;;  %vm2373_vm3 = vmor %vm2371_vm10, %vm2372_vm0 }
 0xaa9   : > { %v2368_v21 = vsub.f32 1.0, %v2367_v61  ;;  %v2377_v61 = vand.u32 2147483648, %v2308_v5  ;;  %v2271_v5 = vsub.f32 %v6014_v7, %v6179_v56 }
 0xaab   : > { %v2369_v19 = vmul.f32 %v4605_v4, %v2368_v21  ;;  %v6232_v21 = vpop.eup %4606  ;;  %v2290_v53 = vmul.f32 1.442695, %v2271_v5  ;;  %v2407_v5 = vand.u32 2147483648, %v6216_v11 }
 0xaac   : > { %vm2402_vm8 = vweird.f32 %v6232_v21 }
 0xaad   : > { %v2370_v54 = vadd.f32 %v4605_v4, %v2369_v19  ;;  %vm6272_vm15 = vmor %vm2401_vm11, %vm2402_vm8 }
 0xaae   : > { %v4459_v45 = vpop.permute.xlu0 %4458 }
 0xaaf   : > { %v4460_v28 = vunpack.i.l.bf16 %v4459_v45  ;;  %v4461_v43 = vunpack.i.h.bf16 %v4459_v45 }
 0xab2   : > { %v4454_v41 = vpop.permute.xlu1 %4453 }
 0xab3   : > { %v4456_v51 = vunpack.i.h.bf16 %v4454_v41  ;;  %v4455_v42 = vunpack.i.l.bf16 %v4454_v41  ;;  %v2364_v41 = vsel %vm2361_vm12, %v2363_v23, %v2359_v33 }
 0xab4   : > { %v2365_v46 = vmul.f32 %v6060_v16, %v2364_v41 }
 0xab5   : > { %2576 = vmatpush.msra.mxu1 %v4455_v42  ;;  %3103 = vmatpush.msrb.mxu2 %v4456_v51  ;;  %v2374_v42 = vsel %vm2373_vm3, %v4605_v4, %v2370_v54  ;;  %v2378_v51 = vor.u32 1.1754944e-38, %v2377_v61 }
 0xab6   : > { %4338 = vmatmul.msk.f32.vlgmr.msra.gmra.mxu1 %vm593_vm1, %v2350_v47  ;;  %v2272_v47 = vsub.f32 %v6022_v50, %v6189_v29 }
 0xab7   : > { %3104 = vmatpush.msrb.mxu2 %v4460_v28  ;;  %v2379_v12 = vsel %vm2376_vm4, %v2378_v51, %v2374_v42 }
 0xab8   : > { %v2380_v25 = vmul.f32 %v6094_v13, %v2379_v12  ;;  %v2397_v13 = vmul.f32 %v6232_v21, %v6216_v11  ;;  %v2292_v56 = vmul.f32 1.442695, %v2272_v47 }
 0xab9   : > { %3105 = vmatpush.msrb.mxu2 %v4461_v43 }
 0xaba   : > { %v2398_v28 = vsub.f32 1.0, %v2397_v13 }
 0xabc   : > { %v2399_v50 = vmul.f32 %v6232_v21, %v2398_v28 }
 0xabe   : > { %4339 = vmatmul.msk.f32.gmra.mxu1 %vm593_vm1, %v2365_v46 }
 0xac6   : > { %4340 = vmatmul.msk.f32.gmra.mxu1 %vm593_vm1, %v2380_v25 }
 0xad9   : > { %v2771_v9 = vpop.xlane.xlu0 %2770 }
 0xada   : > { %v2797_v6 = vsub.f32 %v6120_v15, %v2771_v9 }
 0xadb   : > { %v2311_v16 = vpop.xlane.xlu2 %2310 }
 0xadc   : > { %v2813_v45 = vmul.f32 1.442695, %v2797_v6  ;;  %4608 = vrcp.f32 %v2311_v16  ;;  %v2392_v29 = vand.u32 2147483648, %v2311_v16  ;;  %v2390_v46 = vand.u32 2147483647, %v2311_v16 }
 0xadd   : > { %v6236_v4 = vpop.xlane.xlu1 %2259  ;;  %vm2386_vm6 = vweird.f32 %v2311_v16  ;;  %v2400_v6 = vadd.f32 %v6232_v21, %v2399_v50 }
 0xade   : > { %4610 = vpow2.f32 %v2813_v45  ;;  %v2393_v25 = vor.u32 1.1754944e-38, %v2392_v29  ;;  %vm2391_vm9 = vcmp.eq.f32.partialorder %v2390_v46, 8.507059e+37 }
 0xadf   : > { %4612 = vpow2.f32 %v2290_v53 }
 0xae1   : > { %v2774_v59 = vpop.xlane.xlu0 %2773 }
 0xae2   : > { %v4609_v15 = vpop.eup %4608  ;;  %v2798_v19 = vsub.f32 %v6133_v26, %v2774_v59 }
 0xae3   : > { %v2382_v33 = vmul.f32 %v4609_v15, %v2311_v16  ;;  %v6245_v41 = vpop.xlane.xlu2 %2262  ;;  %vm2387_vm5 = vweird.f32 %v4609_v15  ;;  %v2405_v16 = vand.u32 2147483647, %v6216_v11  ;;  %v2404_v11 = vsel %vm6272_vm15, %v6232_v21, %v2400_v6 }
 0xae4   : > { %v6243_v23 = vpop.eup %4610  ;;  %v2815_v7 = vmul.f32 1.442695, %v2798_v19  ;;  %vm2388_vm7 = vmor %vm2386_vm6, %vm2387_vm5  ;;  %v2294_v19 = vmul.f32 1.442695, %v2273_v55  ;;  %v2275_v21 = vsub.f32 %v6138_v36, %v6245_v41 }
 0xae5   : > { %v2383_v43 = vsub.f32 1.0, %v2382_v33  ;;  %v6247_v54 = vpop.xlane.xlu1 %2316  ;;  %v2841_v61 = vsel %vm593_vm1, %v6243_v23, 0.0  ;;  %v6255_v12 = vpop.eup %4612  ;;  %vm2406_vm12 = vcmp.eq.f32.partialorder %v2405_v16, 8.507059e+37 }
 0xae6   : > { %4614 = vpow2.f32 %v2815_v7  ;;  %2842 = vadd.xlane.f32.xlu2 %v2841_v61  ;;  %v2274_v61 = vsub.f32 %v6125_v10, %v6236_v4  ;;  %vm2416_vm10 = vweird.f32 %v6247_v54  ;;  %v2420_v36 = vand.u32 2147483647, %v6247_v54 }
 0xae7   : > { %v2384_v26 = vmul.f32 %v4609_v15, %v2383_v43  ;;  %4616 = vrcp.f32 %v6247_v54 }
 0xae8   : > { %4618 = vpow2.f32 %v2292_v56  ;;  %v2408_v56 = vor.u32 1.1754944e-38, %v2407_v5  ;;  %v2296_v6 = vmul.f32 1.442695, %v2274_v61  ;;  %vm2421_vm4 = vcmp.eq.f32.partialorder %v2420_v36, 8.507059e+37 }
 0xae9   : > { %v2777_v42 = vpop.xlane.xlu0 %2776  ;;  %v2385_v51 = vadd.f32 %v4609_v15, %v2384_v26 }
 0xaea   : > { %v2799_v9 = vsub.f32 %v6149_v30, %v2777_v42  ;;  %v2321_v30 = vsel %vm593_vm1, %v6255_v12, 0.0  ;;  %v2409_v29 = vsel %vm2406_vm12, %v2408_v56, %v2404_v11 }
 0xaeb   : > { %v2389_v45 = vsel %vm2388_vm7, %v4609_v15, %v2385_v51  ;;  %v2786_v43 = vpop.xlane.xlu2 %2785  ;;  %v2422_v51 = vand.u32 2147483648, %v6247_v54  ;;  %v2410_v10 = vmul.f32 %v6096_v3, %v2409_v29  ;;  %v2298_v3 = vmul.f32 1.442695, %v2275_v21 }
 0xaec   : > { %v6261_v13 = vpop.eup %4614  ;;  %v2817_v8 = vmul.f32 1.442695, %v2799_v9  ;;  %v2394_v18 = vsel %vm2391_vm9, %v2393_v25, %v2389_v45 }
 0xaed   : > { %v4617_v53 = vpop.eup %4616  ;;  %v6265_v47 = vpop.xlane.xlu1 %2319  ;;  %v2844_v59 = vsel %vm593_vm1, %v6261_v13, 0.0  ;;  %v2395_v15 = vmul.f32 %v6122_v17, %v2394_v18  ;;  %v2423_v18 = vor.u32 1.1754944e-38, %v2422_v51 }
 0xaee   : > { %v2412_v33 = vmul.f32 %v4617_v53, %v6247_v54  ;;  %4620 = vpow2.f32 %v2817_v8  ;;  %2322 = vadd.xlane.f32.xlu2 %v2321_v30  ;;  %2845 = vadd.xlane.f32.xlu1 %v2844_v59  ;;  %v6280_v7 = vpop.eup %4618  ;;  %vm2417_vm0 = vweird.f32 %v4617_v53  ;;  %v2802_v59 = vsub.f32 %v6154_v20, %v2786_v43 }
 0xaef   : > { %4622 = vrcp.f32 %v6265_v47  ;;  %4341 = vmatmul.msk.f32.gmra.mxu1 %vm593_vm1, %v2395_v15  ;;  %v2324_v55 = vsel %vm593_vm1, %v6280_v7, 0.0  ;;  %vm6301_vm3 = vmor %vm2416_vm10, %vm2417_vm0  ;;  %vm2431_vm5 = vweird.f32 %v6265_v47  ;;  %v2435_v43 = vand.u32 2147483647, %v6265_v47 }
 0xaf0   : > { %v2413_v17 = vsub.f32 1.0, %v2412_v33  ;;  %4624 = vpow2.f32 %v2294_v19 }
 0xaf1   : > { %v2780_v50 = vpop.xlane.xlu0 %2779  ;;  %vm2436_vm8 = vcmp.eq.f32.partialorder %v2435_v43, 8.507059e+37 }
 0xaf2   : > { %v2414_v26 = vmul.f32 %v4617_v53, %v2413_v17  ;;  %v2800_v46 = vsub.f32 %v6163_v32, %v2780_v50  ;;  %v2437_v17 = vand.u32 2147483648, %v6265_v47 }
 0xaf3   : > { %v2789_v16 = vpop.xlane.xlu2 %2788 }
 0xaf4   : > { %v6291_v42 = vpop.eup %4620  ;;  %v2819_v25 = vmul.f32 1.442695, %v2800_v46  ;;  %v2415_v4 = vadd.f32 %v4617_v53, %v2414_v26  ;;  %v2803_v61 = vsub.f32 %v6170_v22, %v2789_v16  ;;  %v2823_v26 = vmul.f32 1.442695, %v2802_v59 }
 0xaf5   : > { %v4623_v9 = vpop.eup %4622  ;;  %v2847_v32 = vsel %vm593_vm1, %v6291_v42, 0.0  ;;  %v2792_v28 = vpop.xlane.xlu1 %2791  ;;  %v2438_v21 = vor.u32 1.1754944e-38, %v2437_v17 }
 0xaf6   : > { %v2427_v41 = vmul.f32 %v4623_v9, %v6265_v47  ;;  %4626 = vpow2.f32 %v2819_v25  ;;  %2325 = vadd.xlane.f32.xlu2 %v2324_v55  ;;  %2848 = vadd.xlane.f32.xlu1 %v2847_v32  ;;  %v2419_v45 = vsel %vm6301_vm3, %v4617_v53, %v2415_v4  ;;  %v6308_v8 = vpop.eup %4624  ;;  %vm2432_vm6 = vweird.f32 %v4623_v9 }
 0xaf7   : > { %4342 = vmatmul.msk.f32.gmra.mxu1 %vm593_vm1, %v2410_v10  ;;  %4628 = vpow2.f32 %v2296_v6  ;;  %v2424_v33 = vsel %vm2421_vm4, %v2423_v18, %v2419_v45  ;;  %v2327_v53 = vsel %vm593_vm1, %v6308_v8, 0.0  ;;  %vm2433_vm7 = vmor %vm2431_vm5, %vm2432_vm6  ;;  %v2825_v55 = vmul.f32 1.442695, %v2803_v61 }
 0xaf8   : > { %v2428_v54 = vsub.f32 1.0, %v2427_v41  ;;  %4630 = vpow2.f32 %v2298_v3  ;;  %v2425_v29 = vmul.f32 %v6142_v52, %v2424_v33 }
 0xaf9   : > { %v2783_v30 = vpop.xlane.xlu0 %2782 }
 0xafa   : > { %v2429_v15 = vmul.f32 %v4623_v9, %v2428_v54  ;;  %v2801_v19 = vsub.f32 %v6182_v62, %v2783_v30  ;;  %v2804_v62 = vsub.f32 %v6173_v27, %v2792_v28 }
 0xafc   : > { %v6315_v11 = vpop.eup %4626  ;;  %v2430_v56 = vadd.f32 %v4623_v9, %v2429_v15  ;;  %v2821_v20 = vmul.f32 1.442695, %v2801_v19  ;;  %v2827_v27 = vmul.f32 1.442695, %v2804_v62 }
 0xafd   : > { %v2850_v50 = vsel %vm593_vm1, %v6315_v11, 0.0  ;;  %v6324_v46 = vpop.eup %4628 }
 0xafe   : > { %4632 = vpow2.f32 %v2821_v20  ;;  %2328 = vadd.xlane.f32.xlu2 %v2327_v53  ;;  %2851 = vadd.xlane.f32.xlu1 %v2850_v50  ;;  %v2434_v22 = vsel %vm2433_vm7, %v4623_v9, %v2430_v56  ;;  %v6327_v47 = vpop.eup %4630  ;;  %v2330_v10 = vsel %vm593_vm1, %v6324_v46, 0.0 }
 0xaff   : > { %4343 = vmatmul.msk.f32.gmra.mxu1 %vm593_vm1, %v2425_v29  ;;  %4634 = vpow2.f32 %v2823_v26  ;;  %v2439_v25 = vsel %vm2436_vm8, %v2438_v21, %v2434_v22  ;;  %v2333_v6 = vsel %vm593_vm1, %v6327_v47, 0.0 }
 0xb00   : > { %v2440_v9 = vmul.f32 %v6158_v49, %v2439_v25 }
 0xb02   : > { %v2831_v51 = vpop.xlane.xlu0 %2830 }
 0xb03   : > { %4636 = vrcp.f32 %v2831_v51  ;;  %v2876_v49 = vand.u32 2147483648, %v2831_v51  ;;  %v2874_v59 = vand.u32 2147483647, %v2831_v51  ;;  %vm2870_vm11 = vweird.f32 %v2831_v51 }
 0xb04   : > { %v6329_v52 = vpop.eup %4632  ;;  %4638 = vpow2.f32 %v2825_v55 }
 0xb05   : > { %4640 = vpow2.f32 %v2827_v27  ;;  %v2853_v4 = vsel %vm593_vm1, %v6329_v52, 0.0  ;;  %v6339_v32 = vpop.eup %4634  ;;  %v2877_v33 = vor.u32 1.1754944e-38, %v2876_v49  ;;  %vm2875_vm12 = vcmp.eq.f32.partialorder %v2874_v59, 8.507059e+37 }
 0xb06   : > { %2331 = vadd.xlane.f32.xlu2 %v2330_v10  ;;  %2854 = vadd.xlane.f32.xlu0 %v2853_v4  ;;  %v2856_v54 = vsel %vm593_vm1, %v6339_v32, 0.0 }
 0xb07   : > { %2334 = vadd.xlane.f32.xlu1 %v2333_v6  ;;  %4344 = vmatmul.msk.f32.gmra.mxu1 %vm593_vm1, %v2440_v9 }
 0xb09   : > { %v4637_v36 = vpop.eup %4636 }
 0xb0a   : > { %v6341_v41 = vpop.eup %4638  ;;  %v2866_v5 = vmul.f32 %v4637_v36, %v2831_v51  ;;  %v2834_v3 = vpop.xlane.xlu0 %2833  ;;  %vm2871_vm9 = vweird.f32 %v4637_v36 }
 0xb0b   : > { %v6343_v45 = vpop.eup %4640  ;;  %4642 = vrcp.f32 %v2834_v3  ;;  %v2859_v16 = vsel %vm593_vm1, %v6341_v41, 0.0  ;;  %vm2872_vm15 = vmor %vm2870_vm11, %vm2871_vm9  ;;  %v2891_v50 = vand.u32 2147483648, %v2834_v3  ;;  %v2889_v29 = vand.u32 2147483647, %v2834_v3 }
 0xb0c   : > { %v2867_v18 = vsub.f32 1.0, %v2866_v5  ;;  %v2862_v15 = vsel %vm593_vm1, %v6343_v45, 0.0  ;;  %vm2885_vm10 = vweird.f32 %v2834_v3 }
 0xb0d   : > { %v2892_v21 = vor.u32 1.1754944e-38, %v2891_v50  ;;  %vm2890_vm4 = vcmp.eq.f32.partialorder %v2889_v29, 8.507059e+37 }
 0xb0e   : > { %v2868_v30 = vmul.f32 %v4637_v36, %v2867_v18  ;;  %2857 = vadd.xlane.f32.xlu2 %v2856_v54  ;;  %2860 = vadd.xlane.f32.xlu0 %v2859_v16 }
 0xb0f   : > { %2863 = vadd.xlane.f32.xlu1 %v2862_v15 }
 0xb10   : > { %v2869_v28 = vadd.f32 %v4637_v36, %v2868_v30 }
 0xb11   : > { %v4643_v19 = vpop.eup %4642 }
 0xb12   : > { %v2873_v53 = vsel %vm2872_vm15, %v4637_v36, %v2869_v28  ;;  %v2881_v56 = vmul.f32 %v4643_v19, %v2834_v3  ;;  %v2837_v17 = vpop.xlane.xlu0 %2836  ;;  %vm2886_vm0 = vweird.f32 %v4643_v19 }
 0xb13   : > { %v2878_v61 = vsel %vm2875_vm12, %v2877_v33, %v2873_v53  ;;  %4644 = vrcp.f32 %v2837_v17  ;;  %vm2887_vm3 = vmor %vm2885_vm10, %vm2886_vm0  ;;  %v2904_v6 = vand.u32 2147483647, %v2837_v17  ;;  %vm2900_vm6 = vweird.f32 %v2837_v17 }
 0xb14   : > { %v2879_v20 = vmul.f32 %v6192_v48, %v2878_v61  ;;  %v2882_v43 = vsub.f32 1.0, %v2881_v56  ;;  %v2906_v48 = vand.u32 2147483648, %v2837_v17 }
 0xb15   : > { %vm2905_vm8 = vcmp.eq.f32.partialorder %v2904_v6, 8.507059e+37 }
 0xb16   : > { %v2883_v62 = vmul.f32 %v4643_v19, %v2882_v43  ;;  %4366 = vmatmul.msk.f32.vlgmr.msrb.gmra.mxu2 %vm593_vm1, %v2879_v20  ;;  %v2907_v3 = vor.u32 1.1754944e-38, %v2906_v48 }
 0xb18   : > { %v2884_v26 = vadd.f32 %v4643_v19, %v2883_v62 }
 0xb19   : > { %v4645_v22 = vpop.eup %4644 }
 0xb1a   : > { %v2896_v55 = vmul.f32 %v4645_v22, %v2837_v17  ;;  %v2840_v27 = vpop.xlane.xlu0 %2839  ;;  %v2888_v51 = vsel %vm2887_vm3, %v4643_v19, %v2884_v26  ;;  %vm2901_vm5 = vweird.f32 %v4645_v22 }
 0xb1b   : > { %4646 = vrcp.f32 %v2840_v27  ;;  %v2893_v10 = vsel %vm2890_vm4, %v2892_v21, %v2888_v51  ;;  %vm2902_vm7 = vmor %vm2900_vm6, %vm2901_vm5  ;;  %v2921_v59 = vand.u32 2147483648, %v2840_v27  ;;  %vm2915_vm11 = vweird.f32 %v2840_v27 }
 0xb1c   : > { %v2897_v25 = vsub.f32 1.0, %v2896_v55  ;;  %v2894_v4 = vmul.f32 %v6197_v0, %v2893_v10  ;;  %v2919_v0 = vand.u32 2147483647, %v2840_v27 }
 0xb1d   : > { %v2922_v19 = vor.u32 1.1754944e-38, %v2921_v59 }
 0xb1e   : > { %v2898_v9 = vmul.f32 %v4645_v22, %v2897_v25  ;;  %4367 = vmatmul.msk.f32.gmra.mxu2 %vm593_vm1, %v2894_v4  ;;  %vm2920_vm12 = vcmp.eq.f32.partialorder %v2919_v0, 8.507059e+37 }
 0xb20   : > { %v2899_v36 = vadd.f32 %v4645_v22, %v2898_v9 }
 0xb21   : > { %v4647_v5 = vpop.eup %4646 }
 0xb22   : > { %v2911_v18 = vmul.f32 %v4647_v5, %v2840_v27  ;;  %v2903_v49 = vsel %vm2902_vm7, %v4645_v22, %v2899_v36  ;;  %vm2916_vm9 = vweird.f32 %v4647_v5 }
 0xb23   : > { %v2908_v54 = vsel %vm2905_vm8, %v2907_v3, %v2903_v49  ;;  %vm2917_vm15 = vmor %vm2915_vm11, %vm2916_vm9 }
 0xb24   : > { %v2912_v16 = vsub.f32 1.0, %v2911_v18  ;;  %v2909_v30 = vmul.f32 %v6203_v60, %v2908_v54 }
 0xb26   : > { %v2913_v15 = vmul.f32 %v4647_v5, %v2912_v16  ;;  %4368 = vmatmul.msk.f32.gmra.mxu2 %vm593_vm1, %v2909_v30 }
 0xb28   : > { %v2914_v28 = vadd.f32 %v4647_v5, %v2913_v15 }
 0xb2a   : > { %v2918_v33 = vsel %vm2917_vm15, %v4647_v5, %v2914_v28 }
 0xb2b   : > { %v2923_v53 = vsel %vm2920_vm12, %v2922_v19, %v2918_v33 }
 0xb2c   : > { %v2924_v56 = vmul.f32 %v6211_v14, %v2923_v53 }
 0xb2e   : > { %4369 = vmatmul.msk.f32.gmra.mxu2 %vm593_vm1, %v2924_v56 }
 0xb59   : > { %v2843_v17 = vpop.xlane.xlu2 %2842 }
 0xb5a   : > { %4648 = vrcp.f32 %v2843_v17  ;;  %v2936_v22 = vand.u32 2147483648, %v2843_v17  ;;  %vm2930_vm10 = vweird.f32 %v2843_v17  ;;  %v2934_v55 = vand.u32 2147483647, %v2843_v17 }
 0xb5c   : > { %v2937_v4 = vor.u32 1.1754944e-38, %v2936_v22  ;;  %vm2935_vm4 = vcmp.eq.f32.partialorder %v2934_v55, 8.507059e+37 }
 0xb60   : > { %v4649_v60 = vpop.eup %4648 }
 0xb61   : > { %v2926_v61 = vmul.f32 %v4649_v60, %v2843_v17  ;;  %v2846_v20 = vpop.xlane.xlu1 %2845  ;;  %v2323_v43 = vpop.xlane.xlu2 %2322  ;;  %vm2931_vm0 = vweird.f32 %v4649_v60 }
 0xb62   : > { %4650 = vrcp.f32 %v2846_v20  ;;  %vm2932_vm3 = vmor %vm2930_vm10, %vm2931_vm0  ;;  %vm2945_vm5 = vweird.f32 %v2846_v20  ;;  %v2949_v54 = vand.u32 2147483647, %v2846_v20  ;;  %v2951_v30 = vand.u32 2147483648, %v2846_v20 }
 0xb63   : > { %v2927_v62 = vsub.f32 1.0, %v2926_v61  ;;  %4652 = vrcp.f32 %v2323_v43  ;;  %v2450_v59 = vand.u32 2147483647, %v2323_v43  ;;  %v2452_v15 = vand.u32 2147483648, %v2323_v43 }
 0xb64   : > { %vm2446_vm9 = vweird.f32 %v2323_v43  ;;  %vm2950_vm15 = vcmp.eq.f32.partialorder %v2949_v54, 8.507059e+37 }
 0xb65   : > { %v2928_v50 = vmul.f32 %v4649_v60, %v2927_v62  ;;  %v2453_v61 = vor.u32 1.1754944e-38, %v2452_v15  ;;  %vm2451_vm12 = vcmp.eq.f32.partialorder %v2450_v59, 8.507059e+37 }
 0xb67   : > { %v2929_v29 = vadd.f32 %v4649_v60, %v2928_v50 }
 0xb68   : > { %v4651_v26 = vpop.eup %4650 }
 0xb69   : > { %v4653_v21 = vpop.eup %4652  ;;  %v2941_v14 = vmul.f32 %v4651_v26, %v2846_v20  ;;  %v6359_v27 = vpop.xlane.xlu1 %2848  ;;  %v2933_v48 = vsel %vm2932_vm3, %v4649_v60, %v2929_v29  ;;  %vm2946_vm6 = vweird.f32 %v4651_v26  ;;  %v2952_v60 = vor.u32 1.1754944e-38, %v2951_v30 }
 0xb6a   : > { %v6361_v51 = vpop.xlane.xlu2 %2325  ;;  %v2442_v25 = vmul.f32 %v4653_v21, %v2323_v43  ;;  %4654 = vrcp.f32 %v6359_v27  ;;  %v2938_v5 = vsel %vm2935_vm4, %v2937_v4, %v2933_v48  ;;  %vm2447_vm7 = vweird.f32 %v4653_v21  ;;  %vm2947_vm8 = vmor %vm2945_vm5, %vm2946_vm6 }
 0xb6b   : > { %v2942_v10 = vsub.f32 1.0, %v2941_v14  ;;  %4656 = vrcp.f32 %v6361_v51  ;;  %v2939_v3 = vmul.f32 %v6243_v23, %v2938_v5  ;;  %vm2448_vm11 = vmor %vm2446_vm9, %vm2447_vm7  ;;  %vm2960_vm10 = vweird.f32 %v6359_v27 }
 0xb6c   : > { %v2443_v9 = vsub.f32 1.0, %v2442_v25  ;;  %v2467_v5 = vand.u32 2147483648, %v6361_v51  ;;  %vm2461_vm5 = vweird.f32 %v6361_v51 }
 0xb6d   : > { %v2943_v6 = vmul.f32 %v4651_v26, %v2942_v10  ;;  %4370 = vmatmul.msk.f32.gmra.mxu2 %vm593_vm1, %v2939_v3  ;;  %v2465_v3 = vand.u32 2147483647, %v6361_v51 }
 0xb6e   : > { %v2444_v36 = vmul.f32 %v4653_v21, %v2443_v9  ;;  %v2468_v15 = vor.u32 1.1754944e-38, %v2467_v5 }
 0xb6f   : > { %v2944_v49 = vadd.f32 %v4651_v26, %v2943_v6 }
 0xb70   : > { %v6366_v18 = vpop.eup %4654  ;;  %v2445_v23 = vadd.f32 %v4653_v21, %v2444_v36 }
 0xb71   : > { %v6368_v16 = vpop.eup %4656  ;;  %v2956_v0 = vmul.f32 %v6366_v18, %v6359_v27  ;;  %v6373_v28 = vpop.xlane.xlu1 %2851  ;;  %v2948_v17 = vsel %vm2947_vm8, %v4651_v26, %v2944_v49  ;;  %vm2961_vm0 = vweird.f32 %v6366_v18  ;;  %vm2466_vm8 = vcmp.eq.f32.partialorder %v2465_v3, 8.507059e+37 }
 0xb72   : > { %v6375_v19 = vpop.xlane.xlu2 %2328  ;;  %v2457_v33 = vmul.f32 %v6368_v16, %v6361_v51  ;;  %4658 = vrcp.f32 %v6373_v28  ;;  %v2449_v50 = vsel %vm2448_vm11, %v4653_v21, %v2445_v23  ;;  %v2953_v22 = vsel %vm2950_vm15, %v2952_v60, %v2948_v17  ;;  %vm6408_vm3 = vmor %vm2960_vm10, %vm2961_vm0 }
 0xb73   : > { %v2957_v53 = vsub.f32 1.0, %v2956_v0  ;;  %4660 = vrcp.f32 %v6375_v19  ;;  %v2454_v29 = vsel %vm2451_vm12, %v2453_v61, %v2449_v50  ;;  %v2954_v43 = vmul.f32 %v6261_v13, %v2953_v22 }
 0xb74   : > { %v2458_v56 = vsub.f32 1.0, %v2457_v33  ;;  %v2455_v14 = vmul.f32 %v6255_v12, %v2454_v29  ;;  %v2966_v21 = vand.u32 2147483648, %v6359_v27  ;;  %v2964_v13 = vand.u32 2147483647, %v6359_v27 }
 0xb75   : > { %v2958_v62 = vmul.f32 %v6366_v18, %v2957_v53  ;;  %4371 = vmatmul.msk.f32.gmra.mxu2 %vm593_vm1, %v2954_v43  ;;  %vm2462_vm4 = vweird.f32 %v6368_v16  ;;  %vm2975_vm9 = vweird.f32 %v6373_v28  ;;  %v2981_v22 = vand.u32 2147483648, %v6373_v28 }
 0xb76   : > { %v2459_v20 = vmul.f32 %v6368_v16, %v2458_v56  ;;  %4345 = vmatmul.msk.f32.gmra.mxu1 %vm593_vm1, %v2455_v14  ;;  %v2967_v49 = vor.u32 1.1754944e-38, %v2966_v21  ;;  %vm2965_vm6 = vcmp.eq.f32.partialorder %v2964_v13, 8.507059e+37  ;;  %vm2463_vm7 = vmor %vm2461_vm5, %vm2462_vm4  ;;  %vm2476_vm11 = vweird.f32 %v6375_v19 }
 0xb77   : > { %v2959_v26 = vadd.f32 %v6366_v18, %v2958_v62  ;;  %v2480_v13 = vand.u32 2147483647, %v6375_v19 }
 0xb78   : > { %v6383_v55 = vpop.eup %4658  ;;  %v2460_v36 = vadd.f32 %v6368_v16, %v2459_v20  ;;  %v2482_v20 = vand.u32 2147483648, %v6375_v19 }
 0xb79   : > { %v6388_v25 = vpop.eup %4660  ;;  %v6392_v10 = vpop.xlane.xlu0 %2854  ;;  %v2971_v48 = vmul.f32 %v6383_v55, %v6373_v28  ;;  %v2963_v27 = vsel %vm6408_vm3, %v6366_v18, %v2959_v26  ;;  %vm2976_vm15 = vweird.f32 %v6383_v55 }
 0xb7a   : > { %4662 = vrcp.f32 %v6392_v10  ;;  %v6400_v12 = vpop.xlane.xlu2 %2331  ;;  %v2472_v4 = vmul.f32 %v6388_v25, %v6375_v19  ;;  %v6406_v9 = vpop.xlane.xlu1 %2334  ;;  %v2464_v0 = vsel %vm2463_vm7, %v6368_v16, %v2460_v36  ;;  %v2968_v23 = vsel %vm2965_vm6, %v2967_v49, %v2963_v27  ;;  %vm6465_vm10 = vmor %vm2975_vm9, %vm2976_vm15  ;;  %v4285_v27 = vld [vmem:[%s5658_s3 + $0x190] sm:$0xff] }
 0xb7b   : > { %4664 = vrcp.f32 %v6400_v12  ;;  %v2972_v54 = vsub.f32 1.0, %v2971_v48  ;;  %v2469_v53 = vsel %vm2466_vm8, %v2468_v15, %v2464_v0  ;;  %v2969_v61 = vmul.f32 %v6291_v42, %v2968_v23 }
 0xb7c   : > { %4666 = vrcp.f32 %v6406_v9  ;;  %v2473_v30 = vsub.f32 1.0, %v2472_v4  ;;  %v2470_v60 = vmul.f32 %v6280_v7, %v2469_v53  ;;  %v2979_v16 = vand.u32 2147483647, %v6373_v28 }
 0xb7d   : > { %v2973_v18 = vmul.f32 %v6383_v55, %v2972_v54  ;;  %4372 = vmatmul.msk.f32.gmra.mxu2 %vm593_vm1, %v2969_v61  ;;  %vm2477_vm12 = vweird.f32 %v6388_v25  ;;  %v2982_v36 = vor.u32 1.1754944e-38, %v2981_v22  ;;  %v2483_v5 = vor.u32 1.1754944e-38, %v2482_v20 }
 0xb7e   : > { %v2474_v56 = vmul.f32 %v6388_v25, %v2473_v30  ;;  %4346 = vmatmul.msk.f32.gmra.mxu1 %vm593_vm1, %v2470_v60  ;;  %vm6456_vm0 = vcmp.eq.f32.partialorder %v2979_v16, 8.507059e+37  ;;  %v2996_v3 = vand.u32 2147483648, %v6392_v10  ;;  %vm6475_vm4 = vmor %vm2476_vm11, %vm2477_vm12  ;;  %vm2990_vm5 = vweird.f32 %v6392_v10 }
 0xb7f   : > { %v2974_v43 = vadd.f32 %v6383_v55, %v2973_v18  ;;  %v2497_v30 = vand.u32 2147483648, %v6400_v12  ;;  %vm2481_vm7 = vcmp.eq.f32.partialorder %v2480_v13, 8.507059e+37  ;;  %v2994_v23 = vand.u32 2147483647, %v6392_v10 }
 0xb80   : > { %v6422_v59 = vpop.eup %4662  ;;  %v2475_v26 = vadd.f32 %v6388_v25, %v2474_v56  ;;  %vm2491_vm9 = vweird.f32 %v6400_v12  ;;  %v2512_v6 = vand.u32 2147483648, %v6406_v9 }
 0xb81   : > { %v2986_v33 = vmul.f32 %v6422_v59, %v6392_v10  ;;  %v6428_v51 = vpop.eup %4664  ;;  %v6438_v29 = vpop.xlane.xlu0 %2860  ;;  %vm2991_vm3 = vweird.f32 %v6422_v59  ;;  %v2978_v19 = vsel %vm6465_vm10, %v6383_v55, %v2974_v43  ;;  %v2498_v22 = vor.u32 1.1754944e-38, %v2497_v30 }
 0xb82   : > { %v6433_v62 = vpop.eup %4666  ;;  %v2487_v50 = vmul.f32 %v6428_v51, %v6400_v12  ;;  %v6446_v7 = vpop.xlane.xlu2 %2857  ;;  %4668 = vrcp.f32 %v6438_v29  ;;  %vm2492_vm6 = vweird.f32 %v6428_v51  ;;  %v2479_v15 = vsel %vm6475_vm4, %v6388_v25, %v2475_v26  ;;  %vm6490_vm8 = vmor %vm2990_vm5, %vm2991_vm3 }
 0xb83   : > { %v2987_v17 = vsub.f32 1.0, %v2986_v33  ;;  %v2502_v21 = vmul.f32 %v6433_v62, %v6406_v9  ;;  %4670 = vrcp.f32 %v6446_v7  ;;  %v2495_v33 = vand.u32 2147483647, %v6400_v12  ;;  %v6497_v18 = vpop.xlane.xlu1 %2863  ;;  %vm6501_vm11 = vmor %vm2491_vm9, %vm2492_vm6 }
 0xb84   : > { %v2488_v14 = vsub.f32 1.0, %v2487_v50  ;;  %v2997_v25 = vor.u32 1.1754944e-38, %v2996_v3  ;;  %v2484_v55 = vsel %vm2481_vm7, %v2483_v5, %v2479_v15  ;;  %4672 = vrcp.f32 %v6497_v18  ;;  %v4286_v5 = vld [vmem:[%s5658_s3 + $0x198] sm:$0xff] }
 0xb85   : > { %v2988_v42 = vmul.f32 %v6422_v59, %v2987_v17  ;;  %v2503_v54 = vsub.f32 1.0, %v2502_v21  ;;  %v2983_v17 = vsel %vm6456_vm0, %v2982_v36, %v2978_v19  ;;  %v2485_v10 = vmul.f32 %v6308_v8, %v2484_v55  ;;  %3197 = vmatpush.msrb.mxu0 %v4286_v5 }
 0xb86   : > { %v2489_v4 = vmul.f32 %v6428_v51, %v2488_v14  ;;  %v2984_v61 = vmul.f32 %v6315_v11, %v2983_v17  ;;  %vm2995_vm15 = vcmp.eq.f32.partialorder %v2994_v23, 8.507059e+37  ;;  %vm2496_vm12 = vcmp.eq.f32.partialorder %v2495_v33, 8.507059e+37 }
 0xb87   : > { %v2989_v28 = vadd.f32 %v6422_v59, %v2988_v42  ;;  %v2504_v50 = vmul.f32 %v6433_v62, %v2503_v54  ;;  %4347 = vmatmul.msk.f32.gmra.mxu1 %vm593_vm1, %v2485_v10  ;;  %vm2507_vm0 = vweird.f32 %v6433_v62  ;;  %v3011_v43 = vand.u32 2147483648, %v6446_v7  ;;  %3198 = vmatpush.msrb.mxu0 %v4285_v27 }
 0xb88   : > { %v2490_v49 = vadd.f32 %v6428_v51, %v2489_v4  ;;  %v6499_v53 = vpop.eup %4668  ;;  %4373 = vmatmul.msk.f32.gmra.mxu2 %vm593_vm1, %v2984_v61  ;;  %v3009_v21 = vand.u32 2147483647, %v6446_v7  ;;  %vm3005_vm3 = vweird.f32 %v6446_v7  ;;  %vm2506_vm4 = vweird.f32 %v6406_v9 }
 0xb89   : > { %v4671_v60 = vpop.eup %4670  ;;  %v2993_v16 = vsel %vm6490_vm8, %v6422_v59, %v2989_v28  ;;  %v3016_v8 = vmul.f32 %v6499_v53, %v6438_v29  ;;  %v2505_v42 = vadd.f32 %v6433_v62, %v2504_v50  ;;  %v2510_v3 = vand.u32 2147483647, %v6406_v9  ;;  %vm2508_vm6 = vmor %vm2506_vm4, %vm2507_vm0 }
 0xb8a   : > { %v2494_v12 = vsel %vm6501_vm11, %v6428_v51, %v2490_v49  ;;  %v3001_v20 = vmul.f32 %v4671_v60, %v6446_v7  ;;  %v2998_v59 = vsel %vm2995_vm15, %v2997_v25, %v2993_v16  ;;  %vm3006_vm10 = vweird.f32 %v4671_v60  ;;  %v4673_v4 = vpop.eup %4672  ;;  %v2578_v16 = vpop.f32.mrf.mxu1 }
 0xb8b   : > { %v2499_v51 = vsel %vm2496_vm12, %v2498_v22, %v2494_v12  ;;  %v3017_v26 = vsub.f32 1.0, %v3016_v8  ;;  %v2999_v13 = vmul.f32 %v6329_v52, %v2998_v59  ;;  %vm3007_vm5 = vmor %vm3005_vm3, %vm3006_vm10  ;;  %v3031_v52 = vmul.f32 %v4673_v4, %v6497_v18 }
 0xb8c   : > { %v3002_v11 = vsub.f32 1.0, %v3001_v20  ;;  %v2500_v48 = vmul.f32 %v6324_v46, %v2499_v51  ;;  %v3012_v46 = vor.u32 1.1754944e-38, %v3011_v43  ;;  %vm3010_vm7 = vcmp.eq.f32.partialorder %v3009_v21, 8.507059e+37 }
 0xb8d   : > { %v3018_v49 = vmul.f32 %v6499_v53, %v3017_v26  ;;  %v2509_v7 = vsel %vm2508_vm6, %v6433_v62, %v2505_v42  ;;  %v2513_v9 = vor.u32 1.1754944e-38, %v2512_v6  ;;  %vm2511_vm8 = vcmp.eq.f32.partialorder %v2510_v3, 8.507059e+37 }
 0xb8e   : > { %v3003_v14 = vmul.f32 %v4671_v60, %v3002_v11  ;;  %v3032_v15 = vsub.f32 1.0, %v3031_v52  ;;  %vm3021_vm9 = vweird.f32 %v6499_v53  ;;  %v3026_v23 = vand.u32 2147483648, %v6438_v29  ;;  %v4284_v11 = vld [vmem:[%s5658_s3 + $0x188] sm:$0xff] }
 0xb8f   : > { %4348 = vmatmul.msk.f32.gmra.mxu1 %vm593_vm1, %v2500_v48  ;;  %v2514_v30 = vsel %vm2511_vm8, %v2513_v9, %v2509_v7  ;;  %v3019_v19 = vadd.f32 %v6499_v53, %v3018_v49  ;;  %vm3020_vm11 = vweird.f32 %v6438_v29  ;;  %v3024_v33 = vand.u32 2147483647, %v6438_v29  ;;  %3199 = vmatpush.msrb.mxu0 %v4284_v11 }
 0xb90   : > { %v3004_v36 = vadd.f32 %v4671_v60, %v3003_v14  ;;  %4374 = vmatmul.msk.f32.gmra.mxu2 %vm593_vm1, %v2999_v13  ;;  %v2515_v62 = vmul.f32 %v6327_v47, %v2514_v30  ;;  %vm3022_vm15 = vmor %vm3020_vm11, %vm3021_vm9  ;;  %v3033_v25 = vmul.f32 %v4673_v4, %v3032_v15  ;;  %v3027_v55 = vor.u32 1.1754944e-38, %v3026_v23  ;;  %v4283_v14 = vld [vmem:[%s5658_s3 + $0x180] sm:$0xff] }
 0xb91   : > { %v3023_v56 = vsel %vm3022_vm15, %v6499_v53, %v3019_v19  ;;  %vm3025_vm12 = vcmp.eq.f32.partialorder %v3024_v33, 8.507059e+37  ;;  %vm3036_vm0 = vweird.f32 %v4673_v4  ;;  %vm3035_vm10 = vweird.f32 %v6497_v18  ;;  %3200 = vmatpush.msrb.mxu0 %v4283_v14 }
 0xb92   : > { %v3008_v28 = vsel %vm3007_vm5, %v4671_v60, %v3004_v36  ;;  %v3028_v17 = vsel %vm3025_vm12, %v3027_v55, %v3023_v56  ;;  %v3041_v60 = vand.u32 2147483648, %v6497_v18  ;;  %v3039_v29 = vand.u32 2147483647, %v6497_v18  ;;  %vm3037_vm3 = vmor %vm3035_vm10, %vm3036_vm0  ;;  %v2581_v50 = vpop.f32.mrf.mxu1 }
 0xb93   : > { %v3013_v54 = vsel %vm3010_vm7, %v3012_v46, %v3008_v28  ;;  %v3029_v47 = vmul.f32 %v6341_v41, %v3028_v17  ;;  %v2614_v6 = vmul.f32 %v4970_v34, %v2578_v16  ;;  %v2615_v49 = vmul.f32 %v4970_v34, %v2581_v50 }
 0xb94   : > { %v3014_v0 = vmul.f32 %v6339_v32, %v3013_v54  ;;  %v3034_v32 = vadd.f32 %v4673_v4, %v3033_v25  ;;  %v3042_v61 = vor.u32 1.1754944e-38, %v3041_v60  ;;  %vm3040_vm4 = vcmp.eq.f32.partialorder %v3039_v29, 8.507059e+37 }
 0xb96   : > { %v3038_v10 = vsel %vm3037_vm3, %v4673_v4, %v3034_v32 }
 0xb97   : > { %4349 = vmatmul.msk.f32.gmra.mxu1 %vm593_vm1, %v2515_v62  ;;  %v3043_v53 = vsel %vm3040_vm4, %v3042_v61, %v3038_v10 }
 0xb98   : > { %4375 = vmatmul.msk.f32.gmra.mxu2 %vm593_vm1, %v3014_v0  ;;  %v3044_v12 = vmul.f32 %v6343_v45, %v3043_v53 }
 0xb99   : > { %v3107_v20 = vpop.f32.mrf.mxu2 }
 0xb9a   : > { %v2584_v22 = vpop.f32.mrf.mxu1 }
 0xb9b   : > { %v2616_v33 = vmul.f32 %v4970_v34, %v2584_v22 }
 0xba0   : > { %4376 = vmatmul.msk.f32.gmra.mxu2 %vm593_vm1, %v3029_v47  ;;  %v3143_v47 = vmul.f32 %v4970_v34, %v3107_v20 }
 0xba1   : > { %v3110_v8 = vpop.f32.mrf.mxu2 }
 0xba2   : > { %v2587_v18 = vpop.f32.mrf.mxu1 }
 0xba3   : > { %v2617_v13 = vmul.f32 %v4972_v35, %v2587_v18  ;;  %v3144_v18 = vmul.f32 %v4970_v34, %v3110_v8 }
 0xba5   : > { %v2620_v5 = vadd.f32 %v2617_v13, %v2614_v6 }
 0xba8   : > { %4377 = vmatmul.msk.f32.gmra.mxu2 %vm593_vm1, %v3044_v12 }
 0xba9   : > { %v3113_v51 = vpop.f32.mrf.mxu2 }
 0xbaa   : > { %v2590_v41 = vpop.f32.mrf.mxu1 }
 0xbab   : > { %v2618_v28 = vmul.f32 %v4972_v35, %v2590_v41 }
 0xbad   : > { %v2621_v54 = vadd.f32 %v2618_v28, %v2615_v49 }
 0xbb1   : > { %v3116_v42 = vpop.f32.mrf.mxu2 }
 0xbb2   : > { %v2593_v59 = vpop.f32.mrf.mxu1  ;;  %v3146_v60 = vmul.f32 %v4972_v35, %v3116_v42 }
 0xbb3   : > { %v2619_v0 = vmul.f32 %v4972_v35, %v2593_v59 }
 0xbb4   : > { %v3149_v53 = vadd.f32 %v3146_v60, %v3143_v47 }
 0xbb5   : > { %v2622_v56 = vadd.f32 %v2619_v0, %v2616_v33  ;;  %v4719_v33 = vld [vmem:[#allocation2 + $0x48] sm:$0xff] }
 0xbba   : > { %v2596_v43 = vpop.f32.mrf.mxu1 }
 0xbbb   : > { %v2623_v36 = vmul.f32 %v4975_v38, %v2596_v43 }
 0xbbd   : > { %v2626_v27 = vadd.f32 %v2623_v36, %v2620_v5  ;;  %v4467_v36 = vld [vmem:[%s5676_s23 + $0xc] ss:$0 sm:$0xff]  ;;  %s6838_s23 = scalar_lea.vmem %s7445_s16, %s4201_s6  ;;  %s4767_s6 = smov (%p332_p3), 32  }
 0xbbe   :  { %s4127_s16 = sshll.u32 (%p332_p3), %s7451_s22, 4  ;;  %s4128_s16 = int_to_ptr.hbm [resolvable:$true] %s4127_s16 }
 0xbf0   : > { %v3119_v26 = vpop.f32.mrf.mxu2 }
 0xbf1   : > { %v3147_v50 = vmul.f32 %v4972_v35, %v3119_v26 }
 0xbf3   : > { %v2599_v21 = vpop.f32.mrf.mxu1  ;;  %v3150_v41 = vadd.f32 %v3147_v50, %v3144_v18 }
 0xbf4   : > { %v2624_v7 = vmul.f32 %v4975_v38, %v2599_v21  ;;  %v3145_v21 = vmul.f32 %v4970_v34, %v3113_v51 }
 0xbf6   : > { %v2627_v15 = vadd.f32 %v2624_v7, %v2621_v54 }
 0xbf8   : > { %v3122_v45 = vpop.f32.mrf.mxu2 }
 0xbf9   : > { %v3148_v14 = vmul.f32 %v4972_v35, %v3122_v45 }
 0xbfb   : > { %v2602_v48 = vpop.f32.mrf.mxu1 }
 0xbfc   : > { %v2625_v62 = vmul.f32 %v4975_v38, %v2602_v48  ;;  %v3151_v48 = vadd.f32 %v3148_v14, %v3145_v21 }
 0xbfe   : > { %v2628_v17 = vadd.f32 %v2625_v62, %v2622_v56 }
 0xc00   : > { %v3125_v4 = vpop.f32.mrf.mxu2 }
 0xc01   : > { %v3152_v10 = vmul.f32 %v4975_v38, %v3125_v4 }
 0xc03   : > { %v3155_v16 = vadd.f32 %v3152_v10, %v3149_v53  ;;  %v4721_v10 = vld [vmem:[#allocation2 + $0x58] sm:$0xff] }
 0xc04   : > { %v2605_v3 = vpop.f32.mrf.mxu1 }
 0xc05   : > { %v2629_v46 = vmul.f32 %v4977_v39, %v2605_v3 }
 0xc07   : > { %v2632_v52 = vadd.f32 %v2629_v46, %v2626_v27  ;;  %v4716_v27 = vld [vmem:[#allocation2 + $0x30] sm:$0xff] }
 0xc09   : > { %4378 = vmatmul.msk.f32.vlgmr.msrb.gmra.mxu0 %vm113_vm2, %v2632_v52  ;;  %v4717_v52 = vld [vmem:[#allocation2 + $0x38] sm:$0xff] }
 0xc0b   : > { %v3128_v9 = vpop.f32.mrf.mxu2 }
 0xc0c   : > { %v2608_v30 = vpop.f32.mrf.mxu1  ;;  %v3153_v11 = vmul.f32 %v4975_v38, %v3128_v9 }
 0xc0d   : > { %v2630_v19 = vmul.f32 %v4977_v39, %v2608_v30  ;;  %v4718_v30 = vld [vmem:[#allocation2 + $0x40] sm:$0xff] }
 0xc0e   : > { %v3156_v42 = vadd.f32 %v3153_v11, %v3150_v41 }
 0xc0f   : > { %v2633_v23 = vadd.f32 %v2630_v19, %v2627_v15 }
 0xc11   : > { %4379 = vmatmul.msk.f32.gmra.mxu0 %vm113_vm2, %v2633_v23 }
 0xc13   : > { %v3131_v25 = vpop.f32.mrf.mxu2 }
 0xc14   : > { %v2611_v55 = vpop.f32.mrf.mxu1  ;;  %v3154_v26 = vmul.f32 %v4975_v38, %v3131_v25 }
 0xc15   : > { %v2631_v32 = vmul.f32 %v4977_v39, %v2611_v55 }
 0xc16   : > { %v3157_v4 = vadd.f32 %v3154_v26, %v3151_v48 }
 0xc17   : > { %v2634_v29 = vadd.f32 %v2631_v32, %v2628_v17  ;;  %v4720_v17 = vld [vmem:[#allocation2 + $0x50] sm:$0xff] }
 0xc19   : > { %4380 = vmatmul.msk.f32.gmra.mxu0 %vm113_vm2, %v2634_v29 }
 0xc1b   : > { %v3134_v61 = vpop.f32.mrf.mxu2 }
 0xc1c   : > { %v3158_v12 = vmul.f32 %v4977_v39, %v3134_v61 }
 0xc1e   : > { %v3161_v22 = vadd.f32 %v3158_v12, %v3155_v16 }
 0xc21   : > { %4381 = vmatmul.msk.f32.gmra.mxu0 %vm113_vm2, %v3161_v22 }
 0xc23   : > { %v3137_v20 = vpop.f32.mrf.mxu2 }
 0xc24   : > { %v3159_v59 = vmul.f32 %v4977_v39, %v3137_v20 }
 0xc26   : > { %v3162_v43 = vadd.f32 %v3159_v59, %v3156_v42 }
 0xc29   : > { %4382 = vmatmul.msk.f32.gmra.mxu0 %vm113_vm2, %v3162_v43 }
 0xc2b   : > { %v3140_v8 = vpop.f32.mrf.mxu2 }
 0xc2c   : > { %v3160_v13 = vmul.f32 %v4977_v39, %v3140_v8 }
 0xc2e   : > { %v3163_v6 = vadd.f32 %v3160_v13, %v3157_v4 }
 0xc31   : > { %4383 = vmatmul.msk.f32.gmra.mxu0 %vm113_vm2, %v3163_v6  ;;  %v6619_v6 = vld [vmem:[%s5928_s1] ss:$0 sm:$0xff] }
 0xc86   : > { %v3202_v5 = vpop.f32.mrf.mxu0 }
 0xc87   : > { %v3203_v3 = vadd.f32 %v4467_v36, %v3202_v5  ;;  %v1827_v5 = vadd.f32 %v6619_v6, %v6048_v1  ;;  %v1836_v1 = vadd.f32 %v6619_v6, %v6067_v57  ;;  %v1821_v57 = vadd.f32 %v6619_v6, %v6038_v58 }
 0xc88   : > { %v1833_v58 = vadd.f32 %v6619_v6, %v6058_v2 }
 0xc89   : > { %v3220_v45 = vadd.f32 %v4716_v27, %v3203_v3 }
 0xc8b   : > { %v3226_v46 = vsel %vm113_vm2, %v3220_v45, 0.0 }
 0xc8c   : > { %3227 = vadd.xlane.f32.xlu2 %v3226_v46  ;;  %v4293_v46 = vld [vmem:[%s5797_s30 + $0x190] sm:$0xff] }
 0xc8e   : > { %v3205_v51 = vpop.f32.mrf.mxu0 }
 0xc8f   : > { %v3206_v28 = vadd.f32 %v4467_v36, %v3205_v51 }
 0xc91   : > { %v3221_v49 = vadd.f32 %v4717_v52, %v3206_v28  ;;  %v6630_v28 = vadd.f32 %v1827_v5, %v5859_v37 }
 0xc93   : > { %v3229_v7 = vsel %vm113_vm2, %v3221_v49, 0.0 }
 0xc94   : > { %3230 = vadd.xlane.f32.xlu0 %v3229_v7 }
 0xc96   : > { %v3208_v9 = vpop.f32.mrf.mxu0 }
 0xc97   : > { %v3209_v54 = vadd.f32 %v4467_v36, %v3208_v9  ;;  %v1850_v9 = vsel %vm113_vm2, %v6630_v28, 0.0 }
 0xc99   : > { %v3222_v15 = vadd.f32 %v4718_v30, %v3209_v54 }
 0xc9b   : > { %v3232_v19 = vsel %vm113_vm2, %v3222_v15, 0.0 }
 0xc9c   : > { %3233 = vadd.xlane.f32.xlu1 %v3232_v19 }
 0xc9e   : > { %v3211_v0 = vpop.f32.mrf.mxu0 }
 0xc9f   : > { %v3212_v23 = vadd.f32 %v4467_v36, %v3211_v0  ;;  %v1824_v0 = vadd.f32 %v6619_v6, %v6045_v44 }
 0xca1   : > { %v3223_v62 = vadd.f32 %v4719_v33, %v3212_v23 }
 0xca3   : > { %v3235_v25 = vsel %vm113_vm2, %v3223_v62, 0.0 }
 0xca4   : > { %3236 = vadd.xlane.f32.xlu2 %v3235_v25 }
 0xca6   : > { %v3214_v56 = vpop.f32.mrf.mxu0 }
 0xca7   : > { %v3215_v55 = vadd.f32 %v4467_v36, %v3214_v56  ;;  %v7509_v56 = vld [vmem:[#allocation8_spill] sm:$0xff] }
 0xca9   : > { %v3224_v32 = vadd.f32 %v4720_v17, %v3215_v55  ;;  %v6669_v55 = vadd.f32 %v1833_v58, %v7509_v56  ;;  %v4291_v17 = vld [vmem:[%s5797_s30 + $0x180] sm:$0xff] }
 0xcab   : > { %v3238_v60 = vsel %vm113_vm2, %v3224_v32, 0.0 }
 0xcac   : > { %3239 = vadd.xlane.f32.xlu0 %v3238_v60 }
 0xcae   : > { %v3217_v29 = vpop.f32.mrf.mxu0 }
 0xcaf   : > { %v3218_v47 = vadd.f32 %v4467_v36, %v3217_v29 }
 0xcb1   : > { %v3225_v61 = vadd.f32 %v4721_v10, %v3218_v47 }
 0xcb3   : > { %v3241_v53 = vsel %vm113_vm2, %v3225_v61, 0.0 }
 0xcb4   : > { %3242 = vadd.xlane.f32.xlu1 %v3241_v53 }
 0xcff   : > { %v3228_v12 = vpop.xlane.xlu2 %3227 }
 0xd00   : > { %v3244_v16 = vmul.f32 %v3228_v12, %v4931_v24 }
 0xd02   : > { %v6598_v50 = vsub.f32 %v3220_v45, %v3244_v16  ;;  %v4294_v45 = vld [vmem:[%s5797_s30 + $0x198] sm:$0xff] }
 0xd03   : > { %3405 = vmatpush.msrb.mxu1 %v4294_v45 }
 0xd04   : > { %v3256_v22 = vmul.f32 %v6598_v50, %v6598_v50 }
 0xd05   : > { %3406 = vmatpush.msrb.mxu1 %v4293_v46 }
 0xd06   : > { %v3262_v18 = vsel %vm113_vm2, %v3256_v22, 0.0 }
 0xd07   : > { %v3231_v11 = vpop.xlane.xlu0 %3230  ;;  %3263 = vadd.xlane.f32.xlu2 %v3262_v18 }
 0xd08   : > { %v3245_v20 = vmul.f32 %v3231_v11, %v4931_v24  ;;  %v4289_v11 = vld [vmem:[%s5821_s29 + $0x18] sm:$0x3] }
 0xd0a   : > { %v6604_v41 = vsub.f32 %v3221_v49, %v3245_v20 }
 0xd0c   : > { %v3257_v59 = vmul.f32 %v6604_v41, %v6604_v41 }
 0xd0e   : > { %v3265_v42 = vsel %vm113_vm2, %v3257_v59, 0.0 }
 0xd0f   : > { %3266 = vadd.xlane.f32.xlu0 %v3265_v42  ;;  %v3234_v14 = vpop.xlane.xlu1 %3233 }
 0xd10   : > { %v3246_v43 = vmul.f32 %v3234_v14, %v4931_v24 }
 0xd12   : > { %v6610_v21 = vsub.f32 %v3222_v15, %v3246_v43  ;;  %v6645_v15 = vadd.f32 %v1836_v1, %v5910_v40  ;;  %v6657_v40 = vadd.f32 %v1821_v57, %v5845_v31  ;;  %v1856_v31 = vsel %vm113_vm2, %v6669_v55, 0.0 }
 0xd14   : > { %v3258_v26 = vmul.f32 %v6610_v21, %v6610_v21  ;;  %v1859_v23 = vsel %vm113_vm2, %v6645_v15, 0.0  ;;  %v1844_v44 = vsel %vm113_vm2, %v6657_v40, 0.0 }
 0xd16   : > { %v3268_v8 = vsel %vm113_vm2, %v3258_v26, 0.0  ;;  %v6679_v26 = vperm.slane %v4289_v11, 0 }
 0xd17   : > { %v3237_v48 = vpop.xlane.xlu2 %3236  ;;  %3269 = vadd.xlane.f32.xlu1 %v3268_v8 }
 0xd18   : > { %v3247_v13 = vmul.f32 %v3237_v48, %v4931_v24 }
 0xd1a   : > { %v6616_v4 = vsub.f32 %v3223_v62, %v3247_v13  ;;  %v6660_v62 = vadd.f32 %v1824_v0, %v5852_v63  ;;  %v4292_v63 = vld [vmem:[%s5797_s30 + $0x188] sm:$0xff]  ;;  %v6681_v13 = vperm.slane %v4289_v11, 1  ;;  %s3635_s30 = scalar_select %p3630_p2, 1, 0 }
 0xd1b   : > { %3407 = vmatpush.msrb.mxu1 %v4292_v63  ;;  %v4311_v63 = vld [vmem:[%s5875_s25 + $0x670] sm:$0xff] }
 0xd1c   : > { %v3259_v36 = vmul.f32 %v6616_v4, %v6616_v4  ;;  %v1847_v25 = vsel %vm113_vm2, %v6660_v62, 0.0 }
 0xd1d   : > { %3408 = vmatpush.msrb.mxu1 %v4291_v17 }
 0xd1e   : > { %v3271_v3 = vsel %vm113_vm2, %v3259_v36, 0.0 }
 0xd1f   : > { %v3240_v27 = vpop.xlane.xlu0 %3239  ;;  %3272 = vadd.xlane.f32.xlu2 %v3271_v3 }
 0xd20   : > { %v3248_v51 = vmul.f32 %v3240_v27, %v4931_v24 }
 0xd22   : > { %v6632_v52 = vsub.f32 %v3224_v32, %v3248_v51 }
 0xd24   : > { %v3260_v49 = vmul.f32 %v6632_v52, %v6632_v52 }
 0xd26   : > { %v3274_v7 = vsel %vm113_vm2, %v3260_v49, 0.0 }
 0xd27   : > { %3275 = vadd.xlane.f32.xlu0 %v3274_v7  ;;  %1851 = vadd.xlane.f32.xlu2 %v1850_v9  ;;  %v3243_v54 = vpop.xlane.xlu1 %3242 }
 0xd28   : > { %v3249_v37 = vmul.f32 %v3243_v54, %v4931_v24 }
 0xd2a   : > { %v6642_v30 = vsub.f32 %v3225_v61, %v3249_v37 }
 0xd2c   : > { %v3261_v19 = vmul.f32 %v6642_v30, %v6642_v30 }
 0xd2e   : > { %v3277_v33 = vsel %vm113_vm2, %v3261_v19, 0.0 }
 0xd2f   : > { %1860 = vadd.xlane.f32.xlu0 %v1859_v23  ;;  %3278 = vadd.xlane.f32.xlu1 %v3277_v33 }
 0xd37   : > { %1845 = vadd.xlane.f32.xlu0 %v1844_v44  ;;  %1848 = vadd.xlane.f32.xlu1 %v1847_v25 }
 0xd3f   : > { %1857 = vadd.xlane.f32.xlu0 %v1856_v31 }
 0xd7a   : > { %v3264_v2 = vpop.xlane.xlu2 %3263 }
 0xd7b   : > { %v3280_v32 = vmul.f32 %v3264_v2, %v4931_v24 }
 0xd7d   : > { %v3286_v60 = vadd.f32 1e-05, %v3280_v32 }
 0xd7f   : > { %4674 = vrsqrt.f32 %v3286_v60  ;;  %vm3298_vm5 = vweird.f32 %v3286_v60 }
 0xd82   : > { %v3267_v29 = vpop.xlane.xlu0 %3266 }
 0xd83   : > { %v3281_v47 = vmul.f32 %v3267_v29, %v4931_v24 }
 0xd85   : > { %v4675_v10 = vpop.eup %4674  ;;  %v3287_v61 = vadd.f32 1e-05, %v3281_v47 }
 0xd86   : > { %v3293_v53 = vmul.f32 %v4675_v10, %v3286_v60  ;;  %vm3299_vm1 = vweird.f32 %v4675_v10  ;;  %v4310_v60 = vld [vmem:[%s5875_s25 + $0x668] sm:$0xff] }
 0xd87   : > { %4676 = vrsqrt.f32 %v3287_v61  ;;  %vm3300_vm6 = vmor %vm3298_vm5, %vm3299_vm1  ;;  %vm3308_vm8 = vweird.f32 %v3287_v61 }
 0xd88   : > { %v3294_v12 = vmul.f32 %v4675_v10, %v3293_v53  ;;  %v4309_v53 = vld [vmem:[%s5875_s25 + $0x660] sm:$0xff] }
 0xd8a   : > { %v3295_v16 = vmul.f32 0.5, %v3294_v12  ;;  %v3270_v22 = vpop.xlane.xlu1 %3269 }
 0xd8b   : > { %v3282_v18 = vmul.f32 %v3270_v22, %v4931_v24 }
 0xd8c   : > { %v3296_v20 = vsub.f32 1.5, %v3295_v16 }
 0xd8d   : > { %v4677_v59 = vpop.eup %4676  ;;  %v3288_v42 = vadd.f32 1e-05, %v3282_v18 }
 0xd8e   : > { %v3297_v14 = vmul.f32 %v4675_v10, %v3296_v20  ;;  %v3303_v43 = vmul.f32 %v4677_v59, %v3287_v61  ;;  %vm3309_vm7 = vweird.f32 %v4677_v59 }
 0xd8f   : > { %4678 = vrsqrt.f32 %v3288_v42  ;;  %vm3310_vm9 = vmor %vm3308_vm8, %vm3309_vm7  ;;  %vm3318_vm15 = vweird.f32 %v3288_v42 }
 0xd90   : > { %v3301_v8 = vsel %vm3300_vm6, %v4675_v10, %v3297_v14  ;;  %v3304_v48 = vmul.f32 %v4677_v59, %v3303_v43 }
 0xd91   : > { %v3352_v36 = vmul.f32 %v3301_v8, %v6598_v50  ;;  %v4306_v8 = vld [vmem:[%s5875_s25 + $0x648] sm:$0xff] }
 0xd92   : > { %v3305_v5 = vmul.f32 0.5, %v3304_v48  ;;  %v3273_v3 = vpop.xlane.xlu2 %3272 }
 0xd93   : > { %v3359_v27 = vmul.f32 %v6679_v26, %v3352_v36  ;;  %v3283_v45 = vmul.f32 %v3273_v3, %v4931_v24 }
 0xd94   : > { %v3306_v46 = vsub.f32 1.5, %v3305_v5  ;;  %v4305_v5 = vld [vmem:[%s5875_s25 + $0x640] sm:$0xff] }
 0xd95   : > { %v4679_v51 = vpop.eup %4678  ;;  %v3289_v49 = vadd.f32 1e-05, %v3283_v45  ;;  %v6687_v1 = vadd.f32 %v6681_v13, %v3359_v27 }
 0xd96   : > { %v3307_v7 = vmul.f32 %v4677_v59, %v3306_v46  ;;  %v3313_v9 = vmul.f32 %v4679_v51, %v3288_v42  ;;  %vm3319_vm11 = vweird.f32 %v4679_v51  ;;  %v4304_v46 = vld [vmem:[%s5875_s25 + $0x638] sm:$0xff] }
 0xd97   : > { %4680 = vrsqrt.f32 %v3289_v49  ;;  %4384 = vmatmul.msk.f32.vlgmr.msrb.gmra.mxu1 %vm113_vm2, %v6687_v1  ;;  %vm3320_vm12 = vmor %vm3318_vm15, %vm3319_vm11  ;;  %vm3328_vm10 = vweird.f32 %v3289_v49 }
 0xd98   : > { %v3311_v50 = vsel %vm3310_vm9, %v4677_v59, %v3307_v7  ;;  %v3314_v54 = vmul.f32 %v4679_v51, %v3313_v9  ;;  %v4307_v59 = vld [vmem:[%s5875_s25 + $0x650] sm:$0xff] }
 0xd99   : > { %v3353_v37 = vmul.f32 %v3311_v50, %v6604_v41  ;;  %v4312_v41 = vld [vmem:[%s5875_s25 + $0x678] sm:$0xff] }
 0xd9a   : > { %v3315_v19 = vmul.f32 0.5, %v3314_v54  ;;  %v3276_v57 = vpop.xlane.xlu0 %3275  ;;  %3437 = vmatpush.msrb.mxu3 %v4312_v41  ;;  %v4302_v54 = vld [vmem:[%s5875_s25 + $0x628] sm:$0xff]  ;;  %v4299_v41 = vld [vmem:[%s5875_s25 + $0x610] sm:$0xff] }
 0xd9b   : > { %v3284_v0 = vmul.f32 %v3276_v57, %v4931_v24  ;;  %v3360_v23 = vmul.f32 %v6679_v26, %v3353_v37  ;;  %v4301_v57 = vld [vmem:[%s5875_s25 + $0x620] sm:$0xff] }
 0xd9c   : > { %v3316_v33 = vsub.f32 1.5, %v3315_v19  ;;  %3438 = vmatpush.msrb.mxu3 %v4311_v63  ;;  %v4298_v63 = vld [vmem:[%s5875_s25 + $0x608] sm:$0xff] }
 0xd9d   : > { %v4681_v58 = vpop.eup %4680  ;;  %v3290_v44 = vadd.f32 1e-05, %v3284_v0  ;;  %v6695_v25 = vadd.f32 %v6681_v13, %v3360_v23 }
 0xd9e   : > { %v3317_v56 = vmul.f32 %v4679_v51, %v3316_v33  ;;  %v3323_v31 = vmul.f32 %v4681_v58, %v3289_v49  ;;  %vm3329_vm0 = vweird.f32 %v4681_v58  ;;  %3439 = vmatpush.msrb.mxu3 %v4310_v60  ;;  %v4303_v49 = vld [vmem:[%s5875_s25 + $0x630] sm:$0xff]  ;;  %v4300_v33 = vld [vmem:[%s5875_s25 + $0x618] sm:$0xff] }
 0xd9f   : > { %4682 = vrsqrt.f32 %v3290_v44  ;;  %4385 = vmatmul.msk.f32.gmra.mxu1 %vm113_vm2, %v6695_v25  ;;  %vm3330_vm3 = vmor %vm3328_vm10, %vm3329_vm0  ;;  %vm3338_vm1 = vweird.f32 %v3290_v44 }
 0xda0   : > { %v3321_v17 = vsel %vm3320_vm12, %v4679_v51, %v3317_v56  ;;  %v3324_v2 = vmul.f32 %v4681_v58, %v3323_v31  ;;  %3440 = vmatpush.msrb.mxu3 %v4309_v53 }
 0xda1   : > { %v3354_v32 = vmul.f32 %v3321_v17, %v6610_v21  ;;  %v4308_v21 = vld [vmem:[%s5875_s25 + $0x658] sm:$0xff]  ;;  %v4297_v17 = vld [vmem:[%s5875_s25 + $0x600] sm:$0xff] }
 0xda2   : > { %v3325_v29 = vmul.f32 0.5, %v3324_v2  ;;  %v3279_v47 = vpop.xlane.xlu1 %3278  ;;  %3441 = vmatpush.msrb.mxu3 %v4308_v21  ;;  %v4468_v2 = vld [vmem:[%s5838_s28 + $0xc] ss:$0 sm:$0xff] }
 0xda3   : > { %v3285_v10 = vmul.f32 %v3279_v47, %v4931_v24  ;;  %v3361_v61 = vmul.f32 %v6679_v26, %v3354_v32 }
 0xda4   : > { %v3326_v12 = vsub.f32 1.5, %v3325_v29  ;;  %3442 = vmatpush.msrb.mxu3 %v4307_v59 }
 0xda5   : > { %v4683_v16 = vpop.eup %4682  ;;  %v3291_v22 = vadd.f32 1e-05, %v3285_v10  ;;  %v6707_v18 = vadd.f32 %v6681_v13, %v3361_v61 }
 0xda6   : > { %v3327_v11 = vmul.f32 %v4681_v58, %v3326_v12  ;;  %v3333_v20 = vmul.f32 %v4683_v16, %v3290_v44  ;;  %vm3339_vm4 = vweird.f32 %v4683_v16  ;;  %3443 = vmatpush.msrb.mxu3 %v4306_v8  ;;  %v4469_v8 = vld [vmem:[%s5928_s1 + $0xc] ss:$0 sm:$0xff] }
 0xda7   : > { %4684 = vrsqrt.f32 %v3291_v22  ;;  %4386 = vmatmul.msk.f32.gmra.mxu1 %vm113_vm2, %v6707_v18  ;;  %vm3340_vm5 = vmor %vm3338_vm1, %vm3339_vm4  ;;  %vm3348_vm7 = vweird.f32 %v3291_v22 }
 0xda8   : > { %v3331_v42 = vsel %vm3330_vm3, %v4681_v58, %v3327_v11  ;;  %v3334_v14 = vmul.f32 %v4683_v16, %v3333_v20  ;;  %3444 = vmatpush.msrb.mxu3 %v4305_v5  ;;  %v1861_v5 = vpop.xlane.xlu0 %1860 }
 0xda9   : > { %v3355_v43 = vmul.f32 %v3331_v42, %v6616_v4 }
 0xdaa   : > { %v3335_v48 = vmul.f32 0.5, %v3334_v14  ;;  %3445 = vmatpush.msrb.mxu3 %v4304_v46 }
 0xdab   : > { %v3362_v36 = vmul.f32 %v6679_v26, %v3355_v43 }
 0xdac   : > { %v3336_v3 = vsub.f32 1.5, %v3335_v48  ;;  %3446 = vmatpush.msrb.mxu3 %v4303_v49 }
 0xdad   : > { %v4685_v27 = vpop.eup %4684  ;;  %v6718_v45 = vadd.f32 %v6681_v13, %v3362_v36 }
 0xdae   : > { %v3337_v51 = vmul.f32 %v4683_v16, %v3336_v3  ;;  %v3343_v4 = vmul.f32 %v4685_v27, %v3291_v22  ;;  %vm3349_vm6 = vweird.f32 %v4685_v27  ;;  %3447 = vmatpush.msrb.mxu3 %v4302_v54 }
 0xdaf   : > { %4387 = vmatmul.msk.f32.gmra.mxu1 %vm113_vm2, %v6718_v45  ;;  %vm3350_vm8 = vmor %vm3348_vm7, %vm3349_vm6 }
 0xdb0   : > { %v3341_v7 = vsel %vm3340_vm5, %v4683_v16, %v3337_v51  ;;  %v3344_v9 = vmul.f32 %v4685_v27, %v3343_v4  ;;  %3448 = vmatpush.msrb.mxu3 %v4301_v57  ;;  %v1867_v4 = vmul.f32 %v1861_v5, %v4931_v24 }
 0xdb1   : > { %v3356_v50 = vmul.f32 %v3341_v7, %v6632_v52 }
 0xdb2   : > { %v3345_v37 = vmul.f32 0.5, %v3344_v9  ;;  %3449 = vmatpush.msrb.mxu3 %v4300_v33  ;;  %v6752_v54 = vsub.f32 %v6645_v15, %v1867_v4 }
 0xdb3   : > { %v3363_v19 = vmul.f32 %v6679_v26, %v3356_v50  ;;  %v1846_v50 = vpop.xlane.xlu0 %1845 }
 0xdb4   : > { %v3346_v0 = vsub.f32 1.5, %v3345_v37  ;;  %3450 = vmatpush.msrb.mxu3 %v4299_v41  ;;  %v1862_v57 = vmul.f32 %v1846_v50, %v4931_v24  ;;  %v1879_v33 = vmul.f32 %v6752_v54, %v6752_v54 }
 0xdb5   : > { %v6729_v23 = vadd.f32 %v6681_v13, %v3363_v19 }
 0xdb6   : > { %v3347_v58 = vmul.f32 %v4685_v27, %v3346_v0  ;;  %3451 = vmatpush.msrb.mxu3 %v4298_v63  ;;  %v1895_v15 = vsel %vm113_vm2, %v1879_v33, 0.0 }
 0xdb7   : > { %4388 = vmatmul.msk.f32.gmra.mxu1 %vm113_vm2, %v6729_v23 }
 0xdb8   : > { %v3351_v52 = vsel %vm3350_vm8, %v4685_v27, %v3347_v58  ;;  %3452 = vmatpush.msrb.mxu3 %v4297_v17 }
 0xdb9   : > { %v3357_v44 = vmul.f32 %v3351_v52, %v6642_v30 }
 0xdbb   : > { %v3364_v56 = vmul.f32 %v6679_v26, %v3357_v44  ;;  %v1858_v52 = vpop.xlane.xlu0 %1857 }
 0xdbd   : > { %v6737_v31 = vadd.f32 %v6681_v13, %v3364_v56  ;;  %v1866_v56 = vmul.f32 %v1858_v52, %v4931_v24 }
 0xdbf   : > { %4389 = vmatmul.msk.f32.gmra.mxu1 %vm113_vm2, %v6737_v31 }
 0xe14   : > { %v3410_v32 = vpop.f32.mrf.mxu1 }
 0xe15   : > { %v3411_v60 = vadd.f32 %v4468_v2, %v3410_v32 }
 0xe17   : > { %v3428_v29 = vmax.f32 %v3411_v60, 0.0 }
 0xe19   : > { %3453 = vmatmul.f32.vlgmr.msrb.gmra.mxu3 %v3428_v29  ;;  %v7511_v29 = vld [vmem:[#allocation7_spill] sm:$0xff] }
 0xe1c   : > { %v3413_v30 = vpop.f32.mrf.mxu1 }
 0xe1d   : > { %v3414_v47 = vadd.f32 %v4468_v2, %v3413_v30 }
 0xe1f   : > { %v3429_v26 = vmax.f32 %v3414_v47, 0.0 }
 0xe21   : > { %3456 = vmatmul.f32.gmra.mxu3 %v3429_v26 }
 0xe24   : > { %v3416_v13 = vpop.f32.mrf.mxu1 }
 0xe25   : > { %v3417_v10 = vadd.f32 %v4468_v2, %v3416_v13 }
 0xe27   : > { %v3430_v61 = vmax.f32 %v3417_v10, 0.0 }
 0xe29   : > { %3459 = vmatmul.f32.gmra.mxu3 %v3430_v61 }
 0xe2c   : > { %v3419_v53 = vpop.f32.mrf.mxu1 }
 0xe2d   : > { %v3420_v12 = vadd.f32 %v4468_v2, %v3419_v53 }
 0xe2f   : > { %v3431_v16 = vmax.f32 %v3420_v12, 0.0 }
 0xe31   : > { %3462 = vmatmul.f32.gmra.mxu3 %v3431_v16 }
 0xe34   : > { %v3422_v22 = vpop.f32.mrf.mxu1 }
 0xe35   : > { %v3423_v21 = vadd.f32 %v4468_v2, %v3422_v22  ;;  %v1849_v22 = vpop.xlane.xlu1 %1848 }
 0xe37   : > { %v3432_v11 = vmax.f32 %v3423_v21, 0.0 }
 0xe39   : > { %3465 = vmatmul.f32.gmra.mxu3 %v3432_v11 }
 0xe3c   : > { %v3425_v20 = vpop.f32.mrf.mxu1 }
 0xe3d   : > { %v3426_v59 = vadd.f32 %v4468_v2, %v3425_v20  ;;  %v6772_v2 = vsub.f32 %v6669_v55, %v1866_v56  ;;  %v1852_v55 = vpop.xlane.xlu2 %1851 }
 0xe3e   : > { %v1864_v13 = vmul.f32 %v1852_v55, %v4931_v24 }
 0xe3f   : > { %v3433_v42 = vmax.f32 %v3426_v59, 0.0  ;;  %v1878_v47 = vmul.f32 %v6772_v2, %v6772_v2 }
 0xe40   : > { %v6789_v61 = vsub.f32 %v6630_v28, %v1864_v13 }
 0xe41   : > { %3468 = vmatmul.f32.gmra.mxu3 %v3433_v42 }
 0xe42   : > { %v1876_v12 = vmul.f32 %v6789_v61, %v6789_v61 }
 0xe44   : > { %v1886_v16 = vsel %vm113_vm2, %v1876_v12, 0.0 }
 0xe9c   : > { %v3454_v14 = vpop.f32.mrf.mxu3 }
 0xe9d   : > { %v3455_v27 = vadd.f32 %v4469_v8, %v3454_v14 }
 0xe9f   : > { %v3472_v7 = vadd.f32 %v3455_v27, %v6687_v1 }
 0xea4   : > { %v3457_v43 = vpop.f32.mrf.mxu3 }
 0xea5   : > { %v3458_v26 = vadd.f32 %v4469_v8, %v3457_v43 }
 0xea7   : > { %v6786_v10 = vadd.f32 %v3458_v26, %v6695_v25  ;;  %v1863_v25 = vmul.f32 %v1849_v22, %v4931_v24 }
 0xea9   : > { %v3481_v53 = vsel %vm113_vm2, %v6786_v10, 0.0  ;;  %v6803_v59 = vsub.f32 %v6660_v62, %v1863_v25 }
 0xeab   : > { %v1875_v5 = vmul.f32 %v6803_v59, %v6803_v59 }
 0xeac   : > { %v3460_v48 = vpop.f32.mrf.mxu3 }
 0xead   : > { %v3461_v36 = vadd.f32 %v4469_v8, %v3460_v48 }
 0xeaf   : > { %v3474_v3 = vadd.f32 %v3461_v36, %v6707_v18  ;;  %v3478_v18 = vsel %vm113_vm2, %v3472_v7, 0.0 }
 0xeb1   : > { %v3484_v46 = vsel %vm113_vm2, %v3474_v3, 0.0 }
 0xeb2   : > { %3485 = vadd.xlane.f32.xlu1 %v3484_v46  ;;  %v1883_v46 = vsel %vm113_vm2, %v1875_v5, 0.0 }
 0xeb4   : > { %v3463_v51 = vpop.f32.mrf.mxu3 }
 0xeb5   : > { %v3464_v49 = vadd.f32 %v4469_v8, %v3463_v51 }
 0xeb7   : > { %v3475_v9 = vadd.f32 %v3464_v49, %v6718_v45  ;;  %v6761_v45 = vsub.f32 %v6657_v40, %v1862_v57 }
 0xeb9   : > { %v3487_v37 = vsel %vm113_vm2, %v3475_v9, 0.0  ;;  %v1874_v63 = vmul.f32 %v6761_v45, %v6761_v45 }
 0xeba   : > { %3488 = vadd.xlane.f32.xlu0 %v3487_v37  ;;  %3479 = vadd.xlane.f32.xlu1 %v3478_v18 }
 0xebb   : > { %v1880_v32 = vsel %vm113_vm2, %v1874_v63, 0.0 }
 0xebc   : > { %v3466_v19 = vpop.f32.mrf.mxu3 }
 0xebd   : > { %v3467_v0 = vadd.f32 %v4469_v8, %v3466_v19 }
 0xebf   : > { %v3476_v1 = vadd.f32 %v3467_v0, %v6729_v23  ;;  %v7510_v23 = vld [vmem:[#allocation9_spill] sm:$0xff] }
 0xec0   : > { %v1830_v40 = vadd.f32 %v6619_v6, %v7510_v23 }
 0xec1   : > { %v3490_v58 = vsel %vm113_vm2, %v3476_v1, 0.0 }
 0xec2   : > { %1896 = vadd.xlane.f32.xlu0 %v1895_v15  ;;  %3491 = vadd.xlane.f32.xlu1 %v3490_v58  ;;  %v6777_v30 = vadd.f32 %v1830_v40, %v7511_v29 }
 0xec4   : > { %v3469_v44 = vpop.f32.mrf.mxu3  ;;  %v1853_v6 = vsel %vm113_vm2, %v6777_v30, 0.0 }
 0xec5   : > { %v3470_v41 = vadd.f32 %v4469_v8, %v3469_v44 }
 0xec7   : > { %v3477_v17 = vadd.f32 %v3470_v41, %v6737_v31  ;;  %v1892_v31 = vsel %vm113_vm2, %v1878_v47, 0.0  ;;  %v409_v47 = vld [vmem:[%s6838_s23] sm:$0x3] }
 0xec8   : > { %v6848_v12 = vperm.slane %v409_v47, 0 }
 0xec9   : > { %v3493_v60 = vsel %vm113_vm2, %v3477_v17, 0.0 }
 0xeca   : > { %1881 = vadd.xlane.f32.xlu0 %v1880_v32  ;;  %3494 = vadd.xlane.f32.xlu2 %v3493_v60 }
 0xed2   : > { %1893 = vadd.xlane.f32.xlu0 %v1892_v31  ;;  %1854 = vadd.xlane.f32.xlu2 %v1853_v6 }
 0xeda   : > { %3482 = vadd.xlane.f32.xlu2 %v3481_v53 }
 0xee2   : > { %1887 = vadd.xlane.f32.xlu2 %v1886_v16 }
 0xf25   : > { %v3486_v21 = vpop.xlane.xlu1 %3485 }
 0xf26   : > { %v3498_v11 = vmul.f32 %v3486_v21, %v4931_v24 }
 0xf28   : > { %v6798_v20 = vsub.f32 %v3474_v3, %v3498_v11  ;;  %v6852_v11 = vperm.slane %v409_v47, 1 }
 0xf2a   : > { %v3510_v28 = vmul.f32 %v6798_v20, %v6798_v20 }
 0xf2c   : > { %v3520_v42 = vsel %vm113_vm2, %v3510_v28, 0.0 }
 0xf2d   : > { %v3489_v14 = vpop.xlane.xlu0 %3488  ;;  %3521 = vadd.xlane.f32.xlu1 %v3520_v42  ;;  %v3480_v43 = vpop.xlane.xlu1 %3479 }
 0xf2e   : > { %v3499_v8 = vmul.f32 %v3489_v14, %v4931_v24  ;;  %v3496_v36 = vmul.f32 %v3480_v43, %v4931_v24 }
 0xf30   : > { %v6807_v48 = vsub.f32 %v3475_v9, %v3499_v8  ;;  %v6814_v27 = vsub.f32 %v3472_v7, %v3496_v36 }
 0xf32   : > { %v3511_v3 = vmul.f32 %v6807_v48, %v6807_v48  ;;  %v3508_v37 = vmul.f32 %v6814_v27, %v6814_v27 }
 0xf34   : > { %v3523_v62 = vsel %vm113_vm2, %v3511_v3, 0.0  ;;  %v3514_v18 = vsel %vm113_vm2, %v3508_v37, 0.0 }
 0xf35   : > { %3524 = vadd.xlane.f32.xlu0 %v3523_v62  ;;  %v1897_v51 = vpop.xlane.xlu0 %1896  ;;  %1884 = vadd.xlane.f32.xlu1 %v1883_v46  ;;  %v3492_v4 = vpop.xlane.xlu1 %3491 }
 0xf36   : > { %v1903_v49 = vmul.f32 %v1897_v51, %v4931_v24  ;;  %v3500_v50 = vmul.f32 %v3492_v4, %v4931_v24 }
 0xf38   : > { %v1909_v9 = vadd.f32 1e-05, %v1903_v49  ;;  %v6822_v7 = vsub.f32 %v3476_v1, %v3500_v50 }
 0xf3a   : > { %4686 = vrsqrt.f32 %v1909_v9  ;;  %v3512_v44 = vmul.f32 %v6822_v7, %v6822_v7  ;;  %vm1966_vm11 = vweird.f32 %v1909_v9 }
 0xf3d   : > { %v1882_v19 = vpop.xlane.xlu0 %1881  ;;  %v3495_v57 = vpop.xlane.xlu2 %3494  ;;  %3515 = vadd.xlane.f32.xlu1 %v3514_v18 }
 0xf3e   : > { %v1898_v0 = vmul.f32 %v1882_v19, %v4931_v24  ;;  %v3501_v33 = vmul.f32 %v3495_v57, %v4931_v24 }
 0xf40   : > { %v4687_v15 = vpop.eup %4686  ;;  %v1904_v58 = vadd.f32 1e-05, %v1898_v0  ;;  %v6827_v52 = vsub.f32 %v3477_v17, %v3501_v33  ;;  %v3526_v17 = vsel %vm113_vm2, %v3512_v44, 0.0 }
 0xf41   : > { %v1961_v56 = vmul.f32 %v4687_v15, %v1909_v9  ;;  %vm1967_vm9 = vweird.f32 %v4687_v15 }
 0xf42   : > { %4688 = vrsqrt.f32 %v1904_v58  ;;  %v3513_v1 = vmul.f32 %v6827_v52, %v6827_v52  ;;  %vm1968_vm15 = vmor %vm1966_vm11, %vm1967_vm9  ;;  %vm1916_vm0 = vweird.f32 %v1904_v58 }
 0xf43   : > { %v1962_v41 = vmul.f32 %v4687_v15, %v1961_v56 }
 0xf44   : > { %v3529_v63 = vsel %vm113_vm2, %v3513_v1, 0.0 }
 0xf45   : > { %v1963_v23 = vmul.f32 0.5, %v1962_v41  ;;  %v1894_v40 = vpop.xlane.xlu0 %1893  ;;  %3530 = vadd.xlane.f32.xlu2 %v3529_v63  ;;  %v1855_v32 = vpop.xlane.xlu2 %1854  ;;  %3527 = vadd.xlane.f32.xlu1 %v3526_v17 }
 0xf46   : > { %v1902_v60 = vmul.f32 %v1894_v40, %v4931_v24  ;;  %v1865_v29 = vmul.f32 %v1855_v32, %v4931_v24 }
 0xf47   : > { %v1964_v26 = vsub.f32 1.5, %v1963_v23 }
 0xf48   : > { %v4689_v31 = vpop.eup %4688  ;;  %v1908_v6 = vadd.f32 1e-05, %v1902_v60  ;;  %v6846_v55 = vsub.f32 %v6777_v30, %v1865_v29 }
 0xf49   : > { %v1965_v13 = vmul.f32 %v4687_v15, %v1964_v26  ;;  %v1911_v53 = vmul.f32 %v4689_v31, %v1904_v58  ;;  %vm1917_vm12 = vweird.f32 %v4689_v31 }
 0xf4a   : > { %4690 = vrsqrt.f32 %v1908_v6  ;;  %v1877_v16 = vmul.f32 %v6846_v55, %v6846_v55  ;;  %vm1918_vm10 = vmor %vm1916_vm0, %vm1917_vm12  ;;  %vm1956_vm4 = vweird.f32 %v1908_v6 }
 0xf4b   : > { %v1969_v22 = vsel %vm1968_vm15, %v4687_v15, %v1965_v13  ;;  %v1912_v21 = vmul.f32 %v4689_v31, %v1911_v53 }
 0xf4c   : > { %v1975_v25 = vmul.f32 %v1969_v22, %v6752_v54  ;;  %v1889_v28 = vsel %vm113_vm2, %v1877_v16, 0.0 }
 0xf4d   : > { %v1913_v30 = vmul.f32 0.5, %v1912_v21  ;;  %1890 = vadd.xlane.f32.xlu2 %v1889_v28  ;;  %v3483_v42 = vpop.xlane.xlu2 %3482 }
 0xf4e   : > { %v1982_v14 = vmul.f32 %v6848_v12, %v1975_v25  ;;  %v3497_v43 = vmul.f32 %v3483_v42, %v4931_v24 }
 0xf4f   : > { %v1914_v8 = vsub.f32 1.5, %v1913_v30 }
 0xf50   : > { %v4691_v36 = vpop.eup %4690  ;;  %v1989_v5 = vadd.f32 %v6852_v11, %v1982_v14  ;;  %v6860_v3 = vsub.f32 %v6786_v10, %v3497_v43  ;;  %v4315_v14 = vld [vmem:[%s6838_s23 + $0x18] sm:$0x3] }
 0xf51   : > { %v1915_v62 = vmul.f32 %v4689_v31, %v1914_v8  ;;  %v1951_v54 = vmul.f32 %v4691_v36, %v1908_v6  ;;  %vm1957_vm3 = vweird.f32 %v4691_v36 }
 0xf52   : > { %1995 = vst.msk [vmem:[#allocation2 + $0x28] sm:$0xff] %vm113_vm2, %v1989_v5  ;;  %v3509_v46 = vmul.f32 %v6860_v3, %v6860_v3  ;;  %vm1958_vm1 = vmor %vm1956_vm4, %vm1957_vm3 }
 0xf53   : > { %v1919_v51 = vsel %vm1918_vm10, %v4689_v31, %v1915_v62  ;;  %v1952_v4 = vmul.f32 %v4691_v36, %v1951_v54 }
 0xf54   : > { %v1970_v49 = vmul.f32 %v1919_v51, %v6761_v45  ;;  %v3517_v9 = vsel %vm113_vm2, %v3509_v46, 0.0  ;;  %v6886_v46 = vperm.slane %v4315_v14, 0 }
 0xf55   : > { %v1953_v50 = vmul.f32 0.5, %v1952_v4  ;;  %3518 = vadd.xlane.f32.xlu2 %v3517_v9  ;;  %v1888_v37 = vpop.xlane.xlu2 %1887  ;;  %v6889_v9 = vperm.slane %v4315_v14, 1 }
 0xf56   : > { %v1977_v10 = vmul.f32 %v6848_v12, %v1970_v49  ;;  %v1900_v18 = vmul.f32 %v1888_v37, %v4931_v24 }
 0xf57   : > { %v1954_v19 = vsub.f32 1.5, %v1953_v50 }
 0xf58   : > { %v1984_v57 = vadd.f32 %v6852_v11, %v1977_v10  ;;  %v1906_v0 = vadd.f32 1e-05, %v1900_v18 }
 0xf59   : > { %v1955_v33 = vmul.f32 %v4691_v36, %v1954_v19 }
 0xf5a   : > { %1990 = vst.msk [vmem:[#allocation2] sm:$0xff] %vm113_vm2, %v1984_v57  ;;  %4692 = vrsqrt.f32 %v1906_v0  ;;  %vm1936_vm6 = vweird.f32 %v1906_v0 }
 0xf5b   : > { %v1959_v45 = vsel %vm1958_vm1, %v4691_v36, %v1955_v33 }
 0xf5c   : > { %v1974_v15 = vmul.f32 %v1959_v45, %v6772_v2 }
 0xf5e   : > { %v1981_v58 = vmul.f32 %v6848_v12, %v1974_v15 }
 0xf60   : > { %v4693_v44 = vpop.eup %4692  ;;  %v1988_v56 = vadd.f32 %v6852_v11, %v1981_v58 }
 0xf61   : > { %v1931_v1 = vmul.f32 %v4693_v44, %v1906_v0  ;;  %vm1937_vm5 = vweird.f32 %v4693_v44 }
 0xf62   : > { %1994 = vst.msk [vmem:[#allocation2 + $0x20] sm:$0xff] %vm113_vm2, %v1988_v56  ;;  %vm1938_vm7 = vmor %vm1936_vm6, %vm1937_vm5 }
 0xf63   : > { %v1932_v41 = vmul.f32 %v4693_v44, %v1931_v1 }
 0xf65   : > { %v1933_v63 = vmul.f32 0.5, %v1932_v41 }
 0xf67   : > { %v1934_v17 = vsub.f32 1.5, %v1933_v63 }
 0xf69   : > { %v1935_v23 = vmul.f32 %v4693_v44, %v1934_v17 }
 0xf6b   : > { %v1939_v40 = vsel %vm1938_vm7, %v4693_v44, %v1935_v23 }
 0xf6c   : > { %v1972_v32 = vmul.f32 %v1939_v40, %v6789_v61 }
 0xf6e   : > { %v1979_v2 = vmul.f32 %v6848_v12, %v1972_v32 }
 0xf70   : > { %v1986_v60 = vadd.f32 %v6852_v11, %v1979_v2 }
 0xf72   : > { %1992 = vst.msk [vmem:[#allocation2 + $0x10] sm:$0xff] %vm113_vm2, %v1986_v60 }
 0xfa0   : > { %v3522_v29 = vpop.xlane.xlu1 %3521 }
 0xfa1   : > { %v3534_v47 = vmul.f32 %v3522_v29, %v4931_v24 }
 0xfa3   : > { %v3540_v26 = vadd.f32 1e-05, %v3534_v47 }
 0xfa5   : > { %4694 = vrsqrt.f32 %v3540_v26  ;;  %vm3570_vm9 = vweird.f32 %v3540_v26 }
 0xfa8   : > { %v3525_v31 = vpop.xlane.xlu0 %3524  ;;  %v1885_v6 = vpop.xlane.xlu1 %1884 }
 0xfa9   : > { %v3535_v13 = vmul.f32 %v3525_v31, %v4931_v24  ;;  %v1899_v53 = vmul.f32 %v1885_v6, %v4931_v24 }
 0xfab   : > { %v4695_v16 = vpop.eup %4694  ;;  %v3541_v61 = vadd.f32 1e-05, %v3535_v13  ;;  %v1905_v22 = vadd.f32 1e-05, %v1899_v53 }
 0xfac   : > { %v3565_v21 = vmul.f32 %v4695_v16, %v3540_v26  ;;  %vm3571_vm8 = vweird.f32 %v4695_v16 }
 0xfad   : > { %4696 = vrsqrt.f32 %v3541_v61  ;;  %vm3572_vm11 = vmor %vm3570_vm9, %vm3571_vm8  ;;  %vm3580_vm0 = vweird.f32 %v3541_v61  ;;  %vm1926_vm3 = vweird.f32 %v1905_v22 }
 0xfae   : > { %v3566_v25 = vmul.f32 %v4695_v16, %v3565_v21  ;;  %4698 = vrsqrt.f32 %v1905_v22 }
 0xfb0   : > { %v3567_v28 = vmul.f32 0.5, %v3566_v25  ;;  %v3516_v30 = vpop.xlane.xlu1 %3515 }
 0xfb1   : > { %v3532_v42 = vmul.f32 %v3516_v30, %v4931_v24 }
 0xfb2   : > { %v3568_v43 = vsub.f32 1.5, %v3567_v28 }
 0xfb3   : > { %v4697_v8 = vpop.eup %4696  ;;  %v6884_v36 = vadd.f32 1e-05, %v3532_v42 }
 0xfb4   : > { %v4699_v5 = vpop.eup %4698  ;;  %v3569_v62 = vmul.f32 %v4695_v16, %v3568_v43  ;;  %v3575_v54 = vmul.f32 %v4697_v8, %v3541_v61  ;;  %vm3581_vm15 = vweird.f32 %v4697_v8 }
 0xfb5   : > { %v1921_v51 = vmul.f32 %v4699_v5, %v1905_v22  ;;  %4700 = vrsqrt.f32 %v6884_v36  ;;  %vm1927_vm12 = vweird.f32 %v4699_v5  ;;  %vm3582_vm10 = vmor %vm3580_vm0, %vm3581_vm15  ;;  %vm3550_vm5 = vweird.f32 %v6884_v36 }
 0xfb6   : > { %v3573_v4 = vsel %vm3572_vm11, %v4695_v16, %v3569_v62  ;;  %v3576_v49 = vmul.f32 %v4697_v8, %v3575_v54  ;;  %vm1928_vm4 = vmor %vm1926_vm3, %vm1927_vm12  ;;  %v3636_v16 = vstv %s3635_s30 }
 0xfb7   : > { %v3606_v50 = vmul.f32 %v3573_v4, %v6798_v20  ;;  %v1922_v37 = vmul.f32 %v4699_v5, %v1921_v51  ;;  %vm6919_vm7 = vcmp.eq.s32.totalorder %v3636_v16, 1 }
 0xfb8   : > { %v3577_v10 = vmul.f32 0.5, %v3576_v49  ;;  %v3531_v18 = vpop.xlane.xlu2 %3530  ;;  %v3528_v19 = vpop.xlane.xlu1 %3527 }
 0xfb9   : > { %v3613_v57 = vmul.f32 %v6886_v46, %v3606_v50  ;;  %v1923_v0 = vmul.f32 0.5, %v1922_v37  ;;  %v3537_v33 = vmul.f32 %v3531_v18, %v4931_v24  ;;  %v3536_v45 = vmul.f32 %v3528_v19, %v4931_v24 }
 0xfba   : > { %v3578_v15 = vsub.f32 1.5, %v3577_v10 }
 0xfbb   : > { %v4701_v58 = vpop.eup %4700  ;;  %v3620_v44 = vadd.f32 %v6889_v9, %v3613_v57  ;;  %v1924_v20 = vsub.f32 1.5, %v1923_v0  ;;  %v6897_v56 = vadd.f32 1e-05, %v3537_v33  ;;  %v6899_v1 = vadd.f32 1e-05, %v3536_v45 }
 0xfbc   : > { %v3579_v41 = vmul.f32 %v4697_v8, %v3578_v15  ;;  %v3545_v63 = vmul.f32 %v4701_v58, %v6884_v36  ;;  %vm3551_vm1 = vweird.f32 %v4701_v58 }
 0xfbd   : > { %3626 = vst.msk [vmem:[#allocation2 + $0x40] sm:$0xff] %vm113_vm2, %v3620_v44  ;;  %v1925_v17 = vmul.f32 %v4699_v5, %v1924_v20  ;;  %4702 = vrsqrt.f32 %v6897_v56  ;;  %vm3552_vm6 = vmor %vm3550_vm5, %vm3551_vm1  ;;  %vm3600_vm11 = vweird.f32 %v6897_v56  ;;  %vm3590_vm12 = vweird.f32 %v6899_v1 }
 0xfbe   : > { %v3583_v23 = vsel %vm3582_vm10, %v4697_v8, %v3579_v41  ;;  %v3546_v40 = vmul.f32 %v4701_v58, %v3545_v63  ;;  %4704 = vrsqrt.f32 %v6899_v1 }
 0xfbf   : > { %v3607_v32 = vmul.f32 %v3583_v23, %v6807_v48  ;;  %v1929_v2 = vsel %vm1928_vm4, %v4699_v5, %v1925_v17  ;;  %v3631_v48 = vld [vmem:[#allocation2 + $0x10] sm:$0xf] }
 0xfc0   : > { %v1971_v60 = vmul.f32 %v1929_v2, %v6803_v59  ;;  %v3547_v29 = vmul.f32 0.5, %v3546_v40  ;;  %v1891_v47 = vpop.xlane.xlu2 %1890 }
 0xfc1   : > { %v3614_v26 = vmul.f32 %v6886_v46, %v3607_v32  ;;  %v1901_v31 = vmul.f32 %v1891_v47, %v4931_v24 }
 0xfc2   : > { %v1978_v6 = vmul.f32 %v6848_v12, %v1971_v60  ;;  %v3548_v13 = vsub.f32 1.5, %v3547_v29 }
 0xfc3   : > { %v4703_v53 = vpop.eup %4702  ;;  %v3621_v61 = vadd.f32 %v6889_v9, %v3614_v26  ;;  %v1907_v22 = vadd.f32 1e-05, %v1901_v31 }
 0xfc4   : > { %v4705_v21 = vpop.eup %4704  ;;  %v3632_v25 = vld [vmem:[#allocation2 + $0x40] sm:$0xf]  ;;  %v1985_v59 = vadd.f32 %v6852_v11, %v1978_v6  ;;  %v3549_v28 = vmul.f32 %v4701_v58, %v3548_v13  ;;  %v3595_v30 = vmul.f32 %v4703_v53, %v6897_v56  ;;  %vm3601_vm8 = vweird.f32 %v4703_v53 }
 0xfc5   : > { %v3633_v42 = vadd.f32 %v3632_v25, %v3631_v48  ;;  %3627 = vst.msk [vmem:[#allocation2 + $0x48] sm:$0xff] %vm113_vm2, %v3621_v61  ;;  %v3585_v14 = vmul.f32 %v4705_v21, %v6899_v1  ;;  %4706 = vrsqrt.f32 %v1907_v22  ;;  %v3640_v51 = vld [vmem:[#allocation2 + $0x40] sm:$0xf]  ;;  %vm3591_vm9 = vweird.f32 %v4705_v21  ;;  %vm3602_vm15 = vmor %vm3600_vm11, %vm3601_vm8  ;;  %v3643_v61 = vld [vmem:[#allocation2 + $0x28] sm:$0xf] }
 0xfc6   : > { %1991 = vst.msk [vmem:[#allocation2 + $0x8] sm:$0xff] %vm113_vm2, %v1985_v59  ;;  %v3553_v8 = vsel %vm3552_vm6, %v4701_v58, %v3549_v28  ;;  %v3596_v5 = vmul.f32 %v4703_v53, %v3595_v30  ;;  %vm3592_vm0 = vmor %vm3590_vm12, %vm3591_vm9  ;;  %vm1946_vm3 = vweird.f32 %v1907_v22  ;;  %vm3768_vm9 = vcmask (%p332_p3), 523264  }
 0xfc7   : > { %v3634_v62 = vmul.f32 0.5, %v3633_v42  ;;  %v3604_v36 = vmul.f32 %v3553_v8, %v6814_v27  ;;  %v3586_v54 = vmul.f32 %v4705_v21, %v3585_v14  ;;  %vm4118_vm11 = vcmask (%p332_p3), 91136  }
 0xfc8   : > { %v3597_v4 = vmul.f32 0.5, %v3596_v5  ;;  %v3519_v49 = vpop.xlane.xlu2 %3518  ;;  %v3652_v5 = vld [vmem:[#allocation2] sm:$0x1] (%p332_p3) }
 0xfc9   : > { %v3638_v50 = vsel %vm6919_vm7, %v3634_v62, %v3631_v48  ;;  %v3641_v37 = vsel %vm6919_vm7, %v3634_v62, %v3640_v51  ;;  %v3611_v10 = vmul.f32 %v6886_v46, %v3604_v36  ;;  %v3587_v18 = vmul.f32 0.5, %v3586_v54 }
 0xfca   : > { %3639 = vst.msk [vmem:[#allocation2 + $0x10] sm:$0xf] %vm343_vm14, %v3638_v50  ;;  %v3598_v19 = vsub.f32 1.5, %v3597_v4  ;;  %v3533_v57 = vmul.f32 %v3519_v49, %v4931_v24  ;;  %v4768_v24 = vmov (%p332_p3), 64.0  }
 0xfcb   : > { %v4707_v27 = vpop.eup %4706  ;;  %3642 = vst.msk [vmem:[#allocation2 + $0x40] sm:$0xf] %vm343_vm14, %v3641_v37  ;;  %v3618_v0 = vadd.f32 %v6889_v9, %v3611_v10  ;;  %v3588_v33 = vsub.f32 1.5, %v3587_v18 }
 0xfcc   : > { %v3599_v45 = vmul.f32 %v4703_v53, %v3598_v19  ;;  %v1941_v15 = vmul.f32 %v4707_v27, %v1907_v22  ;;  %v3539_v58 = vadd.f32 1e-05, %v3533_v57  ;;  %vm1947_vm10 = vweird.f32 %v4707_v27  ;;  %v3748_v57 = vld [vmem:[%s7447_s18 + $0x150] sm:$0xff] (%p332_p3) }
 0xfcd   : > { %3624 = vst.msk [vmem:[#allocation2 + $0x30] sm:$0xff] %vm113_vm2, %v3618_v0  ;;  %v3589_v44 = vmul.f32 %v4705_v21, %v3588_v33  ;;  %vm1948_vm4 = vmor %vm1946_vm3, %vm1947_vm10  ;;  %3780 = vmatpush.msra.mxu0 (%p332_p3), %v3748_v57  ;;  %v3742_v0 = vld [vmem:[%s7447_s18 + $0x120] sm:$0xff] (%p332_p3)  ;;  %v3743_v33 = vld [vmem:[%s7447_s18 + $0x128] sm:$0xff] (%p332_p3) }
 0xfce   : > { %v3603_v20 = vsel %vm3602_vm15, %v4703_v53, %v3599_v45  ;;  %v1942_v41 = vmul.f32 %v4707_v27, %v1941_v15  ;;  %4708 = vrsqrt.f32 %v3539_v58  ;;  %vm3560_vm5 = vweird.f32 %v3539_v58  ;;  %v3736_v45 = vld [vmem:[%s7447_s18 + $0xf0] sm:$0xff] (%p332_p3)  ;;  %v3737_v15 = vld [vmem:[%s7447_s18 + $0xf8] sm:$0xff] (%p332_p3) }
 0xfcf   : > { %v3609_v63 = vmul.f32 %v3603_v20, %v6827_v52  ;;  %v3593_v17 = vsel %vm3592_vm0, %v4705_v21, %v3589_v44  ;;  %4725 = vrcp.f32 (%p332_p3), %v4768_v24  ;;  %3781 = vmatpush.msra.mxu0 (%p332_p3), %v3742_v0  ;;  %v3731_v44 = vld [vmem:[%s7447_s18 + $0xc8] sm:$0xff] (%p332_p3)  ;;  %v3750_v20 = vld [vmem:[%s7447_s18 + $0x160] sm:$0xff] (%p332_p3)  ;;  %v3929_v24 = vld [vmem:[%s7449_s20 + $0xf8] sm:$0xff] (%p332_p3) }
 0xfd0   : > { %v3608_v23 = vmul.f32 %v3593_v17, %v6822_v7  ;;  %v1943_v40 = vmul.f32 0.5, %v1942_v41  ;;  %v3751_v41 = vld [vmem:[%s7447_s18 + $0x168] sm:$0xff] (%p332_p3)  ;;  %3820 = vmatpush.msra.mxu2 (%p332_p3), %v3750_v20  ;;  %v3725_v17 = vld [vmem:[%s7447_s18 + $0x98] sm:$0xff] (%p332_p3)  ;;  %v3908_v57 = vld [vmem:[%s7449_s20 + $0x50] sm:$0xff] (%p332_p3) }
 0xfd1   : > { %v3616_v56 = vmul.f32 %v6886_v46, %v3609_v63  ;;  %3782 = vmatpush.msra.mxu0 (%p332_p3), %v3736_v45  ;;  %3840 = vmatpush.msra.mxu3 (%p332_p3), %v3751_v41  ;;  %v3724_v63 = vld [vmem:[%s7447_s18 + $0x90] sm:$0xff] (%p332_p3)  ;;  %v3923_v45 = vld [vmem:[%s7449_s20 + $0xc8] sm:$0xff] (%p332_p3)  ;;  %v3905_v41 = vld [vmem:[%s7449_s20 + $0x38] sm:$0xff] (%p332_p3) }
 0xfd2   : > { %v3615_v32 = vmul.f32 %v6886_v46, %v3608_v23  ;;  %v1944_v2 = vsub.f32 1.5, %v1943_v40  ;;  %v3744_v23 = vld [vmem:[%s7447_s18 + $0x130] sm:$0xff] (%p332_p3)  ;;  %v3745_v40 = vld [vmem:[%s7447_s18 + $0x138] sm:$0xff] (%p332_p3) }
 0xfd3   : > { %v3623_v60 = vadd.f32 %v6889_v9, %v3616_v56  ;;  %3821 = vmatpush.msra.mxu2 (%p332_p3), %v3744_v23  ;;  %3841 = vmatpush.msra.mxu3 (%p332_p3), %v3745_v40  ;;  %v3718_v56 = vld [vmem:[%s7447_s18 + $0x60] sm:$0xff] (%p332_p3)  ;;  %v3904_v40 = vld [vmem:[%s7449_s20 + $0x30] sm:$0xff] (%p332_p3) }
 0xfd4   : > { %v4709_v29 = vpop.eup %4708  ;;  %v3622_v1 = vadd.f32 %v6889_v9, %v3615_v32  ;;  %v1945_v47 = vmul.f32 %v4707_v27, %v1944_v2  ;;  %v3653_v14 = vld [vmem:[#allocation2 + $0x30] sm:$0x1] (%p332_p3)  ;;  %v3719_v32 = vld [vmem:[%s7447_s18 + $0x68] sm:$0xff] (%p332_p3)  ;;  %v3738_v2 = vld [vmem:[%s7447_s18 + $0x100] sm:$0xff] (%p332_p3) }
 0xfd5   : > { %3629 = vst.msk [vmem:[#allocation2 + $0x58] sm:$0xff] %vm113_vm2, %v3623_v60  ;;  %v3555_v52 = vmul.f32 %v4709_v29, %v3539_v58  ;;  %vm3561_vm1 = vweird.f32 %v4709_v29  ;;  %v4726_v34 = vpop.eup (%p332_p3), %4725  ;;  %v3730_v58 = vld [vmem:[%s7447_s18 + $0xc0] sm:$0xff] (%p332_p3)  ;;  %v3739_v60 = vld [vmem:[%s7447_s18 + $0x108] sm:$0xff] (%p332_p3)  ;;  %3822 = vmatpush.msra.mxu2 (%p332_p3), %v3738_v2 }
 0xfd6   : > { %3628 = vst.msk [vmem:[#allocation2 + $0x50] sm:$0xff] %vm113_vm2, %v3622_v1  ;;  %v1949_v7 = vsel %vm1948_vm4, %v4707_v27, %v1945_v47  ;;  %vm3562_vm6 = vmor %vm3560_vm5, %vm3561_vm1  ;;  %v3677_v35 = vmul.f32 (%p332_p3), 64.0, %v4726_v34  ;;  %v3749_v27 = vld [vmem:[%s7447_s18 + $0x158] sm:$0xff] (%p332_p3)  ;;  %3783 = vmatpush.msra.mxu0 (%p332_p3), %v3730_v58  ;;  %3842 = vmatpush.msra.mxu3 (%p332_p3), %v3739_v60  ;;  %v3732_v47 = vld [vmem:[%s7447_s18 + $0xd0] sm:$0xff] (%p332_p3) }
 0xfd7   : > { %v1973_v26 = vmul.f32 %v1949_v7, %v6846_v55  ;;  %v3556_v31 = vmul.f32 %v4709_v29, %v3555_v52  ;;  %3800 = vmatpush.msra.mxu1 (%p332_p3), %v3749_v27  ;;  %v3713_v1 = vld [vmem:[%s7447_s18 + $0x38] sm:$0xff] (%p332_p3)  ;;  %3823 = vmatpush.msra.mxu2 (%p332_p3), %v3732_v47  ;;  %v3706_v7 = vld [vmem:[%s7447_s18] sm:$0xff] (%p332_p3)  ;;  %v3924_v27 = vld [vmem:[%s7449_s20 + $0xd0] sm:$0xff] (%p332_p3) }
 0xfd8   :  { %v3678_v38 = vsub.f32 (%p332_p3), 1.0, %v3677_v35  ;;  %3784 = vmatpush.msra.mxu0 (%p332_p3), %v3724_v63  ;;  %v3733_v52 = vld [vmem:[%s7447_s18 + $0xd8] sm:$0xff] (%p332_p3)  ;;  %v3928_v35 = vld [vmem:[%s7449_s20 + $0xf0] sm:$0xff] (%p332_p3)  ;;  %v3906_v58 = vld [vmem:[%s7449_s20 + $0x40] sm:$0xff] (%p332_p3) }
 0xfd9   : > { %v1980_v6 = vmul.f32 %v6848_v12, %v1973_v26  ;;  %v3557_v13 = vmul.f32 0.5, %v3556_v31  ;;  %3801 = vmatpush.msra.mxu1 (%p332_p3), %v3743_v33  ;;  %3843 = vmatpush.msra.mxu3 (%p332_p3), %v3733_v52  ;;  %v3707_v26 = vld [vmem:[%s7447_s18 + $0x8] sm:$0xff] (%p332_p3)  ;;  %v3726_v31 = vld [vmem:[%s7447_s18 + $0xa0] sm:$0xff] (%p332_p3)  ;;  %v3921_v63 = vld [vmem:[%s7449_s20 + $0xb8] sm:$0xff] (%p332_p3) }
 0xfda   :  { %v3679_v39 = vmul.f32 (%p332_p3), %v4726_v34, %v3678_v38  ;;  %3785 = vmatpush.msra.mxu0 (%p332_p3), %v3718_v56  ;;  %3824 = vmatpush.msra.mxu2 (%p332_p3), %v3726_v31  ;;  %v3911_v38 = vld [vmem:[%s7449_s20 + $0x68] sm:$0xff] (%p332_p3)  ;;  %v3920_v56 = vld [vmem:[%s7449_s20 + $0xb0] sm:$0xff] (%p332_p3)  ;;  %v4723_v2 = vld [vmem:[%s7446_s17 + $0x1] ss:$0 sm:$0xff] (%p332_p3) }
 0xfdb   : > { %v1987_v53 = vadd.f32 %v6852_v11, %v1980_v6  ;;  %v3558_v16 = vsub.f32 1.5, %v3557_v13  ;;  %3802 = vmatpush.msra.mxu1 (%p332_p3), %v3737_v15  ;;  %v3727_v6 = vld [vmem:[%s7447_s18 + $0xa8] sm:$0xff] (%p332_p3)  ;;  %v3752_v13 = vld [vmem:[%s7447_s18 + $0x170] sm:$0xff] (%p332_p3)  ;;  %v3902_v52 = vld [vmem:[%s7449_s20 + $0x20] sm:$0xff] (%p332_p3) }
 0xfdc   : > { %v3644_v21 = vld [vmem:[#allocation2 + $0x58] sm:$0xf]  ;;  %v3680_v4 = vadd.f32 (%p332_p3), %v4726_v34, %v3679_v39  ;;  %3844 = vmatpush.msra.mxu3 (%p332_p3), %v3727_v6  ;;  %v3927_v39 = vld [vmem:[%s7449_s20 + $0xe8] sm:$0xff] (%p332_p3) }
 0xfdd   : > { %v3645_v22 = vadd.f32 %v3644_v21, %v3643_v61  ;;  %1993 = vst.msk [vmem:[#allocation2 + $0x18] sm:$0xff] %vm113_vm2, %v1987_v53  ;;  %v3559_v48 = vmul.f32 %v4709_v29, %v3558_v16  ;;  %v3649_v28 = vld [vmem:[#allocation2 + $0x58] sm:$0xf]  ;;  %3803 = vmatpush.msra.mxu1 (%p332_p3), %v3731_v44  ;;  %v3720_v16 = vld [vmem:[%s7447_s18 + $0x70] sm:$0xff] (%p332_p3)  ;;  %v3746_v21 = vld [vmem:[%s7447_s18 + $0x140] sm:$0xff] (%p332_p3) }
 0xfde   :  { %v3753_v53 = vld [vmem:[%s7447_s18 + $0x178] sm:$0xff] (%p332_p3)  ;;  %3825 = vmatpush.msra.mxu2 (%p332_p3), %v3720_v16  ;;  %v3907_v33 = vld [vmem:[%s7449_s20 + $0x48] sm:$0xff] (%p332_p3)  ;;  %v3922_v44 = vld [vmem:[%s7449_s20 + $0xc0] sm:$0xff] (%p332_p3) }
 0xfdf   : > { %v3646_v25 = vmul.f32 0.5, %v3645_v22  ;;  %v3563_v59 = vsel %vm3562_vm6, %v4709_v29, %v3559_v48  ;;  %3804 = vmatpush.msra.mxu1 (%p332_p3), %v3725_v17  ;;  %v3712_v29 = vld [vmem:[%s7447_s18 + $0x30] sm:$0xff] (%p332_p3)  ;;  %v3747_v22 = vld [vmem:[%s7447_s18 + $0x148] sm:$0xff] (%p332_p3)  ;;  %v3714_v48 = vld [vmem:[%s7447_s18 + $0x40] sm:$0xff] (%p332_p3) }
 0xfe0   : > { %v3605_v55 = vmul.f32 %v3563_v59, %v6860_v3  ;;  %v3660_v3 = vld [vmem:[#allocation2 + $0x48] sm:$0x1] (%p332_p3)  ;;  %3786 = vmatpush.msra.mxu0 (%p332_p3), %v3712_v29  ;;  %v3740_v59 = vld [vmem:[%s7447_s18 + $0x110] sm:$0xff] (%p332_p3)  ;;  %3826 = vmatpush.msra.mxu2 (%p332_p3), %v3714_v48  ;;  %v4722_v17 = vld [vmem:[%s7446_s17] ss:$0 sm:$0xff] (%p332_p3) }
 0xfe1   : > { %v3647_v12 = vsel %vm6919_vm7, %v3646_v25, %v3643_v61  ;;  %v3650_v11 = vsel %vm6919_vm7, %v3646_v25, %v3649_v28  ;;  %3662 = vrot.lane.b32.xlu0 (%p332_p3), %v3660_v3, %s4767_s6  ;;  %vm3681_vm7 = vweird.f32 (%p332_p3), %v4726_v34  ;;  %3805 = vmatpush.msra.mxu1 (%p332_p3), %v3719_v32  ;;  %v3721_v61 = vld [vmem:[%s7447_s18 + $0x78] sm:$0xff] (%p332_p3)  ;;  %v3715_v25 = vld [vmem:[%s7447_s18 + $0x48] sm:$0xff] (%p332_p3)  ;;  %v3916_v16 = vld [vmem:[%s7449_s20 + $0x90] sm:$0xff] (%p332_p3) }
 0xfe2   : > { %3648 = vst.msk [vmem:[#allocation2 + $0x28] sm:$0xf] %vm343_vm14, %v3647_v12  ;;  %v3612_v30 = vmul.f32 %v6886_v46, %v3605_v55  ;;  %v6966_v49 = vsel (%p332_p3), %vm3681_vm7, %v4726_v34, %v3680_v4  ;;  %3787 = vmatpush.msra.mxu0 (%p332_p3), %v3706_v7  ;;  %3845 = vmatpush.msra.mxu3 (%p332_p3), %v3721_v61  ;;  %v3741_v28 = vld [vmem:[%s7447_s18 + $0x118] sm:$0xff] (%p332_p3)  ;;  %v3708_v55 = vld [vmem:[%s7447_s18 + $0x10] sm:$0xff] (%p332_p3)  ;;  %v3910_v4 = vld [vmem:[%s7449_s20 + $0x60] sm:$0xff] (%p332_p3) }
 0xfe3   : > { %3651 = vst.msk [vmem:[#allocation2 + $0x58] sm:$0xf] %vm343_vm14, %v3650_v11  ;;  %vm3672_vm14 = vcmask (%p332_p3), 517120   ;;  %3806 = vmatpush.msra.mxu1 (%p332_p3), %v3713_v1  ;;  %v3709_v12 = vld [vmem:[%s7447_s18 + $0x18] sm:$0xff] (%p332_p3)  ;;  %v3734_v11 = vld [vmem:[%s7447_s18 + $0xe0] sm:$0xff] (%p332_p3)  ;;  %3827 = vmatpush.msra.mxu2 (%p332_p3), %v3708_v55  ;;  %v3912_v34 = vld [vmem:[%s7449_s20 + $0x70] sm:$0xff] (%p332_p3) }
 0xfe4   : > { %v3619_v42 = vadd.f32 %v6889_v9, %v3612_v30  ;;  %v3659_v8 = vld [vmem:[#allocation2 + $0x18] sm:$0x1] (%p332_p3)  ;;  %3860 = vmatpush.msrb.mxu0 (%p332_p3), %v3752_v13  ;;  %3846 = vmatpush.msra.mxu3 (%p332_p3), %v3715_v25  ;;  %v3735_v30 = vld [vmem:[%s7447_s18 + $0xe8] sm:$0xff] (%p332_p3)  ;;  %v3918_v7 = vld [vmem:[%s7449_s20 + $0xa0] sm:$0xff] (%p332_p3) }
 0xfe5   :  { %3807 = vmatpush.msra.mxu1 (%p332_p3), %v3707_v26  ;;  %v3729_v3 = vld [vmem:[%s7447_s18 + $0xb8] sm:$0xff] (%p332_p3)  ;;  %v3903_v29 = vld [vmem:[%s7449_s20 + $0x28] sm:$0xff] (%p332_p3)  ;;  %v3944_v61 = vld [vmem:[%s7449_s20 + $0x170] sm:$0xff] (%p332_p3) }
 0xfe6   : > { %3625 = vst.msk [vmem:[#allocation2 + $0x38] sm:$0xff] %vm113_vm2, %v3619_v42  ;;  %334 = sbr.rel (!%p332_p3) target bundleno = 841 (0x349), region = 141  ;;  %3861 = vmatpush.msrb.mxu0 (%p332_p3), %v3746_v21  ;;  %3847 = vmatpush.msra.mxu3 (%p332_p3), %v3709_v12  ;;  %v3728_v42 = vld [vmem:[%s7447_s18 + $0xb0] sm:$0xff] (%p332_p3)  ;;  %v3919_v1 = vld [vmem:[%s7449_s20 + $0xa8] sm:$0xff] (%p332_p3)  ;;  %v3901_v26 = vld [vmem:[%s7449_s20 + $0x18] sm:$0xff] (%p332_p3) }
 0xfe7   :  { %3880 = vmatpush.msrb.mxu1 (%p332_p3), %v3753_v53  ;;  %v3917_v31 = vld [vmem:[%s7449_s20 + $0x98] sm:$0xff] (%p332_p3)  ;;  %v3900_v53 = vld [vmem:[%s7449_s20 + $0x10] sm:$0xff] (%p332_p3)  ;;  %v3915_v48 = vld [vmem:[%s7449_s20 + $0x88] sm:$0xff] (%p332_p3) }
 0xfe8   :  { %3862 = vmatpush.msrb.mxu0 (%p332_p3), %v3740_v59  ;;  %4018 = vmatpush.msrb.mxu3 (%p332_p3), %v3929_v24  ;;  %v3945_v6 = vld [vmem:[%s7449_s20 + $0x178] sm:$0xff] (%p332_p3)  ;;  %v3960_v21 = vld [vmem:[%s7449_s20 + $0x1f0] sm:$0xff] (%p332_p3)  ;;  %v3943_v25 = vld [vmem:[%s7449_s20 + $0x168] sm:$0xff] (%p332_p3) }
 0xfe9   :  { %3655 = vrot.lane.b32.xlu0 (%p332_p3), %v3653_v14, %s4767_s6  ;;  %3881 = vmatpush.msrb.mxu1 (%p332_p3), %v3747_v22  ;;  %v3722_v14 = vld [vmem:[%s7447_s18 + $0x80] sm:$0xff] (%p332_p3)  ;;  %v3961_v13 = vld [vmem:[%s7449_s20 + $0x1f8] sm:$0xff] (%p332_p3)  ;;  %v3899_v22 = vld [vmem:[%s7449_s20 + $0x8] sm:$0xff] (%p332_p3) }
 0xfea   :  { %3863 = vmatpush.msrb.mxu0 (%p332_p3), %v3734_v11  ;;  %4019 = vmatpush.msrb.mxu3 (%p332_p3), %v3928_v35  ;;  %v3959_v59 = vld [vmem:[%s7449_s20 + $0x1e8] sm:$0xff] (%p332_p3)  ;;  %v3914_v55 = vld [vmem:[%s7449_s20 + $0x80] sm:$0xff] (%p332_p3)  ;;  %v3977_v12 = vld [vmem:[%s7449_s20 + $0x278] sm:$0xff] (%p332_p3) }
 0xfeb   :  { %3882 = vmatpush.msrb.mxu1 %v3741_v28  ;;  %v3898_v28 = vld [vmem:[%s7449_s20] sm:$0xff]  ;;  %v3993_v11 = vld [vmem:[%s7449_s20 + $0x2f8] sm:$0xff]  ;;  %v3955_v24 = vld [vmem:[%s7449_s20 + $0x1c8] sm:$0xff] }
 0xfec   :  { %3864 = vmatpush.msrb.mxu0 %v3728_v42  ;;  %4020 = vmatpush.msrb.mxu3 %v3927_v39  ;;  %v3958_v42 = vld [vmem:[%s7449_s20 + $0x1e0] sm:$0xff]  ;;  %v3989_v35 = vld [vmem:[%s7449_s20 + $0x2d8] sm:$0xff] }
 0xfed   :  { %3883 = vmatpush.msrb.mxu1 %v3735_v30  ;;  %v3942_v30 = vld [vmem:[%s7449_s20 + $0x160] sm:$0xff] }
 0xfee   :  { %3865 = vmatpush.msrb.mxu0 %v3722_v14  ;;  %v3992_v14 = vld [vmem:[%s7449_s20 + $0x2f0] sm:$0xff]  ;;  %v3954_v39 = vld [vmem:[%s7449_s20 + $0x1c0] sm:$0xff] }
 0xfef   :  { %3884 = vmatpush.msrb.mxu1 %v3729_v3  ;;  %v3976_v3 = vld [vmem:[%s7449_s20 + $0x270] sm:$0xff] }
0x1053   :  { %v3663_v43 = vpop.permute.xlu0 %3662 }
0x1054   :  { %v3665_v46 = vsel %vm113_vm2, %v3659_v8, %v3663_v43  ;;  %v3723_v43 = vld [vmem:[%s7447_s18 + $0x88] sm:$0xff] }
0x1055   :  { %v3667_v62 = vrot.slane %v3665_v46, 7  ;;  %v3716_v46 = vld [vmem:[%s7447_s18 + $0x50] sm:$0xff]  ;;  %3885 = vmatpush.msrb.mxu1 %v3723_v43  ;;  %v3941_v43 = vld [vmem:[%s7449_s20 + $0x158] sm:$0xff] }
0x1056   :  { %3866 = vmatpush.msrb.mxu0 %v3716_v46  ;;  %v3975_v46 = vld [vmem:[%s7449_s20 + $0x268] sm:$0xff] }
0x105b   :  { %v3656_v9 = vpop.permute.xlu0 %3655 }
0x105c   :  { %v3658_v36 = vsel %vm113_vm2, %v3652_v5, %v3656_v9  ;;  %v3717_v5 = vld [vmem:[%s7447_s18 + $0x58] sm:$0xff]  ;;  %v3710_v9 = vld [vmem:[%s7447_s18 + $0x20] sm:$0xff] }
0x105d   :  { %v3669_v54 = vsel %vm274_vm13, %v3658_v36, %v3667_v62  ;;  %v3711_v36 = vld [vmem:[%s7447_s18 + $0x28] sm:$0xff]  ;;  %3886 = vmatpush.msrb.mxu1 %v3717_v5  ;;  %3867 = vmatpush.msrb.mxu0 %v3710_v9  ;;  %v3956_v9 = vld [vmem:[%s7449_s20 + $0x1d0] sm:$0xff] }
0x105e   :  { %v3673_v51 = vsel %vm3672_vm14, %v3669_v54, 0.0  ;;  %v3991_v5 = vld [vmem:[%s7449_s20 + $0x2e8] sm:$0xff] }
0x105f   :  { %3674 = vadd.xlane.f32.xlu1 %v3673_v51  ;;  %3887 = vmatpush.msrb.mxu1 %v3711_v36  ;;  %v3913_v51 = vld [vmem:[%s7449_s20 + $0x78] sm:$0xff]  ;;  %v3974_v36 = vld [vmem:[%s7449_s20 + $0x260] sm:$0xff] }
0x1060   :  { %3998 = vmatpush.msrb.mxu2 %v3913_v51  ;;  %v3939_v51 = vld [vmem:[%s7449_s20 + $0x148] sm:$0xff] }
0x1062   :  { %3999 = vmatpush.msrb.mxu2 %v3912_v34  ;;  %v3973_v34 = vld [vmem:[%s7449_s20 + $0x258] sm:$0xff] }
0x1064   :  { %4000 = vmatpush.msrb.mxu2 %v3911_v38  ;;  %v3938_v38 = vld [vmem:[%s7449_s20 + $0x140] sm:$0xff] }
0x1066   :  { %4001 = vmatpush.msrb.mxu2 %v3910_v4  ;;  %v3972_v4 = vld [vmem:[%s7449_s20 + $0x250] sm:$0xff] }
0x10d2   :  { %v3675_v50 = vpop.xlane.xlu1 %3674 }
0x10d3   :  { %v3683_v37 = vmul.f32 %v6966_v49, %v3675_v50 }
0x10d5   :  { %v6969_v10 = vsub.f32 %v3669_v54, %v3683_v37  ;;  %v3909_v37 = vld [vmem:[%s7449_s20 + $0x58] sm:$0xff] }
0x10d6   :  { %4002 = vmatpush.msrb.mxu2 %v3909_v37  ;;  %v3953_v37 = vld [vmem:[%s7449_s20 + $0x1b8] sm:$0xff] }
0x10d7   :  { %v3685_v18 = vmul.f32 %v6969_v10, %v6969_v10 }
0x10d8   :  { %4003 = vmatpush.msrb.mxu2 %v3908_v57  ;;  %v3936_v57 = vld [vmem:[%s7449_s20 + $0x130] sm:$0xff] }
0x10d9   :  { %v3686_v19 = vsel %vm3672_vm14, %v3685_v18, 0.0  ;;  %v3925_v18 = vld [vmem:[%s7449_s20 + $0xd8] sm:$0xff] }
0x10da   :  { %3687 = vadd.xlane.f32.xlu1 %v3686_v19  ;;  %4004 = vmatpush.msrb.mxu2 %v3907_v33  ;;  %v3986_v33 = vld [vmem:[%s7449_s20 + $0x2c0] sm:$0xff] }
0x10dc   :  { %4005 = vmatpush.msrb.mxu2 %v3906_v58  ;;  %v3935_v58 = vld [vmem:[%s7449_s20 + $0x128] sm:$0xff] }
0x10de   :  { %4006 = vmatpush.msrb.mxu2 %v3905_v41  ;;  %v3984_v41 = vld [vmem:[%s7449_s20 + $0x2b0] sm:$0xff] }
0x10e0   :  { %4007 = vmatpush.msrb.mxu2 %v3904_v40  ;;  %v3983_v40 = vld [vmem:[%s7449_s20 + $0x2a8] sm:$0xff] }
0x10e2   :  { %4008 = vmatpush.msrb.mxu2 %v3903_v29  ;;  %v3932_v29 = vld [vmem:[%s7449_s20 + $0x110] sm:$0xff] }
0x10e4   :  { %4009 = vmatpush.msrb.mxu2 %v3902_v52  ;;  %v3981_v52 = vld [vmem:[%s7449_s20 + $0x298] sm:$0xff] }
0x10e6   :  { %4010 = vmatpush.msrb.mxu2 %v3901_v26  ;;  %v3964_v26 = vld [vmem:[%s7449_s20 + $0x210] sm:$0xff] }
0x10e8   :  { %4011 = vmatpush.msrb.mxu2 %v3900_v53  ;;  %v3963_v53 = vld [vmem:[%s7449_s20 + $0x208] sm:$0xff] }
0x10ea   :  { %4012 = vmatpush.msrb.mxu2 %v3899_v22  ;;  %v3754_v22 = vld [vmem:[%s7448_s19] sm:$0x3f] }
0x10ec   :  { %4013 = vmatpush.msrb.mxu2 %v3898_v28 }
0x114d   :  { %v3688_v8 = vpop.xlane.xlu1 %3687 }
0x114e   :  { %v3689_v62 = vmul.f32 %v3688_v8, %v6966_v49  ;;  %v3926_v49 = vld [vmem:[%s7449_s20 + $0xe0] sm:$0xff]  ;;  %v3957_v8 = vld [vmem:[%s7449_s20 + $0x1d8] sm:$0xff] }
0x114f   :  { %4021 = vmatpush.msrb.mxu3 %v3926_v49  ;;  %v3988_v49 = vld [vmem:[%s7449_s20 + $0x2d0] sm:$0xff] }
0x1150   :  { %v3690_v54 = vadd.f32 1e-05, %v3689_v62  ;;  %v3940_v62 = vld [vmem:[%s7449_s20 + $0x150] sm:$0xff] }
0x1151   :  { %4022 = vmatpush.msrb.mxu3 %v3925_v18  ;;  %v3971_v18 = vld [vmem:[%s7449_s20 + $0x248] sm:$0xff] }
0x1152   :  { %4727 = vrsqrt.f32 %v3690_v54  ;;  %vm3697_vm13 = vweird.f32 %v3690_v54 }
0x1153   :  { %4023 = vmatpush.msrb.mxu3 %v3924_v27  ;;  %v3952_v27 = vld [vmem:[%s7449_s20 + $0x1b0] sm:$0xff] }
0x1155   :  { %4024 = vmatpush.msrb.mxu3 %v3923_v45  ;;  %v3969_v45 = vld [vmem:[%s7449_s20 + $0x238] sm:$0xff] }
0x1157   :  { %4025 = vmatpush.msrb.mxu3 %v3922_v44  ;;  %v3951_v44 = vld [vmem:[%s7449_s20 + $0x1a8] sm:$0xff] }
0x1158   :  { %v4728_v50 = vpop.eup %4727 }
0x1159   :  { %v3692_v19 = vmul.f32 %v4728_v50, %v3690_v54  ;;  %vm3698_vm2 = vweird.f32 %v4728_v50  ;;  %4026 = vmatpush.msrb.mxu3 %v3921_v63  ;;  %v3990_v54 = vld [vmem:[%s7449_s20 + $0x2e0] sm:$0xff] }
0x115a   :  { %vm3699_vm8 = vmor %vm3697_vm13, %vm3698_vm2  ;;  %v3934_v63 = vld [vmem:[%s7449_s20 + $0x120] sm:$0xff] }
0x115b   :  { %v3693_v0 = vmul.f32 %v4728_v50, %v3692_v19  ;;  %4027 = vmatpush.msrb.mxu3 %v3920_v56  ;;  %v3987_v19 = vld [vmem:[%s7449_s20 + $0x2c8] sm:$0xff]  ;;  %v3933_v56 = vld [vmem:[%s7449_s20 + $0x118] sm:$0xff] }
0x115d   :  { %v3694_v15 = vmul.f32 0.5, %v3693_v0  ;;  %4028 = vmatpush.msrb.mxu3 %v3919_v1  ;;  %v3970_v0 = vld [vmem:[%s7449_s20 + $0x240] sm:$0xff]  ;;  %v3948_v1 = vld [vmem:[%s7449_s20 + $0x190] sm:$0xff] }
0x115f   :  { %v3695_v20 = vsub.f32 1.5, %v3694_v15  ;;  %4029 = vmatpush.msrb.mxu3 %v3918_v7  ;;  %v3985_v15 = vld [vmem:[%s7449_s20 + $0x2b8] sm:$0xff]  ;;  %v3931_v7 = vld [vmem:[%s7449_s20 + $0x108] sm:$0xff] }
0x1161   :  { %v3696_v23 = vmul.f32 %v4728_v50, %v3695_v20  ;;  %4030 = vmatpush.msrb.mxu3 %v3917_v31  ;;  %v3968_v20 = vld [vmem:[%s7449_s20 + $0x230] sm:$0xff] }
0x1162   :  { %v3980_v31 = vld [vmem:[%s7449_s20 + $0x290] sm:$0xff] }
0x1163   :  { %v3700_v32 = vsel %vm3699_vm8, %v4728_v50, %v3696_v23  ;;  %4031 = vmatpush.msrb.mxu3 %v3916_v16  ;;  %v3937_v50 = vld [vmem:[%s7449_s20 + $0x138] sm:$0xff]  ;;  %v3967_v23 = vld [vmem:[%s7449_s20 + $0x228] sm:$0xff] }
0x1164   :  { %v3701_v60 = vmul.f32 %v3700_v32, %v6969_v10  ;;  %v3949_v32 = vld [vmem:[%s7449_s20 + $0x198] sm:$0xff]  ;;  %v3979_v16 = vld [vmem:[%s7449_s20 + $0x288] sm:$0xff] }
0x1165   :  { %4032 = vmatpush.msrb.mxu3 %v3915_v48  ;;  %v3756_v48 = vperm.slane %v3754_v22, 0 }
0x1166   :  { %v3703_v47 = vmul.f32 %v4722_v17, %v3701_v60  ;;  %v3950_v17 = vld [vmem:[%s7449_s20 + $0x1a0] sm:$0xff] }
0x1167   :  { %4033 = vmatpush.msrb.mxu3 %v3914_v55  ;;  %v3982_v60 = vld [vmem:[%s7449_s20 + $0x2a0] sm:$0xff] }
0x1168   :  { %v3705_v10 = vadd.f32 %v4723_v2, %v3703_v47  ;;  %v3966_v2 = vld [vmem:[%s7449_s20 + $0x220] sm:$0xff]  ;;  %v3965_v47 = vld [vmem:[%s7449_s20 + $0x218] sm:$0xff] }
0x116a   :  { %4390 = vmatmul.msk.f32.vlgmr.msra.gmra.mxu0 %vm3768_vm9, %v3705_v10  ;;  %4391 = vmatmul.msk.f32.vlgmr.msra.gmra.mxu1 %vm3768_vm9, %v3705_v10 }
0x116b   :  { %4392 = vmatmul.msk.f32.vlgmr.msra.gmra.mxu2 %vm3768_vm9, %v3705_v10  ;;  %4393 = vmatmul.msk.f32.vlgmr.msra.gmra.mxu3 %vm3768_vm9, %v3705_v10 }
0x116c   :  { %4038 = vmatpush.msra.mxu0 %v3945_v6  ;;  %4058 = vmatpush.msra.mxu1 %v3961_v13  ;;  %v3930_v6 = vld [vmem:[%s7449_s20 + $0x100] sm:$0xff] }
0x116d   :  { %4078 = vmatpush.msra.mxu2 %v3977_v12  ;;  %4098 = vmatpush.msra.mxu3 %v3993_v11  ;;  %v3946_v13 = vld [vmem:[%s7449_s20 + $0x180] sm:$0xff] }
0x116e   :  { %4039 = vmatpush.msra.mxu0 %v3944_v61  ;;  %4059 = vmatpush.msra.mxu1 %v3960_v21  ;;  %v3962_v61 = vld [vmem:[%s7449_s20 + $0x200] sm:$0xff] }
0x116f   :  { %4079 = vmatpush.msra.mxu2 %v3976_v3  ;;  %4099 = vmatpush.msra.mxu3 %v3992_v14  ;;  %v3978_v21 = vld [vmem:[%s7449_s20 + $0x280] sm:$0xff]  ;;  %v3759_v3 = vperm.slane %v3754_v22, 3  ;;  %v3760_v14 = vperm.slane %v3754_v22, 4 }
0x1170   :  { %4040 = vmatpush.msra.mxu0 %v3943_v25  ;;  %4060 = vmatpush.msra.mxu1 %v3959_v59  ;;  %v3757_v25 = vperm.slane %v3754_v22, 1 }
0x1171   :  { %4080 = vmatpush.msra.mxu2 %v3975_v46  ;;  %4100 = vmatpush.msra.mxu3 %v3991_v5 }
0x1172   :  { %4394 = vmatmul.msk.f32.vlgmr.msrb.gmra.mxu0 %vm3768_vm9, %v3705_v10  ;;  %4395 = vmatmul.msk.f32.vlgmr.msrb.gmra.mxu1 %vm3768_vm9, %v3705_v10  ;;  %v3947_v10 = vld [vmem:[%s7449_s20 + $0x188] sm:$0xff] }
0x1173   :  { %4041 = vmatpush.msra.mxu0 %v3942_v30  ;;  %4061 = vmatpush.msra.mxu1 %v3958_v42  ;;  %v3758_v42 = vperm.slane %v3754_v22, 2 }
0x1174   :  { %4081 = vmatpush.msra.mxu2 %v3974_v36  ;;  %4101 = vmatpush.msra.mxu3 %v3990_v54 }
0x1175   :  { %4042 = vmatpush.msra.mxu0 %v3941_v43  ;;  %4062 = vmatpush.msra.mxu1 %v3957_v8  ;;  %v3761_v43 = vperm.slane %v3754_v22, 5 }
0x1176   :  { %4082 = vmatpush.msra.mxu2 %v3973_v34  ;;  %4102 = vmatpush.msra.mxu3 %v3989_v35 }
0x1177   :  { %4043 = vmatpush.msra.mxu0 %v3940_v62  ;;  %4063 = vmatpush.msra.mxu1 %v3956_v9 }
0x1178   :  { %4083 = vmatpush.msra.mxu2 %v3972_v4  ;;  %4103 = vmatpush.msra.mxu3 %v3988_v49 }
0x1179   :  { %4044 = vmatpush.msra.mxu0 %v3939_v51  ;;  %4064 = vmatpush.msra.mxu1 %v3955_v24 }
0x117a   :  { %4084 = vmatpush.msra.mxu2 %v3971_v18  ;;  %4104 = vmatpush.msra.mxu3 %v3987_v19 }
0x117b   :  { %4045 = vmatpush.msra.mxu0 %v3938_v38  ;;  %4065 = vmatpush.msra.mxu1 %v3954_v39  ;;  %v4724_v39 = vld [vmem:[%s7450_s21] ss:$0 sm:$0xff] }
0x117c   :  { %4085 = vmatpush.msra.mxu2 %v3970_v0  ;;  %4105 = vmatpush.msra.mxu3 %v3986_v33 }
0x117d   :  { %4046 = vmatpush.msra.mxu0 %v3937_v50  ;;  %4066 = vmatpush.msra.mxu1 %v3953_v37 }
0x117e   :  { %4086 = vmatpush.msra.mxu2 %v3969_v45  ;;  %4106 = vmatpush.msra.mxu3 %v3985_v15 }
0x117f   :  { %4047 = vmatpush.msra.mxu0 %v3936_v57  ;;  %4067 = vmatpush.msra.mxu1 %v3952_v27 }
0x1180   :  { %4087 = vmatpush.msra.mxu2 %v3968_v20  ;;  %4107 = vmatpush.msra.mxu3 %v3984_v41 }
0x1181   :  { %4048 = vmatpush.msra.mxu0 %v3935_v58  ;;  %4068 = vmatpush.msra.mxu1 %v3951_v44 }
0x1182   :  { %4088 = vmatpush.msra.mxu2 %v3967_v23  ;;  %4108 = vmatpush.msra.mxu3 %v3983_v40 }
0x1183   :  { %4049 = vmatpush.msra.mxu0 %v3934_v63  ;;  %4069 = vmatpush.msra.mxu1 %v3950_v17 }
0x1184   :  { %4089 = vmatpush.msra.mxu2 %v3966_v2  ;;  %4109 = vmatpush.msra.mxu3 %v3982_v60 }
0x1185   :  { %4050 = vmatpush.msra.mxu0 %v3933_v56  ;;  %4070 = vmatpush.msra.mxu1 %v3949_v32 }
0x1186   :  { %4090 = vmatpush.msra.mxu2 %v3965_v47  ;;  %4110 = vmatpush.msra.mxu3 %v3981_v52 }
0x1187   :  { %4051 = vmatpush.msra.mxu0 %v3932_v29  ;;  %4071 = vmatpush.msra.mxu1 %v3948_v1 }
0x1188   :  { %4091 = vmatpush.msra.mxu2 %v3964_v26  ;;  %4111 = vmatpush.msra.mxu3 %v3980_v31 }
0x1189   :  { %4052 = vmatpush.msra.mxu0 %v3931_v7  ;;  %4072 = vmatpush.msra.mxu1 %v3947_v10 }
0x118a   :  { %4092 = vmatpush.msra.mxu2 %v3963_v53  ;;  %4112 = vmatpush.msra.mxu3 %v3979_v16 }
0x118b   :  { %4053 = vmatpush.msra.mxu0 %v3930_v6  ;;  %4073 = vmatpush.msra.mxu1 %v3946_v13 }
0x118c   :  { %4093 = vmatpush.msra.mxu2 %v3962_v61  ;;  %4113 = vmatpush.msra.mxu3 %v3978_v21 }
0x11e7   :  { %v3789_v59 = vpop.f32.mrf.mxu0  ;;  %v3809_v28 = vpop.f32.mrf.mxu1 }
0x11e8   :  { %v3790_v55 = vadd.f32 %v3789_v59, %v3756_v48  ;;  %v3810_v12 = vadd.f32 %v3809_v28, %v3757_v25 }
0x11ea   :  { %v3892_v11 = vmax.f32 %v3790_v55, 0.0  ;;  %v3893_v30 = vmax.f32 %v3810_v12, 0.0 }
0x11ec   :  { %4014 = vmatmul.f32.vlgmr.msrb.gmra.mxu2 %v3892_v11  ;;  %4034 = vmatmul.f32.vlgmr.msrb.gmra.mxu3 %v3893_v30 }
0x11ee   :  { %v3829_v8 = vpop.f32.mrf.mxu2  ;;  %v3849_v46 = vpop.f32.mrf.mxu3 }
0x11ef   :  { %v3830_v5 = vadd.f32 %v3829_v8, %v3758_v42  ;;  %v3850_v62 = vadd.f32 %v3849_v46, %v3759_v3  ;;  %v3869_v9 = vpop.f32.mrf.mxu0  ;;  %v3889_v36 = vpop.f32.mrf.mxu1 }
0x11f0   :  { %v3870_v54 = vadd.f32 %v3869_v9, %v3760_v14  ;;  %v3890_v51 = vadd.f32 %v3889_v36, %v3761_v43 }
0x11f1   :  { %v3894_v24 = vmax.f32 %v3830_v5, 0.0  ;;  %v3895_v34 = vmax.f32 %v3850_v62, 0.0 }
0x11f2   :  { %v3896_v35 = vmax.f32 %v3870_v54, 0.0  ;;  %v3897_v38 = vmax.f32 %v3890_v51, 0.0 }
0x11f3   :  { %4054 = vmatmul.f32.vlgmr.msra.gmra.mxu0 %v3894_v24  ;;  %4074 = vmatmul.f32.vlgmr.msra.gmra.mxu1 %v3895_v34 }
0x11f4   :  { %4094 = vmatmul.f32.vlgmr.msra.gmra.mxu2 %v3896_v35  ;;  %4114 = vmatmul.f32.vlgmr.msra.gmra.mxu3 %v3897_v38 }
0x126f   :  { %v4015_v4 = vpop.f32.mrf.mxu2  ;;  %v4035_v49 = vpop.f32.mrf.mxu3 }
0x1270   :  { %v4016_v50 = vadd.f32 %v4724_v39, %v4015_v4  ;;  %v4055_v18 = vpop.f32.mrf.mxu0  ;;  %v4075_v57 = vpop.f32.mrf.mxu1 }
0x1272   :  { %v4036_v37 = vadd.f32 %v4035_v49, %v4016_v50 }
0x1274   :  { %v4056_v19 = vadd.f32 %v4055_v18, %v4036_v37 }
0x1276   :  { %v4076_v27 = vadd.f32 %v4075_v57, %v4056_v19 }
0x1277   :  { %v4095_v0 = vpop.f32.mrf.mxu2  ;;  %v4115_v45 = vpop.f32.mrf.mxu3 }
0x1278   :  { %v4096_v33 = vadd.f32 %v4095_v0, %v4076_v27 }
0x127a   :  { %v4116_v15 = vadd.f32 %v4115_v45, %v4096_v33 }
0x127c   :  { %4119 = vst.msk [vmem:[#allocation3] sm:$0x3] %vm4118_vm11, %v4116_v15 }
0x127d   :  { %4130 = dma.vmem_to_hbm [thread:$0]  %s4126_s13, 32, %s4128_s16, [#allocation4]  }
0x127e   :  { %4757 = dma.done.wait [#allocation4], 32  }
0x127f   :  { %4758 = vsyncadd [#allocation4], 4294967264 }
0x1280   :  { %4135 = vsyncpa [#allocation4], 1 }

</bundles_post_ra>
